<compile_context>
chip_gen: v7x
topology: tpu7x:2x2x1
jax: 0.10.0
libtpu: 0.0.40
codegen_flags: <defaults>
</compile_context>

<pallas_src>
import functools
import math

import jax
import jax.numpy as jnp
from jax.experimental import pallas as pl
from jax.experimental.pallas import tpu as pltpu

# ----- synthetic MMFN_config (small shapes consistent with the module) -----
MMFN_config = {
    "XLNET_size": 32,
    "SWIN_size": 32,
    "CLIP_size": 32,
    "d_model": 32,
    "k_dim": 32,
    "v_dim": 32,
    "num_heads": 4,
    "xlent_max_length": 8,
    "SWIN_max_length": 8,
}
PROJ_OUT = 512          # projectionHead final width (1024 -> 512 -> 512)
LN_EPS = 1e-5           # nn.LayerNorm default
COS_EPS = 1e-6          # nn.CosineSimilarity eps
N_BLOCK_PARAMS = 18     # packed params per co-attention block (see pack_params)


# ----------------------------- in-kernel helpers -----------------------------
def _affine(x, w, b):
    return jnp.dot(x, w, preferred_element_type=jnp.float32) + b


def _layernorm(x, g, b):
    mu = jnp.mean(x, axis=-1, keepdims=True)
    xc = x - mu
    var = jnp.mean(xc * xc, axis=-1, keepdims=True)
    return xc * jax.lax.rsqrt(var + LN_EPS) * g + b


def _coattention(xa2, xb2, tb, la, lb, p, num_heads):
    """One CTCoAttentionTransformer on a batch tile.

    xa2: (tb*la, in_a) query-side tokens (seq flattened into rows)
    xb2: (tb*lb, in_b) key/value-side tokens
    p  : 18 folded parameter arrays (see pack_params ordering)
    returns (tb*la, k_dim)
    """
    (wq, bq, wiq, biq, wk, bk, wv, bv, wo, bo,
     g1, be1, wf1, bf1, wf2, bf2, g2, be2) = p
    k_dim = wq.shape[1]
    hd = k_dim // num_heads

    # Outer Q (needed for the residual); input Linear already folded into wq/bq.
    q_outer = _affine(xa2, wq, bq)                 # (tb*la, k)
    # MHA in-projections; the K/V in-proj is folded into wk/wv/bk/bv.
    q_in = _affine(q_outer, wiq, biq)
    k_in = _affine(xb2, wk, bk)
    v_in = _affine(xb2, wv, bv)

    q3 = q_in.reshape(tb, la, k_dim)
    k3 = k_in.reshape(tb, lb, k_dim)
    v3 = v_in.reshape(tb, lb, k_dim)

    scale = 1.0 / math.sqrt(hd)
    heads = []
    for h in range(num_heads):                     # static per-head loop (4 iters)
        lo, hi = h * hd, (h + 1) * hd
        qh = q3[:, :, lo:hi]                       # (tb, la, hd)
        kh = k3[:, :, lo:hi]                       # (tb, lb, hd)
        vh = v3[:, :, lo:hi]
        s = jnp.einsum("bld,bmd->blm", qh, kh,
                       preferred_element_type=jnp.float32) * scale
        s = s - jnp.max(s, axis=-1, keepdims=True)
        e = jnp.exp(s)
        w = e / jnp.sum(e, axis=-1, keepdims=True)
        heads.append(jnp.einsum("blm,bmd->bld", w, vh,
                                preferred_element_type=jnp.float32))
    attn = jnp.concatenate(heads, axis=-1).reshape(tb * la, k_dim)
    attn = _affine(attn, wo, bo)                   # MHA out-projection

    x = _layernorm(q_outer + attn, g1, be1)
    ff = jnp.maximum(_affine(x, wf1, bf1), 0.0)
    ff = _affine(ff, wf2, bf2)
    return _layernorm(x + ff, g2, be2)


def _mmfn_kernel(*refs, num_heads):
    xl_ref, sw_ref, ct_ref, ci_ref = refs[:4]
    out_ref = refs[-1]
    prefs = refs[4:-1]

    p_ti = [r[...] for r in prefs[:N_BLOCK_PARAMS]]
    p_it = [r[...] for r in prefs[N_BLOCK_PARAMS:2 * N_BLOCK_PARAMS]]
    (w01a, b01a, w01b, b01b,
     w02a, b02a, w02b, b02b,
     wp, bp) = [r[...] for r in prefs[2 * N_BLOCK_PARAMS:]]

    xl = xl_ref[...].astype(jnp.float32)           # (TB, Lx, X)
    sw = sw_ref[...].astype(jnp.float32)           # (TB, Ls, S)
    ct = ct_ref[...].astype(jnp.float32)           # (TB, C)
    ci = ci_ref[...].astype(jnp.float32)           # (TB, C)

    tb, lx, x_dim = xl.shape
    ls, s_dim = sw.shape[1], sw.shape[2]

    xl2 = xl.reshape(tb * lx, x_dim)
    sw2 = sw.reshape(tb * ls, s_dim)

    out_x = _coattention(xl2, sw2, tb, lx, ls, p_ti, num_heads)   # (tb*lx, k)
    out_s = _coattention(sw2, xl2, tb, ls, lx, p_it, num_heads)   # (tb*ls, k)

    # avg_pool1d(kernel=full length) == mean over the sequence axis.
    # TODO(synk): assumes sequences are exactly xlent_max_length / SWIN_max_length
    # (no padding mask), exactly as in the reference module.
    ox = jnp.mean(out_x.reshape(tb, lx, -1), axis=1)    # (tb, k)
    osw = jnp.mean(out_s.reshape(tb, ls, -1), axis=1)   # (tb, k)

    t = jnp.concatenate([ox, osw], axis=1)              # (tb, 2k)
    t = jnp.maximum(_affine(t, w01a, b01a), 0.0)
    t = _affine(t, w01b, b01b)

    c = jnp.concatenate([ct, ci], axis=1)               # (tb, 2C)
    c = jnp.maximum(_affine(c, w02a, b02a), 0.0)
    c = _affine(c, w02b, b02b)

    comb = jnp.concatenate([t, c], axis=1)              # (tb, 2k + 2C)
    proj = _affine(comb, wp, bp)                        # (tb, 512) -- folded head

    # CosineSimilarity(dim=1, eps=1e-6)
    dot_tc = jnp.sum(ct * ci, axis=1, keepdims=True)
    nt = jnp.sqrt(jnp.sum(ct * ct, axis=1, keepdims=True))
    ni = jnp.sqrt(jnp.sum(ci * ci, axis=1, keepdims=True))
    cos = dot_tc / jnp.maximum(nt * ni, COS_EPS)

    out_ref[...] = (cos * proj).astype(out_ref.dtype)


# ------------------------------- host wrapper --------------------------------
def _round_up(x, m):
    return ((x + m - 1) // m) * m


def _const_spec(arr):
    ndim = arr.ndim
    return pl.BlockSpec(arr.shape, lambda i, _nd=ndim: (0,) * _nd)


def mmfn_forward(inputs_xlnet, inputs_swin, inputs_clip_text, inputs_clip_img,
                 packed_params, *, batch_tile=256):
    b = inputs_xlnet.shape[0]
    lx, x_dim = inputs_xlnet.shape[1], inputs_xlnet.shape[2]
    ls, s_dim = inputs_swin.shape[1], inputs_swin.shape[2]
    c_dim = inputs_clip_text.shape[1]
    k_dim = MMFN_config["k_dim"]
    num_heads = MMFN_config["num_heads"]
    assert k_dim % num_heads == 0

    # Batch tile: multiple of 8 (f32 sublane) so the MXU M-dim / output stores are
    # unmasked; pad the batch so the tile divides it exactly.
    tb = min(batch_tile, _round_up(b, 8))
    bp = _round_up(b, tb)
    pad = bp - b
    if pad:
        inputs_xlnet = jnp.pad(inputs_xlnet, ((0, pad), (0, 0), (0, 0)))
        inputs_swin = jnp.pad(inputs_swin, ((0, pad), (0, 0), (0, 0)))
        inputs_clip_text = jnp.pad(inputs_clip_text, ((0, pad), (0, 0)))
        inputs_clip_img = jnp.pad(inputs_clip_img, ((0, pad), (0, 0)))

    in_specs = [
        pl.BlockSpec((tb, lx, x_dim), lambda i: (i, 0, 0)),
        pl.BlockSpec((tb, ls, s_dim), lambda i: (i, 0, 0)),
        pl.BlockSpec((tb, c_dim), lambda i: (i, 0)),
        pl.BlockSpec((tb, c_dim), lambda i: (i, 0)),
    ] + [_const_spec(w) for w in packed_params]       # weights stay VMEM-resident
    out_spec = pl.BlockSpec((tb, PROJ_OUT), lambda i: (i, 0))

    def _coattn_flops(la, lb, in_a, in_b, kk):
        return (2 * la * in_a * kk + 2 * la * kk * kk   # Q, q_in
                + 4 * lb * in_b * kk                    # folded K, V
                + 4 * la * lb * kk                      # scores + weighted sum
                + 2 * la * kk * kk                      # out-proj
                + 4 * la * kk * kk)                     # feed-forward

    per_sample = (_coattn_flops(lx, ls, x_dim, s_dim, k_dim)
                  + _coattn_flops(ls, lx, s_dim, x_dim, k_dim)
                  + 8 * (2 * k_dim) ** 2
                  + 8 * (2 * c_dim) ** 2
                  + 2 * (2 * k_dim + 2 * c_dim) * PROJ_OUT)
    cost = pl.CostEstimate(
        flops=int(bp * per_sample),
        transcendentals=int(bp * (2 * num_heads * lx * ls + 64)),
        bytes_accessed=int(4 * (inputs_xlnet.size + inputs_swin.size
                                + inputs_clip_text.size + inputs_clip_img.size
                                + bp * PROJ_OUT
                                + sum(int(w.size) for w in packed_params))),
    )

    out = pl.pallas_call(
        functools.partial(_mmfn_kernel, num_heads=num_heads),
        out_shape=jax.ShapeDtypeStruct((bp, PROJ_OUT), jnp.float32),
        grid=(bp // tb,),
        in_specs=in_specs,
        out_specs=out_spec,
        compiler_params=pltpu.CompilerParams(
            dimension_semantics=("parallel",),
            vmem_limit_bytes=64 * 1024 * 1024),
        cost_estimate=cost,
    )(inputs_xlnet, inputs_swin, inputs_clip_text, inputs_clip_img,
      *packed_params)
    return out[:b]


# ------------------------------ params & packing ------------------------------
def init_params(key):
    """Synthetic params in [in, out] layout (transposed w.r.t. nn.Linear.weight)."""
    cfg = MMFN_config
    x_dim, s_dim, c_dim = cfg["XLNET_size"], cfg["SWIN_size"], cfg["CLIP_size"]
    d, k = cfg["d_model"], cfg["k_dim"]
    keys = iter(jax.random.split(key, 128))

    def linear(fan_in, fan_out):
        lim = 1.0 / math.sqrt(fan_in)
        w = jax.random.uniform(next(keys), (fan_in, fan_out), jnp.float32, -lim, lim)
        bb = jax.random.uniform(next(keys), (1, fan_out), jnp.float32, -lim, lim)
        return w, bb

    def coattn_block():
        blk = {
            "Wq": jax.random.normal(next(keys), (d, k), jnp.float32),
            "Wk": jax.random.normal(next(keys), (d, k), jnp.float32),
            "Wv": jax.random.normal(next(keys), (d, cfg["v_dim"]), jnp.float32),
        }
        lim = 1.0 / math.sqrt(k)
        for name in ("Win_q", "Win_k", "Win_v", "Wo"):
            blk[name] = jax.random.uniform(next(keys), (k, k), jnp.float32, -lim, lim)
        for name in ("bin_q", "bin_k", "bin_v", "bo"):
            blk[name] = jax.random.uniform(next(keys), (1, k), jnp.float32, -lim, lim)
        blk["g1"] = 1.0 + 0.1 * jax.random.normal(next(keys), (1, k), jnp.float32)
        blk["be1"] = 0.1 * jax.random.normal(next(keys), (1, k), jnp.float32)
        blk["Wf1"], blk["bf1"] = linear(k, k)
        blk["Wf2"], blk["bf2"] = linear(k, k)
        blk["g2"] = 1.0 + 0.1 * jax.random.normal(next(keys), (1, k), jnp.float32)
        blk["be2"] = 0.1 * jax.random.normal(next(keys), (1, k), jnp.float32)
        return blk

    p = {}
    p["Wt"], p["bt"] = linear(x_dim, d)          # LinearTexture
    p["Wi"], p["bi"] = linear(s_dim, d)          # LinearImage
    p["TI"] = coattn_block()
    p["IT"] = coattn_block()
    p["W01a"], p["b01a"] = linear(2 * k, 2 * k)
    p["W01b"], p["b01b"] = linear(2 * k, 2 * k)
    p["W02a"], p["b02a"] = linear(2 * c_dim, 2 * c_dim)
    p["W02b"], p["b02b"] = linear(2 * c_dim, 2 * c_dim)
    p["Wp1"], p["bp1"] = linear(2 * k + 2 * c_dim, 1024)
    p["Wp2"], p["bp2"] = linear(1024, 512)
    p["Wp3"], p["bp3"] = linear(512, PROJ_OUT)
    return p


def pack_params(p):
    """Exact algebraic folds (no nonlinearity in between) + flatten for the kernel."""
    wt, bt, wi, bi = p["Wt"], p["bt"], p["Wi"], p["bi"]

    def block(blk, w_a, b_a, w_b, b_b):
        wq = w_a @ blk["Wq"]                               # input Linear folded in
        bq = b_a @ blk["Wq"]
        wk = w_b @ blk["Wk"] @ blk["Win_k"]                # + MHA K in-proj folded
        bk = b_b @ blk["Wk"] @ blk["Win_k"] + blk["bin_k"]
        wv = w_b @ blk["Wv"] @ blk["Win_v"]                # + MHA V in-proj folded
        bv = b_b @ blk["Wv"] @ blk["Win_v"] + blk["bin_v"]
        return (wq, bq, blk["Win_q"], blk["bin_q"], wk, bk, wv, bv,
                blk["Wo"], blk["bo"], blk["g1"], blk["be1"],
                blk["Wf1"], blk["bf1"], blk["Wf2"], blk["bf2"],
                blk["g2"], blk["be2"])

    ti = block(p["TI"], wt, bt, wi, bi)     # A = xlnet, B = swin
    it = block(p["IT"], wi, bi, wt, bt)     # A = swin,  B = xlnet

    # projectionHead: three chained bias-only Linears -> one (2k+2C, 512) affine.
    wp = p["Wp1"] @ p["Wp2"] @ p["Wp3"]
    bp = (p["bp1"] @ p["Wp2"] + p["bp2"]) @ p["Wp3"] + p["bp3"]

    packed = ti + it + (p["W01a"], p["b01a"], p["W01b"], p["b01b"],
                        p["W02a"], p["b02a"], p["W02b"], p["b02b"], wp, bp)
    assert len(packed) == 2 * N_BLOCK_PARAMS + 10
    return tuple(jnp.asarray(w, jnp.float32) for w in packed)


# ------------------------------ plain-JAX reference ----------------------------
def reference_forward(xl, sw, ct, ci, p):
    """Mirrors the PyTorch forward structure (no folds) for validation."""
    nh = MMFN_config["num_heads"]

    def layernorm(x, g, b):
        mu = x.mean(-1, keepdims=True)
        var = ((x - mu) ** 2).mean(-1, keepdims=True)
        return (x - mu) / jnp.sqrt(var + LN_EPS) * g + b

    def coattn(a, b_in, blk):
        q = a @ blk["Wq"]
        k = b_in @ blk["Wk"]
        v = b_in @ blk["Wv"]
        e = q.shape[-1]
        hd = e // nh
        qi = q @ blk["Win_q"] + blk["bin_q"]
        ki = k @ blk["Win_k"] + blk["bin_k"]
        vi = v @ blk["Win_v"] + blk["bin_v"]
        bsz, la, _ = q.shape
        lb = k.shape[1]
        qh = qi.reshape(bsz, la, nh, hd).transpose(0, 2, 1, 3)
        kh = ki.reshape(bsz, lb, nh, hd).transpose(0, 2, 1, 3)
        vh = vi.reshape(bsz, lb, nh, hd).transpose(0, 2, 1, 3)
        s = jnp.einsum("bhld,bhmd->bhlm", qh, kh) / math.sqrt(hd)
        w = jax.nn.softmax(s, axis=-1)
        o = jnp.einsum("bhlm,bhmd->bhld", w, vh).transpose(0, 2, 1, 3).reshape(bsz, la, e)
        attn = o @ blk["Wo"] + blk["bo"]
        x = layernorm(q + attn, blk["g1"], blk["be1"])
        ff = jnp.maximum(x @ blk["Wf1"] + blk["bf1"], 0.0) @ blk["Wf2"] + blk["bf2"]
        return layernorm(x + ff, blk["g2"], blk["be2"])

    tx = xl @ p["Wt"] + p["bt"]
    swp = sw @ p["Wi"] + p["bi"]
    ox = coattn(tx, swp, p["TI"]).mean(axis=1)
    osw = coattn(swp, tx, p["IT"]).mean(axis=1)
    t = jnp.concatenate([ox, osw], axis=1)
    t = jnp.maximum(t @ p["W01a"] + p["b01a"], 0.0) @ p["W01b"] + p["b01b"]

    cos = jnp.sum(ct * ci, axis=1) / jnp.maximum(
        jnp.linalg.norm(ct, axis=1) * jnp.linalg.norm(ci, axis=1), COS_EPS)

    c = jnp.concatenate([ct, ci], axis=1)
    c = jnp.maximum(c @ p["W02a"] + p["b02a"], 0.0) @ p["W02b"] + p["b02b"]

    comb = jnp.concatenate([t, c], axis=1)
    proj = ((comb @ p["Wp1"] + p["bp1"]) @ p["Wp2"] + p["bp2"]) @ p["Wp3"] + p["bp3"]
    return cos[:, None] * proj


if __name__ == "__main__":
    cfg = MMFN_config
    b = 2
    key = jax.random.PRNGKey(0)
    k_xl, k_sw, k_ct, k_ci, k_p = jax.random.split(key, 5)
    inputs_xlnet = jax.random.normal(
        k_xl, (b, cfg["xlent_max_length"], cfg["XLNET_size"]), jnp.float32)
    inputs_swin = jax.random.normal(
        k_sw, (b, cfg["SWIN_max_length"], cfg["SWIN_size"]), jnp.float32)
    inputs_clip_text = jax.random.normal(k_ct, (b, cfg["CLIP_size"]), jnp.float32)
    inputs_clip_img = jax.random.normal(k_ci, (b, cfg["CLIP_size"]), jnp.float32)

    params = init_params(k_p)
    packed = pack_params(params)

    out = mmfn_forward(inputs_xlnet, inputs_swin, inputs_clip_text,
                       inputs_clip_img, packed)
    out = jax.block_until_ready(out)

    ref = reference_forward(inputs_xlnet, inputs_swin, inputs_clip_text,
                            inputs_clip_img, params)
    assert out.shape == (b, PROJ_OUT), out.shape
    assert bool(jnp.all(jnp.isfinite(out)))
    assert jnp.allclose(out, ref, atol=3e-3, rtol=3e-3), \
        float(jnp.max(jnp.abs(out - ref)))

    print("KERNEL_OK")
</pallas_src>

<mosaic_0001>
module attributes {stable_mosaic.version = 11 : i64} {
  func.func @_mmfn_kernel(%arg0: i32, %arg1: memref<8x8x32xf32, #tpu.memory_space<vmem>>, %arg2: memref<8x8x32xf32, #tpu.memory_space<vmem>>, %arg3: memref<8x32xf32, #tpu.memory_space<vmem>>, %arg4: memref<8x32xf32, #tpu.memory_space<vmem>>, %arg5: memref<32x32xf32, #tpu.memory_space<vmem>>, %arg6: memref<1x32xf32, #tpu.memory_space<vmem>>, %arg7: memref<32x32xf32, #tpu.memory_space<vmem>>, %arg8: memref<1x32xf32, #tpu.memory_space<vmem>>, %arg9: memref<32x32xf32, #tpu.memory_space<vmem>>, %arg10: memref<1x32xf32, #tpu.memory_space<vmem>>, %arg11: memref<32x32xf32, #tpu.memory_space<vmem>>, %arg12: memref<1x32xf32, #tpu.memory_space<vmem>>, %arg13: memref<32x32xf32, #tpu.memory_space<vmem>>, %arg14: memref<1x32xf32, #tpu.memory_space<vmem>>, %arg15: memref<1x32xf32, #tpu.memory_space<vmem>>, %arg16: memref<1x32xf32, #tpu.memory_space<vmem>>, %arg17: memref<32x32xf32, #tpu.memory_space<vmem>>, %arg18: memref<1x32xf32, #tpu.memory_space<vmem>>, %arg19: memref<32x32xf32, #tpu.memory_space<vmem>>, %arg20: memref<1x32xf32, #tpu.memory_space<vmem>>, %arg21: memref<1x32xf32, #tpu.memory_space<vmem>>, %arg22: memref<1x32xf32, #tpu.memory_space<vmem>>, %arg23: memref<32x32xf32, #tpu.memory_space<vmem>>, %arg24: memref<1x32xf32, #tpu.memory_space<vmem>>, %arg25: memref<32x32xf32, #tpu.memory_space<vmem>>, %arg26: memref<1x32xf32, #tpu.memory_space<vmem>>, %arg27: memref<32x32xf32, #tpu.memory_space<vmem>>, %arg28: memref<1x32xf32, #tpu.memory_space<vmem>>, %arg29: memref<32x32xf32, #tpu.memory_space<vmem>>, %arg30: memref<1x32xf32, #tpu.memory_space<vmem>>, %arg31: memref<32x32xf32, #tpu.memory_space<vmem>>, %arg32: memref<1x32xf32, #tpu.memory_space<vmem>>, %arg33: memref<1x32xf32, #tpu.memory_space<vmem>>, %arg34: memref<1x32xf32, #tpu.memory_space<vmem>>, %arg35: memref<32x32xf32, #tpu.memory_space<vmem>>, %arg36: memref<1x32xf32, #tpu.memory_space<vmem>>, %arg37: memref<32x32xf32, #tpu.memory_space<vmem>>, %arg38: memref<1x32xf32, #tpu.memory_space<vmem>>, %arg39: memref<1x32xf32, #tpu.memory_space<vmem>>, %arg40: memref<1x32xf32, #tpu.memory_space<vmem>>, %arg41: memref<64x64xf32, #tpu.memory_space<vmem>>, %arg42: memref<1x64xf32, #tpu.memory_space<vmem>>, %arg43: memref<64x64xf32, #tpu.memory_space<vmem>>, %arg44: memref<1x64xf32, #tpu.memory_space<vmem>>, %arg45: memref<64x64xf32, #tpu.memory_space<vmem>>, %arg46: memref<1x64xf32, #tpu.memory_space<vmem>>, %arg47: memref<64x64xf32, #tpu.memory_space<vmem>>, %arg48: memref<1x64xf32, #tpu.memory_space<vmem>>, %arg49: memref<128x512xf32, #tpu.memory_space<vmem>>, %arg50: memref<1x512xf32, #tpu.memory_space<vmem>>, %arg51: memref<8x512xf32, #tpu.memory_space<vmem>>) attributes {dimension_semantics = [#tpu.dimension_semantics<parallel>], iteration_bounds = array<i64: 1>, scalar_prefetch = 0 : i64, scratch_operands = 0 : i64, tpu.core_type = #tpu.core_type<tc>, window_params = [{transform_indices = @transform_0, window_bounds = array<i64: 8, 8, 32>}, {transform_indices = @transform_1, window_bounds = array<i64: 8, 8, 32>}, {transform_indices = @transform_2, window_bounds = array<i64: 8, 32>}, {transform_indices = @transform_3, window_bounds = array<i64: 8, 32>}, {pipeline_mode = #tpu.pipeline_mode<synchronous>, transform_indices = @transform_4, window_bounds = array<i64: 32, 32>}, {pipeline_mode = #tpu.pipeline_mode<synchronous>, transform_indices = @transform_5, window_bounds = array<i64: 1, 32>}, {pipeline_mode = #tpu.pipeline_mode<synchronous>, transform_indices = @transform_6, window_bounds = array<i64: 32, 32>}, {pipeline_mode = #tpu.pipeline_mode<synchronous>, transform_indices = @transform_7, window_bounds = array<i64: 1, 32>}, {pipeline_mode = #tpu.pipeline_mode<synchronous>, transform_indices = @transform_8, window_bounds = array<i64: 32, 32>}, {pipeline_mode = #tpu.pipeline_mode<synchronous>, transform_indices = @transform_9, window_bounds = array<i64: 1, 32>}, {pipeline_mode = #tpu.pipeline_mode<synchronous>, transform_indices = @transform_10, window_bounds = array<i64: 32, 32>}, {pipeline_mode = #tpu.pipeline_mode<synchronous>, transform_indices = @transform_11, window_bounds = array<i64: 1, 32>}, {pipeline_mode = #tpu.pipeline_mode<synchronous>, transform_indices = @transform_12, window_bounds = array<i64: 32, 32>}, {pipeline_mode = #tpu.pipeline_mode<synchronous>, transform_indices = @transform_13, window_bounds = array<i64: 1, 32>}, {pipeline_mode = #tpu.pipeline_mode<synchronous>, transform_indices = @transform_14, window_bounds = array<i64: 1, 32>}, {pipeline_mode = #tpu.pipeline_mode<synchronous>, transform_indices = @transform_15, window_bounds = array<i64: 1, 32>}, {pipeline_mode = #tpu.pipeline_mode<synchronous>, transform_indices = @transform_16, window_bounds = array<i64: 32, 32>}, {pipeline_mode = #tpu.pipeline_mode<synchronous>, transform_indices = @transform_17, window_bounds = array<i64: 1, 32>}, {pipeline_mode = #tpu.pipeline_mode<synchronous>, transform_indices = @transform_18, window_bounds = array<i64: 32, 32>}, {pipeline_mode = #tpu.pipeline_mode<synchronous>, transform_indices = @transform_19, window_bounds = array<i64: 1, 32>}, {pipeline_mode = #tpu.pipeline_mode<synchronous>, transform_indices = @transform_20, window_bounds = array<i64: 1, 32>}, {pipeline_mode = #tpu.pipeline_mode<synchronous>, transform_indices = @transform_21, window_bounds = array<i64: 1, 32>}, {pipeline_mode = #tpu.pipeline_mode<synchronous>, transform_indices = @transform_22, window_bounds = array<i64: 32, 32>}, {pipeline_mode = #tpu.pipeline_mode<synchronous>, transform_indices = @transform_23, window_bounds = array<i64: 1, 32>}, {pipeline_mode = #tpu.pipeline_mode<synchronous>, transform_indices = @transform_24, window_bounds = array<i64: 32, 32>}, {pipeline_mode = #tpu.pipeline_mode<synchronous>, transform_indices = @transform_25, window_bounds = array<i64: 1, 32>}, {pipeline_mode = #tpu.pipeline_mode<synchronous>, transform_indices = @transform_26, window_bounds = array<i64: 32, 32>}, {pipeline_mode = #tpu.pipeline_mode<synchronous>, transform_indices = @transform_27, window_bounds = array<i64: 1, 32>}, {pipeline_mode = #tpu.pipeline_mode<synchronous>, transform_indices = @transform_28, window_bounds = array<i64: 32, 32>}, {pipeline_mode = #tpu.pipeline_mode<synchronous>, transform_indices = @transform_29, window_bounds = array<i64: 1, 32>}, {pipeline_mode = #tpu.pipeline_mode<synchronous>, transform_indices = @transform_30, window_bounds = array<i64: 32, 32>}, {pipeline_mode = #tpu.pipeline_mode<synchronous>, transform_indices = @transform_31, window_bounds = array<i64: 1, 32>}, {pipeline_mode = #tpu.pipeline_mode<synchronous>, transform_indices = @transform_32, window_bounds = array<i64: 1, 32>}, {pipeline_mode = #tpu.pipeline_mode<synchronous>, transform_indices = @transform_33, window_bounds = array<i64: 1, 32>}, {pipeline_mode = #tpu.pipeline_mode<synchronous>, transform_indices = @transform_34, window_bounds = array<i64: 32, 32>}, {pipeline_mode = #tpu.pipeline_mode<synchronous>, transform_indices = @transform_35, window_bounds = array<i64: 1, 32>}, {pipeline_mode = #tpu.pipeline_mode<synchronous>, transform_indices = @transform_36, window_bounds = array<i64: 32, 32>}, {pipeline_mode = #tpu.pipeline_mode<synchronous>, transform_indices = @transform_37, window_bounds = array<i64: 1, 32>}, {pipeline_mode = #tpu.pipeline_mode<synchronous>, transform_indices = @transform_38, window_bounds = array<i64: 1, 32>}, {pipeline_mode = #tpu.pipeline_mode<synchronous>, transform_indices = @transform_39, window_bounds = array<i64: 1, 32>}, {pipeline_mode = #tpu.pipeline_mode<synchronous>, transform_indices = @transform_40, window_bounds = array<i64: 64, 64>}, {pipeline_mode = #tpu.pipeline_mode<synchronous>, transform_indices = @transform_41, window_bounds = array<i64: 1, 64>}, {pipeline_mode = #tpu.pipeline_mode<synchronous>, transform_indices = @transform_42, window_bounds = array<i64: 64, 64>}, {pipeline_mode = #tpu.pipeline_mode<synchronous>, transform_indices = @transform_43, window_bounds = array<i64: 1, 64>}, {pipeline_mode = #tpu.pipeline_mode<synchronous>, transform_indices = @transform_44, window_bounds = array<i64: 64, 64>}, {pipeline_mode = #tpu.pipeline_mode<synchronous>, transform_indices = @transform_45, window_bounds = array<i64: 1, 64>}, {pipeline_mode = #tpu.pipeline_mode<synchronous>, transform_indices = @transform_46, window_bounds = array<i64: 64, 64>}, {pipeline_mode = #tpu.pipeline_mode<synchronous>, transform_indices = @transform_47, window_bounds = array<i64: 1, 64>}, {pipeline_mode = #tpu.pipeline_mode<synchronous>, transform_indices = @transform_48, window_bounds = array<i64: 128, 512>}, {pipeline_mode = #tpu.pipeline_mode<synchronous>, transform_indices = @transform_49, window_bounds = array<i64: 1, 512>}, {transform_indices = @transform_50, window_bounds = array<i64: 8, 512>}]} {
    %c0 = arith.constant 0 : index
    %c0_0 = arith.constant 0 : index
    %0 = vector.load %arg5[%c0, %c0_0] : memref<32x32xf32, #tpu.memory_space<vmem>>, vector<32x32xf32>
    %c0_1 = arith.constant 0 : index
    %c0_2 = arith.constant 0 : index
    %1 = vector.load %arg6[%c0_1, %c0_2] : memref<1x32xf32, #tpu.memory_space<vmem>>, vector<1x32xf32>
    %c0_3 = arith.constant 0 : index
    %c0_4 = arith.constant 0 : index
    %2 = vector.load %arg7[%c0_3, %c0_4] : memref<32x32xf32, #tpu.memory_space<vmem>>, vector<32x32xf32>
    %c0_5 = arith.constant 0 : index
    %c0_6 = arith.constant 0 : index
    %3 = vector.load %arg8[%c0_5, %c0_6] : memref<1x32xf32, #tpu.memory_space<vmem>>, vector<1x32xf32>
    %c0_7 = arith.constant 0 : index
    %c0_8 = arith.constant 0 : index
    %4 = vector.load %arg9[%c0_7, %c0_8] : memref<32x32xf32, #tpu.memory_space<vmem>>, vector<32x32xf32>
    %c0_9 = arith.constant 0 : index
    %c0_10 = arith.constant 0 : index
    %5 = vector.load %arg10[%c0_9, %c0_10] : memref<1x32xf32, #tpu.memory_space<vmem>>, vector<1x32xf32>
    %c0_11 = arith.constant 0 : index
    %c0_12 = arith.constant 0 : index
    %6 = vector.load %arg11[%c0_11, %c0_12] : memref<32x32xf32, #tpu.memory_space<vmem>>, vector<32x32xf32>
    %c0_13 = arith.constant 0 : index
    %c0_14 = arith.constant 0 : index
    %7 = vector.load %arg12[%c0_13, %c0_14] : memref<1x32xf32, #tpu.memory_space<vmem>>, vector<1x32xf32>
    %c0_15 = arith.constant 0 : index
    %c0_16 = arith.constant 0 : index
    %8 = vector.load %arg13[%c0_15, %c0_16] : memref<32x32xf32, #tpu.memory_space<vmem>>, vector<32x32xf32>
    %c0_17 = arith.constant 0 : index
    %c0_18 = arith.constant 0 : index
    %9 = vector.load %arg14[%c0_17, %c0_18] : memref<1x32xf32, #tpu.memory_space<vmem>>, vector<1x32xf32>
    %c0_19 = arith.constant 0 : index
    %c0_20 = arith.constant 0 : index
    %10 = vector.load %arg15[%c0_19, %c0_20] : memref<1x32xf32, #tpu.memory_space<vmem>>, vector<1x32xf32>
    %c0_21 = arith.constant 0 : index
    %c0_22 = arith.constant 0 : index
    %11 = vector.load %arg16[%c0_21, %c0_22] : memref<1x32xf32, #tpu.memory_space<vmem>>, vector<1x32xf32>
    %c0_23 = arith.constant 0 : index
    %c0_24 = arith.constant 0 : index
    %12 = vector.load %arg17[%c0_23, %c0_24] : memref<32x32xf32, #tpu.memory_space<vmem>>, vector<32x32xf32>
    %c0_25 = arith.constant 0 : index
    %c0_26 = arith.constant 0 : index
    %13 = vector.load %arg18[%c0_25, %c0_26] : memref<1x32xf32, #tpu.memory_space<vmem>>, vector<1x32xf32>
    %c0_27 = arith.constant 0 : index
    %c0_28 = arith.constant 0 : index
    %14 = vector.load %arg19[%c0_27, %c0_28] : memref<32x32xf32, #tpu.memory_space<vmem>>, vector<32x32xf32>
    %c0_29 = arith.constant 0 : index
    %c0_30 = arith.constant 0 : index
    %15 = vector.load %arg20[%c0_29, %c0_30] : memref<1x32xf32, #tpu.memory_space<vmem>>, vector<1x32xf32>
    %c0_31 = arith.constant 0 : index
    %c0_32 = arith.constant 0 : index
    %16 = vector.load %arg21[%c0_31, %c0_32] : memref<1x32xf32, #tpu.memory_space<vmem>>, vector<1x32xf32>
    %c0_33 = arith.constant 0 : index
    %c0_34 = arith.constant 0 : index
    %17 = vector.load %arg22[%c0_33, %c0_34] : memref<1x32xf32, #tpu.memory_space<vmem>>, vector<1x32xf32>
    %c0_35 = arith.constant 0 : index
    %c0_36 = arith.constant 0 : index
    %18 = vector.load %arg23[%c0_35, %c0_36] : memref<32x32xf32, #tpu.memory_space<vmem>>, vector<32x32xf32>
    %c0_37 = arith.constant 0 : index
    %c0_38 = arith.constant 0 : index
    %19 = vector.load %arg24[%c0_37, %c0_38] : memref<1x32xf32, #tpu.memory_space<vmem>>, vector<1x32xf32>
    %c0_39 = arith.constant 0 : index
    %c0_40 = arith.constant 0 : index
    %20 = vector.load %arg25[%c0_39, %c0_40] : memref<32x32xf32, #tpu.memory_space<vmem>>, vector<32x32xf32>
    %c0_41 = arith.constant 0 : index
    %c0_42 = arith.constant 0 : index
    %21 = vector.load %arg26[%c0_41, %c0_42] : memref<1x32xf32, #tpu.memory_space<vmem>>, vector<1x32xf32>
    %c0_43 = arith.constant 0 : index
    %c0_44 = arith.constant 0 : index
    %22 = vector.load %arg27[%c0_43, %c0_44] : memref<32x32xf32, #tpu.memory_space<vmem>>, vector<32x32xf32>
    %c0_45 = arith.constant 0 : index
    %c0_46 = arith.constant 0 : index
    %23 = vector.load %arg28[%c0_45, %c0_46] : memref<1x32xf32, #tpu.memory_space<vmem>>, vector<1x32xf32>
    %c0_47 = arith.constant 0 : index
    %c0_48 = arith.constant 0 : index
    %24 = vector.load %arg29[%c0_47, %c0_48] : memref<32x32xf32, #tpu.memory_space<vmem>>, vector<32x32xf32>
    %c0_49 = arith.constant 0 : index
    %c0_50 = arith.constant 0 : index
    %25 = vector.load %arg30[%c0_49, %c0_50] : memref<1x32xf32, #tpu.memory_space<vmem>>, vector<1x32xf32>
    %c0_51 = arith.constant 0 : index
    %c0_52 = arith.constant 0 : index
    %26 = vector.load %arg31[%c0_51, %c0_52] : memref<32x32xf32, #tpu.memory_space<vmem>>, vector<32x32xf32>
    %c0_53 = arith.constant 0 : index
    %c0_54 = arith.constant 0 : index
    %27 = vector.load %arg32[%c0_53, %c0_54] : memref<1x32xf32, #tpu.memory_space<vmem>>, vector<1x32xf32>
    %c0_55 = arith.constant 0 : index
    %c0_56 = arith.constant 0 : index
    %28 = vector.load %arg33[%c0_55, %c0_56] : memref<1x32xf32, #tpu.memory_space<vmem>>, vector<1x32xf32>
    %c0_57 = arith.constant 0 : index
    %c0_58 = arith.constant 0 : index
    %29 = vector.load %arg34[%c0_57, %c0_58] : memref<1x32xf32, #tpu.memory_space<vmem>>, vector<1x32xf32>
    %c0_59 = arith.constant 0 : index
    %c0_60 = arith.constant 0 : index
    %30 = vector.load %arg35[%c0_59, %c0_60] : memref<32x32xf32, #tpu.memory_space<vmem>>, vector<32x32xf32>
    %c0_61 = arith.constant 0 : index
    %c0_62 = arith.constant 0 : index
    %31 = vector.load %arg36[%c0_61, %c0_62] : memref<1x32xf32, #tpu.memory_space<vmem>>, vector<1x32xf32>
    %c0_63 = arith.constant 0 : index
    %c0_64 = arith.constant 0 : index
    %32 = vector.load %arg37[%c0_63, %c0_64] : memref<32x32xf32, #tpu.memory_space<vmem>>, vector<32x32xf32>
    %c0_65 = arith.constant 0 : index
    %c0_66 = arith.constant 0 : index
    %33 = vector.load %arg38[%c0_65, %c0_66] : memref<1x32xf32, #tpu.memory_space<vmem>>, vector<1x32xf32>
    %c0_67 = arith.constant 0 : index
    %c0_68 = arith.constant 0 : index
    %34 = vector.load %arg39[%c0_67, %c0_68] : memref<1x32xf32, #tpu.memory_space<vmem>>, vector<1x32xf32>
    %c0_69 = arith.constant 0 : index
    %c0_70 = arith.constant 0 : index
    %35 = vector.load %arg40[%c0_69, %c0_70] : memref<1x32xf32, #tpu.memory_space<vmem>>, vector<1x32xf32>
    %c0_71 = arith.constant 0 : index
    %c0_72 = arith.constant 0 : index
    %36 = vector.load %arg41[%c0_71, %c0_72] : memref<64x64xf32, #tpu.memory_space<vmem>>, vector<64x64xf32>
    %c0_73 = arith.constant 0 : index
    %c0_74 = arith.constant 0 : index
    %37 = vector.load %arg42[%c0_73, %c0_74] : memref<1x64xf32, #tpu.memory_space<vmem>>, vector<1x64xf32>
    %c0_75 = arith.constant 0 : index
    %c0_76 = arith.constant 0 : index
    %38 = vector.load %arg43[%c0_75, %c0_76] : memref<64x64xf32, #tpu.memory_space<vmem>>, vector<64x64xf32>
    %c0_77 = arith.constant 0 : index
    %c0_78 = arith.constant 0 : index
    %39 = vector.load %arg44[%c0_77, %c0_78] : memref<1x64xf32, #tpu.memory_space<vmem>>, vector<1x64xf32>
    %c0_79 = arith.constant 0 : index
    %c0_80 = arith.constant 0 : index
    %40 = vector.load %arg45[%c0_79, %c0_80] : memref<64x64xf32, #tpu.memory_space<vmem>>, vector<64x64xf32>
    %c0_81 = arith.constant 0 : index
    %c0_82 = arith.constant 0 : index
    %41 = vector.load %arg46[%c0_81, %c0_82] : memref<1x64xf32, #tpu.memory_space<vmem>>, vector<1x64xf32>
    %c0_83 = arith.constant 0 : index
    %c0_84 = arith.constant 0 : index
    %42 = vector.load %arg47[%c0_83, %c0_84] : memref<64x64xf32, #tpu.memory_space<vmem>>, vector<64x64xf32>
    %c0_85 = arith.constant 0 : index
    %c0_86 = arith.constant 0 : index
    %43 = vector.load %arg48[%c0_85, %c0_86] : memref<1x64xf32, #tpu.memory_space<vmem>>, vector<1x64xf32>
    %c0_87 = arith.constant 0 : index
    %c0_88 = arith.constant 0 : index
    %44 = vector.load %arg49[%c0_87, %c0_88] : memref<128x512xf32, #tpu.memory_space<vmem>>, vector<128x512xf32>
    %c0_89 = arith.constant 0 : index
    %c0_90 = arith.constant 0 : index
    %45 = vector.load %arg50[%c0_89, %c0_90] : memref<1x512xf32, #tpu.memory_space<vmem>>, vector<1x512xf32>
    %c0_91 = arith.constant 0 : index
    %c0_92 = arith.constant 0 : index
    %c0_93 = arith.constant 0 : index
    %46 = vector.load %arg1[%c0_91, %c0_92, %c0_93] : memref<8x8x32xf32, #tpu.memory_space<vmem>>, vector<8x8x32xf32>
    %c0_94 = arith.constant 0 : index
    %c0_95 = arith.constant 0 : index
    %c0_96 = arith.constant 0 : index
    %47 = vector.load %arg2[%c0_94, %c0_95, %c0_96] : memref<8x8x32xf32, #tpu.memory_space<vmem>>, vector<8x8x32xf32>
    %c0_97 = arith.constant 0 : index
    %c0_98 = arith.constant 0 : index
    %48 = vector.load %arg3[%c0_97, %c0_98] : memref<8x32xf32, #tpu.memory_space<vmem>>, vector<8x32xf32>
    %c0_99 = arith.constant 0 : index
    %c0_100 = arith.constant 0 : index
    %49 = vector.load %arg4[%c0_99, %c0_100] : memref<8x32xf32, #tpu.memory_space<vmem>>, vector<8x32xf32>
    %50 = vector.shape_cast %46 : vector<8x8x32xf32> to vector<64x32xf32>
    %51 = vector.shape_cast %47 : vector<8x8x32xf32> to vector<64x32xf32>
    %cst = arith.constant dense<0.000000e+00> : vector<64x32xf32>
    %52 = tpu.matmul %50, %0, %cst {dimension_numbers = #tpu.dot_dimension_numbers<[1], [0], [0], [1], [0, 0, 1, 1], [], []>} : vector<64x32xf32>, vector<32x32xf32>, vector<64x32xf32> -> vector<64x32xf32>
    %53 = vector.broadcast %1 : vector<1x32xf32> to vector<64x32xf32>
    %54 = arith.addf %52, %53 : vector<64x32xf32>
    %cst_101 = arith.constant dense<0.000000e+00> : vector<64x32xf32>
    %55 = tpu.matmul %54, %2, %cst_101 {dimension_numbers = #tpu.dot_dimension_numbers<[1], [0], [0], [1], [0, 0, 1, 1], [], []>} : vector<64x32xf32>, vector<32x32xf32>, vector<64x32xf32> -> vector<64x32xf32>
    %56 = vector.broadcast %3 : vector<1x32xf32> to vector<64x32xf32>
    %57 = arith.addf %55, %56 : vector<64x32xf32>
    %cst_102 = arith.constant dense<0.000000e+00> : vector<64x32xf32>
    %58 = tpu.matmul %51, %4, %cst_102 {dimension_numbers = #tpu.dot_dimension_numbers<[1], [0], [0], [1], [0, 0, 1, 1], [], []>} : vector<64x32xf32>, vector<32x32xf32>, vector<64x32xf32> -> vector<64x32xf32>
    %59 = vector.broadcast %5 : vector<1x32xf32> to vector<64x32xf32>
    %60 = arith.addf %58, %59 : vector<64x32xf32>
    %cst_103 = arith.constant dense<0.000000e+00> : vector<64x32xf32>
    %61 = tpu.matmul %51, %6, %cst_103 {dimension_numbers = #tpu.dot_dimension_numbers<[1], [0], [0], [1], [0, 0, 1, 1], [], []>} : vector<64x32xf32>, vector<32x32xf32>, vector<64x32xf32> -> vector<64x32xf32>
    %62 = vector.broadcast %7 : vector<1x32xf32> to vector<64x32xf32>
    %63 = arith.addf %61, %62 : vector<64x32xf32>
    %64 = vector.shape_cast %57 : vector<64x32xf32> to vector<8x8x32xf32>
    %65 = vector.shape_cast %60 : vector<64x32xf32> to vector<8x8x32xf32>
    %66 = vector.shape_cast %63 : vector<64x32xf32> to vector<8x8x32xf32>
    %67 = vector.extract_strided_slice %64 {offsets = [0, 0, 0], sizes = [8, 8, 8], strides = [1, 1, 1]} : vector<8x8x32xf32> to vector<8x8x8xf32>
    %68 = vector.extract_strided_slice %65 {offsets = [0, 0, 0], sizes = [8, 8, 8], strides = [1, 1, 1]} : vector<8x8x32xf32> to vector<8x8x8xf32>
    %69 = vector.extract_strided_slice %66 {offsets = [0, 0, 0], sizes = [8, 8, 8], strides = [1, 1, 1]} : vector<8x8x32xf32> to vector<8x8x8xf32>
    "tpu.trace_start"() <{level = 10 : i32, message = "bld,bmd->blm"}> : () -> ()
    %cst_104 = arith.constant dense<0.000000e+00> : vector<8x8x8xf32>
    %70 = tpu.matmul %67, %68, %cst_104 {dimension_numbers = #tpu.dot_dimension_numbers<[2], [2], [1], [1], [0, 0, 0, 1, 1, 1], [0], [0]>} : vector<8x8x8xf32>, vector<8x8x8xf32>, vector<8x8x8xf32> -> vector<8x8x8xf32>
    "tpu.trace_stop"() : () -> ()
    %cst_105 = arith.constant 0.353553385 : f32
    %71 = vector.broadcast %cst_105 : f32 to vector<8x8x8xf32>
    %72 = arith.mulf %70, %71 : vector<8x8x8xf32>
    %cst_106 = arith.constant dense<0xFF800000> : vector<8x8xf32>
    %73 = vector.multi_reduction <maximumf>, %72, %cst_106 [2] : vector<8x8x8xf32> to vector<8x8xf32>
    %74 = vector.shape_cast %73 : vector<8x8xf32> to vector<8x8x1xf32>
    %75 = vector.broadcast %74 : vector<8x8x1xf32> to vector<8x8x8xf32>
    %76 = arith.subf %72, %75 : vector<8x8x8xf32>
    %77 = math.exp %76 : vector<8x8x8xf32>
    %cst_107 = arith.constant dense<0.000000e+00> : vector<8x8xf32>
    %78 = vector.multi_reduction <add>, %77, %cst_107 [2] : vector<8x8x8xf32> to vector<8x8xf32>
    %79 = vector.shape_cast %78 : vector<8x8xf32> to vector<8x8x1xf32>
    %80 = vector.broadcast %79 : vector<8x8x1xf32> to vector<8x8x8xf32>
    %81 = arith.divf %77, %80 : vector<8x8x8xf32>
    "tpu.trace_start"() <{level = 10 : i32, message = "blm,bmd->bld"}> : () -> ()
    %cst_108 = arith.constant dense<0.000000e+00> : vector<8x8x8xf32>
    %82 = tpu.matmul %81, %69, %cst_108 {dimension_numbers = #tpu.dot_dimension_numbers<[2], [1], [1], [2], [0, 0, 0, 1, 1, 2], [0], [0]>} : vector<8x8x8xf32>, vector<8x8x8xf32>, vector<8x8x8xf32> -> vector<8x8x8xf32>
    "tpu.trace_stop"() : () -> ()
    %83 = vector.extract_strided_slice %64 {offsets = [0, 0, 8], sizes = [8, 8, 8], strides = [1, 1, 1]} : vector<8x8x32xf32> to vector<8x8x8xf32>
    %84 = vector.extract_strided_slice %65 {offsets = [0, 0, 8], sizes = [8, 8, 8], strides = [1, 1, 1]} : vector<8x8x32xf32> to vector<8x8x8xf32>
    %85 = vector.extract_strided_slice %66 {offsets = [0, 0, 8], sizes = [8, 8, 8], strides = [1, 1, 1]} : vector<8x8x32xf32> to vector<8x8x8xf32>
    "tpu.trace_start"() <{level = 10 : i32, message = "bld,bmd->blm"}> : () -> ()
    %cst_109 = arith.constant dense<0.000000e+00> : vector<8x8x8xf32>
    %86 = tpu.matmul %83, %84, %cst_109 {dimension_numbers = #tpu.dot_dimension_numbers<[2], [2], [1], [1], [0, 0, 0, 1, 1, 1], [0], [0]>} : vector<8x8x8xf32>, vector<8x8x8xf32>, vector<8x8x8xf32> -> vector<8x8x8xf32>
    "tpu.trace_stop"() : () -> ()
    %cst_110 = arith.constant 0.353553385 : f32
    %87 = vector.broadcast %cst_110 : f32 to vector<8x8x8xf32>
    %88 = arith.mulf %86, %87 : vector<8x8x8xf32>
    %cst_111 = arith.constant dense<0xFF800000> : vector<8x8xf32>
    %89 = vector.multi_reduction <maximumf>, %88, %cst_111 [2] : vector<8x8x8xf32> to vector<8x8xf32>
    %90 = vector.shape_cast %89 : vector<8x8xf32> to vector<8x8x1xf32>
    %91 = vector.broadcast %90 : vector<8x8x1xf32> to vector<8x8x8xf32>
    %92 = arith.subf %88, %91 : vector<8x8x8xf32>
    %93 = math.exp %92 : vector<8x8x8xf32>
    %cst_112 = arith.constant dense<0.000000e+00> : vector<8x8xf32>
    %94 = vector.multi_reduction <add>, %93, %cst_112 [2] : vector<8x8x8xf32> to vector<8x8xf32>
    %95 = vector.shape_cast %94 : vector<8x8xf32> to vector<8x8x1xf32>
    %96 = vector.broadcast %95 : vector<8x8x1xf32> to vector<8x8x8xf32>
    %97 = arith.divf %93, %96 : vector<8x8x8xf32>
    "tpu.trace_start"() <{level = 10 : i32, message = "blm,bmd->bld"}> : () -> ()
    %cst_113 = arith.constant dense<0.000000e+00> : vector<8x8x8xf32>
    %98 = tpu.matmul %97, %85, %cst_113 {dimension_numbers = #tpu.dot_dimension_numbers<[2], [1], [1], [2], [0, 0, 0, 1, 1, 2], [0], [0]>} : vector<8x8x8xf32>, vector<8x8x8xf32>, vector<8x8x8xf32> -> vector<8x8x8xf32>
    "tpu.trace_stop"() : () -> ()
    %99 = vector.extract_strided_slice %64 {offsets = [0, 0, 16], sizes = [8, 8, 8], strides = [1, 1, 1]} : vector<8x8x32xf32> to vector<8x8x8xf32>
    %100 = vector.extract_strided_slice %65 {offsets = [0, 0, 16], sizes = [8, 8, 8], strides = [1, 1, 1]} : vector<8x8x32xf32> to vector<8x8x8xf32>
    %101 = vector.extract_strided_slice %66 {offsets = [0, 0, 16], sizes = [8, 8, 8], strides = [1, 1, 1]} : vector<8x8x32xf32> to vector<8x8x8xf32>
    "tpu.trace_start"() <{level = 10 : i32, message = "bld,bmd->blm"}> : () -> ()
    %cst_114 = arith.constant dense<0.000000e+00> : vector<8x8x8xf32>
    %102 = tpu.matmul %99, %100, %cst_114 {dimension_numbers = #tpu.dot_dimension_numbers<[2], [2], [1], [1], [0, 0, 0, 1, 1, 1], [0], [0]>} : vector<8x8x8xf32>, vector<8x8x8xf32>, vector<8x8x8xf32> -> vector<8x8x8xf32>
    "tpu.trace_stop"() : () -> ()
    %cst_115 = arith.constant 0.353553385 : f32
    %103 = vector.broadcast %cst_115 : f32 to vector<8x8x8xf32>
    %104 = arith.mulf %102, %103 : vector<8x8x8xf32>
    %cst_116 = arith.constant dense<0xFF800000> : vector<8x8xf32>
    %105 = vector.multi_reduction <maximumf>, %104, %cst_116 [2] : vector<8x8x8xf32> to vector<8x8xf32>
    %106 = vector.shape_cast %105 : vector<8x8xf32> to vector<8x8x1xf32>
    %107 = vector.broadcast %106 : vector<8x8x1xf32> to vector<8x8x8xf32>
    %108 = arith.subf %104, %107 : vector<8x8x8xf32>
    %109 = math.exp %108 : vector<8x8x8xf32>
    %cst_117 = arith.constant dense<0.000000e+00> : vector<8x8xf32>
    %110 = vector.multi_reduction <add>, %109, %cst_117 [2] : vector<8x8x8xf32> to vector<8x8xf32>
    %111 = vector.shape_cast %110 : vector<8x8xf32> to vector<8x8x1xf32>
    %112 = vector.broadcast %111 : vector<8x8x1xf32> to vector<8x8x8xf32>
    %113 = arith.divf %109, %112 : vector<8x8x8xf32>
    "tpu.trace_start"() <{level = 10 : i32, message = "blm,bmd->bld"}> : () -> ()
    %cst_118 = arith.constant dense<0.000000e+00> : vector<8x8x8xf32>
    %114 = tpu.matmul %113, %101, %cst_118 {dimension_numbers = #tpu.dot_dimension_numbers<[2], [1], [1], [2], [0, 0, 0, 1, 1, 2], [0], [0]>} : vector<8x8x8xf32>, vector<8x8x8xf32>, vector<8x8x8xf32> -> vector<8x8x8xf32>
    "tpu.trace_stop"() : () -> ()
    %115 = vector.extract_strided_slice %64 {offsets = [0, 0, 24], sizes = [8, 8, 8], strides = [1, 1, 1]} : vector<8x8x32xf32> to vector<8x8x8xf32>
    %116 = vector.extract_strided_slice %65 {offsets = [0, 0, 24], sizes = [8, 8, 8], strides = [1, 1, 1]} : vector<8x8x32xf32> to vector<8x8x8xf32>
    %117 = vector.extract_strided_slice %66 {offsets = [0, 0, 24], sizes = [8, 8, 8], strides = [1, 1, 1]} : vector<8x8x32xf32> to vector<8x8x8xf32>
    "tpu.trace_start"() <{level = 10 : i32, message = "bld,bmd->blm"}> : () -> ()
    %cst_119 = arith.constant dense<0.000000e+00> : vector<8x8x8xf32>
    %118 = tpu.matmul %115, %116, %cst_119 {dimension_numbers = #tpu.dot_dimension_numbers<[2], [2], [1], [1], [0, 0, 0, 1, 1, 1], [0], [0]>} : vector<8x8x8xf32>, vector<8x8x8xf32>, vector<8x8x8xf32> -> vector<8x8x8xf32>
    "tpu.trace_stop"() : () -> ()
    %cst_120 = arith.constant 0.353553385 : f32
    %119 = vector.broadcast %cst_120 : f32 to vector<8x8x8xf32>
    %120 = arith.mulf %118, %119 : vector<8x8x8xf32>
    %cst_121 = arith.constant dense<0xFF800000> : vector<8x8xf32>
    %121 = vector.multi_reduction <maximumf>, %120, %cst_121 [2] : vector<8x8x8xf32> to vector<8x8xf32>
    %122 = vector.shape_cast %121 : vector<8x8xf32> to vector<8x8x1xf32>
    %123 = vector.broadcast %122 : vector<8x8x1xf32> to vector<8x8x8xf32>
    %124 = arith.subf %120, %123 : vector<8x8x8xf32>
    %125 = math.exp %124 : vector<8x8x8xf32>
    %cst_122 = arith.constant dense<0.000000e+00> : vector<8x8xf32>
    %126 = vector.multi_reduction <add>, %125, %cst_122 [2] : vector<8x8x8xf32> to vector<8x8xf32>
    %127 = vector.shape_cast %126 : vector<8x8xf32> to vector<8x8x1xf32>
    %128 = vector.broadcast %127 : vector<8x8x1xf32> to vector<8x8x8xf32>
    %129 = arith.divf %125, %128 : vector<8x8x8xf32>
    "tpu.trace_start"() <{level = 10 : i32, message = "blm,bmd->bld"}> : () -> ()
    %cst_123 = arith.constant dense<0.000000e+00> : vector<8x8x8xf32>
    %130 = tpu.matmul %129, %117, %cst_123 {dimension_numbers = #tpu.dot_dimension_numbers<[2], [1], [1], [2], [0, 0, 0, 1, 1, 2], [0], [0]>} : vector<8x8x8xf32>, vector<8x8x8xf32>, vector<8x8x8xf32> -> vector<8x8x8xf32>
    "tpu.trace_stop"() : () -> ()
    %131 = tpu.concatenate %82, %98, %114, %130 in 2 : vector<8x8x8xf32>, vector<8x8x8xf32>, vector<8x8x8xf32>, vector<8x8x8xf32> -> vector<8x8x32xf32>
    %132 = vector.shape_cast %131 : vector<8x8x32xf32> to vector<64x32xf32>
    %cst_124 = arith.constant dense<0.000000e+00> : vector<64x32xf32>
    %133 = tpu.matmul %132, %8, %cst_124 {dimension_numbers = #tpu.dot_dimension_numbers<[1], [0], [0], [1], [0, 0, 1, 1], [], []>} : vector<64x32xf32>, vector<32x32xf32>, vector<64x32xf32> -> vector<64x32xf32>
    %134 = vector.broadcast %9 : vector<1x32xf32> to vector<64x32xf32>
    %135 = arith.addf %133, %134 : vector<64x32xf32>
    %136 = arith.addf %54, %135 : vector<64x32xf32>
    %cst_125 = arith.constant dense<0.000000e+00> : vector<64xf32>
    %137 = vector.multi_reduction <add>, %136, %cst_125 [1] : vector<64x32xf32> to vector<64xf32>
    %138 = vector.shape_cast %137 : vector<64xf32> to vector<64x1xf32>
    %cst_126 = arith.constant 3.200000e+01 : f32
    %139 = vector.broadcast %cst_126 : f32 to vector<64x1xf32>
    %140 = arith.divf %138, %139 : vector<64x1xf32>
    %141 = vector.broadcast %140 : vector<64x1xf32> to vector<64x32xf32>
    %142 = arith.subf %136, %141 : vector<64x32xf32>
    %143 = arith.mulf %142, %142 : vector<64x32xf32>
    %cst_127 = arith.constant dense<0.000000e+00> : vector<64xf32>
    %144 = vector.multi_reduction <add>, %143, %cst_127 [1] : vector<64x32xf32> to vector<64xf32>
    %145 = vector.shape_cast %144 : vector<64xf32> to vector<64x1xf32>
    %cst_128 = arith.constant 3.200000e+01 : f32
    %146 = vector.broadcast %cst_128 : f32 to vector<64x1xf32>
    %147 = arith.divf %145, %146 : vector<64x1xf32>
    %cst_129 = arith.constant 9.99999974E-6 : f32
    %148 = vector.broadcast %cst_129 : f32 to vector<64x1xf32>
    %149 = arith.addf %147, %148 : vector<64x1xf32>
    %150 = math.rsqrt %149 : vector<64x1xf32>
    %151 = vector.broadcast %150 : vector<64x1xf32> to vector<64x32xf32>
    %152 = arith.mulf %142, %151 : vector<64x32xf32>
    %153 = vector.broadcast %10 : vector<1x32xf32> to vector<64x32xf32>
    %154 = arith.mulf %152, %153 : vector<64x32xf32>
    %155 = vector.broadcast %11 : vector<1x32xf32> to vector<64x32xf32>
    %156 = arith.addf %154, %155 : vector<64x32xf32>
    %cst_130 = arith.constant dense<0.000000e+00> : vector<64x32xf32>
    %157 = tpu.matmul %156, %12, %cst_130 {dimension_numbers = #tpu.dot_dimension_numbers<[1], [0], [0], [1], [0, 0, 1, 1], [], []>} : vector<64x32xf32>, vector<32x32xf32>, vector<64x32xf32> -> vector<64x32xf32>
    %158 = vector.broadcast %13 : vector<1x32xf32> to vector<64x32xf32>
    %159 = arith.addf %157, %158 : vector<64x32xf32>
    %cst_131 = arith.constant 0.000000e+00 : f32
    %160 = vector.broadcast %cst_131 : f32 to vector<64x32xf32>
    %161 = arith.maximumf %159, %160 : vector<64x32xf32>
    %cst_132 = arith.constant dense<0.000000e+00> : vector<64x32xf32>
    %162 = tpu.matmul %161, %14, %cst_132 {dimension_numbers = #tpu.dot_dimension_numbers<[1], [0], [0], [1], [0, 0, 1, 1], [], []>} : vector<64x32xf32>, vector<32x32xf32>, vector<64x32xf32> -> vector<64x32xf32>
    %163 = vector.broadcast %15 : vector<1x32xf32> to vector<64x32xf32>
    %164 = arith.addf %162, %163 : vector<64x32xf32>
    %165 = arith.addf %156, %164 : vector<64x32xf32>
    %cst_133 = arith.constant dense<0.000000e+00> : vector<64xf32>
    %166 = vector.multi_reduction <add>, %165, %cst_133 [1] : vector<64x32xf32> to vector<64xf32>
    %167 = vector.shape_cast %166 : vector<64xf32> to vector<64x1xf32>
    %cst_134 = arith.constant 3.200000e+01 : f32
    %168 = vector.broadcast %cst_134 : f32 to vector<64x1xf32>
    %169 = arith.divf %167, %168 : vector<64x1xf32>
    %170 = vector.broadcast %169 : vector<64x1xf32> to vector<64x32xf32>
    %171 = arith.subf %165, %170 : vector<64x32xf32>
    %172 = arith.mulf %171, %171 : vector<64x32xf32>
    %cst_135 = arith.constant dense<0.000000e+00> : vector<64xf32>
    %173 = vector.multi_reduction <add>, %172, %cst_135 [1] : vector<64x32xf32> to vector<64xf32>
    %174 = vector.shape_cast %173 : vector<64xf32> to vector<64x1xf32>
    %cst_136 = arith.constant 3.200000e+01 : f32
    %175 = vector.broadcast %cst_136 : f32 to vector<64x1xf32>
    %176 = arith.divf %174, %175 : vector<64x1xf32>
    %cst_137 = arith.constant 9.99999974E-6 : f32
    %177 = vector.broadcast %cst_137 : f32 to vector<64x1xf32>
    %178 = arith.addf %176, %177 : vector<64x1xf32>
    %179 = math.rsqrt %178 : vector<64x1xf32>
    %180 = vector.broadcast %179 : vector<64x1xf32> to vector<64x32xf32>
    %181 = arith.mulf %171, %180 : vector<64x32xf32>
    %182 = vector.broadcast %16 : vector<1x32xf32> to vector<64x32xf32>
    %183 = arith.mulf %181, %182 : vector<64x32xf32>
    %184 = vector.broadcast %17 : vector<1x32xf32> to vector<64x32xf32>
    %185 = arith.addf %183, %184 : vector<64x32xf32>
    %cst_138 = arith.constant dense<0.000000e+00> : vector<64x32xf32>
    %186 = tpu.matmul %51, %18, %cst_138 {dimension_numbers = #tpu.dot_dimension_numbers<[1], [0], [0], [1], [0, 0, 1, 1], [], []>} : vector<64x32xf32>, vector<32x32xf32>, vector<64x32xf32> -> vector<64x32xf32>
    %187 = vector.broadcast %19 : vector<1x32xf32> to vector<64x32xf32>
    %188 = arith.addf %186, %187 : vector<64x32xf32>
    %cst_139 = arith.constant dense<0.000000e+00> : vector<64x32xf32>
    %189 = tpu.matmul %188, %20, %cst_139 {dimension_numbers = #tpu.dot_dimension_numbers<[1], [0], [0], [1], [0, 0, 1, 1], [], []>} : vector<64x32xf32>, vector<32x32xf32>, vector<64x32xf32> -> vector<64x32xf32>
    %190 = vector.broadcast %21 : vector<1x32xf32> to vector<64x32xf32>
    %191 = arith.addf %189, %190 : vector<64x32xf32>
    %cst_140 = arith.constant dense<0.000000e+00> : vector<64x32xf32>
    %192 = tpu.matmul %50, %22, %cst_140 {dimension_numbers = #tpu.dot_dimension_numbers<[1], [0], [0], [1], [0, 0, 1, 1], [], []>} : vector<64x32xf32>, vector<32x32xf32>, vector<64x32xf32> -> vector<64x32xf32>
    %193 = vector.broadcast %23 : vector<1x32xf32> to vector<64x32xf32>
    %194 = arith.addf %192, %193 : vector<64x32xf32>
    %cst_141 = arith.constant dense<0.000000e+00> : vector<64x32xf32>
    %195 = tpu.matmul %50, %24, %cst_141 {dimension_numbers = #tpu.dot_dimension_numbers<[1], [0], [0], [1], [0, 0, 1, 1], [], []>} : vector<64x32xf32>, vector<32x32xf32>, vector<64x32xf32> -> vector<64x32xf32>
    %196 = vector.broadcast %25 : vector<1x32xf32> to vector<64x32xf32>
    %197 = arith.addf %195, %196 : vector<64x32xf32>
    %198 = vector.shape_cast %191 : vector<64x32xf32> to vector<8x8x32xf32>
    %199 = vector.shape_cast %194 : vector<64x32xf32> to vector<8x8x32xf32>
    %200 = vector.shape_cast %197 : vector<64x32xf32> to vector<8x8x32xf32>
    %201 = vector.extract_strided_slice %198 {offsets = [0, 0, 0], sizes = [8, 8, 8], strides = [1, 1, 1]} : vector<8x8x32xf32> to vector<8x8x8xf32>
    %202 = vector.extract_strided_slice %199 {offsets = [0, 0, 0], sizes = [8, 8, 8], strides = [1, 1, 1]} : vector<8x8x32xf32> to vector<8x8x8xf32>
    %203 = vector.extract_strided_slice %200 {offsets = [0, 0, 0], sizes = [8, 8, 8], strides = [1, 1, 1]} : vector<8x8x32xf32> to vector<8x8x8xf32>
    "tpu.trace_start"() <{level = 10 : i32, message = "bld,bmd->blm"}> : () -> ()
    %cst_142 = arith.constant dense<0.000000e+00> : vector<8x8x8xf32>
    %204 = tpu.matmul %201, %202, %cst_142 {dimension_numbers = #tpu.dot_dimension_numbers<[2], [2], [1], [1], [0, 0, 0, 1, 1, 1], [0], [0]>} : vector<8x8x8xf32>, vector<8x8x8xf32>, vector<8x8x8xf32> -> vector<8x8x8xf32>
    "tpu.trace_stop"() : () -> ()
    %cst_143 = arith.constant 0.353553385 : f32
    %205 = vector.broadcast %cst_143 : f32 to vector<8x8x8xf32>
    %206 = arith.mulf %204, %205 : vector<8x8x8xf32>
    %cst_144 = arith.constant dense<0xFF800000> : vector<8x8xf32>
    %207 = vector.multi_reduction <maximumf>, %206, %cst_144 [2] : vector<8x8x8xf32> to vector<8x8xf32>
    %208 = vector.shape_cast %207 : vector<8x8xf32> to vector<8x8x1xf32>
    %209 = vector.broadcast %208 : vector<8x8x1xf32> to vector<8x8x8xf32>
    %210 = arith.subf %206, %209 : vector<8x8x8xf32>
    %211 = math.exp %210 : vector<8x8x8xf32>
    %cst_145 = arith.constant dense<0.000000e+00> : vector<8x8xf32>
    %212 = vector.multi_reduction <add>, %211, %cst_145 [2] : vector<8x8x8xf32> to vector<8x8xf32>
    %213 = vector.shape_cast %212 : vector<8x8xf32> to vector<8x8x1xf32>
    %214 = vector.broadcast %213 : vector<8x8x1xf32> to vector<8x8x8xf32>
    %215 = arith.divf %211, %214 : vector<8x8x8xf32>
    "tpu.trace_start"() <{level = 10 : i32, message = "blm,bmd->bld"}> : () -> ()
    %cst_146 = arith.constant dense<0.000000e+00> : vector<8x8x8xf32>
    %216 = tpu.matmul %215, %203, %cst_146 {dimension_numbers = #tpu.dot_dimension_numbers<[2], [1], [1], [2], [0, 0, 0, 1, 1, 2], [0], [0]>} : vector<8x8x8xf32>, vector<8x8x8xf32>, vector<8x8x8xf32> -> vector<8x8x8xf32>
    "tpu.trace_stop"() : () -> ()
    %217 = vector.extract_strided_slice %198 {offsets = [0, 0, 8], sizes = [8, 8, 8], strides = [1, 1, 1]} : vector<8x8x32xf32> to vector<8x8x8xf32>
    %218 = vector.extract_strided_slice %199 {offsets = [0, 0, 8], sizes = [8, 8, 8], strides = [1, 1, 1]} : vector<8x8x32xf32> to vector<8x8x8xf32>
    %219 = vector.extract_strided_slice %200 {offsets = [0, 0, 8], sizes = [8, 8, 8], strides = [1, 1, 1]} : vector<8x8x32xf32> to vector<8x8x8xf32>
    "tpu.trace_start"() <{level = 10 : i32, message = "bld,bmd->blm"}> : () -> ()
    %cst_147 = arith.constant dense<0.000000e+00> : vector<8x8x8xf32>
    %220 = tpu.matmul %217, %218, %cst_147 {dimension_numbers = #tpu.dot_dimension_numbers<[2], [2], [1], [1], [0, 0, 0, 1, 1, 1], [0], [0]>} : vector<8x8x8xf32>, vector<8x8x8xf32>, vector<8x8x8xf32> -> vector<8x8x8xf32>
    "tpu.trace_stop"() : () -> ()
    %cst_148 = arith.constant 0.353553385 : f32
    %221 = vector.broadcast %cst_148 : f32 to vector<8x8x8xf32>
    %222 = arith.mulf %220, %221 : vector<8x8x8xf32>
    %cst_149 = arith.constant dense<0xFF800000> : vector<8x8xf32>
    %223 = vector.multi_reduction <maximumf>, %222, %cst_149 [2] : vector<8x8x8xf32> to vector<8x8xf32>
    %224 = vector.shape_cast %223 : vector<8x8xf32> to vector<8x8x1xf32>
    %225 = vector.broadcast %224 : vector<8x8x1xf32> to vector<8x8x8xf32>
    %226 = arith.subf %222, %225 : vector<8x8x8xf32>
    %227 = math.exp %226 : vector<8x8x8xf32>
    %cst_150 = arith.constant dense<0.000000e+00> : vector<8x8xf32>
    %228 = vector.multi_reduction <add>, %227, %cst_150 [2] : vector<8x8x8xf32> to vector<8x8xf32>
    %229 = vector.shape_cast %228 : vector<8x8xf32> to vector<8x8x1xf32>
    %230 = vector.broadcast %229 : vector<8x8x1xf32> to vector<8x8x8xf32>
    %231 = arith.divf %227, %230 : vector<8x8x8xf32>
    "tpu.trace_start"() <{level = 10 : i32, message = "blm,bmd->bld"}> : () -> ()
    %cst_151 = arith.constant dense<0.000000e+00> : vector<8x8x8xf32>
    %232 = tpu.matmul %231, %219, %cst_151 {dimension_numbers = #tpu.dot_dimension_numbers<[2], [1], [1], [2], [0, 0, 0, 1, 1, 2], [0], [0]>} : vector<8x8x8xf32>, vector<8x8x8xf32>, vector<8x8x8xf32> -> vector<8x8x8xf32>
    "tpu.trace_stop"() : () -> ()
    %233 = vector.extract_strided_slice %198 {offsets = [0, 0, 16], sizes = [8, 8, 8], strides = [1, 1, 1]} : vector<8x8x32xf32> to vector<8x8x8xf32>
    %234 = vector.extract_strided_slice %199 {offsets = [0, 0, 16], sizes = [8, 8, 8], strides = [1, 1, 1]} : vector<8x8x32xf32> to vector<8x8x8xf32>
    %235 = vector.extract_strided_slice %200 {offsets = [0, 0, 16], sizes = [8, 8, 8], strides = [1, 1, 1]} : vector<8x8x32xf32> to vector<8x8x8xf32>
    "tpu.trace_start"() <{level = 10 : i32, message = "bld,bmd->blm"}> : () -> ()
    %cst_152 = arith.constant dense<0.000000e+00> : vector<8x8x8xf32>
    %236 = tpu.matmul %233, %234, %cst_152 {dimension_numbers = #tpu.dot_dimension_numbers<[2], [2], [1], [1], [0, 0, 0, 1, 1, 1], [0], [0]>} : vector<8x8x8xf32>, vector<8x8x8xf32>, vector<8x8x8xf32> -> vector<8x8x8xf32>
    "tpu.trace_stop"() : () -> ()
    %cst_153 = arith.constant 0.353553385 : f32
    %237 = vector.broadcast %cst_153 : f32 to vector<8x8x8xf32>
    %238 = arith.mulf %236, %237 : vector<8x8x8xf32>
    %cst_154 = arith.constant dense<0xFF800000> : vector<8x8xf32>
    %239 = vector.multi_reduction <maximumf>, %238, %cst_154 [2] : vector<8x8x8xf32> to vector<8x8xf32>
    %240 = vector.shape_cast %239 : vector<8x8xf32> to vector<8x8x1xf32>
    %241 = vector.broadcast %240 : vector<8x8x1xf32> to vector<8x8x8xf32>
    %242 = arith.subf %238, %241 : vector<8x8x8xf32>
    %243 = math.exp %242 : vector<8x8x8xf32>
    %cst_155 = arith.constant dense<0.000000e+00> : vector<8x8xf32>
    %244 = vector.multi_reduction <add>, %243, %cst_155 [2] : vector<8x8x8xf32> to vector<8x8xf32>
    %245 = vector.shape_cast %244 : vector<8x8xf32> to vector<8x8x1xf32>
    %246 = vector.broadcast %245 : vector<8x8x1xf32> to vector<8x8x8xf32>
    %247 = arith.divf %243, %246 : vector<8x8x8xf32>
    "tpu.trace_start"() <{level = 10 : i32, message = "blm,bmd->bld"}> : () -> ()
    %cst_156 = arith.constant dense<0.000000e+00> : vector<8x8x8xf32>
    %248 = tpu.matmul %247, %235, %cst_156 {dimension_numbers = #tpu.dot_dimension_numbers<[2], [1], [1], [2], [0, 0, 0, 1, 1, 2], [0], [0]>} : vector<8x8x8xf32>, vector<8x8x8xf32>, vector<8x8x8xf32> -> vector<8x8x8xf32>
    "tpu.trace_stop"() : () -> ()
    %249 = vector.extract_strided_slice %198 {offsets = [0, 0, 24], sizes = [8, 8, 8], strides = [1, 1, 1]} : vector<8x8x32xf32> to vector<8x8x8xf32>
    %250 = vector.extract_strided_slice %199 {offsets = [0, 0, 24], sizes = [8, 8, 8], strides = [1, 1, 1]} : vector<8x8x32xf32> to vector<8x8x8xf32>
    %251 = vector.extract_strided_slice %200 {offsets = [0, 0, 24], sizes = [8, 8, 8], strides = [1, 1, 1]} : vector<8x8x32xf32> to vector<8x8x8xf32>
    "tpu.trace_start"() <{level = 10 : i32, message = "bld,bmd->blm"}> : () -> ()
    %cst_157 = arith.constant dense<0.000000e+00> : vector<8x8x8xf32>
    %252 = tpu.matmul %249, %250, %cst_157 {dimension_numbers = #tpu.dot_dimension_numbers<[2], [2], [1], [1], [0, 0, 0, 1, 1, 1], [0], [0]>} : vector<8x8x8xf32>, vector<8x8x8xf32>, vector<8x8x8xf32> -> vector<8x8x8xf32>
    "tpu.trace_stop"() : () -> ()
    %cst_158 = arith.constant 0.353553385 : f32
    %253 = vector.broadcast %cst_158 : f32 to vector<8x8x8xf32>
    %254 = arith.mulf %252, %253 : vector<8x8x8xf32>
    %cst_159 = arith.constant dense<0xFF800000> : vector<8x8xf32>
    %255 = vector.multi_reduction <maximumf>, %254, %cst_159 [2] : vector<8x8x8xf32> to vector<8x8xf32>
    %256 = vector.shape_cast %255 : vector<8x8xf32> to vector<8x8x1xf32>
    %257 = vector.broadcast %256 : vector<8x8x1xf32> to vector<8x8x8xf32>
    %258 = arith.subf %254, %257 : vector<8x8x8xf32>
    %259 = math.exp %258 : vector<8x8x8xf32>
    %cst_160 = arith.constant dense<0.000000e+00> : vector<8x8xf32>
    %260 = vector.multi_reduction <add>, %259, %cst_160 [2] : vector<8x8x8xf32> to vector<8x8xf32>
    %261 = vector.shape_cast %260 : vector<8x8xf32> to vector<8x8x1xf32>
    %262 = vector.broadcast %261 : vector<8x8x1xf32> to vector<8x8x8xf32>
    %263 = arith.divf %259, %262 : vector<8x8x8xf32>
    "tpu.trace_start"() <{level = 10 : i32, message = "blm,bmd->bld"}> : () -> ()
    %cst_161 = arith.constant dense<0.000000e+00> : vector<8x8x8xf32>
    %264 = tpu.matmul %263, %251, %cst_161 {dimension_numbers = #tpu.dot_dimension_numbers<[2], [1], [1], [2], [0, 0, 0, 1, 1, 2], [0], [0]>} : vector<8x8x8xf32>, vector<8x8x8xf32>, vector<8x8x8xf32> -> vector<8x8x8xf32>
    "tpu.trace_stop"() : () -> ()
    %265 = tpu.concatenate %216, %232, %248, %264 in 2 : vector<8x8x8xf32>, vector<8x8x8xf32>, vector<8x8x8xf32>, vector<8x8x8xf32> -> vector<8x8x32xf32>
    %266 = vector.shape_cast %265 : vector<8x8x32xf32> to vector<64x32xf32>
    %cst_162 = arith.constant dense<0.000000e+00> : vector<64x32xf32>
    %267 = tpu.matmul %266, %26, %cst_162 {dimension_numbers = #tpu.dot_dimension_numbers<[1], [0], [0], [1], [0, 0, 1, 1], [], []>} : vector<64x32xf32>, vector<32x32xf32>, vector<64x32xf32> -> vector<64x32xf32>
    %268 = vector.broadcast %27 : vector<1x32xf32> to vector<64x32xf32>
    %269 = arith.addf %267, %268 : vector<64x32xf32>
    %270 = arith.addf %188, %269 : vector<64x32xf32>
    %cst_163 = arith.constant dense<0.000000e+00> : vector<64xf32>
    %271 = vector.multi_reduction <add>, %270, %cst_163 [1] : vector<64x32xf32> to vector<64xf32>
    %272 = vector.shape_cast %271 : vector<64xf32> to vector<64x1xf32>
    %cst_164 = arith.constant 3.200000e+01 : f32
    %273 = vector.broadcast %cst_164 : f32 to vector<64x1xf32>
    %274 = arith.divf %272, %273 : vector<64x1xf32>
    %275 = vector.broadcast %274 : vector<64x1xf32> to vector<64x32xf32>
    %276 = arith.subf %270, %275 : vector<64x32xf32>
    %277 = arith.mulf %276, %276 : vector<64x32xf32>
    %cst_165 = arith.constant dense<0.000000e+00> : vector<64xf32>
    %278 = vector.multi_reduction <add>, %277, %cst_165 [1] : vector<64x32xf32> to vector<64xf32>
    %279 = vector.shape_cast %278 : vector<64xf32> to vector<64x1xf32>
    %cst_166 = arith.constant 3.200000e+01 : f32
    %280 = vector.broadcast %cst_166 : f32 to vector<64x1xf32>
    %281 = arith.divf %279, %280 : vector<64x1xf32>
    %cst_167 = arith.constant 9.99999974E-6 : f32
    %282 = vector.broadcast %cst_167 : f32 to vector<64x1xf32>
    %283 = arith.addf %281, %282 : vector<64x1xf32>
    %284 = math.rsqrt %283 : vector<64x1xf32>
    %285 = vector.broadcast %284 : vector<64x1xf32> to vector<64x32xf32>
    %286 = arith.mulf %276, %285 : vector<64x32xf32>
    %287 = vector.broadcast %28 : vector<1x32xf32> to vector<64x32xf32>
    %288 = arith.mulf %286, %287 : vector<64x32xf32>
    %289 = vector.broadcast %29 : vector<1x32xf32> to vector<64x32xf32>
    %290 = arith.addf %288, %289 : vector<64x32xf32>
    %cst_168 = arith.constant dense<0.000000e+00> : vector<64x32xf32>
    %291 = tpu.matmul %290, %30, %cst_168 {dimension_numbers = #tpu.dot_dimension_numbers<[1], [0], [0], [1], [0, 0, 1, 1], [], []>} : vector<64x32xf32>, vector<32x32xf32>, vector<64x32xf32> -> vector<64x32xf32>
    %292 = vector.broadcast %31 : vector<1x32xf32> to vector<64x32xf32>
    %293 = arith.addf %291, %292 : vector<64x32xf32>
    %cst_169 = arith.constant 0.000000e+00 : f32
    %294 = vector.broadcast %cst_169 : f32 to vector<64x32xf32>
    %295 = arith.maximumf %293, %294 : vector<64x32xf32>
    %cst_170 = arith.constant dense<0.000000e+00> : vector<64x32xf32>
    %296 = tpu.matmul %295, %32, %cst_170 {dimension_numbers = #tpu.dot_dimension_numbers<[1], [0], [0], [1], [0, 0, 1, 1], [], []>} : vector<64x32xf32>, vector<32x32xf32>, vector<64x32xf32> -> vector<64x32xf32>
    %297 = vector.broadcast %33 : vector<1x32xf32> to vector<64x32xf32>
    %298 = arith.addf %296, %297 : vector<64x32xf32>
    %299 = arith.addf %290, %298 : vector<64x32xf32>
    %cst_171 = arith.constant dense<0.000000e+00> : vector<64xf32>
    %300 = vector.multi_reduction <add>, %299, %cst_171 [1] : vector<64x32xf32> to vector<64xf32>
    %301 = vector.shape_cast %300 : vector<64xf32> to vector<64x1xf32>
    %cst_172 = arith.constant 3.200000e+01 : f32
    %302 = vector.broadcast %cst_172 : f32 to vector<64x1xf32>
    %303 = arith.divf %301, %302 : vector<64x1xf32>
    %304 = vector.broadcast %303 : vector<64x1xf32> to vector<64x32xf32>
    %305 = arith.subf %299, %304 : vector<64x32xf32>
    %306 = arith.mulf %305, %305 : vector<64x32xf32>
    %cst_173 = arith.constant dense<0.000000e+00> : vector<64xf32>
    %307 = vector.multi_reduction <add>, %306, %cst_173 [1] : vector<64x32xf32> to vector<64xf32>
    %308 = vector.shape_cast %307 : vector<64xf32> to vector<64x1xf32>
    %cst_174 = arith.constant 3.200000e+01 : f32
    %309 = vector.broadcast %cst_174 : f32 to vector<64x1xf32>
    %310 = arith.divf %308, %309 : vector<64x1xf32>
    %cst_175 = arith.constant 9.99999974E-6 : f32
    %311 = vector.broadcast %cst_175 : f32 to vector<64x1xf32>
    %312 = arith.addf %310, %311 : vector<64x1xf32>
    %313 = math.rsqrt %312 : vector<64x1xf32>
    %314 = vector.broadcast %313 : vector<64x1xf32> to vector<64x32xf32>
    %315 = arith.mulf %305, %314 : vector<64x32xf32>
    %316 = vector.broadcast %34 : vector<1x32xf32> to vector<64x32xf32>
    %317 = arith.mulf %315, %316 : vector<64x32xf32>
    %318 = vector.broadcast %35 : vector<1x32xf32> to vector<64x32xf32>
    %319 = arith.addf %317, %318 : vector<64x32xf32>
    %320 = vector.shape_cast %185 : vector<64x32xf32> to vector<8x8x32xf32>
    %cst_176 = arith.constant dense<0.000000e+00> : vector<8x32xf32>
    %321 = vector.multi_reduction <add>, %320, %cst_176 [1] : vector<8x8x32xf32> to vector<8x32xf32>
    %cst_177 = arith.constant 8.000000e+00 : f32
    %322 = vector.broadcast %cst_177 : f32 to vector<8x32xf32>
    %323 = arith.divf %321, %322 : vector<8x32xf32>
    %324 = vector.shape_cast %319 : vector<64x32xf32> to vector<8x8x32xf32>
    %cst_178 = arith.constant dense<0.000000e+00> : vector<8x32xf32>
    %325 = vector.multi_reduction <add>, %324, %cst_178 [1] : vector<8x8x32xf32> to vector<8x32xf32>
    %cst_179 = arith.constant 8.000000e+00 : f32
    %326 = vector.broadcast %cst_179 : f32 to vector<8x32xf32>
    %327 = arith.divf %325, %326 : vector<8x32xf32>
    %328 = tpu.concatenate %323, %327 in 1 : vector<8x32xf32>, vector<8x32xf32> -> vector<8x64xf32>
    %cst_180 = arith.constant dense<0.000000e+00> : vector<8x64xf32>
    %329 = tpu.matmul %328, %36, %cst_180 {dimension_numbers = #tpu.dot_dimension_numbers<[1], [0], [0], [1], [0, 0, 1, 1], [], []>} : vector<8x64xf32>, vector<64x64xf32>, vector<8x64xf32> -> vector<8x64xf32>
    %330 = vector.broadcast %37 : vector<1x64xf32> to vector<8x64xf32>
    %331 = arith.addf %329, %330 : vector<8x64xf32>
    %cst_181 = arith.constant 0.000000e+00 : f32
    %332 = vector.broadcast %cst_181 : f32 to vector<8x64xf32>
    %333 = arith.maximumf %331, %332 : vector<8x64xf32>
    %cst_182 = arith.constant dense<0.000000e+00> : vector<8x64xf32>
    %334 = tpu.matmul %333, %38, %cst_182 {dimension_numbers = #tpu.dot_dimension_numbers<[1], [0], [0], [1], [0, 0, 1, 1], [], []>} : vector<8x64xf32>, vector<64x64xf32>, vector<8x64xf32> -> vector<8x64xf32>
    %335 = vector.broadcast %39 : vector<1x64xf32> to vector<8x64xf32>
    %336 = arith.addf %334, %335 : vector<8x64xf32>
    %337 = tpu.concatenate %48, %49 in 1 : vector<8x32xf32>, vector<8x32xf32> -> vector<8x64xf32>
    %cst_183 = arith.constant dense<0.000000e+00> : vector<8x64xf32>
    %338 = tpu.matmul %337, %40, %cst_183 {dimension_numbers = #tpu.dot_dimension_numbers<[1], [0], [0], [1], [0, 0, 1, 1], [], []>} : vector<8x64xf32>, vector<64x64xf32>, vector<8x64xf32> -> vector<8x64xf32>
    %339 = vector.broadcast %41 : vector<1x64xf32> to vector<8x64xf32>
    %340 = arith.addf %338, %339 : vector<8x64xf32>
    %cst_184 = arith.constant 0.000000e+00 : f32
    %341 = vector.broadcast %cst_184 : f32 to vector<8x64xf32>
    %342 = arith.maximumf %340, %341 : vector<8x64xf32>
    %cst_185 = arith.constant dense<0.000000e+00> : vector<8x64xf32>
    %343 = tpu.matmul %342, %42, %cst_185 {dimension_numbers = #tpu.dot_dimension_numbers<[1], [0], [0], [1], [0, 0, 1, 1], [], []>} : vector<8x64xf32>, vector<64x64xf32>, vector<8x64xf32> -> vector<8x64xf32>
    %344 = vector.broadcast %43 : vector<1x64xf32> to vector<8x64xf32>
    %345 = arith.addf %343, %344 : vector<8x64xf32>
    %346 = tpu.concatenate %336, %345 in 1 : vector<8x64xf32>, vector<8x64xf32> -> vector<8x128xf32>
    %cst_186 = arith.constant dense<0.000000e+00> : vector<8x512xf32>
    %347 = tpu.matmul %346, %44, %cst_186 {dimension_numbers = #tpu.dot_dimension_numbers<[1], [0], [0], [1], [0, 0, 1, 1], [], []>} : vector<8x128xf32>, vector<128x512xf32>, vector<8x512xf32> -> vector<8x512xf32>
    %348 = vector.broadcast %45 : vector<1x512xf32> to vector<8x512xf32>
    %349 = arith.addf %347, %348 : vector<8x512xf32>
    %350 = arith.mulf %48, %49 : vector<8x32xf32>
    %cst_187 = arith.constant dense<0.000000e+00> : vector<8xf32>
    %351 = vector.multi_reduction <add>, %350, %cst_187 [1] : vector<8x32xf32> to vector<8xf32>
    %352 = vector.shape_cast %351 : vector<8xf32> to vector<8x1xf32>
    %353 = arith.mulf %48, %48 : vector<8x32xf32>
    %cst_188 = arith.constant dense<0.000000e+00> : vector<8xf32>
    %354 = vector.multi_reduction <add>, %353, %cst_188 [1] : vector<8x32xf32> to vector<8xf32>
    %355 = vector.shape_cast %354 : vector<8xf32> to vector<8x1xf32>
    %356 = math.sqrt %355 : vector<8x1xf32>
    %357 = arith.mulf %49, %49 : vector<8x32xf32>
    %cst_189 = arith.constant dense<0.000000e+00> : vector<8xf32>
    %358 = vector.multi_reduction <add>, %357, %cst_189 [1] : vector<8x32xf32> to vector<8xf32>
    %359 = vector.shape_cast %358 : vector<8xf32> to vector<8x1xf32>
    %360 = math.sqrt %359 : vector<8x1xf32>
    %361 = arith.mulf %356, %360 : vector<8x1xf32>
    %cst_190 = arith.constant 9.99999997E-7 : f32
    %362 = vector.broadcast %cst_190 : f32 to vector<8x1xf32>
    %363 = arith.maximumf %361, %362 : vector<8x1xf32>
    %364 = arith.divf %352, %363 : vector<8x1xf32>
    %365 = vector.broadcast %364 : vector<8x1xf32> to vector<8x512xf32>
    %366 = arith.mulf %365, %349 : vector<8x512xf32>
    %c0_191 = arith.constant 0 : index
    %c0_192 = arith.constant 0 : index
    %367 = vector.load %arg51[%c0_191, %c0_192] : memref<8x512xf32, #tpu.memory_space<vmem>>, vector<8x512xf32>
    tpu.vector_store %arg51[%c0_191, %c0_192], %366 {strides = array<i32>} : memref<8x512xf32, #tpu.memory_space<vmem>>, vector<8x512xf32>,
    return
  }
  func.func @transform_0(%arg0: i32) -> (i32, i32, i32) {
    %c0_i32 = arith.constant 0 : i32
    %c0_i32_0 = arith.constant 0 : i32
    %c0_i32_1 = arith.constant 0 : i32
    return %arg0, %c0_i32, %c0_i32_0 : i32, i32, i32
  }
  func.func @transform_1(%arg0: i32) -> (i32, i32, i32) {
    %c0_i32 = arith.constant 0 : i32
    %c0_i32_0 = arith.constant 0 : i32
    %c0_i32_1 = arith.constant 0 : i32
    return %arg0, %c0_i32, %c0_i32_0 : i32, i32, i32
  }
  func.func @transform_2(%arg0: i32) -> (i32, i32) {
    %c0_i32 = arith.constant 0 : i32
    %c0_i32_0 = arith.constant 0 : i32
    return %arg0, %c0_i32 : i32, i32
  }
  func.func @transform_3(%arg0: i32) -> (i32, i32) {
    %c0_i32 = arith.constant 0 : i32
    %c0_i32_0 = arith.constant 0 : i32
    return %arg0, %c0_i32 : i32, i32
  }
  func.func @transform_4(%arg0: i32) -> (i32, i32) {
    %c0_i32 = arith.constant 0 : i32
    %c0_i32_0 = arith.constant 0 : i32
    %c0_i32_1 = arith.constant 0 : i32
    return %c0_i32, %c0_i32_0 : i32, i32
  }
  func.func @transform_5(%arg0: i32) -> (i32, i32) {
    %c0_i32 = arith.constant 0 : i32
    %c0_i32_0 = arith.constant 0 : i32
    %c0_i32_1 = arith.constant 0 : i32
    return %c0_i32, %c0_i32_0 : i32, i32
  }
  func.func @transform_6(%arg0: i32) -> (i32, i32) {
    %c0_i32 = arith.constant 0 : i32
    %c0_i32_0 = arith.constant 0 : i32
    %c0_i32_1 = arith.constant 0 : i32
    return %c0_i32, %c0_i32_0 : i32, i32
  }
  func.func @transform_7(%arg0: i32) -> (i32, i32) {
    %c0_i32 = arith.constant 0 : i32
    %c0_i32_0 = arith.constant 0 : i32
    %c0_i32_1 = arith.constant 0 : i32
    return %c0_i32, %c0_i32_0 : i32, i32
  }
  func.func @transform_8(%arg0: i32) -> (i32, i32) {
    %c0_i32 = arith.constant 0 : i32
    %c0_i32_0 = arith.constant 0 : i32
    %c0_i32_1 = arith.constant 0 : i32
    return %c0_i32, %c0_i32_0 : i32, i32
  }
  func.func @transform_9(%arg0: i32) -> (i32, i32) {
    %c0_i32 = arith.constant 0 : i32
    %c0_i32_0 = arith.constant 0 : i32
    %c0_i32_1 = arith.constant 0 : i32
    return %c0_i32, %c0_i32_0 : i32, i32
  }
  func.func @transform_10(%arg0: i32) -> (i32, i32) {
    %c0_i32 = arith.constant 0 : i32
    %c0_i32_0 = arith.constant 0 : i32
    %c0_i32_1 = arith.constant 0 : i32
    return %c0_i32, %c0_i32_0 : i32, i32
  }
  func.func @transform_11(%arg0: i32) -> (i32, i32) {
    %c0_i32 = arith.constant 0 : i32
    %c0_i32_0 = arith.constant 0 : i32
    %c0_i32_1 = arith.constant 0 : i32
    return %c0_i32, %c0_i32_0 : i32, i32
  }
  func.func @transform_12(%arg0: i32) -> (i32, i32) {
    %c0_i32 = arith.constant 0 : i32
    %c0_i32_0 = arith.constant 0 : i32
    %c0_i32_1 = arith.constant 0 : i32
    return %c0_i32, %c0_i32_0 : i32, i32
  }
  func.func @transform_13(%arg0: i32) -> (i32, i32) {
    %c0_i32 = arith.constant 0 : i32
    %c0_i32_0 = arith.constant 0 : i32
    %c0_i32_1 = arith.constant 0 : i32
    return %c0_i32, %c0_i32_0 : i32, i32
  }
  func.func @transform_14(%arg0: i32) -> (i32, i32) {
    %c0_i32 = arith.constant 0 : i32
    %c0_i32_0 = arith.constant 0 : i32
    %c0_i32_1 = arith.constant 0 : i32
    return %c0_i32, %c0_i32_0 : i32, i32
  }
  func.func @transform_15(%arg0: i32) -> (i32, i32) {
    %c0_i32 = arith.constant 0 : i32
    %c0_i32_0 = arith.constant 0 : i32
    %c0_i32_1 = arith.constant 0 : i32
    return %c0_i32, %c0_i32_0 : i32, i32
  }
  func.func @transform_16(%arg0: i32) -> (i32, i32) {
    %c0_i32 = arith.constant 0 : i32
    %c0_i32_0 = arith.constant 0 : i32
    %c0_i32_1 = arith.constant 0 : i32
    return %c0_i32, %c0_i32_0 : i32, i32
  }
  func.func @transform_17(%arg0: i32) -> (i32, i32) {
    %c0_i32 = arith.constant 0 : i32
    %c0_i32_0 = arith.constant 0 : i32
    %c0_i32_1 = arith.constant 0 : i32
    return %c0_i32, %c0_i32_0 : i32, i32
  }
  func.func @transform_18(%arg0: i32) -> (i32, i32) {
    %c0_i32 = arith.constant 0 : i32
    %c0_i32_0 = arith.constant 0 : i32
    %c0_i32_1 = arith.constant 0 : i32
    return %c0_i32, %c0_i32_0 : i32, i32
  }
  func.func @transform_19(%arg0: i32) -> (i32, i32) {
    %c0_i32 = arith.constant 0 : i32
    %c0_i32_0 = arith.constant 0 : i32
    %c0_i32_1 = arith.constant 0 : i32
    return %c0_i32, %c0_i32_0 : i32, i32
  }
  func.func @transform_20(%arg0: i32) -> (i32, i32) {
    %c0_i32 = arith.constant 0 : i32
    %c0_i32_0 = arith.constant 0 : i32
    %c0_i32_1 = arith.constant 0 : i32
    return %c0_i32, %c0_i32_0 : i32, i32
  }
  func.func @transform_21(%arg0: i32) -> (i32, i32) {
    %c0_i32 = arith.constant 0 : i32
    %c0_i32_0 = arith.constant 0 : i32
    %c0_i32_1 = arith.constant 0 : i32
    return %c0_i32, %c0_i32_0 : i32, i32
  }
  func.func @transform_22(%arg0: i32) -> (i32, i32) {
    %c0_i32 = arith.constant 0 : i32
    %c0_i32_0 = arith.constant 0 : i32
    %c0_i32_1 = arith.constant 0 : i32
    return %c0_i32, %c0_i32_0 : i32, i32
  }
  func.func @transform_23(%arg0: i32) -> (i32, i32) {
    %c0_i32 = arith.constant 0 : i32
    %c0_i32_0 = arith.constant 0 : i32
    %c0_i32_1 = arith.constant 0 : i32
    return %c0_i32, %c0_i32_0 : i32, i32
  }
  func.func @transform_24(%arg0: i32) -> (i32, i32) {
    %c0_i32 = arith.constant 0 : i32
    %c0_i32_0 = arith.constant 0 : i32
    %c0_i32_1 = arith.constant 0 : i32
    return %c0_i32, %c0_i32_0 : i32, i32
  }
  func.func @transform_25(%arg0: i32) -> (i32, i32) {
    %c0_i32 = arith.constant 0 : i32
    %c0_i32_0 = arith.constant 0 : i32
    %c0_i32_1 = arith.constant 0 : i32
    return %c0_i32, %c0_i32_0 : i32, i32
  }
  func.func @transform_26(%arg0: i32) -> (i32, i32) {
    %c0_i32 = arith.constant 0 : i32
    %c0_i32_0 = arith.constant 0 : i32
    %c0_i32_1 = arith.constant 0 : i32
    return %c0_i32, %c0_i32_0 : i32, i32
  }
  func.func @transform_27(%arg0: i32) -> (i32, i32) {
    %c0_i32 = arith.constant 0 : i32
    %c0_i32_0 = arith.constant 0 : i32
    %c0_i32_1 = arith.constant 0 : i32
    return %c0_i32, %c0_i32_0 : i32, i32
  }
  func.func @transform_28(%arg0: i32) -> (i32, i32) {
    %c0_i32 = arith.constant 0 : i32
    %c0_i32_0 = arith.constant 0 : i32
    %c0_i32_1 = arith.constant 0 : i32
    return %c0_i32, %c0_i32_0 : i32, i32
  }
  func.func @transform_29(%arg0: i32) -> (i32, i32) {
    %c0_i32 = arith.constant 0 : i32
    %c0_i32_0 = arith.constant 0 : i32
    %c0_i32_1 = arith.constant 0 : i32
    return %c0_i32, %c0_i32_0 : i32, i32
  }
  func.func @transform_30(%arg0: i32) -> (i32, i32) {
    %c0_i32 = arith.constant 0 : i32
    %c0_i32_0 = arith.constant 0 : i32
    %c0_i32_1 = arith.constant 0 : i32
    return %c0_i32, %c0_i32_0 : i32, i32
  }
  func.func @transform_31(%arg0: i32) -> (i32, i32) {
    %c0_i32 = arith.constant 0 : i32
    %c0_i32_0 = arith.constant 0 : i32
    %c0_i32_1 = arith.constant 0 : i32
    return %c0_i32, %c0_i32_0 : i32, i32
  }
  func.func @transform_32(%arg0: i32) -> (i32, i32) {
    %c0_i32 = arith.constant 0 : i32
    %c0_i32_0 = arith.constant 0 : i32
    %c0_i32_1 = arith.constant 0 : i32
    return %c0_i32, %c0_i32_0 : i32, i32
  }
  func.func @transform_33(%arg0: i32) -> (i32, i32) {
    %c0_i32 = arith.constant 0 : i32
    %c0_i32_0 = arith.constant 0 : i32
    %c0_i32_1 = arith.constant 0 : i32
    return %c0_i32, %c0_i32_0 : i32, i32
  }
  func.func @transform_34(%arg0: i32) -> (i32, i32) {
    %c0_i32 = arith.constant 0 : i32
    %c0_i32_0 = arith.constant 0 : i32
    %c0_i32_1 = arith.constant 0 : i32
    return %c0_i32, %c0_i32_0 : i32, i32
  }
  func.func @transform_35(%arg0: i32) -> (i32, i32) {
    %c0_i32 = arith.constant 0 : i32
    %c0_i32_0 = arith.constant 0 : i32
    %c0_i32_1 = arith.constant 0 : i32
    return %c0_i32, %c0_i32_0 : i32, i32
  }
  func.func @transform_36(%arg0: i32) -> (i32, i32) {
    %c0_i32 = arith.constant 0 : i32
    %c0_i32_0 = arith.constant 0 : i32
    %c0_i32_1 = arith.constant 0 : i32
    return %c0_i32, %c0_i32_0 : i32, i32
  }
  func.func @transform_37(%arg0: i32) -> (i32, i32) {
    %c0_i32 = arith.constant 0 : i32
    %c0_i32_0 = arith.constant 0 : i32
    %c0_i32_1 = arith.constant 0 : i32
    return %c0_i32, %c0_i32_0 : i32, i32
  }
  func.func @transform_38(%arg0: i32) -> (i32, i32) {
    %c0_i32 = arith.constant 0 : i32
    %c0_i32_0 = arith.constant 0 : i32
    %c0_i32_1 = arith.constant 0 : i32
    return %c0_i32, %c0_i32_0 : i32, i32
  }
  func.func @transform_39(%arg0: i32) -> (i32, i32) {
    %c0_i32 = arith.constant 0 : i32
    %c0_i32_0 = arith.constant 0 : i32
    %c0_i32_1 = arith.constant 0 : i32
    return %c0_i32, %c0_i32_0 : i32, i32
  }
  func.func @transform_40(%arg0: i32) -> (i32, i32) {
    %c0_i32 = arith.constant 0 : i32
    %c0_i32_0 = arith.constant 0 : i32
    %c0_i32_1 = arith.constant 0 : i32
    return %c0_i32, %c0_i32_0 : i32, i32
  }
  func.func @transform_41(%arg0: i32) -> (i32, i32) {
    %c0_i32 = arith.constant 0 : i32
    %c0_i32_0 = arith.constant 0 : i32
    %c0_i32_1 = arith.constant 0 : i32
    return %c0_i32, %c0_i32_0 : i32, i32
  }
  func.func @transform_42(%arg0: i32) -> (i32, i32) {
    %c0_i32 = arith.constant 0 : i32
    %c0_i32_0 = arith.constant 0 : i32
    %c0_i32_1 = arith.constant 0 : i32
    return %c0_i32, %c0_i32_0 : i32, i32
  }
  func.func @transform_43(%arg0: i32) -> (i32, i32) {
    %c0_i32 = arith.constant 0 : i32
    %c0_i32_0 = arith.constant 0 : i32
    %c0_i32_1 = arith.constant 0 : i32
    return %c0_i32, %c0_i32_0 : i32, i32
  }
  func.func @transform_44(%arg0: i32) -> (i32, i32) {
    %c0_i32 = arith.constant 0 : i32
    %c0_i32_0 = arith.constant 0 : i32
    %c0_i32_1 = arith.constant 0 : i32
    return %c0_i32, %c0_i32_0 : i32, i32
  }
  func.func @transform_45(%arg0: i32) -> (i32, i32) {
    %c0_i32 = arith.constant 0 : i32
    %c0_i32_0 = arith.constant 0 : i32
    %c0_i32_1 = arith.constant 0 : i32
    return %c0_i32, %c0_i32_0 : i32, i32
  }
  func.func @transform_46(%arg0: i32) -> (i32, i32) {
    %c0_i32 = arith.constant 0 : i32
    %c0_i32_0 = arith.constant 0 : i32
    %c0_i32_1 = arith.constant 0 : i32
    return %c0_i32, %c0_i32_0 : i32, i32
  }
  func.func @transform_47(%arg0: i32) -> (i32, i32) {
    %c0_i32 = arith.constant 0 : i32
    %c0_i32_0 = arith.constant 0 : i32
    %c0_i32_1 = arith.constant 0 : i32
    return %c0_i32, %c0_i32_0 : i32, i32
  }
  func.func @transform_48(%arg0: i32) -> (i32, i32) {
    %c0_i32 = arith.constant 0 : i32
    %c0_i32_0 = arith.constant 0 : i32
    %c0_i32_1 = arith.constant 0 : i32
    return %c0_i32, %c0_i32_0 : i32, i32
  }
  func.func @transform_49(%arg0: i32) -> (i32, i32) {
    %c0_i32 = arith.constant 0 : i32
    %c0_i32_0 = arith.constant 0 : i32
    %c0_i32_1 = arith.constant 0 : i32
    return %c0_i32, %c0_i32_0 : i32, i32
  }
  func.func @transform_50(%arg0: i32) -> (i32, i32) {
    %c0_i32 = arith.constant 0 : i32
    %c0_i32_0 = arith.constant 0 : i32
    return %arg0, %c0_i32 : i32, i32
  }
}

</mosaic_0001>

<bundles_post_ra>
// kernel: tpu_custom_call.1
= control target key start
LH: loop header
LB: loop body
LE: loop exit
PB: predicated region body
PF: predicated region fallthrough
CT: control target
= control target key end

     0   :  { %s18639_s6 = smov 1   ;;  %s18640_s10 = smov 2   ;;  %s21857_s0 = inlined_call_operand.smem [shape: u32[51], index: -1, kind: input, shape index: {}] }
   0x1   :  { %s18761_s5 = sld [smem:[%s21857_s0]]   ;;  %s18641_s14 = smov 3  }
   0x2   :  { %s18766_s9 = sld [smem:[%s21857_s0 + %s18639_s6]]   ;;  %s18642_s18 = smov 4  }
   0x3   :  { %s18771_s13 = sld [smem:[%s21857_s0 + %s18640_s10]]   ;;  %s18643_s22 = smov 5  }
   0x4   :  { %s18776_s17 = sld [smem:[%s21857_s0 + %s18641_s14]]   ;;  %s18644_s26 = smov 6  }
   0x5   :  { %s18781_s21 = sld [smem:[%s21857_s0 + %s18642_s18]]   ;;  %s18645_s30 = smov 7  }
   0x6   :  { %s18786_s25 = sld [smem:[%s21857_s0 + %s18643_s22]]   ;;  %s18646_s4 = smov 8  }
   0x7   :  { %21917 = sst [smem:[#allocation107_spill]] %s18761_s5  ;;  %s18647_s10 = smov 9  }
   0x8   :  { %s18791_s29 = sld [smem:[%s21857_s0 + %s18644_s26]]   ;;  %s18648_s15 = smov 10  }
   0x9   :  { %21918 = sst [smem:[#allocation108_spill]] %s18771_s13  ;;  %s18649_s20 = smov 11  }
   0xa   :  { %s18796_s3 = sld [smem:[%s21857_s0 + %s18645_s30]]   ;;  %s18650_s26 = smov 12  }
   0xb   :  { %21919 = sst [smem:[#allocation109_spill]] %s18781_s21  ;;  %s18651_s1 = smov 13  }
   0xc   :  { %s18801_s8 = sld [smem:[%s21857_s0 + %s18646_s4]]   ;;  %s18652_s7 = smov 14  }
   0xd   :  { %s18806_s14 = sld [smem:[%s21857_s0 + %s18647_s10]]   ;;  %s18654_s22 = smov 16  }
   0xe   :  { %21920 = sst [smem:[#allocation110_spill]] %s18791_s29  ;;  %s18655_s28 = smov 17  }
   0xf   :  { %s18811_s19 = sld [smem:[%s21857_s0 + %s18648_s15]]   ;;  %s18653_s15 = smov 15  }
  0x10   :  { %s18816_s24 = sld [smem:[%s21857_s0 + %s18649_s20]]  }
  0x11   :  { %s18821_s30 = sld [smem:[%s21857_s0 + %s18650_s26]]  }
  0x12   :  { %21921 = sst [smem:[#allocation111_spill]] %s18801_s8 }
  0x13   :  { %s18826_s6 = sld [smem:[%s21857_s0 + %s18651_s1]]  }
  0x14   :  { %s18831_s12 = sld [smem:[%s21857_s0 + %s18652_s7]]   ;;  %s18656_s7 = smov 18  }
  0x15   :  { %21922 = sst [smem:[#allocation112_spill]] %s18811_s19 }
  0x16   :  { %s18836_s20 = sld [smem:[%s21857_s0 + %s18653_s15]]   ;;  %s18657_s15 = smov 19  }
  0x17   :  { %21923 = sst [smem:[#allocation113_spill]] %s18821_s30 }
  0x18   :  { %s18841_s27 = sld [smem:[%s21857_s0 + %s18654_s22]]   ;;  %s18658_s22 = smov 20  }
  0x19   :  { %s18846_s4 = sld [smem:[%s21857_s0 + %s18655_s28]]   ;;  %s18659_s28 = smov 21  }
  0x1a   :  { %21924 = sst [smem:[#allocation114_spill]] %s18831_s12 }
  0x1b   :  { %s18851_s12 = sld [smem:[%s21857_s0 + %s18656_s7]]   ;;  %s18660_s7 = smov 22  }
  0x1c   :  { %s18856_s30 = sld [smem:[%s21857_s0 + %s18657_s15]]   ;;  %s18661_s15 = smov 23  }
  0x1d   :  { %s18866_s19 = sld [smem:[%s21857_s0 + %s18659_s28]]   ;;  %s18663_s28 = smov 25  }
  0x1e   :  { %21925 = sst [smem:[#allocation115_spill]] %s18841_s27 }
  0x1f   :  { %s18861_s27 = sld [smem:[%s21857_s0 + %s18658_s22]]   ;;  %s18662_s22 = smov 24  }
  0x20   :  { %s18876_s8 = sld [smem:[%s21857_s0 + %s18661_s15]]   ;;  %s18665_s15 = smov 27  }
  0x21   :  { %21926 = sst [smem:[#allocation116_spill]] %s18851_s12 }
  0x22   :  { %s18871_s12 = sld [smem:[%s21857_s0 + %s18660_s7]]   ;;  %s18664_s7 = smov 26  }
  0x23   :  { %s18886_s29 = sld [smem:[%s21857_s0 + %s18663_s28]]   ;;  %s18667_s28 = smov 29  }
  0x24   :  { %s18896_s21 = sld [smem:[%s21857_s0 + %s18665_s15]]   ;;  %s18669_s15 = smov 31  }
  0x25   :  { %21927 = sst [smem:[#allocation117_spill]] %s18861_s27 }
  0x26   :  { %s18881_s27 = sld [smem:[%s21857_s0 + %s18662_s22]]   ;;  %s18666_s22 = smov 28  }
  0x27   :  { %s18906_s13 = sld [smem:[%s21857_s0 + %s18667_s28]]   ;;  %s18671_s28 = smov 33  }
  0x28   :  { %21928 = sst [smem:[#allocation118_spill]] %s18871_s12 }
  0x29   :  { %s18891_s12 = sld [smem:[%s21857_s0 + %s18664_s7]]   ;;  %s18668_s7 = smov 30  }
  0x2a   :  { %s18916_s5 = sld [smem:[%s21857_s0 + %s18669_s15]]   ;;  %s18673_s15 = smov 35  }
  0x2c   :  { %21929 = sst [smem:[#allocation119_spill]] %s18881_s27 }
  0x2d   :  { %s18901_s27 = sld [smem:[%s21857_s0 + %s18666_s22]]   ;;  %s18670_s22 = smov 32  }
  0x2e   :  { %21932 = sst [smem:[#allocation122_spill]] %s18906_s13 }
  0x2f   :  { %21930 = sst [smem:[#allocation120_spill]] %s18891_s12 }
  0x30   :  { %s18911_s12 = sld [smem:[%s21857_s0 + %s18668_s7]]   ;;  %s18672_s7 = smov 34  }
  0x31   :  { %21934 = sst [smem:[#allocation124_spill]] %s18916_s5 }
  0x32   :  { %s18926_s13 = sld [smem:[%s21857_s0 + %s18671_s28]]   ;;  %s18675_s28 = smov 37  }
  0x33   :  { %21931 = sst [smem:[#allocation121_spill]] %s18901_s27 }
  0x34   :  { %s18921_s27 = sld [smem:[%s21857_s0 + %s18670_s22]]   ;;  %s18674_s22 = smov 36  }
  0x35   :  { %s18936_s5 = sld [smem:[%s21857_s0 + %s18673_s15]]   ;;  %s18677_s15 = smov 39  }
  0x36   :  { %21933 = sst [smem:[#allocation123_spill]] %s18911_s12 }
  0x37   :  { %s18931_s12 = sld [smem:[%s21857_s0 + %s18672_s7]]   ;;  %s18676_s7 = smov 38  }
  0x38   :  { %21936 = sst [smem:[#allocation126_spill]] %s18926_s13 }
  0x39   :  { %s18946_s13 = sld [smem:[%s21857_s0 + %s18675_s28]]   ;;  %s18679_s28 = smov 41  }
  0x3a   :  { %21935 = sst [smem:[#allocation125_spill]] %s18921_s27 }
  0x3b   :  { %21938 = sst [smem:[#allocation128_spill]] %s18936_s5 }
  0x3c   :  { %s18941_s27 = sld [smem:[%s21857_s0 + %s18674_s22]]   ;;  %s18678_s22 = smov 40  }
  0x3d   :  { %21937 = sst [smem:[#allocation127_spill]] %s18931_s12 }
  0x3e   :  { %s18951_s12 = sld [smem:[%s21857_s0 + %s18676_s7]]   ;;  %s18680_s7 = smov 42  }
  0x3f   :  { %21940 = sst [smem:[#allocation130_spill]] %s18946_s13 }
  0x40   :  { %s18956_s5 = sld [smem:[%s21857_s0 + %s18677_s15]]   ;;  %s18681_s15 = smov 43  }
  0x41   :  { %s18966_s13 = sld [smem:[%s21857_s0 + %s18679_s28]]   ;;  %s18683_s28 = smov 45  }
  0x42   :  { %21939 = sst [smem:[#allocation129_spill]] %s18941_s27 }
  0x43   :  { %s18961_s27 = sld [smem:[%s21857_s0 + %s18678_s22]]   ;;  %s18682_s22 = smov 44  }
  0x44   :  { %21941 = sst [smem:[#allocation131_spill]] %s18951_s12 }
  0x45   :  { %s18971_s12 = sld [smem:[%s21857_s0 + %s18680_s7]]   ;;  %s18684_s7 = smov 46  }
  0x46   :  { %21942 = sst [smem:[#allocation132_spill]] %s18956_s5 }
  0x47   :  { %21944 = sst [smem:[#allocation134_spill]] %s18966_s13 }
  0x48   :  { %s18976_s5 = sld [smem:[%s21857_s0 + %s18681_s15]]   ;;  %s18685_s15 = smov 47  }
  0x49   :  { %21943 = sst [smem:[#allocation133_spill]] %s18961_s27 }
  0x4a   :  { %s18981_s27 = sld [smem:[%s21857_s0 + %s18682_s22]]   ;;  %s18686_s22 = smov 48  }
  0x4b   :  { %21945 = sst [smem:[#allocation135_spill]] %s18971_s12 }
  0x4c   :  { %s18986_s13 = sld [smem:[%s21857_s0 + %s18683_s28]]   ;;  %s18687_s28 = smov 49  }
  0x4d   :  { %s18991_s12 = sld [smem:[%s21857_s0 + %s18684_s7]]   ;;  %s18688_s7 = smov 50  }
  0x4e   :  { %21946 = sst [smem:[#allocation136_spill]] %s18976_s5 }
  0x4f   :  { %s18996_s5 = sld [smem:[%s21857_s0 + %s18685_s15]]  }
  0x50   :  { %21947 = sst [smem:[#allocation137_spill]] %s18981_s27 }
  0x51   :  { %s19001_s27 = sld [smem:[%s21857_s0 + %s18686_s22]]  }
  0x52   :  { %21948 = sst [smem:[#allocation138_spill]] %s18986_s13 }
  0x53   :  { %21949 = sst [smem:[#allocation139_spill]] %s18991_s12 }
  0x54   :  { %s19006_s13 = sld [smem:[%s21857_s0 + %s18687_s28]]  }
  0x55   :  { %s19011_s12 = sld [smem:[%s21857_s0 + %s18688_s7]]  }
  0x56   :  { %106 = vsyncpa [#allocation3], 0 }
  0x57   :  { %107 = vsyncpa [#allocation6], 0 }
  0x58   :  { %108 = vsyncpa [#allocation9], 0 }
  0x59   :  { %109 = vsyncpa [#allocation12], 0 }
  0x5a   :  { %110 = vsyncpa [#allocation15], 0 }
  0x5b   :  { %111 = vsyncpa [#allocation18], 0 }
  0x5c   :  { %112 = vsyncpa [#allocation21], 0 }
  0x5d   :  { %113 = vsyncpa [#allocation24], 0 }
  0x5e   :  { %114 = vsyncpa [#allocation27], 0 }
  0x5f   :  { %115 = vsyncpa [#allocation30], 0 }
  0x60   :  { %116 = vsyncpa [#allocation33], 0 }
  0x61   :  { %117 = vsyncpa [#allocation36], 0 }
  0x62   :  { %118 = vsyncpa [#allocation39], 0 }
  0x63   :  { %119 = vsyncpa [#allocation42], 0 }
  0x64   :  { %120 = vsyncpa [#allocation45], 0 }
  0x65   :  { %121 = vsyncpa [#allocation48], 0 }
  0x66   :  { %122 = vsyncpa [#allocation51], 0 }
  0x67   :  { %123 = vsyncpa [#allocation54], 0 }
  0x68   :  { %124 = vsyncpa [#allocation57], 0 }
  0x69   :  { %125 = vsyncpa [#allocation60], 0 }
  0x6a   :  { %126 = vsyncpa [#allocation63], 0 }
  0x6b   :  { %127 = vsyncpa [#allocation66], 0 }
  0x6c   :  { %128 = vsyncpa [#allocation69], 0 }
  0x6d   :  { %129 = vsyncpa [#allocation72], 0 }
  0x6e   :  { %130 = vsyncpa [#allocation75], 0 }
  0x6f   :  { %131 = vsyncpa [#allocation78], 0 }
  0x70   :  { %132 = vsyncpa [#allocation4], 0  ;;  %s18689_s0 = smov [#allocation5]   ;;  %s18690_s16 = smov [#allocation8]  }
  0x71   :  { %s150_s15 = sshll.u32 %s18689_s0, 4  ;;  %s173_s18 = sshll.u32 %s18690_s16, 4  ;;  %s151_s15 = int_to_ptr.vmem [resolvable:$true] %s150_s15  ;;  %s174_s18 = int_to_ptr.vmem [resolvable:$true] %s173_s18 }
  0x72   :  { %s17463_s22 = scalar_lea.hbm %s18766_s9, 1024 }
  0x73   :  { %p17464_p0 = scmp.ne.s32.totalorder %s18766_s9, %s17463_s22  ;;  %p17467_p1 = scmp.lt.u32.totalorder %s17463_s22, %s18766_s9 }
  0x75   :  { %p17469_p2 = pnand %p17467_p1, %p17464_p0 }
  0x77   :  { %17472 = shalt.err (!%p17469_p2)
}
  0x78   :  { %s17473_s23 = scalar_lea.vmem %s151_s15, 1024  ;;  %p17478_p4 = scmp.lt.s32.totalorder %s151_s15, %s151_s15 }
  0x79   :  { %p17474_p3 = scmp.ne.s32.totalorder %s151_s15, %s17473_s23  ;;  %p17479_p5 = scmp.lt.s32.totalorder %s17473_s23, %s17473_s23 }
  0x7b   :  { %p17480_p6 = por %p17479_p5, %p17478_p4 }
  0x7d   :  { %p17481_p7 = pnand %p17480_p6, %p17474_p3 }
  0x7f   :  { %17484 = shalt.err (!%p17481_p7)
}
  0x80   :  { %s18691_s26 = smov 128   ;;  %s18692_s28 = smov 8  }
  0x81   :  { %156 = dma.hbm_to_vmem [thread:$0]  %s18766_s9, 1024, %s151_s15, [#allocation6], %s18691_s26, %s18691_s26, %s18692_s28  }
  0x82   :  { %s17485_s1 = scalar_lea.hbm %s18776_s17, 128 }
  0x83   :  { %p17486_p8 = scmp.ne.s32.totalorder %s18776_s17, %s17485_s1  ;;  %p17489_p9 = scmp.lt.u32.totalorder %s17485_s1, %s18776_s17 }
  0x85   :  { %p17491_p10 = pnand %p17489_p9, %p17486_p8 }
  0x87   :  { %17494 = shalt.err (!%p17491_p10)
}
  0x88   :  { %s17495_s2 = scalar_lea.vmem %s174_s18, 128  ;;  %p17500_p12 = scmp.lt.s32.totalorder %s174_s18, %s174_s18 }
  0x89   :  { %p17496_p11 = scmp.ne.s32.totalorder %s174_s18, %s17495_s2  ;;  %p17501_p13 = scmp.lt.s32.totalorder %s17495_s2, %s17495_s2 }
  0x8b   :  { %p17502_p0 = por %p17501_p13, %p17500_p12 }
  0x8d   :  { %p17503_p1 = pnand %p17502_p0, %p17496_p11 }
  0x8f   :  { %17506 = shalt.err (!%p17503_p1)
}
  0x90   :  { %176 = dma.hbm_to_vmem [thread:$0]  %s18776_s17, 128, %s174_s18, [#allocation9]  }
  0x91   :  { %s18693_s7 = smov [#allocation11]   ;;  %s18694_s9 = smov [#allocation14]  }
  0x92   :  { %s195_s10 = sshll.u32 %s18693_s7, 4  ;;  %s217_s11 = sshll.u32 %s18694_s9, 4  ;;  %s196_s10 = int_to_ptr.vmem [resolvable:$true] %s195_s10  ;;  %s218_s11 = int_to_ptr.vmem [resolvable:$true] %s217_s11 }
  0x93   :  { %s17507_s0 = scalar_lea.hbm %s18786_s25, 16 }
  0x94   :  { %p17508_p2 = scmp.ne.s32.totalorder %s18786_s25, %s17507_s0  ;;  %p17511_p3 = scmp.lt.u32.totalorder %s17507_s0, %s18786_s25 }
  0x96   :  { %p17513_p4 = pnand %p17511_p3, %p17508_p2 }
  0x98   :  { %17516 = shalt.err (!%p17513_p4)
}
  0x99   :  { %s17517_s15 = scalar_lea.vmem %s196_s10, 16  ;;  %s17521_s16 = scalar_lea.vmem %s196_s10, 32 }
  0x9a   :  { %p17518_p5 = scmp.ne.s32.totalorder %s196_s10, %s17517_s15  ;;  %p17522_p6 = scmp.lt.s32.totalorder %s196_s10, %s196_s10 }
  0x9b   :  { %p17523_p7 = scmp.lt.s32.totalorder %s17521_s16, %s17517_s15 }
  0x9d   :  { %p17524_p8 = por %p17523_p7, %p17522_p6 }
  0x9f   :  { %p17525_p9 = pnand %p17524_p8, %p17518_p5 }
  0xa1   :  { %17528 = shalt.err (!%p17525_p9)
}
  0xa2   :  { %198 = dma.hbm_to_vmem [thread:$0]  %s18786_s25, 16, %s196_s10, [#allocation12]  }
  0xa3   :  { %s17529_s17 = scalar_lea.hbm %s18796_s3, 16 }
  0xa4   :  { %p17530_p10 = scmp.ne.s32.totalorder %s18796_s3, %s17529_s17  ;;  %p17533_p11 = scmp.lt.u32.totalorder %s17529_s17, %s18796_s3 }
  0xa6   :  { %p17535_p12 = pnand %p17533_p11, %p17530_p10 }
  0xa8   :  { %17538 = shalt.err (!%p17535_p12)
}
  0xa9   :  { %s17539_s18 = scalar_lea.vmem %s218_s11, 16  ;;  %s17543_s22 = scalar_lea.vmem %s218_s11, 32 }
  0xaa   :  { %p17540_p13 = scmp.ne.s32.totalorder %s218_s11, %s17539_s18  ;;  %p17544_p0 = scmp.lt.s32.totalorder %s218_s11, %s218_s11 }
  0xab   :  { %p17545_p1 = scmp.lt.s32.totalorder %s17543_s22, %s17539_s18 }
  0xad   :  { %p17546_p2 = por %p17545_p1, %p17544_p0 }
  0xaf   :  { %p17547_p3 = pnand %p17546_p2, %p17540_p13 }
  0xb1   :  { %17550 = shalt.err (!%p17547_p3)
}
  0xb2   :  { %220 = dma.hbm_to_vmem [thread:$0]  %s18796_s3, 16, %s218_s11, [#allocation15]  }
  0xb3   :  { %s18695_s23 = smov [#allocation17]   ;;  %s18696_s1 = smov [#allocation20]  }
  0xb4   :  { %s239_s25 = sshll.u32 %s18695_s23, 4  ;;  %s261_s2 = sshll.u32 %s18696_s1, 4  ;;  %s240_s25 = int_to_ptr.vmem [resolvable:$true] %s239_s25  ;;  %s262_s2 = int_to_ptr.vmem [resolvable:$true] %s261_s2 }
  0xb5   :  { %s17551_s7 = scalar_lea.hbm %s18806_s14, 16 }
  0xb6   :  { %p17552_p4 = scmp.ne.s32.totalorder %s18806_s14, %s17551_s7  ;;  %p17555_p5 = scmp.lt.u32.totalorder %s17551_s7, %s18806_s14 }
  0xb8   :  { %p17557_p6 = pnand %p17555_p5, %p17552_p4 }
  0xba   :  { %17560 = shalt.err (!%p17557_p6)
}
  0xbb   :  { %s17561_s10 = scalar_lea.vmem %s240_s25, 16  ;;  %s17565_s9 = scalar_lea.vmem %s240_s25, 32 }
  0xbc   :  { %p17562_p7 = scmp.ne.s32.totalorder %s240_s25, %s17561_s10  ;;  %p17566_p8 = scmp.lt.s32.totalorder %s240_s25, %s240_s25 }
  0xbd   :  { %p17567_p9 = scmp.lt.s32.totalorder %s17565_s9, %s17561_s10 }
  0xbf   :  { %p17568_p10 = por %p17567_p9, %p17566_p8 }
  0xc1   :  { %p17569_p11 = pnand %p17568_p10, %p17562_p7 }
  0xc3   :  { %17572 = shalt.err (!%p17569_p11)
}
  0xc4   :  { %242 = dma.hbm_to_vmem [thread:$0]  %s18806_s14, 16, %s240_s25, [#allocation18]  }
  0xc5   :  { %s17573_s3 = scalar_lea.hbm %s18816_s24, 16 }
  0xc6   :  { %p17574_p12 = scmp.ne.s32.totalorder %s18816_s24, %s17573_s3  ;;  %p17577_p13 = scmp.lt.u32.totalorder %s17573_s3, %s18816_s24 }
  0xc8   :  { %p17579_p0 = pnand %p17577_p13, %p17574_p12 }
  0xca   :  { %17582 = shalt.err (!%p17579_p0)
}
  0xcb   :  { %s17583_s11 = scalar_lea.vmem %s262_s2, 16  ;;  %s17587_s0 = scalar_lea.vmem %s262_s2, 32 }
  0xcc   :  { %p17584_p1 = scmp.ne.s32.totalorder %s262_s2, %s17583_s11  ;;  %p17588_p2 = scmp.lt.s32.totalorder %s262_s2, %s262_s2 }
  0xcd   :  { %p17589_p3 = scmp.lt.s32.totalorder %s17587_s0, %s17583_s11 }
  0xcf   :  { %p17590_p4 = por %p17589_p3, %p17588_p2 }
  0xd1   :  { %p17591_p5 = pnand %p17590_p4, %p17584_p1 }
  0xd3   :  { %17594 = shalt.err (!%p17591_p5)
}
  0xd4   :  { %264 = dma.hbm_to_vmem [thread:$0]  %s18816_s24, 16, %s262_s2, [#allocation21]  }
  0xd5   :  { %s18697_s15 = smov [#allocation23]   ;;  %s18698_s16 = smov [#allocation26]  }
  0xd6   :  { %s283_s14 = sshll.u32 %s18697_s15, 4  ;;  %s303_s17 = sshll.u32 %s18698_s16, 4  ;;  %s284_s14 = int_to_ptr.vmem [resolvable:$true] %s283_s14  ;;  %s304_s17 = int_to_ptr.vmem [resolvable:$true] %s303_s17 }
  0xd7   :  { %s17595_s18 = scalar_lea.hbm %s18826_s6, 16 }
  0xd8   :  { %p17596_p6 = scmp.ne.s32.totalorder %s18826_s6, %s17595_s18  ;;  %p17599_p7 = scmp.lt.u32.totalorder %s17595_s18, %s18826_s6 }
  0xda   :  { %p17601_p8 = pnand %p17599_p7, %p17596_p6 }
  0xdc   :  { %17604 = shalt.err (!%p17601_p8)
}
  0xdd   :  { %s17605_s22 = scalar_lea.vmem %s284_s14, 16  ;;  %s17609_s23 = scalar_lea.vmem %s284_s14, 32 }
  0xde   :  { %p17606_p9 = scmp.ne.s32.totalorder %s284_s14, %s17605_s22  ;;  %p17610_p10 = scmp.lt.s32.totalorder %s284_s14, %s284_s14 }
  0xdf   :  { %p17611_p11 = scmp.lt.s32.totalorder %s17609_s23, %s17605_s22 }
  0xe1   :  { %p17612_p12 = por %p17611_p11, %p17610_p10 }
  0xe3   :  { %p17613_p13 = pnand %p17612_p12, %p17606_p9 }
  0xe5   :  { %17616 = shalt.err (!%p17613_p13)
}
  0xe6   :  { %286 = dma.hbm_to_vmem [thread:$0]  %s18826_s6, 16, %s284_s14, [#allocation24]  }
  0xe7   :  { %s17617_s24 = scalar_lea.hbm %s18836_s20, 16 }
  0xe8   :  { %p17618_p0 = scmp.ne.s32.totalorder %s18836_s20, %s17617_s24  ;;  %p17621_p1 = scmp.lt.u32.totalorder %s17617_s24, %s18836_s20 }
  0xea   :  { %p17623_p2 = pnand %p17621_p1, %p17618_p0 }
  0xec   :  { %17626 = shalt.err (!%p17623_p2)
}
  0xed   :  { %s17627_s25 = scalar_lea.vmem %s304_s17, 16  ;;  %s17631_s1 = scalar_lea.vmem %s304_s17, 32 }
  0xee   :  { %p17628_p3 = scmp.ne.s32.totalorder %s304_s17, %s17627_s25  ;;  %p17632_p4 = scmp.lt.s32.totalorder %s304_s17, %s304_s17 }
  0xef   :  { %p17633_p5 = scmp.lt.s32.totalorder %s17631_s1, %s17627_s25 }
  0xf1   :  { %p17634_p6 = por %p17633_p5, %p17632_p4 }
  0xf3   :  { %p17635_p7 = pnand %p17634_p6, %p17628_p3 }
  0xf5   :  { %17638 = shalt.err (!%p17635_p7)
}
  0xf6   :  { %306 = dma.hbm_to_vmem [thread:$0]  %s18836_s20, 16, %s304_s17, [#allocation27]  }
  0xf7   :  { %s18699_s2 = smov [#allocation29]   ;;  %s18700_s7 = smov [#allocation32]  }
  0xf8   :  { %s325_s6 = sshll.u32 %s18699_s2, 4  ;;  %s347_s10 = sshll.u32 %s18700_s7, 4  ;;  %s326_s6 = int_to_ptr.vmem [resolvable:$true] %s325_s6  ;;  %s348_s10 = int_to_ptr.vmem [resolvable:$true] %s347_s10 }
  0xf9   :  { %s17639_s9 = scalar_lea.hbm %s18846_s4, 16 }
  0xfa   :  { %p17640_p8 = scmp.ne.s32.totalorder %s18846_s4, %s17639_s9  ;;  %p17643_p9 = scmp.lt.u32.totalorder %s17639_s9, %s18846_s4 }
  0xfc   :  { %p17645_p10 = pnand %p17643_p9, %p17640_p8 }
  0xfe   :  { %17648 = shalt.err (!%p17645_p10)
}
  0xff   :  { %s17649_s3 = scalar_lea.vmem %s326_s6, 16  ;;  %s17653_s11 = scalar_lea.vmem %s326_s6, 32 }
 0x100   :  { %p17650_p11 = scmp.ne.s32.totalorder %s326_s6, %s17649_s3  ;;  %p17654_p12 = scmp.lt.s32.totalorder %s326_s6, %s326_s6 }
 0x101   :  { %p17655_p13 = scmp.lt.s32.totalorder %s17653_s11, %s17649_s3 }
 0x103   :  { %p17656_p0 = por %p17655_p13, %p17654_p12 }
 0x105   :  { %p17657_p1 = pnand %p17656_p0, %p17650_p11 }
 0x107   :  { %17660 = shalt.err (!%p17657_p1)
}
 0x108   :  { %328 = dma.hbm_to_vmem [thread:$0]  %s18846_s4, 16, %s326_s6, [#allocation30]  }
 0x109   :  { %s17661_s20 = scalar_lea.hbm %s18856_s30, 16 }
 0x10a   :  { %p17662_p2 = scmp.ne.s32.totalorder %s18856_s30, %s17661_s20  ;;  %p17665_p3 = scmp.lt.u32.totalorder %s17661_s20, %s18856_s30 }
 0x10c   :  { %p17667_p4 = pnand %p17665_p3, %p17662_p2 }
 0x10e   :  { %17670 = shalt.err (!%p17667_p4)
}
 0x10f   :  { %s17671_s0 = scalar_lea.vmem %s348_s10, 16  ;;  %s17675_s15 = scalar_lea.vmem %s348_s10, 32 }
 0x110   :  { %p17672_p5 = scmp.ne.s32.totalorder %s348_s10, %s17671_s0  ;;  %p17676_p6 = scmp.lt.s32.totalorder %s348_s10, %s348_s10 }
 0x111   :  { %p17677_p7 = scmp.lt.s32.totalorder %s17675_s15, %s17671_s0 }
 0x113   :  { %p17678_p8 = por %p17677_p7, %p17676_p6 }
 0x115   :  { %p17679_p9 = pnand %p17678_p8, %p17672_p5 }
 0x117   :  { %17682 = shalt.err (!%p17679_p9)
}
 0x118   :  { %350 = dma.hbm_to_vmem [thread:$0]  %s18856_s30, 16, %s348_s10, [#allocation33]  }
 0x119   :  { %s18701_s14 = smov [#allocation35]   ;;  %s18702_s16 = smov [#allocation38]  }
 0x11a   :  { %s367_s4 = sshll.u32 %s18701_s14, 4  ;;  %s389_s17 = sshll.u32 %s18702_s16, 4  ;;  %s368_s4 = int_to_ptr.vmem [resolvable:$true] %s367_s4  ;;  %s390_s17 = int_to_ptr.vmem [resolvable:$true] %s389_s17 }
 0x11b   :  { %s17683_s18 = scalar_lea.hbm %s18866_s19, 16 }
 0x11c   :  { %p17684_p10 = scmp.ne.s32.totalorder %s18866_s19, %s17683_s18  ;;  %p17687_p11 = scmp.lt.u32.totalorder %s17683_s18, %s18866_s19 }
 0x11e   :  { %p17689_p12 = pnand %p17687_p11, %p17684_p10 }
 0x120   :  { %17692 = shalt.err (!%p17689_p12)
}
 0x121   :  { %s17693_s22 = scalar_lea.vmem %s368_s4, 16  ;;  %s17697_s23 = scalar_lea.vmem %s368_s4, 32 }
 0x122   :  { %p17694_p13 = scmp.ne.s32.totalorder %s368_s4, %s17693_s22  ;;  %p17698_p0 = scmp.lt.s32.totalorder %s368_s4, %s368_s4 }
 0x123   :  { %p17699_p1 = scmp.lt.s32.totalorder %s17697_s23, %s17693_s22 }
 0x125   :  { %p17700_p2 = por %p17699_p1, %p17698_p0 }
 0x127   :  { %p17701_p3 = pnand %p17700_p2, %p17694_p13 }
 0x129   :  { %17704 = shalt.err (!%p17701_p3)
}
 0x12a   :  { %370 = dma.hbm_to_vmem [thread:$0]  %s18866_s19, 16, %s368_s4, [#allocation36]  }
 0x12b   :  { %s17705_s30 = scalar_lea.hbm %s18876_s8, 16 }
 0x12c   :  { %p17706_p4 = scmp.ne.s32.totalorder %s18876_s8, %s17705_s30  ;;  %p17709_p5 = scmp.lt.u32.totalorder %s17705_s30, %s18876_s8 }
 0x12e   :  { %p17711_p6 = pnand %p17709_p5, %p17706_p4 }
 0x130   :  { %17714 = shalt.err (!%p17711_p6)
}
 0x131   :  { %s17715_s24 = scalar_lea.vmem %s390_s17, 16  ;;  %s17719_s25 = scalar_lea.vmem %s390_s17, 32 }
 0x132   :  { %p17716_p7 = scmp.ne.s32.totalorder %s390_s17, %s17715_s24  ;;  %p17720_p8 = scmp.lt.s32.totalorder %s390_s17, %s390_s17 }
 0x133   :  { %p17721_p9 = scmp.lt.s32.totalorder %s17719_s25, %s17715_s24 }
 0x135   :  { %p17722_p10 = por %p17721_p9, %p17720_p8 }
 0x137   :  { %p17723_p11 = pnand %p17722_p10, %p17716_p7 }
 0x139   :  { %17726 = shalt.err (!%p17723_p11)
}
 0x13a   :  { %392 = dma.hbm_to_vmem [thread:$0]  %s18876_s8, 16, %s390_s17, [#allocation39]  }
 0x13b   :  { %s18703_s1 = smov [#allocation41]   ;;  %s18704_s2 = smov [#allocation44]  }
 0x13c   :  { %s411_s19 = sshll.u32 %s18703_s1, 4  ;;  %s433_s6 = sshll.u32 %s18704_s2, 4  ;;  %s412_s19 = int_to_ptr.vmem [resolvable:$true] %s411_s19  ;;  %s434_s6 = int_to_ptr.vmem [resolvable:$true] %s433_s6 }
 0x13d   :  { %s17727_s7 = scalar_lea.hbm %s18886_s29, 16 }
 0x13e   :  { %p17728_p12 = scmp.ne.s32.totalorder %s18886_s29, %s17727_s7  ;;  %p17731_p13 = scmp.lt.u32.totalorder %s17727_s7, %s18886_s29 }
 0x140   :  { %p17733_p0 = pnand %p17731_p13, %p17728_p12 }
 0x142   :  { %17736 = shalt.err (!%p17733_p0)
}
 0x143   :  { %s17737_s10 = scalar_lea.vmem %s412_s19, 16  ;;  %s17741_s9 = scalar_lea.vmem %s412_s19, 32 }
 0x144   :  { %p17738_p1 = scmp.ne.s32.totalorder %s412_s19, %s17737_s10  ;;  %p17742_p2 = scmp.lt.s32.totalorder %s412_s19, %s412_s19 }
 0x145   :  { %p17743_p3 = scmp.lt.s32.totalorder %s17741_s9, %s17737_s10 }
 0x147   :  { %p17744_p4 = por %p17743_p3, %p17742_p2 }
 0x149   :  { %p17745_p5 = pnand %p17744_p4, %p17738_p1 }
 0x14b   :  { %17748 = shalt.err (!%p17745_p5)
}
 0x14c   :  { %414 = dma.hbm_to_vmem [thread:$0]  %s18886_s29, 16, %s412_s19, [#allocation42]  }
 0x14d   :  { %s17749_s8 = scalar_lea.hbm %s18896_s21, 16 }
 0x14e   :  { %p17750_p6 = scmp.ne.s32.totalorder %s18896_s21, %s17749_s8  ;;  %p17753_p7 = scmp.lt.u32.totalorder %s17749_s8, %s18896_s21 }
 0x150   :  { %p17755_p8 = pnand %p17753_p7, %p17750_p6 }
 0x152   :  { %17758 = shalt.err (!%p17755_p8)
}
 0x153   :  { %s17759_s3 = scalar_lea.vmem %s434_s6, 16  ;;  %s17763_s11 = scalar_lea.vmem %s434_s6, 32 }
 0x154   :  { %p17760_p9 = scmp.ne.s32.totalorder %s434_s6, %s17759_s3  ;;  %p17764_p10 = scmp.lt.s32.totalorder %s434_s6, %s434_s6 }
 0x155   :  { %p17765_p11 = scmp.lt.s32.totalorder %s17763_s11, %s17759_s3 }
 0x157   :  { %p17766_p12 = por %p17765_p11, %p17764_p10 }
 0x159   :  { %p17767_p13 = pnand %p17766_p12, %p17760_p9 }
 0x15b   :  { %17770 = shalt.err (!%p17767_p13)
}
 0x15c   :  { %s21950_s20 = sld [smem:[#allocation122_spill]]  ;;  %s18705_s0 = smov [#allocation47]  }
 0x15d   :  { %436 = dma.hbm_to_vmem [thread:$0]  %s18896_s21, 16, %s434_s6, [#allocation45]  }
 0x15e   :  { %s455_s29 = sshll.u32 %s18705_s0, 4  ;;  %s18706_s15 = smov [#allocation50]   ;;  %s456_s29 = int_to_ptr.vmem [resolvable:$true] %s455_s29 }
 0x15f   :  { %s477_s14 = sshll.u32 %s18706_s15, 4  ;;  %s478_s14 = int_to_ptr.vmem [resolvable:$true] %s477_s14 }
 0x162   :  { %s17771_s4 = scalar_lea.hbm %s21950_s20, 16 }
 0x163   :  { %p17772_p0 = scmp.ne.s32.totalorder %s21950_s20, %s17771_s4  ;;  %p17775_p1 = scmp.lt.u32.totalorder %s17771_s4, %s21950_s20 }
 0x165   :  { %p17777_p2 = pnand %p17775_p1, %p17772_p0 }
 0x167   :  { %17780 = shalt.err (!%p17777_p2)
}
 0x168   :  { %s17781_s16 = scalar_lea.vmem %s456_s29, 16  ;;  %s17785_s17 = scalar_lea.vmem %s456_s29, 32 }
 0x169   :  { %p17782_p3 = scmp.ne.s32.totalorder %s456_s29, %s17781_s16  ;;  %p17786_p4 = scmp.lt.s32.totalorder %s456_s29, %s456_s29 }
 0x16a   :  { %p17787_p5 = scmp.lt.s32.totalorder %s17785_s17, %s17781_s16 }
 0x16c   :  { %p17788_p6 = por %p17787_p5, %p17786_p4 }
 0x16e   :  { %p17789_p7 = pnand %p17788_p6, %p17782_p3 }
 0x170   :  { %17792 = shalt.err (!%p17789_p7)
}
 0x171   :  { %s21951_s21 = sld [smem:[#allocation124_spill]] }
 0x172   :  { %458 = dma.hbm_to_vmem [thread:$0]  %s21950_s20, 16, %s456_s29, [#allocation48]  }
 0x177   :  { %s17793_s18 = scalar_lea.hbm %s21951_s21, 16 }
 0x178   :  { %p17794_p8 = scmp.ne.s32.totalorder %s21951_s21, %s17793_s18  ;;  %p17797_p9 = scmp.lt.u32.totalorder %s17793_s18, %s21951_s21 }
 0x17a   :  { %p17799_p10 = pnand %p17797_p9, %p17794_p8 }
 0x17c   :  { %17802 = shalt.err (!%p17799_p10)
}
 0x17d   :  { %s17803_s22 = scalar_lea.vmem %s478_s14, 16  ;;  %s17807_s23 = scalar_lea.vmem %s478_s14, 32 }
 0x17e   :  { %p17804_p11 = scmp.ne.s32.totalorder %s478_s14, %s17803_s22  ;;  %p17808_p12 = scmp.lt.s32.totalorder %s478_s14, %s478_s14 }
 0x17f   :  { %p17809_p13 = scmp.lt.s32.totalorder %s17807_s23, %s17803_s22 }
 0x181   :  { %p17810_p0 = por %p17809_p13, %p17808_p12 }
 0x183   :  { %p17811_p1 = pnand %p17810_p0, %p17804_p11 }
 0x185   :  { %17814 = shalt.err (!%p17811_p1)
}
 0x186   :  { %s21952_s30 = sld [smem:[#allocation126_spill]]  ;;  %s18707_s24 = smov [#allocation53]  }
 0x187   :  { %480 = dma.hbm_to_vmem [thread:$0]  %s21951_s21, 16, %s478_s14, [#allocation51]  }
 0x188   :  { %s497_s25 = sshll.u32 %s18707_s24, 4  ;;  %s18708_s1 = smov [#allocation56]   ;;  %s498_s25 = int_to_ptr.vmem [resolvable:$true] %s497_s25 }
 0x189   :  { %s519_s19 = sshll.u32 %s18708_s1, 4  ;;  %s520_s19 = int_to_ptr.vmem [resolvable:$true] %s519_s19 }
 0x18c   :  { %s17815_s2 = scalar_lea.hbm %s21952_s30, 16 }
 0x18d   :  { %p17816_p2 = scmp.ne.s32.totalorder %s21952_s30, %s17815_s2  ;;  %p17819_p3 = scmp.lt.u32.totalorder %s17815_s2, %s21952_s30 }
 0x18f   :  { %p17821_p4 = pnand %p17819_p3, %p17816_p2 }
 0x191   :  { %17824 = shalt.err (!%p17821_p4)
}
 0x192   :  { %s17825_s6 = scalar_lea.vmem %s498_s25, 16  ;;  %s17829_s7 = scalar_lea.vmem %s498_s25, 32 }
 0x193   :  { %p17826_p5 = scmp.ne.s32.totalorder %s498_s25, %s17825_s6  ;;  %p17830_p6 = scmp.lt.s32.totalorder %s498_s25, %s498_s25 }
 0x194   :  { %p17831_p7 = scmp.lt.s32.totalorder %s17829_s7, %s17825_s6 }
 0x196   :  { %p17832_p8 = por %p17831_p7, %p17830_p6 }
 0x198   :  { %p17833_p9 = pnand %p17832_p8, %p17826_p5 }
 0x19a   :  { %17836 = shalt.err (!%p17833_p9)
}
 0x19b   :  { %s21953_s10 = sld [smem:[#allocation128_spill]] }
 0x19c   :  { %500 = dma.hbm_to_vmem [thread:$0]  %s21952_s30, 16, %s498_s25, [#allocation54]  }
 0x1a1   :  { %s17837_s9 = scalar_lea.hbm %s21953_s10, 16 }
 0x1a2   :  { %p17838_p10 = scmp.ne.s32.totalorder %s21953_s10, %s17837_s9  ;;  %p17841_p11 = scmp.lt.u32.totalorder %s17837_s9, %s21953_s10 }
 0x1a4   :  { %p17843_p12 = pnand %p17841_p11, %p17838_p10 }
 0x1a6   :  { %17846 = shalt.err (!%p17843_p12)
}
 0x1a7   :  { %s17847_s8 = scalar_lea.vmem %s520_s19, 16  ;;  %s17851_s3 = scalar_lea.vmem %s520_s19, 32 }
 0x1a8   :  { %p17848_p13 = scmp.ne.s32.totalorder %s520_s19, %s17847_s8  ;;  %p17852_p0 = scmp.lt.s32.totalorder %s520_s19, %s520_s19 }
 0x1a9   :  { %p17853_p1 = scmp.lt.s32.totalorder %s17851_s3, %s17847_s8 }
 0x1ab   :  { %p17854_p2 = por %p17853_p1, %p17852_p0 }
 0x1ad   :  { %p17855_p3 = pnand %p17854_p2, %p17848_p13 }
 0x1af   :  { %17858 = shalt.err (!%p17855_p3)
}
 0x1b0   :  { %s21954_s11 = sld [smem:[#allocation130_spill]]  ;;  %s18709_s20 = smov [#allocation59]  }
 0x1b1   :  { %522 = dma.hbm_to_vmem [thread:$0]  %s21953_s10, 16, %s520_s19, [#allocation57]  }
 0x1b2   :  { %s541_s0 = sshll.u32 %s18709_s20, 4  ;;  %s18710_s29 = smov [#allocation62]   ;;  %s542_s0 = int_to_ptr.vmem [resolvable:$true] %s541_s0 }
 0x1b3   :  { %s561_s15 = sshll.u32 %s18710_s29, 4  ;;  %s562_s15 = int_to_ptr.vmem [resolvable:$true] %s561_s15 }
 0x1b6   :  { %s17859_s14 = scalar_lea.hbm %s21954_s11, 16 }
 0x1b7   :  { %p17860_p4 = scmp.ne.s32.totalorder %s21954_s11, %s17859_s14  ;;  %p17863_p5 = scmp.lt.u32.totalorder %s17859_s14, %s21954_s11 }
 0x1b9   :  { %p17865_p6 = pnand %p17863_p5, %p17860_p4 }
 0x1bb   :  { %17868 = shalt.err (!%p17865_p6)
}
 0x1bc   :  { %s17869_s4 = scalar_lea.vmem %s542_s0, 16  ;;  %s17873_s16 = scalar_lea.vmem %s542_s0, 32 }
 0x1bd   :  { %p17870_p7 = scmp.ne.s32.totalorder %s542_s0, %s17869_s4  ;;  %p17874_p8 = scmp.lt.s32.totalorder %s542_s0, %s542_s0 }
 0x1be   :  { %p17875_p9 = scmp.lt.s32.totalorder %s17873_s16, %s17869_s4 }
 0x1c0   :  { %p17876_p10 = por %p17875_p9, %p17874_p8 }
 0x1c2   :  { %p17877_p11 = pnand %p17876_p10, %p17870_p7 }
 0x1c4   :  { %17880 = shalt.err (!%p17877_p11)
}
 0x1c5   :  { %s21955_s17 = sld [smem:[#allocation132_spill]] }
 0x1c6   :  { %544 = dma.hbm_to_vmem [thread:$0]  %s21954_s11, 16, %s542_s0, [#allocation60]  }
 0x1cb   :  { %s17881_s21 = scalar_lea.hbm %s21955_s17, 16 }
 0x1cc   :  { %p17882_p12 = scmp.ne.s32.totalorder %s21955_s17, %s17881_s21  ;;  %p17885_p13 = scmp.lt.u32.totalorder %s17881_s21, %s21955_s17 }
 0x1ce   :  { %p17887_p0 = pnand %p17885_p13, %p17882_p12 }
 0x1d0   :  { %17890 = shalt.err (!%p17887_p0)
}
 0x1d1   :  { %s17891_s18 = scalar_lea.vmem %s562_s15, 16  ;;  %s17895_s22 = scalar_lea.vmem %s562_s15, 32 }
 0x1d2   :  { %p17892_p1 = scmp.ne.s32.totalorder %s562_s15, %s17891_s18  ;;  %p17896_p2 = scmp.lt.s32.totalorder %s562_s15, %s562_s15 }
 0x1d3   :  { %p17897_p3 = scmp.lt.s32.totalorder %s17895_s22, %s17891_s18 }
 0x1d5   :  { %p17898_p4 = por %p17897_p3, %p17896_p2 }
 0x1d7   :  { %p17899_p5 = pnand %p17898_p4, %p17892_p1 }
 0x1d9   :  { %17902 = shalt.err (!%p17899_p5)
}
 0x1da   :  { %s21956_s23 = sld [smem:[#allocation134_spill]]  ;;  %s18711_s30 = smov [#allocation65]  }
 0x1db   :  { %564 = dma.hbm_to_vmem [thread:$0]  %s21955_s17, 16, %s562_s15, [#allocation63]  }
 0x1dc   :  { %s583_s24 = sshll.u32 %s18711_s30, 4  ;;  %s18712_s25 = smov [#allocation68]   ;;  %s584_s24 = int_to_ptr.vmem [resolvable:$true] %s583_s24 }
 0x1dd   :  { %s605_s1 = sshll.u32 %s18712_s25, 4  ;;  %s606_s1 = int_to_ptr.vmem [resolvable:$true] %s605_s1 }
 0x1e0   :  { %s17903_s19 = scalar_lea.hbm %s21956_s23, 16 }
 0x1e1   :  { %p17904_p6 = scmp.ne.s32.totalorder %s21956_s23, %s17903_s19  ;;  %p17907_p7 = scmp.lt.u32.totalorder %s17903_s19, %s21956_s23 }
 0x1e3   :  { %p17909_p8 = pnand %p17907_p7, %p17904_p6 }
 0x1e5   :  { %17912 = shalt.err (!%p17909_p8)
}
 0x1e6   :  { %s17913_s2 = scalar_lea.vmem %s584_s24, 16  ;;  %s17917_s6 = scalar_lea.vmem %s584_s24, 32 }
 0x1e7   :  { %p17914_p9 = scmp.ne.s32.totalorder %s584_s24, %s17913_s2  ;;  %p17918_p10 = scmp.lt.s32.totalorder %s584_s24, %s584_s24 }
 0x1e8   :  { %p17919_p11 = scmp.lt.s32.totalorder %s17917_s6, %s17913_s2 }
 0x1ea   :  { %p17920_p12 = por %p17919_p11, %p17918_p10 }
 0x1ec   :  { %p17921_p13 = pnand %p17920_p12, %p17914_p9 }
 0x1ee   :  { %17924 = shalt.err (!%p17921_p13)
}
 0x1ef   :  { %s21957_s7 = sld [smem:[#allocation136_spill]] }
 0x1f0   :  { %586 = dma.hbm_to_vmem [thread:$0]  %s21956_s23, 16, %s584_s24, [#allocation66]  }
 0x1f5   :  { %s17925_s10 = scalar_lea.hbm %s21957_s7, 16 }
 0x1f6   :  { %p17926_p0 = scmp.ne.s32.totalorder %s21957_s7, %s17925_s10  ;;  %p17929_p1 = scmp.lt.u32.totalorder %s17925_s10, %s21957_s7 }
 0x1f8   :  { %p17931_p2 = pnand %p17929_p1, %p17926_p0 }
 0x1fa   :  { %17934 = shalt.err (!%p17931_p2)
}
 0x1fb   :  { %s17935_s9 = scalar_lea.vmem %s606_s1, 16  ;;  %s17939_s8 = scalar_lea.vmem %s606_s1, 32 }
 0x1fc   :  { %p17936_p3 = scmp.ne.s32.totalorder %s606_s1, %s17935_s9  ;;  %p17940_p4 = scmp.lt.s32.totalorder %s606_s1, %s606_s1 }
 0x1fd   :  { %p17941_p5 = scmp.lt.s32.totalorder %s17939_s8, %s17935_s9 }
 0x1ff   :  { %p17942_p6 = por %p17941_p5, %p17940_p4 }
 0x201   :  { %p17943_p7 = pnand %p17942_p6, %p17936_p3 }
 0x203   :  { %17946 = shalt.err (!%p17943_p7)
}
 0x204   :  { %s21958_s3 = sld [smem:[#allocation138_spill]]  ;;  %s18713_s11 = smov [#allocation71]  }
 0x205   :  { %608 = dma.hbm_to_vmem [thread:$0]  %s21957_s7, 16, %s606_s1, [#allocation69]  }
 0x206   :  { %s627_s20 = sshll.u32 %s18713_s11, 4  ;;  %s18714_s0 = smov [#allocation74]   ;;  %s628_s20 = int_to_ptr.vmem [resolvable:$true] %s627_s20 }
 0x207   :  { %s649_s29 = sshll.u32 %s18714_s0, 4  ;;  %s650_s29 = int_to_ptr.vmem [resolvable:$true] %s649_s29 }
 0x20a   :  { %s17947_s15 = scalar_lea.hbm %s21958_s3, 16 }
 0x20b   :  { %p17948_p8 = scmp.ne.s32.totalorder %s21958_s3, %s17947_s15  ;;  %p17951_p9 = scmp.lt.u32.totalorder %s17947_s15, %s21958_s3 }
 0x20d   :  { %p17953_p10 = pnand %p17951_p9, %p17948_p8 }
 0x20f   :  { %17956 = shalt.err (!%p17953_p10)
}
 0x210   :  { %s17957_s14 = scalar_lea.vmem %s628_s20, 16  ;;  %s17961_s4 = scalar_lea.vmem %s628_s20, 32 }
 0x211   :  { %p17958_p11 = scmp.ne.s32.totalorder %s628_s20, %s17957_s14  ;;  %p17962_p12 = scmp.lt.s32.totalorder %s628_s20, %s628_s20 }
 0x212   :  { %p17963_p13 = scmp.lt.s32.totalorder %s17961_s4, %s17957_s14 }
 0x214   :  { %p17964_p0 = por %p17963_p13, %p17962_p12 }
 0x216   :  { %p17965_p1 = pnand %p17964_p0, %p17958_p11 }
 0x218   :  { %17968 = shalt.err (!%p17965_p1)
}
 0x219   :  { %630 = dma.hbm_to_vmem [thread:$0]  %s21958_s3, 16, %s628_s20, [#allocation72]  }
 0x21a   :  { %s17969_s16 = scalar_lea.hbm %s18996_s5, 16 }
 0x21b   :  { %p17970_p2 = scmp.ne.s32.totalorder %s18996_s5, %s17969_s16  ;;  %p17973_p3 = scmp.lt.u32.totalorder %s17969_s16, %s18996_s5 }
 0x21d   :  { %p17975_p4 = pnand %p17973_p3, %p17970_p2 }
 0x21f   :  { %17978 = shalt.err (!%p17975_p4)
}
 0x220   :  { %s17979_s17 = scalar_lea.vmem %s650_s29, 16  ;;  %s17983_s21 = scalar_lea.vmem %s650_s29, 32 }
 0x221   :  { %p17980_p5 = scmp.ne.s32.totalorder %s650_s29, %s17979_s17  ;;  %p17984_p6 = scmp.lt.s32.totalorder %s650_s29, %s650_s29 }
 0x222   :  { %p17985_p7 = scmp.lt.s32.totalorder %s17983_s21, %s17979_s17 }
 0x224   :  { %p17986_p8 = por %p17985_p7, %p17984_p6 }
 0x226   :  { %p17987_p9 = pnand %p17986_p8, %p17980_p5 }
 0x228   :  { %17990 = shalt.err (!%p17987_p9)
}
 0x229   :  { %s21959_s18 = sld [smem:[#allocation107_spill]]  ;;  %s18715_s22 = smov [#allocation2]  }
 0x22a   :  { %652 = dma.hbm_to_vmem [thread:$0]  %s18996_s5, 16, %s650_s29, [#allocation75]  }
 0x22b   :  { %s138_s23 = sshll.u32 %s18715_s22, 4  ;;  %s18716_s30 = smov [#allocation7]   ;;  %s139_s23 = int_to_ptr.vmem [resolvable:$true] %s138_s23 }
 0x22c   :  { %s163_s24 = sshll.u32 %s18716_s30, 4  ;;  %s164_s24 = int_to_ptr.vmem [resolvable:$true] %s163_s24 }
 0x22f   :  { %s17991_s25 = scalar_lea.hbm %s21959_s18, 1024 }
 0x230   :  { %p17992_p10 = scmp.ne.s32.totalorder %s21959_s18, %s17991_s25  ;;  %p17995_p11 = scmp.lt.u32.totalorder %s17991_s25, %s21959_s18 }
 0x232   :  { %p17997_p12 = pnand %p17995_p11, %p17992_p10 }
 0x234   :  { %18000 = shalt.err (!%p17997_p12)
}
 0x235   :  { %s18001_s1 = scalar_lea.vmem %s139_s23, 1024  ;;  %p18006_p0 = scmp.lt.s32.totalorder %s139_s23, %s139_s23 }
 0x236   :  { %p18002_p13 = scmp.ne.s32.totalorder %s139_s23, %s18001_s1  ;;  %p18007_p1 = scmp.lt.s32.totalorder %s18001_s1, %s18001_s1 }
 0x238   :  { %p18008_p2 = por %p18007_p1, %p18006_p0 }
 0x23a   :  { %p18009_p3 = pnand %p18008_p2, %p18002_p13 }
 0x23c   :  { %18012 = shalt.err (!%p18009_p3)
}
 0x23d   :  { %s21960_s5 = sld [smem:[#allocation108_spill]] }
 0x23e   :  { %144 = dma.hbm_to_vmem [thread:$0]  %s21959_s18, 1024, %s139_s23, [#allocation3], %s18691_s26, %s18691_s26, %s18692_s28  }
 0x243   :  { %s18013_s19 = scalar_lea.hbm %s21960_s5, 128 }
 0x244   :  { %p18014_p4 = scmp.ne.s32.totalorder %s21960_s5, %s18013_s19  ;;  %p18017_p5 = scmp.lt.u32.totalorder %s18013_s19, %s21960_s5 }
 0x246   :  { %p18019_p6 = pnand %p18017_p5, %p18014_p4 }
 0x248   :  { %18022 = shalt.err (!%p18019_p6)
}
 0x249   :  { %s18023_s2 = scalar_lea.vmem %s164_s24, 128  ;;  %p18028_p8 = scmp.lt.s32.totalorder %s164_s24, %s164_s24 }
 0x24a   :  { %p18024_p7 = scmp.ne.s32.totalorder %s164_s24, %s18023_s2  ;;  %p18029_p9 = scmp.lt.s32.totalorder %s18023_s2, %s18023_s2 }
 0x24c   :  { %p18030_p10 = por %p18029_p9, %p18028_p8 }
 0x24e   :  { %p18031_p11 = pnand %p18030_p10, %p18024_p7 }
 0x250   :  { %18034 = shalt.err (!%p18031_p11)
}
 0x251   :  { %s21961_s6 = sld [smem:[#allocation109_spill]]  ;;  %s18717_s7 = smov [#allocation10]  }
 0x252   :  { %166 = dma.hbm_to_vmem [thread:$0]  %s21960_s5, 128, %s164_s24, [#allocation6]  }
 0x253   :  { %s182_s10 = sshll.u32 %s18717_s7, 4  ;;  %s18718_s9 = smov [#allocation13]   ;;  %s183_s10 = int_to_ptr.vmem [resolvable:$true] %s182_s10 }
 0x254   :  { %s204_s8 = sshll.u32 %s18718_s9, 4  ;;  %s19123_s8 = int_to_ptr.vmem [resolvable:$true] %s204_s8 }
 0x257   :  { %s18035_s3 = scalar_lea.hbm %s21961_s6, 512 }
 0x258   :  { %p18036_p12 = scmp.ne.s32.totalorder %s21961_s6, %s18035_s3  ;;  %p18039_p13 = scmp.lt.u32.totalorder %s18035_s3, %s21961_s6 }
 0x25a   :  { %p18041_p0 = pnand %p18039_p13, %p18036_p12 }
 0x25c   :  { %18044 = shalt.err (!%p18041_p0)
}
 0x25d   :  { %s18045_s11 = scalar_lea.vmem %s183_s10, 512  ;;  %p18050_p2 = scmp.lt.s32.totalorder %s183_s10, %s183_s10 }
 0x25e   :  { %p18046_p1 = scmp.ne.s32.totalorder %s183_s10, %s18045_s11  ;;  %p18051_p3 = scmp.lt.s32.totalorder %s18045_s11, %s18045_s11 }
 0x260   :  { %p18052_p4 = por %p18051_p3, %p18050_p2 }
 0x262   :  { %p18053_p5 = pnand %p18052_p4, %p18046_p1 }
 0x264   :  { %18056 = shalt.err (!%p18053_p5)
}
 0x265   :  { %s21962_s20 = sld [smem:[#allocation110_spill]] }
 0x266   :  { %188 = dma.hbm_to_vmem [thread:$0]  %s21961_s6, 512, %s183_s10, [#allocation9], %s18691_s26, %s18691_s26, %s18692_s28  }
 0x26b   :  { %s18057_s0 = scalar_lea.hbm %s21962_s20, 512 }
 0x26c   :  { %p18058_p6 = scmp.ne.s32.totalorder %s21962_s20, %s18057_s0  ;;  %p18061_p7 = scmp.lt.u32.totalorder %s18057_s0, %s21962_s20 }
 0x26e   :  { %p18063_p8 = pnand %p18061_p7, %p18058_p6 }
 0x270   :  { %18066 = shalt.err (!%p18063_p8)
}
 0x271   :  { %s18067_s29 = scalar_lea.vmem %s19123_s8, 512  ;;  %p18072_p10 = scmp.lt.s32.totalorder %s19123_s8, %s19123_s8 }
 0x272   :  { %p18068_p9 = scmp.ne.s32.totalorder %s19123_s8, %s18067_s29  ;;  %p18073_p11 = scmp.lt.s32.totalorder %s18067_s29, %s18067_s29 }
 0x274   :  { %p18074_p12 = por %p18073_p11, %p18072_p10 }
 0x276   :  { %p18075_p13 = pnand %p18074_p12, %p18068_p9 }
 0x278   :  { %18078 = shalt.err (!%p18075_p13)
}
 0x279   :  { %s21963_s15 = sld [smem:[#allocation111_spill]]  ;;  %s18719_s14 = smov [#allocation16]  }
 0x27a   :  { %210 = dma.hbm_to_vmem [thread:$0]  %s21962_s20, 512, %s19123_s8, [#allocation12], %s18691_s26, %s18691_s26, %s18692_s28  }
 0x27b   :  { %s226_s4 = sshll.u32 %s18719_s14, 4  ;;  %s18720_s16 = smov [#allocation19]   ;;  %s227_s4 = int_to_ptr.vmem [resolvable:$true] %s226_s4 }
 0x27c   :  { %s248_s17 = sshll.u32 %s18720_s16, 4  ;;  %s19144_s17 = int_to_ptr.vmem [resolvable:$true] %s248_s17 }
 0x27f   :  { %s18079_s21 = scalar_lea.hbm %s21963_s15, 512 }
 0x280   :  { %p18080_p0 = scmp.ne.s32.totalorder %s21963_s15, %s18079_s21  ;;  %p18083_p1 = scmp.lt.u32.totalorder %s18079_s21, %s21963_s15 }
 0x282   :  { %p18085_p2 = pnand %p18083_p1, %p18080_p0 }
 0x284   :  { %18088 = shalt.err (!%p18085_p2)
}
 0x285   :  { %s18089_s18 = scalar_lea.vmem %s227_s4, 512  ;;  %p18094_p4 = scmp.lt.s32.totalorder %s227_s4, %s227_s4 }
 0x286   :  { %p18090_p3 = scmp.ne.s32.totalorder %s227_s4, %s18089_s18  ;;  %p18095_p5 = scmp.lt.s32.totalorder %s18089_s18, %s18089_s18 }
 0x288   :  { %p18096_p6 = por %p18095_p5, %p18094_p4 }
 0x28a   :  { %p18097_p7 = pnand %p18096_p6, %p18090_p3 }
 0x28c   :  { %18100 = shalt.err (!%p18097_p7)
}
 0x28d   :  { %s21964_s22 = sld [smem:[#allocation112_spill]] }
 0x28e   :  { %232 = dma.hbm_to_vmem [thread:$0]  %s21963_s15, 512, %s227_s4, [#allocation15], %s18691_s26, %s18691_s26, %s18692_s28  }
 0x293   :  { %s18101_s23 = scalar_lea.hbm %s21964_s22, 512 }
 0x294   :  { %p18102_p8 = scmp.ne.s32.totalorder %s21964_s22, %s18101_s23  ;;  %p18105_p9 = scmp.lt.u32.totalorder %s18101_s23, %s21964_s22 }
 0x296   :  { %p18107_p10 = pnand %p18105_p9, %p18102_p8 }
 0x298   :  { %18110 = shalt.err (!%p18107_p10)
}
 0x299   :  { %s18111_s30 = scalar_lea.vmem %s19144_s17, 512  ;;  %p18116_p12 = scmp.lt.s32.totalorder %s19144_s17, %s19144_s17 }
 0x29a   :  { %p18112_p11 = scmp.ne.s32.totalorder %s19144_s17, %s18111_s30  ;;  %p18117_p13 = scmp.lt.s32.totalorder %s18111_s30, %s18111_s30 }
 0x29c   :  { %p18118_p0 = por %p18117_p13, %p18116_p12 }
 0x29e   :  { %p18119_p1 = pnand %p18118_p0, %p18112_p11 }
 0x2a0   :  { %18122 = shalt.err (!%p18119_p1)
}
 0x2a1   :  { %s21965_s24 = sld [smem:[#allocation113_spill]]  ;;  %s18721_s25 = smov [#allocation22]  }
 0x2a2   :  { %254 = dma.hbm_to_vmem [thread:$0]  %s21964_s22, 512, %s19144_s17, [#allocation18], %s18691_s26, %s18691_s26, %s18692_s28  }
 0x2a3   :  { %s270_s1 = sshll.u32 %s18721_s25, 4  ;;  %s18722_s5 = smov [#allocation25]   ;;  %s271_s1 = int_to_ptr.vmem [resolvable:$true] %s270_s1 }
 0x2a4   :  { %s293_s19 = sshll.u32 %s18722_s5, 4  ;;  %s294_s19 = int_to_ptr.vmem [resolvable:$true] %s293_s19 }
 0x2a7   :  { %s18123_s2 = scalar_lea.hbm %s21965_s24, 512 }
 0x2a8   :  { %p18124_p2 = scmp.ne.s32.totalorder %s21965_s24, %s18123_s2  ;;  %p18127_p3 = scmp.lt.u32.totalorder %s18123_s2, %s21965_s24 }
 0x2aa   :  { %p18129_p4 = pnand %p18127_p3, %p18124_p2 }
 0x2ac   :  { %18132 = shalt.err (!%p18129_p4)
}
 0x2ad   :  { %s18133_s6 = scalar_lea.vmem %s271_s1, 512  ;;  %p18138_p6 = scmp.lt.s32.totalorder %s271_s1, %s271_s1 }
 0x2ae   :  { %p18134_p5 = scmp.ne.s32.totalorder %s271_s1, %s18133_s6  ;;  %p18139_p7 = scmp.lt.s32.totalorder %s18133_s6, %s18133_s6 }
 0x2b0   :  { %p18140_p8 = por %p18139_p7, %p18138_p6 }
 0x2b2   :  { %p18141_p9 = pnand %p18140_p8, %p18134_p5 }
 0x2b4   :  { %18144 = shalt.err (!%p18141_p9)
}
 0x2b5   :  { %s21966_s7 = sld [smem:[#allocation114_spill]] }
 0x2b6   :  { %276 = dma.hbm_to_vmem [thread:$0]  %s21965_s24, 512, %s271_s1, [#allocation21], %s18691_s26, %s18691_s26, %s18692_s28  }
 0x2bb   :  { %s18145_s10 = scalar_lea.hbm %s21966_s7, 16 }
 0x2bc   :  { %p18146_p10 = scmp.ne.s32.totalorder %s21966_s7, %s18145_s10  ;;  %p18149_p11 = scmp.lt.u32.totalorder %s18145_s10, %s21966_s7 }
 0x2be   :  { %p18151_p12 = pnand %p18149_p11, %p18146_p10 }
 0x2c0   :  { %18154 = shalt.err (!%p18151_p12)
}
 0x2c1   :  { %s18155_s9 = scalar_lea.vmem %s294_s19, 16  ;;  %s18159_s8 = scalar_lea.vmem %s294_s19, 32 }
 0x2c2   :  { %p18156_p13 = scmp.ne.s32.totalorder %s294_s19, %s18155_s9  ;;  %p18160_p0 = scmp.lt.s32.totalorder %s294_s19, %s294_s19 }
 0x2c3   :  { %p18161_p1 = scmp.lt.s32.totalorder %s18159_s8, %s18155_s9 }
 0x2c5   :  { %p18162_p2 = por %p18161_p1, %p18160_p0 }
 0x2c7   :  { %p18163_p3 = pnand %p18162_p2, %p18156_p13 }
 0x2c9   :  { %18166 = shalt.err (!%p18163_p3)
}
 0x2ca   :  { %s21967_s3 = sld [smem:[#allocation115_spill]]  ;;  %s18723_s11 = smov [#allocation28]  }
 0x2cb   :  { %296 = dma.hbm_to_vmem [thread:$0]  %s21966_s7, 16, %s294_s19, [#allocation24]  }
 0x2cc   :  { %s312_s20 = sshll.u32 %s18723_s11, 4  ;;  %s18724_s0 = smov [#allocation31]   ;;  %s313_s20 = int_to_ptr.vmem [resolvable:$true] %s312_s20 }
 0x2cd   :  { %s334_s29 = sshll.u32 %s18724_s0, 4  ;;  %s19176_s29 = int_to_ptr.vmem [resolvable:$true] %s334_s29 }
 0x2d0   :  { %s18167_s15 = scalar_lea.hbm %s21967_s3, 512 }
 0x2d1   :  { %p18168_p4 = scmp.ne.s32.totalorder %s21967_s3, %s18167_s15  ;;  %p18171_p5 = scmp.lt.u32.totalorder %s18167_s15, %s21967_s3 }
 0x2d3   :  { %p18173_p6 = pnand %p18171_p5, %p18168_p4 }
 0x2d5   :  { %18176 = shalt.err (!%p18173_p6)
}
 0x2d6   :  { %s18177_s14 = scalar_lea.vmem %s313_s20, 512  ;;  %p18182_p8 = scmp.lt.s32.totalorder %s313_s20, %s313_s20 }
 0x2d7   :  { %p18178_p7 = scmp.ne.s32.totalorder %s313_s20, %s18177_s14  ;;  %p18183_p9 = scmp.lt.s32.totalorder %s18177_s14, %s18177_s14 }
 0x2d9   :  { %p18184_p10 = por %p18183_p9, %p18182_p8 }
 0x2db   :  { %p18185_p11 = pnand %p18184_p10, %p18178_p7 }
 0x2dd   :  { %18188 = shalt.err (!%p18185_p11)
}
 0x2de   :  { %s21968_s4 = sld [smem:[#allocation116_spill]] }
 0x2df   :  { %318 = dma.hbm_to_vmem [thread:$0]  %s21967_s3, 512, %s313_s20, [#allocation27], %s18691_s26, %s18691_s26, %s18692_s28  }
 0x2e4   :  { %s18189_s16 = scalar_lea.hbm %s21968_s4, 512 }
 0x2e5   :  { %p18190_p12 = scmp.ne.s32.totalorder %s21968_s4, %s18189_s16  ;;  %p18193_p13 = scmp.lt.u32.totalorder %s18189_s16, %s21968_s4 }
 0x2e7   :  { %p18195_p0 = pnand %p18193_p13, %p18190_p12 }
 0x2e9   :  { %18198 = shalt.err (!%p18195_p0)
}
 0x2ea   :  { %s18199_s17 = scalar_lea.vmem %s19176_s29, 512  ;;  %p18204_p2 = scmp.lt.s32.totalorder %s19176_s29, %s19176_s29 }
 0x2eb   :  { %p18200_p1 = scmp.ne.s32.totalorder %s19176_s29, %s18199_s17  ;;  %p18205_p3 = scmp.lt.s32.totalorder %s18199_s17, %s18199_s17 }
 0x2ed   :  { %p18206_p4 = por %p18205_p3, %p18204_p2 }
 0x2ef   :  { %p18207_p5 = pnand %p18206_p4, %p18200_p1 }
 0x2f1   :  { %18210 = shalt.err (!%p18207_p5)
}
 0x2f2   :  { %s21969_s21 = sld [smem:[#allocation117_spill]]  ;;  %s18725_s18 = smov [#allocation34]  }
 0x2f3   :  { %340 = dma.hbm_to_vmem [thread:$0]  %s21968_s4, 512, %s19176_s29, [#allocation30], %s18691_s26, %s18691_s26, %s18692_s28  }
 0x2f4   :  { %s357_s22 = sshll.u32 %s18725_s18, 4  ;;  %s18726_s23 = smov [#allocation37]   ;;  %s358_s22 = int_to_ptr.vmem [resolvable:$true] %s357_s22 }
 0x2f5   :  { %s376_s30 = sshll.u32 %s18726_s23, 4  ;;  %s19197_s30 = int_to_ptr.vmem [resolvable:$true] %s376_s30 }
 0x2f8   :  { %s18211_s24 = scalar_lea.hbm %s21969_s21, 16 }
 0x2f9   :  { %p18212_p6 = scmp.ne.s32.totalorder %s21969_s21, %s18211_s24  ;;  %p18215_p7 = scmp.lt.u32.totalorder %s18211_s24, %s21969_s21 }
 0x2fb   :  { %p18217_p8 = pnand %p18215_p7, %p18212_p6 }
 0x2fd   :  { %18220 = shalt.err (!%p18217_p8)
}
 0x2fe   :  { %s18221_s25 = scalar_lea.vmem %s358_s22, 16  ;;  %s18225_s1 = scalar_lea.vmem %s358_s22, 32 }
 0x2ff   :  { %p18222_p9 = scmp.ne.s32.totalorder %s358_s22, %s18221_s25  ;;  %p18226_p10 = scmp.lt.s32.totalorder %s358_s22, %s358_s22 }
 0x300   :  { %p18227_p11 = scmp.lt.s32.totalorder %s18225_s1, %s18221_s25 }
 0x302   :  { %p18228_p12 = por %p18227_p11, %p18226_p10 }
 0x304   :  { %p18229_p13 = pnand %p18228_p12, %p18222_p9 }
 0x306   :  { %18232 = shalt.err (!%p18229_p13)
}
 0x307   :  { %s21970_s5 = sld [smem:[#allocation118_spill]] }
 0x308   :  { %360 = dma.hbm_to_vmem [thread:$0]  %s21969_s21, 16, %s358_s22, [#allocation33]  }
 0x30d   :  { %s18233_s19 = scalar_lea.hbm %s21970_s5, 512 }
 0x30e   :  { %p18234_p0 = scmp.ne.s32.totalorder %s21970_s5, %s18233_s19  ;;  %p18237_p1 = scmp.lt.u32.totalorder %s18233_s19, %s21970_s5 }
 0x310   :  { %p18239_p2 = pnand %p18237_p1, %p18234_p0 }
 0x312   :  { %18242 = shalt.err (!%p18239_p2)
}
 0x313   :  { %s18243_s2 = scalar_lea.vmem %s19197_s30, 512  ;;  %p18248_p4 = scmp.lt.s32.totalorder %s19197_s30, %s19197_s30 }
 0x314   :  { %p18244_p3 = scmp.ne.s32.totalorder %s19197_s30, %s18243_s2  ;;  %p18249_p5 = scmp.lt.s32.totalorder %s18243_s2, %s18243_s2 }
 0x316   :  { %p18250_p6 = por %p18249_p5, %p18248_p4 }
 0x318   :  { %p18251_p7 = pnand %p18250_p6, %p18244_p3 }
 0x31a   :  { %18254 = shalt.err (!%p18251_p7)
}
 0x31b   :  { %s21971_s6 = sld [smem:[#allocation119_spill]]  ;;  %s18727_s7 = smov [#allocation40]  }
 0x31c   :  { %382 = dma.hbm_to_vmem [thread:$0]  %s21970_s5, 512, %s19197_s30, [#allocation36], %s18691_s26, %s18691_s26, %s18692_s28  }
 0x31d   :  { %s398_s10 = sshll.u32 %s18727_s7, 4  ;;  %s18728_s9 = smov [#allocation43]   ;;  %s399_s10 = int_to_ptr.vmem [resolvable:$true] %s398_s10 }
 0x31e   :  { %s420_s8 = sshll.u32 %s18728_s9, 4  ;;  %s19215_s8 = int_to_ptr.vmem [resolvable:$true] %s420_s8 }
 0x321   :  { %s18255_s3 = scalar_lea.hbm %s21971_s6, 512 }
 0x322   :  { %p18256_p8 = scmp.ne.s32.totalorder %s21971_s6, %s18255_s3  ;;  %p18259_p9 = scmp.lt.u32.totalorder %s18255_s3, %s21971_s6 }
 0x324   :  { %p18261_p10 = pnand %p18259_p9, %p18256_p8 }
 0x326   :  { %18264 = shalt.err (!%p18261_p10)
}
 0x327   :  { %s18265_s11 = scalar_lea.vmem %s399_s10, 512  ;;  %p18270_p12 = scmp.lt.s32.totalorder %s399_s10, %s399_s10 }
 0x328   :  { %p18266_p11 = scmp.ne.s32.totalorder %s399_s10, %s18265_s11  ;;  %p18271_p13 = scmp.lt.s32.totalorder %s18265_s11, %s18265_s11 }
 0x32a   :  { %p18272_p0 = por %p18271_p13, %p18270_p12 }
 0x32c   :  { %p18273_p1 = pnand %p18272_p0, %p18266_p11 }
 0x32e   :  { %18276 = shalt.err (!%p18273_p1)
}
 0x32f   :  { %s21972_s20 = sld [smem:[#allocation120_spill]] }
 0x330   :  { %404 = dma.hbm_to_vmem [thread:$0]  %s21971_s6, 512, %s399_s10, [#allocation39], %s18691_s26, %s18691_s26, %s18692_s28  }
 0x335   :  { %s18277_s0 = scalar_lea.hbm %s21972_s20, 512 }
 0x336   :  { %p18278_p2 = scmp.ne.s32.totalorder %s21972_s20, %s18277_s0  ;;  %p18281_p3 = scmp.lt.u32.totalorder %s18277_s0, %s21972_s20 }
 0x338   :  { %p18283_p4 = pnand %p18281_p3, %p18278_p2 }
 0x33a   :  { %18286 = shalt.err (!%p18283_p4)
}
 0x33b   :  { %s18287_s29 = scalar_lea.vmem %s19215_s8, 512  ;;  %p18292_p6 = scmp.lt.s32.totalorder %s19215_s8, %s19215_s8 }
 0x33c   :  { %p18288_p5 = scmp.ne.s32.totalorder %s19215_s8, %s18287_s29  ;;  %p18293_p7 = scmp.lt.s32.totalorder %s18287_s29, %s18287_s29 }
 0x33e   :  { %p18294_p8 = por %p18293_p7, %p18292_p6 }
 0x340   :  { %p18295_p9 = pnand %p18294_p8, %p18288_p5 }
 0x342   :  { %18298 = shalt.err (!%p18295_p9)
}
 0x343   :  { %s21973_s15 = sld [smem:[#allocation121_spill]]  ;;  %s18729_s14 = smov [#allocation46]  }
 0x344   :  { %426 = dma.hbm_to_vmem [thread:$0]  %s21972_s20, 512, %s19215_s8, [#allocation42], %s18691_s26, %s18691_s26, %s18692_s28  }
 0x345   :  { %s442_s4 = sshll.u32 %s18729_s14, 4  ;;  %s18730_s16 = smov [#allocation49]   ;;  %s443_s4 = int_to_ptr.vmem [resolvable:$true] %s442_s4 }
 0x346   :  { %s464_s17 = sshll.u32 %s18730_s16, 4  ;;  %s19236_s17 = int_to_ptr.vmem [resolvable:$true] %s464_s17 }
 0x349   :  { %s18299_s21 = scalar_lea.hbm %s21973_s15, 512 }
 0x34a   :  { %p18300_p10 = scmp.ne.s32.totalorder %s21973_s15, %s18299_s21  ;;  %p18303_p11 = scmp.lt.u32.totalorder %s18299_s21, %s21973_s15 }
 0x34c   :  { %p18305_p12 = pnand %p18303_p11, %p18300_p10 }
 0x34e   :  { %18308 = shalt.err (!%p18305_p12)
}
 0x34f   :  { %s18309_s18 = scalar_lea.vmem %s443_s4, 512  ;;  %p18314_p0 = scmp.lt.s32.totalorder %s443_s4, %s443_s4 }
 0x350   :  { %p18310_p13 = scmp.ne.s32.totalorder %s443_s4, %s18309_s18  ;;  %p18315_p1 = scmp.lt.s32.totalorder %s18309_s18, %s18309_s18 }
 0x352   :  { %p18316_p2 = por %p18315_p1, %p18314_p0 }
 0x354   :  { %p18317_p3 = pnand %p18316_p2, %p18310_p13 }
 0x356   :  { %18320 = shalt.err (!%p18317_p3)
}
 0x357   :  { %s21974_s22 = sld [smem:[#allocation123_spill]] }
 0x358   :  { %448 = dma.hbm_to_vmem [thread:$0]  %s21973_s15, 512, %s443_s4, [#allocation45], %s18691_s26, %s18691_s26, %s18692_s28  }
 0x35d   :  { %s18321_s23 = scalar_lea.hbm %s21974_s22, 512 }
 0x35e   :  { %p18322_p4 = scmp.ne.s32.totalorder %s21974_s22, %s18321_s23  ;;  %p18325_p5 = scmp.lt.u32.totalorder %s18321_s23, %s21974_s22 }
 0x360   :  { %p18327_p6 = pnand %p18325_p5, %p18322_p4 }
 0x362   :  { %18330 = shalt.err (!%p18327_p6)
}
 0x363   :  { %s18331_s30 = scalar_lea.vmem %s19236_s17, 512  ;;  %p18336_p8 = scmp.lt.s32.totalorder %s19236_s17, %s19236_s17 }
 0x364   :  { %p18332_p7 = scmp.ne.s32.totalorder %s19236_s17, %s18331_s30  ;;  %p18337_p9 = scmp.lt.s32.totalorder %s18331_s30, %s18331_s30 }
 0x366   :  { %p18338_p10 = por %p18337_p9, %p18336_p8 }
 0x368   :  { %p18339_p11 = pnand %p18338_p10, %p18332_p7 }
 0x36a   :  { %18342 = shalt.err (!%p18339_p11)
}
 0x36b   :  { %s21975_s24 = sld [smem:[#allocation125_spill]]  ;;  %s18731_s25 = smov [#allocation52]  }
 0x36c   :  { %470 = dma.hbm_to_vmem [thread:$0]  %s21974_s22, 512, %s19236_s17, [#allocation48], %s18691_s26, %s18691_s26, %s18692_s28  }
 0x36d   :  { %s487_s1 = sshll.u32 %s18731_s25, 4  ;;  %s18732_s5 = smov [#allocation55]   ;;  %s488_s1 = int_to_ptr.vmem [resolvable:$true] %s487_s1 }
 0x36e   :  { %s506_s19 = sshll.u32 %s18732_s5, 4  ;;  %s19257_s19 = int_to_ptr.vmem [resolvable:$true] %s506_s19 }
 0x371   :  { %s18343_s2 = scalar_lea.hbm %s21975_s24, 16 }
 0x372   :  { %p18344_p12 = scmp.ne.s32.totalorder %s21975_s24, %s18343_s2  ;;  %p18347_p13 = scmp.lt.u32.totalorder %s18343_s2, %s21975_s24 }
 0x374   :  { %p18349_p0 = pnand %p18347_p13, %p18344_p12 }
 0x376   :  { %18352 = shalt.err (!%p18349_p0)
}
 0x377   :  { %s18353_s6 = scalar_lea.vmem %s488_s1, 16  ;;  %s18357_s7 = scalar_lea.vmem %s488_s1, 32 }
 0x378   :  { %p18354_p1 = scmp.ne.s32.totalorder %s488_s1, %s18353_s6  ;;  %p18358_p2 = scmp.lt.s32.totalorder %s488_s1, %s488_s1 }
 0x379   :  { %p18359_p3 = scmp.lt.s32.totalorder %s18357_s7, %s18353_s6 }
 0x37b   :  { %p18360_p4 = por %p18359_p3, %p18358_p2 }
 0x37d   :  { %p18361_p5 = pnand %p18360_p4, %p18354_p1 }
 0x37f   :  { %18364 = shalt.err (!%p18361_p5)
}
 0x380   :  { %s21976_s10 = sld [smem:[#allocation127_spill]] }
 0x381   :  { %490 = dma.hbm_to_vmem [thread:$0]  %s21975_s24, 16, %s488_s1, [#allocation51]  }
 0x386   :  { %s18365_s9 = scalar_lea.hbm %s21976_s10, 512 }
 0x387   :  { %p18366_p6 = scmp.ne.s32.totalorder %s21976_s10, %s18365_s9  ;;  %p18369_p7 = scmp.lt.u32.totalorder %s18365_s9, %s21976_s10 }
 0x389   :  { %p18371_p8 = pnand %p18369_p7, %p18366_p6 }
 0x38b   :  { %18374 = shalt.err (!%p18371_p8)
}
 0x38c   :  { %s18375_s8 = scalar_lea.vmem %s19257_s19, 512  ;;  %p18380_p10 = scmp.lt.s32.totalorder %s19257_s19, %s19257_s19 }
 0x38d   :  { %p18376_p9 = scmp.ne.s32.totalorder %s19257_s19, %s18375_s8  ;;  %p18381_p11 = scmp.lt.s32.totalorder %s18375_s8, %s18375_s8 }
 0x38f   :  { %p18382_p12 = por %p18381_p11, %p18380_p10 }
 0x391   :  { %p18383_p13 = pnand %p18382_p12, %p18376_p9 }
 0x393   :  { %18386 = shalt.err (!%p18383_p13)
}
 0x394   :  { %s21977_s3 = sld [smem:[#allocation129_spill]]  ;;  %s18733_s11 = smov [#allocation58]  }
 0x395   :  { %512 = dma.hbm_to_vmem [thread:$0]  %s21976_s10, 512, %s19257_s19, [#allocation54], %s18691_s26, %s18691_s26, %s18692_s28  }
 0x396   :  { %s528_s20 = sshll.u32 %s18733_s11, 4  ;;  %s18734_s0 = smov [#allocation61]   ;;  %s529_s20 = int_to_ptr.vmem [resolvable:$true] %s528_s20 }
 0x397   :  { %s551_s29 = sshll.u32 %s18734_s0, 4  ;;  %s552_s29 = int_to_ptr.vmem [resolvable:$true] %s551_s29 }
 0x39a   :  { %s18387_s15 = scalar_lea.hbm %s21977_s3, 512 }
 0x39b   :  { %p18388_p0 = scmp.ne.s32.totalorder %s21977_s3, %s18387_s15  ;;  %p18391_p1 = scmp.lt.u32.totalorder %s18387_s15, %s21977_s3 }
 0x39d   :  { %p18393_p2 = pnand %p18391_p1, %p18388_p0 }
 0x39f   :  { %18396 = shalt.err (!%p18393_p2)
}
 0x3a0   :  { %s18397_s14 = scalar_lea.vmem %s529_s20, 512  ;;  %p18402_p4 = scmp.lt.s32.totalorder %s529_s20, %s529_s20 }
 0x3a1   :  { %p18398_p3 = scmp.ne.s32.totalorder %s529_s20, %s18397_s14  ;;  %p18403_p5 = scmp.lt.s32.totalorder %s18397_s14, %s18397_s14 }
 0x3a3   :  { %p18404_p6 = por %p18403_p5, %p18402_p4 }
 0x3a5   :  { %p18405_p7 = pnand %p18404_p6, %p18398_p3 }
 0x3a7   :  { %18408 = shalt.err (!%p18405_p7)
}
 0x3a8   :  { %s21978_s4 = sld [smem:[#allocation131_spill]] }
 0x3a9   :  { %534 = dma.hbm_to_vmem [thread:$0]  %s21977_s3, 512, %s529_s20, [#allocation57], %s18691_s26, %s18691_s26, %s18692_s28  }
 0x3ae   :  { %s18409_s16 = scalar_lea.hbm %s21978_s4, 16 }
 0x3af   :  { %p18410_p8 = scmp.ne.s32.totalorder %s21978_s4, %s18409_s16  ;;  %p18413_p9 = scmp.lt.u32.totalorder %s18409_s16, %s21978_s4 }
 0x3b1   :  { %p18415_p10 = pnand %p18413_p9, %p18410_p8 }
 0x3b3   :  { %18418 = shalt.err (!%p18415_p10)
}
 0x3b4   :  { %s18419_s17 = scalar_lea.vmem %s552_s29, 16  ;;  %s18423_s21 = scalar_lea.vmem %s552_s29, 32 }
 0x3b5   :  { %p18420_p11 = scmp.ne.s32.totalorder %s552_s29, %s18419_s17  ;;  %p18424_p12 = scmp.lt.s32.totalorder %s552_s29, %s552_s29 }
 0x3b6   :  { %p18425_p13 = scmp.lt.s32.totalorder %s18423_s21, %s18419_s17 }
 0x3b8   :  { %p18426_p0 = por %p18425_p13, %p18424_p12 }
 0x3ba   :  { %p18427_p1 = pnand %p18426_p0, %p18420_p11 }
 0x3bc   :  { %18430 = shalt.err (!%p18427_p1)
}
 0x3bd   :  { %s21979_s18 = sld [smem:[#allocation133_spill]]  ;;  %s18735_s22 = smov [#allocation64]  }
 0x3be   :  { %554 = dma.hbm_to_vmem [thread:$0]  %s21978_s4, 16, %s552_s29, [#allocation60]  }
 0x3bf   :  { %s570_s23 = sshll.u32 %s18735_s22, 4  ;;  %s18736_s30 = smov [#allocation67]   ;;  %s571_s23 = int_to_ptr.vmem [resolvable:$true] %s570_s23 }
 0x3c0   :  { %s592_s24 = sshll.u32 %s18736_s30, 4  ;;  %s19286_s24 = int_to_ptr.vmem [resolvable:$true] %s592_s24 }
 0x3c3   :  { %s18431_s25 = scalar_lea.hbm %s21979_s18, 1024 }
 0x3c4   :  { %p18432_p2 = scmp.ne.s32.totalorder %s21979_s18, %s18431_s25  ;;  %p18435_p3 = scmp.lt.u32.totalorder %s18431_s25, %s21979_s18 }
 0x3c6   :  { %p18437_p4 = pnand %p18435_p3, %p18432_p2 }
 0x3c8   :  { %18440 = shalt.err (!%p18437_p4)
}
 0x3c9   :  { %s18441_s1 = scalar_lea.vmem %s571_s23, 1024  ;;  %p18446_p6 = scmp.lt.s32.totalorder %s571_s23, %s571_s23 }
 0x3ca   :  { %p18442_p5 = scmp.ne.s32.totalorder %s571_s23, %s18441_s1  ;;  %p18447_p7 = scmp.lt.s32.totalorder %s18441_s1, %s18441_s1 }
 0x3cc   :  { %p18448_p8 = por %p18447_p7, %p18446_p6 }
 0x3ce   :  { %p18449_p9 = pnand %p18448_p8, %p18442_p5 }
 0x3d0   :  { %18452 = shalt.err (!%p18449_p9)
}
 0x3d1   :  { %s21980_s5 = sld [smem:[#allocation135_spill]] }
 0x3d2   :  { %576 = dma.hbm_to_vmem [thread:$0]  %s21979_s18, 1024, %s571_s23, [#allocation63], %s18691_s26, %s18691_s26, %s18692_s28  }
 0x3d7   :  { %s18453_s19 = scalar_lea.hbm %s21980_s5, 1024 }
 0x3d8   :  { %p18454_p10 = scmp.ne.s32.totalorder %s21980_s5, %s18453_s19  ;;  %p18457_p11 = scmp.lt.u32.totalorder %s18453_s19, %s21980_s5 }
 0x3da   :  { %p18459_p12 = pnand %p18457_p11, %p18454_p10 }
 0x3dc   :  { %18462 = shalt.err (!%p18459_p12)
}
 0x3dd   :  { %s18463_s2 = scalar_lea.vmem %s19286_s24, 1024  ;;  %p18468_p0 = scmp.lt.s32.totalorder %s19286_s24, %s19286_s24 }
 0x3de   :  { %p18464_p13 = scmp.ne.s32.totalorder %s19286_s24, %s18463_s2  ;;  %p18469_p1 = scmp.lt.s32.totalorder %s18463_s2, %s18463_s2 }
 0x3e0   :  { %p18470_p2 = por %p18469_p1, %p18468_p0 }
 0x3e2   :  { %p18471_p3 = pnand %p18470_p2, %p18464_p13 }
 0x3e4   :  { %18474 = shalt.err (!%p18471_p3)
}
 0x3e5   :  { %s21981_s6 = sld [smem:[#allocation137_spill]]  ;;  %s18737_s7 = smov [#allocation70]  }
 0x3e6   :  { %598 = dma.hbm_to_vmem [thread:$0]  %s21980_s5, 1024, %s19286_s24, [#allocation66], %s18691_s26, %s18691_s26, %s18692_s28  }
 0x3e7   :  { %s614_s10 = sshll.u32 %s18737_s7, 4  ;;  %s18738_s9 = smov [#allocation73]   ;;  %s615_s10 = int_to_ptr.vmem [resolvable:$true] %s614_s10 }
 0x3e8   :  { %s636_s8 = sshll.u32 %s18738_s9, 4  ;;  %s19307_s8 = int_to_ptr.vmem [resolvable:$true] %s636_s8 }
 0x3eb   :  { %s18475_s3 = scalar_lea.hbm %s21981_s6, 1024 }
 0x3ec   :  { %p18476_p4 = scmp.ne.s32.totalorder %s21981_s6, %s18475_s3  ;;  %p18479_p5 = scmp.lt.u32.totalorder %s18475_s3, %s21981_s6 }
 0x3ee   :  { %p18481_p6 = pnand %p18479_p5, %p18476_p4 }
 0x3f0   :  { %18484 = shalt.err (!%p18481_p6)
}
 0x3f1   :  { %s18485_s11 = scalar_lea.vmem %s615_s10, 1024  ;;  %p18490_p8 = scmp.lt.s32.totalorder %s615_s10, %s615_s10 }
 0x3f2   :  { %p18486_p7 = scmp.ne.s32.totalorder %s615_s10, %s18485_s11  ;;  %p18491_p9 = scmp.lt.s32.totalorder %s18485_s11, %s18485_s11 }
 0x3f4   :  { %p18492_p10 = por %p18491_p9, %p18490_p8 }
 0x3f6   :  { %p18493_p11 = pnand %p18492_p10, %p18486_p7 }
 0x3f8   :  { %18496 = shalt.err (!%p18493_p11)
}
 0x3f9   :  { %s21982_s20 = sld [smem:[#allocation139_spill]] }
 0x3fa   :  { %620 = dma.hbm_to_vmem [thread:$0]  %s21981_s6, 1024, %s615_s10, [#allocation69], %s18691_s26, %s18691_s26, %s18692_s28  }
 0x3ff   :  { %s18497_s0 = scalar_lea.hbm %s21982_s20, 1024 }
 0x400   :  { %p18498_p12 = scmp.ne.s32.totalorder %s21982_s20, %s18497_s0  ;;  %p18501_p13 = scmp.lt.u32.totalorder %s18497_s0, %s21982_s20 }
 0x402   :  { %p18503_p0 = pnand %p18501_p13, %p18498_p12 }
 0x404   :  { %18506 = shalt.err (!%p18503_p0)
}
 0x405   :  { %s18507_s29 = scalar_lea.vmem %s19307_s8, 1024  ;;  %p18512_p2 = scmp.lt.s32.totalorder %s19307_s8, %s19307_s8 }
 0x406   :  { %p18508_p1 = scmp.ne.s32.totalorder %s19307_s8, %s18507_s29  ;;  %p18513_p3 = scmp.lt.s32.totalorder %s18507_s29, %s18507_s29 }
 0x408   :  { %p18514_p4 = por %p18513_p3, %p18512_p2 }
 0x40a   :  { %p18515_p5 = pnand %p18514_p4, %p18508_p1 }
 0x40c   :  { %18518 = shalt.err (!%p18515_p5)
}
 0x40d   :  { %642 = dma.hbm_to_vmem [thread:$0]  %s21982_s20, 1024, %s19307_s8, [#allocation72], %s18691_s26, %s18691_s26, %s18692_s28  }
 0x40e   :  { %s18739_s15 = smov [#allocation76]   ;;  %s18519_s4 = scalar_lea.hbm %s19001_s27, 8192 }
 0x40f   :  { %s658_s14 = sshll.u32 %s18739_s15, 4  ;;  %p18520_p6 = scmp.ne.s32.totalorder %s19001_s27, %s18519_s4  ;;  %s659_s14 = int_to_ptr.vmem [resolvable:$true] %s658_s14 }
 0x410   :  { %p18523_p7 = scmp.lt.u32.totalorder %s18519_s4, %s19001_s27 }
 0x412   :  { %p18525_p8 = pnand %p18523_p7, %p18520_p6 }
 0x414   :  { %18528 = shalt.err (!%p18525_p8)
}
 0x415   :  { %s18529_s16 = scalar_lea.vmem %s659_s14, 8192  ;;  %p18534_p10 = scmp.lt.s32.totalorder %s659_s14, %s659_s14 }
 0x416   :  { %p18530_p9 = scmp.ne.s32.totalorder %s659_s14, %s18529_s16  ;;  %p18535_p11 = scmp.lt.s32.totalorder %s18529_s16, %s18529_s16 }
 0x418   :  { %p18536_p12 = por %p18535_p11, %p18534_p10 }
 0x41a   :  { %p18537_p13 = pnand %p18536_p12, %p18530_p9 }
 0x41c   :  { %18540 = shalt.err (!%p18537_p13)
}
 0x41d   :  { %s18740_s17 = smov 512   ;;  %s18741_s26 = smov 32  }
 0x41e   :  { %664 = dma.hbm_to_vmem [thread:$0]  %s19001_s27, 8192, %s659_s14, [#allocation75], %s18740_s17, %s18740_s17, %s18741_s26  }
 0x41f   :  { %s18742_s21 = smov [#allocation77]   ;;  %s18541_s22 = scalar_lea.hbm %s19006_s13, 64 }
 0x420   :  { %s671_s18 = sshll.u32 %s18742_s21, 4  ;;  %p18542_p0 = scmp.ne.s32.totalorder %s19006_s13, %s18541_s22  ;;  %s672_s18 = int_to_ptr.vmem [resolvable:$true] %s671_s18 }
 0x421   :  { %p18545_p1 = scmp.lt.u32.totalorder %s18541_s22, %s19006_s13 }
 0x423   :  { %p18547_p2 = pnand %p18545_p1, %p18542_p0 }
 0x425   :  { %18550 = shalt.err (!%p18547_p2)
}
 0x426   :  { %s18551_s23 = scalar_lea.vmem %s672_s18, 64  ;;  %p18556_p4 = scmp.lt.s32.totalorder %s672_s18, %s672_s18 }
 0x427   :  { %p18552_p3 = scmp.ne.s32.totalorder %s672_s18, %s18551_s23  ;;  %p18557_p5 = scmp.lt.s32.totalorder %s18551_s23, %s18551_s23 }
 0x429   :  { %p18558_p6 = por %p18557_p5, %p18556_p4 }
 0x42b   :  { %p18559_p7 = pnand %p18558_p6, %p18552_p3 }
 0x42d   :  { %18562 = shalt.err (!%p18559_p7)
}
 0x42e   :  { %674 = dma.hbm_to_vmem [thread:$0]  %s19006_s13, 64, %s672_s18, [#allocation78]  }
 0x42f   :  { %18585 = dma.done.wait [#allocation3], 1024  }
 0x430   :  { %18586 = vsyncadd [#allocation3], 4294966272 }
 0x431   :  { %18587 = dma.done.wait [#allocation6], 1152  }
 0x432   :  { %18588 = vsyncadd [#allocation6], 4294966144 }
 0x433   :  { %18589 = dma.done.wait [#allocation9], 640  }
 0x434   :  { %18590 = vsyncadd [#allocation9], 4294966656 }
 0x435   :  { %18591 = dma.done.wait [#allocation12], 528  }
 0x436   :  { %18592 = vsyncadd [#allocation12], 4294966768 }
 0x437   :  { %18593 = dma.done.wait [#allocation15], 528  }
 0x438   :  { %18594 = vsyncadd [#allocation15], 4294966768 }
 0x439   :  { %18595 = dma.done.wait [#allocation18], 528  }
 0x43a   :  { %18596 = vsyncadd [#allocation18], 4294966768 }
 0x43b   :  { %18597 = dma.done.wait [#allocation21], 528  }
 0x43c   :  { %18598 = vsyncadd [#allocation21], 4294966768 }
 0x43d   :  { %18599 = dma.done.wait [#allocation24], 32  }
 0x43e   :  { %18600 = vsyncadd [#allocation24], 4294967264 }
 0x43f   :  { %18601 = dma.done.wait [#allocation27], 528  }
 0x440   :  { %18602 = vsyncadd [#allocation27], 4294966768 }
 0x441   :  { %18603 = dma.done.wait [#allocation30], 528  }
 0x442   :  { %18604 = vsyncadd [#allocation30], 4294966768 }
 0x443   :  { %18605 = dma.done.wait [#allocation33], 32  }
 0x444   :  { %18606 = vsyncadd [#allocation33], 4294967264 }
 0x445   :  { %18607 = dma.done.wait [#allocation36], 528  }
 0x446   :  { %18608 = vsyncadd [#allocation36], 4294966768 }
 0x447   :  { %18609 = dma.done.wait [#allocation39], 528  }
 0x448   :  { %18610 = vsyncadd [#allocation39], 4294966768 }
 0x449   :  { %18611 = dma.done.wait [#allocation42], 528  }
 0x44a   :  { %18612 = vsyncadd [#allocation42], 4294966768 }
 0x44b   :  { %18613 = dma.done.wait [#allocation45], 528  }
 0x44c   :  { %18614 = vsyncadd [#allocation45], 4294966768 }
 0x44d   :  { %18615 = dma.done.wait [#allocation48], 528  }
 0x44e   :  { %18616 = vsyncadd [#allocation48], 4294966768 }
 0x44f   :  { %18617 = dma.done.wait [#allocation51], 32  }
 0x450   :  { %18618 = vsyncadd [#allocation51], 4294967264 }
 0x451   :  { %18619 = dma.done.wait [#allocation54], 528  }
 0x452   :  { %18620 = vsyncadd [#allocation54], 4294966768 }
 0x453   :  { %18621 = dma.done.wait [#allocation57], 528  }
 0x454   :  { %18622 = vsyncadd [#allocation57], 4294966768 }
 0x455   :  { %18623 = dma.done.wait [#allocation60], 32  }
 0x456   :  { %18624 = vsyncadd [#allocation60], 4294967264 }
 0x457   :  { %18625 = dma.done.wait [#allocation63], 1040  }
 0x458   :  { %18626 = vsyncadd [#allocation63], 4294966256 }
 0x459   :  { %18627 = dma.done.wait [#allocation66], 1040  }
 0x45a   :  { %18628 = vsyncadd [#allocation66], 4294966256 }
 0x45b   :  { %18629 = dma.done.wait [#allocation69], 1040  }
 0x45c   :  { %18630 = vsyncadd [#allocation69], 4294966256 }
 0x45d   :  { %18631 = dma.done.wait [#allocation72], 1040  }
 0x45e   :  { %18632 = vsyncadd [#allocation72], 4294966256 }
 0x45f   :  { %18633 = dma.done.wait [#allocation75], 8208  }
 0x460   :  { %18634 = vsyncadd [#allocation75], 4294959088 }
 0x461   :  { %18635 = dma.done.wait [#allocation78], 64  }
 0x462   :  { %18636 = vsyncadd [#allocation78], 4294967232  ;;  %vm1028_vm0 = vcmask 261120   ;;  %v825_v0 = vld [vmem:[#allocation10] sm:$0xff]  ;;  %v826_v1 = vld [vmem:[#allocation10 + $0x8] sm:$0xff]  ;;  %v21891_v37 = vmov 0.0  }
 0x463   :  { %v827_v2 = vld [vmem:[#allocation10 + $0x10] sm:$0xff]  ;;  %v16778_v3 = vpack.c.bf16 %v826_v1, %v825_v0  ;;  %v828_v4 = vld [vmem:[#allocation10 + $0x18] sm:$0xff]  ;;  %v835_v8 = vld [vmem:[#allocation16] sm:$0xff]  ;;  %vm1539_vm1 = vcmask 64512   ;;  %vm18744_vm2 = vmmov 0   ;;  %s18745_s13 = smov 120  }
 0x464   :  { %v1004_v5 = vld [vmem:[#allocation2] sm:$0xff]  ;;  %v16782_v6 = vpack.c.bf16 %v828_v4, %v827_v2  ;;  %v830_v11 = vld [vmem:[#allocation13] sm:$0xff]  ;;  %v1005_v16 = vld [vmem:[#allocation2 + $0x8] sm:$0xff]  ;;  %s18746_s27 = smov 112   ;;  %s18747_s30 = smov 104   ;;  %vm6924_vm3 = vcmask 130048  }
 0x465   :  { %15790 = vmatprep.mubr.msk.f32.mxu0 %vm1028_vm0, %v1004_v5  ;;  %16779 = vmatprep.subr.bf16.mxu0 %v16778_v3  ;;  %v1008_v7 = vld [vmem:[#allocation2 + $0x20] sm:$0xff]  ;;  %v838_v14 = vld [vmem:[#allocation16 + $0x18] sm:$0xff]  ;;  %v1007_v21 = vld [vmem:[#allocation2 + $0x18] sm:$0xff]  ;;  %s18748_s24 = smov 16   ;;  %s18749_s25 = smov 24   ;;  %vm6933_vm4 = vcmask 195584  }
 0x466   :  { %17002 = vmatprep.subr.bf16.mxu1 %v16778_v3  ;;  %16781 = vmatpush3.bf16.msra.mxu0 %v16778_v3  ;;  %v836_v9 = vld [vmem:[#allocation16 + $0x8] sm:$0xff]  ;;  %v837_v13 = vld [vmem:[#allocation16 + $0x10] sm:$0xff]  ;;  %v1006_v18 = vld [vmem:[#allocation2 + $0x10] sm:$0xff]  ;;  %vm14334_vm5 = vcmask 1041409   ;;  %vm14336_vm6 = vcmask 1042434   ;;  %vm14338_vm7 = vcmask 1043459  }
 0x467   :  { %17004 = vmatpush3.bf16.msra.mxu1 %v16778_v3  ;;  %16783 = vmatprep.subr.bf16.mxu0 %v16782_v6  ;;  %v16794_v10 = vpack.c.bf16 %v836_v9, %v835_v8  ;;  %v831_v12 = vld [vmem:[#allocation13 + $0x8] sm:$0xff]  ;;  %v1009_v17 = vld [vmem:[#allocation2 + $0x28] sm:$0xff]  ;;  %v1010_v19 = vld [vmem:[#allocation2 + $0x30] sm:$0xff]  ;;  %v16798_v20 = vpack.c.bf16 %v838_v14, %v837_v13  ;;  %vm14340_vm8 = vcmask 1044484   ;;  %vm14342_vm9 = vcmask 1045509   ;;  %s18752_s1 = smov [#allocation79]  }
 0x468   :  { %17003 = vmatprep.subr.bf16.mxu1 %v16782_v6  ;;  %15796 = vmatprep.mubr.msk.f32.mxu1 %vm1028_vm0, %v1008_v7  ;;  %v16786_v15 = vpack.c.bf16 %v831_v12, %v830_v11  ;;  %v1011_v22 = vld [vmem:[#allocation2 + $0x38] sm:$0xff]  ;;  %v19343_v23 = vld [vmem:[#allocation5] sm:$0xff]  ;;  %v19349_v24 = vld [vmem:[#allocation5 + $0x8] sm:$0xff]  ;;  %vm14344_vm10 = vcmask 1046534   ;;  %vm14346_vm11 = vcmask 1047559   ;;  %vm14374_vm12 = vcmask 523264  }
 0x469   :  { %v832_v25 = vld [vmem:[#allocation13 + $0x10] sm:$0xff]  ;;  %v833_v26 = vld [vmem:[#allocation13 + $0x18] sm:$0xff]  ;;  %v1015_v29 = vld [vmem:[#allocation5 + $0x18] sm:$0xff]  ;;  %s14904_s5 = sshll.u32 %s18752_s1, 4  ;;  %s14905_s5 = int_to_ptr.vmem [resolvable:$true] %s14904_s5 }
 0x46a   :  { %16785 = vmatpush3.bf16.msra.mxu0 %v16782_v6  ;;  %v16790_v27 = vpack.c.bf16 %v833_v26, %v832_v25  ;;  %v1014_v28 = vld [vmem:[#allocation5 + $0x10] sm:$0xff]  ;;  %v1016_v30 = vld [vmem:[#allocation5 + $0x20] sm:$0xff]  ;;  %v1017_v31 = vld [vmem:[#allocation5 + $0x28] sm:$0xff]  ;;  %s18563_s19 = scalar_lea.vmem %s14905_s5, 512  ;;  %p18568_p9 = scmp.lt.s32.totalorder %s14905_s5, %s14905_s5 }
 0x46b   :  { %17005 = vmatpush3.bf16.msra.mxu1 %v16782_v6  ;;  %16795 = vmatprep.subr.bf16.mxu0 %v16794_v10  ;;  %v1018_v32 = vld [vmem:[#allocation5 + $0x30] sm:$0xff]  ;;  %v1019_v33 = vld [vmem:[#allocation5 + $0x38] sm:$0xff]  ;;  %v842_v41 = vld [vmem:[#allocation19 + $0x10] sm:$0xff]  ;;  %p18564_p8 = scmp.ne.s32.totalorder %s14905_s5, %s18563_s19  ;;  %p18569_p10 = scmp.lt.s32.totalorder %s18563_s19, %s18563_s19 }
 0x46c   :  { %16787 = vmatprep.subr.bf16.mxu1 %v16786_v15  ;;  %v840_v34 = vld [vmem:[#allocation19] sm:$0xff]  ;;  %v841_v35 = vld [vmem:[#allocation19 + $0x8] sm:$0xff]  ;;  %v14988_v38 = vld [vmem:[#allocation11] ss:$0 sm:$0xff] }
 0x46d   :  { %15791 = vmatmul.mubr.msk.f32.vlgmr.msra.gmra.mrb[0].mxu0 %vm1028_vm0, %v1005_v16  ;;  %v16802_v36 = vpack.c.bf16 %v841_v35, %v840_v34  ;;  %v843_v42 = vld [vmem:[#allocation19 + $0x18] sm:$0xff]  ;;  %p18570_p11 = por %p18569_p10, %p18568_p9 }
 0x46e   :  { %15797 = vmatmul.mubr.msk.f32.vlgmr.msra.gmra.mrb[0].mxu1 %vm1028_vm0, %v1009_v17  ;;  %15793 = vmatprep.mubr.msk.f32.mxu0 %vm1028_vm0, %v1006_v18  ;;  %v16806_v47 = vpack.c.bf16 %v843_v42, %v842_v41  ;;  %v19376_v55 = vld [vmem:[#allocation17] ss:$0 sm:$0xff]  ;;  %v14997_v5 = vld [vmem:[#allocation14] ss:$0 sm:$0xff] }
 0x46f   :  { %15799 = vmatprep.mubr.msk.f32.mxu1 %vm1028_vm0, %v1010_v19  ;;  %16797 = vmatpush3.bf16.msra.mxu0 %v16794_v10  ;;  %p18571_p12 = pnand %p18570_p11, %p18564_p8 }
 0x470   :  { %16789 = vmatpush3.bf16.msra.mxu1 %v16786_v15  ;;  %16799 = vmatprep.subr.bf16.mxu0 %v16798_v20 }
 0x471   :  { %15794 = vmatmul.mubr.msk.f32.gmra.mrb[2].mxu0 %vm1028_vm0, %v1007_v21  ;;  %16791 = vmatprep.subr.bf16.mxu1 %v16790_v27 }
 0x472   :  { %15800 = vmatmul.mubr.msk.f32.gmra.mrb[2].mxu1 %vm1028_vm0, %v1011_v22  ;;  %15830 = vmatprep.mubr.msk.f32.mxu0 %vm1028_vm0, %v19343_v23 }
 0x473   :  { %16801 = vmatpush3.bf16.msra.mxu0 %v16798_v20 }
 0x474   :  { %16793 = vmatpush3.bf16.msra.mxu1 %v16790_v27  ;;  %15862 = vmatprep.subr.mxu0 %v21891_v37 }
 0x475   :  { %16803 = vmatprep.subr.bf16.mxu1 %v16802_v36 }
 0x476   :  { %15831 = vmatmul.mubr.msk.f32.vlgmr.msra.gmra.mrb[4].mxu0 %vm1028_vm0, %v19349_v24 }
 0x477   :  { %15833 = vmatprep.mubr.msk.f32.mxu0 %vm1028_vm0, %v1014_v28 }
 0x47a   :  { %15834 = vmatmul.mubr.msk.f32.gmra.mrb[6].mxu0 %vm1028_vm0, %v1015_v29 }
 0x47b   :  { %15836 = vmatprep.mubr.msk.f32.mxu0 %vm1028_vm0, %v1016_v30 }
 0x47e   :  { %15837 = vmatmul.mubr.msk.f32.gmra.mrb[8].mxu0 %vm1028_vm0, %v1017_v31 }
 0x47f   :  { %15839 = vmatprep.mubr.msk.f32.mxu0 %vm1028_vm0, %v1018_v32 }
 0x482   :  { %15840 = vmatmul.mubr.msk.f32.gmra.mrb[10].mxu0 %vm1028_vm0, %v1019_v33 }
 0x483   :  { %15864 = vmatprep.mubr.msk.f32.mxu0 %vm18744_vm2, %v21891_v37 }
 0x540   :  { %v15792_v39 = vpop.f32.mrb[0].mxu0 }
 0x541   :  { %v15798_v40 = vpop.f32.mrb[0].mxu1  ;;  %v1119_v43 = vpop.f32.mrb[1].mxu0  ;;  %v19362_v46 = vadd.f32 %v15792_v39, %v14988_v38 }
 0x542   :  { %v1139_v44 = vpop.f32.mrb[1].mxu1  ;;  %v19360_v45 = vadd.f32 %v14988_v38, %v1119_v43  ;;  %v19378_v56 = vadd.f32 %v15798_v40, %v14988_v38 }
 0x543   :  { %21984 = vst [vmem:[#allocation141_spill] sm:$0xff] %v19362_v46  ;;  %v19370_v53 = vadd.f32 %v14988_v38, %v1139_v44 }
 0x544   :  { %21983 = vst [vmem:[#allocation140_spill] sm:$0xff] %v19360_v45  ;;  %v15795_v48 = vpop.f32.mrb[2].mxu0  ;;  %15810 = vmatprep.mubr.msk.f32.mxu1 %vm1028_vm0, %v19360_v45  ;;  %21988 = vst [vmem:[#allocation145_spill] sm:$0xff] %v19378_v56 }
 0x545   :  { %v15801_v49 = vpop.f32.mrb[2].mxu1  ;;  %v1129_v50 = vpop.f32.mrb[3].mxu0  ;;  %15811 = vmatmul.mubr.msk.f32.vlgmr.msra.gmra.mrb[4].mxu1 %vm1028_vm0, %v19362_v46  ;;  %21986 = vst [vmem:[#allocation143_spill] sm:$0xff] %v19370_v53  ;;  %v19372_v54 = vadd.f32 %v15795_v48, %v14988_v38 }
 0x546   :  { %v1149_v51 = vpop.f32.mrb[3].mxu1  ;;  %v19368_v52 = vadd.f32 %v14988_v38, %v1129_v50  ;;  %16805 = vmatpush3.bf16.msra.mxu1 %v16802_v36  ;;  %v19390_v61 = vadd.f32 %v15801_v49, %v14988_v38 }
 0x547   :  { %21987 = vst [vmem:[#allocation144_spill] sm:$0xff] %v19372_v54  ;;  %16807 = vmatprep.subr.bf16.mxu1 %v16806_v47  ;;  %v19384_v58 = vadd.f32 %v14988_v38, %v1149_v51 }
 0x548   :  { %21985 = vst [vmem:[#allocation142_spill] sm:$0xff] %v19368_v52  ;;  %15813 = vmatprep.mubr.msk.f32.mxu1 %vm1028_vm0, %v19368_v52  ;;  %21990 = vst [vmem:[#allocation147_spill] sm:$0xff] %v19390_v61 }
 0x549   :  { %15814 = vmatmul.mubr.msk.f32.gmra.mrb[6].mxu1 %vm1028_vm0, %v19372_v54  ;;  %v15832_v57 = vpop.f32.mrb[4].mxu0  ;;  %21989 = vst [vmem:[#allocation146_spill] sm:$0xff] %v19384_v58 }
 0x54a   :  { %15816 = vmatprep.mubr.msk.f32.mxu1 %vm1028_vm0, %v19370_v53  ;;  %16809 = vmatpush3.bf16.msra.mxu1 %v16806_v47  ;;  %v1389_v59 = vpop.f32.mrb[5].mxu0  ;;  %v19402_v62 = vadd.f32 %v15832_v57, %v19376_v55 }
 0x54b   :  { %v19387_v60 = vadd.f32 %v19376_v55, %v1389_v59  ;;  %15867 = vmatprep.subr.mxu1 %v21891_v37 }
 0x54d   :  { %15817 = vmatmul.mubr.msk.f32.gmra.mrb[8].mxu1 %vm1028_vm0, %v19378_v56  ;;  %15863 = vmatpush3.xpose.msk.msra.mxu0 %vm1539_vm1, %v19387_v60  ;;  %v15835_v63 = vpop.f32.mrb[6].mxu0 }
 0x54e   :  { %15819 = vmatprep.mubr.msk.f32.mxu1 %vm1028_vm0, %v19384_v58  ;;  %15872 = vmatprep.subr.mxu0 %v21891_v37  ;;  %v1399_v0 = vpop.f32.mrb[7].mxu0  ;;  %v19422_v7 = vadd.f32 %v15835_v63, %v19376_v55 }
 0x54f   :  { %v19427_v10 = vadd.f32 %v19376_v55, %v1399_v0 }
 0x551   :  { %15820 = vmatmul.mubr.msk.f32.gmra.mrb[10].mxu1 %vm1028_vm0, %v19390_v61  ;;  %v15838_v1 = vpop.f32.mrb[8].mxu0 }
 0x552   :  { %15850 = vmatprep.mubr.msk.f32.mxu1 %vm1028_vm0, %v19343_v23  ;;  %v1409_v2 = vpop.f32.mrb[9].mxu0  ;;  %v19438_v13 = vadd.f32 %v15838_v1, %v19376_v55 }
 0x553   :  { %v19445_v16 = vadd.f32 %v19376_v55, %v1409_v2 }
 0x555   :  { %15851 = vmatmul.mubr.msk.f32.vlgmr.msra.gmra.mrb[12].mxu1 %vm1028_vm0, %v19349_v24  ;;  %v15841_v3 = vpop.f32.mrb[10].mxu0 }
 0x556   :  { %15868 = vmatpush3.xpose.msk.msra.mxu1 %vm1539_vm1, %v19402_v62  ;;  %15853 = vmatprep.mubr.msk.f32.mxu1 %vm1028_vm0, %v1014_v28  ;;  %v1419_v4 = vpop.f32.mrb[11].mxu0  ;;  %v19460_v19 = vadd.f32 %v15841_v3, %v19376_v55  ;;  %v15015_v28 = vld [vmem:[#allocation20] ss:$0 sm:$0xff] }
 0x557   :  { %15877 = vmatprep.subr.mxu1 %v21891_v37  ;;  %v19469_v22 = vadd.f32 %v19376_v55, %v1419_v4 }
 0x559   :  { %15854 = vmatmul.mubr.msk.f32.gmra.mrb[14].mxu1 %vm1028_vm0, %v1015_v29 }
 0x55a   :  { %15856 = vmatprep.mubr.msk.f32.mxu1 %vm1028_vm0, %v1016_v30 }
 0x55d   :  { %15857 = vmatmul.mubr.msk.f32.gmra.mrb[16].mxu1 %vm1028_vm0, %v1017_v31 }
 0x55e   :  { %15859 = vmatprep.mubr.msk.f32.mxu1 %vm1028_vm0, %v1018_v32 }
 0x561   :  { %15860 = vmatmul.mubr.msk.f32.gmra.mrb[18].mxu1 %vm1028_vm0, %v1019_v33 }
 0x562   :  { %15869 = vmatprep.mubr.msk.f32.mxu1 %vm18744_vm2, %v21891_v37 }
 0x618   :  { %v15812_v6 = vpop.f32.mrb[4].mxu1 }
 0x619   :  { %v19424_v8 = vadd.f32 %v15812_v6, %v14997_v5  ;;  %v1254_v9 = vpop.f32.mrb[5].mxu1 }
 0x61a   :  { %v19429_v11 = vadd.f32 %v14997_v5, %v1254_v9 }
 0x61b   :  { %15870 = vmatmul.mubr.msk.f32.vlgmr.msra.gmra.mrb[20].mxu1 %vm1539_vm1, %v19424_v8 }
 0x61c   :  { %v15815_v12 = vpop.f32.mrb[6].mxu1  ;;  %15865 = vmatmul.mubr.msk.f32.vlgmr.msra.gmra.mrb[12].mxu0 %vm1539_vm1, %v19429_v11  ;;  %15878 = vmatpush3.xpose.msk.msra.mxu1 %vm1539_vm1, %v19422_v7 }
 0x61d   :  { %v19440_v14 = vadd.f32 %v15815_v12, %v14997_v5  ;;  %15873 = vmatpush3.xpose.msk.msra.mxu0 %vm1539_vm1, %v19427_v10  ;;  %v1264_v15 = vpop.f32.mrb[7].mxu1  ;;  %15879 = vmatprep.mubr.msk.f32.mxu1 %vm18744_vm2, %v21891_v37 }
 0x61e   :  { %v19449_v17 = vadd.f32 %v14997_v5, %v1264_v15  ;;  %15874 = vmatprep.mubr.msk.f32.mxu0 %vm18744_vm2, %v21891_v37  ;;  %15882 = vmatprep.subr.mxu0 %v21891_v37 }
 0x61f   :  { %15880 = vmatmul.mubr.msk.f32.vlgmr.msra.gmra.mrb[22].mxu1 %vm1539_vm1, %v19440_v14  ;;  %15887 = vmatprep.subr.mxu1 %v21891_v37 }
 0x620   :  { %v15818_v18 = vpop.f32.mrb[8].mxu1  ;;  %15875 = vmatmul.mubr.msk.f32.vlgmr.msra.gmra.mrb[14].mxu0 %vm1539_vm1, %v19449_v17  ;;  %15888 = vmatpush3.xpose.msk.msra.mxu1 %vm1539_vm1, %v19438_v13 }
 0x621   :  { %v19464_v20 = vadd.f32 %v15818_v18, %v14997_v5  ;;  %v1274_v21 = vpop.f32.mrb[9].mxu1  ;;  %15883 = vmatpush3.xpose.msk.msra.mxu0 %vm1539_vm1, %v19445_v16  ;;  %15884 = vmatprep.mubr.msk.f32.mxu0 %vm18744_vm2, %v21891_v37 }
 0x622   :  { %v19473_v23 = vadd.f32 %v14997_v5, %v1274_v21  ;;  %15889 = vmatprep.mubr.msk.f32.mxu1 %vm18744_vm2, %v21891_v37  ;;  %15892 = vmatprep.subr.mxu0 %v21891_v37 }
 0x623   :  { %15890 = vmatmul.mubr.msk.f32.vlgmr.msra.gmra.mrb[24].mxu1 %vm1539_vm1, %v19464_v20  ;;  %15897 = vmatprep.subr.mxu1 %v21891_v37 }
 0x624   :  { %v15821_v24 = vpop.f32.mrb[10].mxu1  ;;  %15885 = vmatmul.mubr.msk.f32.vlgmr.msra.gmra.mrb[16].mxu0 %vm1539_vm1, %v19473_v23  ;;  %15898 = vmatpush3.xpose.msk.msra.mxu1 %vm1539_vm1, %v19460_v19 }
 0x625   :  { %v19485_v25 = vadd.f32 %v15821_v24, %v14997_v5  ;;  %v1284_v26 = vpop.f32.mrb[11].mxu1  ;;  %15893 = vmatpush3.xpose.msk.msra.mxu0 %vm1539_vm1, %v19469_v22  ;;  %15894 = vmatprep.mubr.msk.f32.mxu0 %vm18744_vm2, %v21891_v37 }
 0x626   :  { %v19491_v27 = vadd.f32 %v14997_v5, %v1284_v26  ;;  %15899 = vmatprep.mubr.msk.f32.mxu1 %vm18744_vm2, %v21891_v37  ;;  %15902 = vmatprep.subr.mxu0 %v21891_v37 }
 0x627   :  { %15900 = vmatmul.mubr.msk.f32.vlgmr.msra.gmra.mrb[26].mxu1 %vm1539_vm1, %v19485_v25  ;;  %15907 = vmatprep.subr.mxu1 %v21891_v37 }
 0x628   :  { %15895 = vmatmul.mubr.msk.f32.vlgmr.msra.gmra.mrb[18].mxu0 %vm1539_vm1, %v19491_v27  ;;  %v15852_v29 = vpop.f32.mrb[12].mxu1  ;;  %15909 = vmatprep.mubr.msk.f32.mxu1 %vm18744_vm2, %v21891_v37 }
 0x629   :  { %v19503_v30 = vadd.f32 %v15852_v29, %v15015_v28  ;;  %v1500_v31 = vpop.f32.mrb[13].mxu1  ;;  %15904 = vmatprep.mubr.msk.f32.mxu0 %vm18744_vm2, %v21891_v37 }
 0x62a   :  { %v19507_v32 = vadd.f32 %v15015_v28, %v1500_v31 }
 0x62b   :  { %15908 = vmatpush3.msra.mxu1 %v19503_v30 }
 0x62c   :  { %v15855_v33 = vpop.f32.mrb[14].mxu1  ;;  %15903 = vmatpush3.msra.mxu0 %v19507_v32  ;;  %15917 = vmatprep.subr.mxu1 %v21891_v37 }
 0x62d   :  { %v19512_v34 = vadd.f32 %v15855_v33, %v15015_v28  ;;  %v1510_v35 = vpop.f32.mrb[15].mxu1  ;;  %15912 = vmatprep.subr.mxu0 %v21891_v37 }
 0x62e   :  { %v19515_v36 = vadd.f32 %v15015_v28, %v1510_v35 }
 0x630   :  { %v15858_v38 = vpop.f32.mrb[16].mxu1 }
 0x631   :  { %v19517_v39 = vadd.f32 %v15858_v38, %v15015_v28  ;;  %v1520_v40 = vpop.f32.mrb[17].mxu1 }
 0x632   :  { %v19519_v41 = vadd.f32 %v15015_v28, %v1520_v40 }
 0x634   :  { %v15861_v42 = vpop.f32.mrb[18].mxu1 }
 0x635   :  { %v19521_v43 = vadd.f32 %v15861_v42, %v15015_v28  ;;  %v1530_v44 = vpop.f32.mrb[19].mxu1 }
 0x636   :  { %v19523_v47 = vadd.f32 %v15015_v28, %v1530_v44 }
 0x6ee   :  { %v1688_v48 = vpop.f32.mrb[20].mxu1 }
 0x6ef   :  { %v1612_v49 = vpop.f32.mrb[12].mxu0  ;;  %v15871_v50 = vpop.f32.mrb[21].mxu1  ;;  %v2149_v57 = vmul.f32 0.35355338, %v1688_v48 }
 0x6f0   :  { %v2148_v51 = vmul.f32 0.35355338, %v1612_v49  ;;  %v15866_v55 = vpop.f32.mrb[13].mxu0 }
 0x6f1   :  { %v2159_v6 = vsel %vm1539_vm1, %v2149_v57, -inf }
 0x6f2   :  { %v1840_v59 = vpop.f32.mrb[22].mxu1  ;;  %v2156_v63 = vsel %vm1539_vm1, %v2148_v51, -inf }
 0x6f3   :  { %v15881_v0 = vpop.f32.mrb[23].mxu1  ;;  %2157 = vmax.xlane.f32.xlu0 %v2156_v63  ;;  %v1764_v1 = vpop.f32.mrb[14].mxu0  ;;  %v2151_v4 = vmul.f32 0.35355338, %v1840_v59 }
 0x6f4   :  { %v2150_v2 = vmul.f32 0.35355338, %v1764_v1  ;;  %v15876_v3 = vpop.f32.mrb[15].mxu0 }
 0x6f5   :  { %v2165_v26 = vsel %vm1539_vm1, %v2151_v4, -inf }
 0x6f6   :  { %v1992_v5 = vpop.f32.mrb[24].mxu1  ;;  %v2162_v9 = vsel %vm1539_vm1, %v2150_v2, -inf }
 0x6f7   :  { %2160 = vmax.xlane.f32.xlu0 %v2159_v6  ;;  %2163 = vmax.xlane.f32.xlu1 %v2162_v9  ;;  %v1916_v12 = vpop.f32.mrb[16].mxu0  ;;  %v15891_v15 = vpop.f32.mrb[25].mxu1  ;;  %v2153_v24 = vmul.f32 0.35355338, %v1992_v5 }
 0x6f8   :  { %v2152_v18 = vmul.f32 0.35355338, %v1916_v12  ;;  %v15886_v21 = vpop.f32.mrb[17].mxu0 }
 0x6f9   :  { %v2171_v42 = vsel %vm1539_vm1, %v2153_v24, -inf }
 0x6fa   :  { %v2168_v28 = vsel %vm1539_vm1, %v2152_v18, -inf  ;;  %v2144_v29 = vpop.f32.mrb[26].mxu1 }
 0x6fb   :  { %2166 = vmax.xlane.f32.xlu1 %v2165_v26  ;;  %2169 = vmax.xlane.f32.xlu0 %v2168_v28  ;;  %v2068_v31 = vpop.f32.mrb[18].mxu0  ;;  %v15901_v33 = vpop.f32.mrb[27].mxu1  ;;  %v2155_v38 = vmul.f32 0.35355338, %v2144_v29 }
 0x6fc   :  { %v2154_v35 = vmul.f32 0.35355338, %v2068_v31  ;;  %v15896_v40 = vpop.f32.mrb[19].mxu0 }
 0x6fd   :  { %v2177_v48 = vsel %vm1539_vm1, %v2155_v38, -inf }
 0x6fe   :  { %v2174_v44 = vsel %vm1539_vm1, %v2154_v35, -inf }
 0x6ff   :  { %2172 = vmax.xlane.f32.xlu1 %v2171_v42  ;;  %2175 = vmax.xlane.f32.xlu0 %v2174_v44 }
 0x703   :  { %2178 = vmax.xlane.f32.xlu1 %v2177_v48 }
 0x714   :  { %2908 = vrot.lane.b32.xlu1 %v19402_v62, %s18745_s13 }
 0x715   :  { %2830 = vrot.lane.b32.xlu0 %v19387_v60, %s18745_s13 }
 0x718   :  { %2828 = vrot.lane.b32.xlu1 %v19429_v11, %s18745_s13 }
 0x719   :  { %2986 = vrot.lane.b32.xlu0 %v19427_v10, %s18745_s13 }
 0x71c   :  { %2906 = vrot.lane.b32.xlu1 %v19424_v8, %s18745_s13 }
 0x720   :  { %3064 = vrot.lane.b32.xlu1 %v19422_v7, %s18745_s13 }
 0x780   :  { %v2158_v49 = vpop.xlane.xlu0 %2157 }
 0x781   :  { %v2180_v50 = vsub.f32 %v2148_v51, %v2158_v49 }
 0x783   :  { %v2188_v55 = vmul.f32 1.442695, %v2180_v50 }
 0x784   :  { %v2161_v59 = vpop.xlane.xlu0 %2160  ;;  %v2164_v63 = vpop.xlane.xlu1 %2163 }
 0x785   :  { %17120 = vpow2.f32 %v2188_v55  ;;  %v2181_v0 = vsub.f32 %v2149_v57, %v2161_v59  ;;  %v2182_v1 = vsub.f32 %v2150_v2, %v2164_v63 }
 0x787   :  { %v2190_v3 = vmul.f32 1.442695, %v2181_v0  ;;  %v2192_v5 = vmul.f32 1.442695, %v2182_v1 }
 0x788   :  { %v2167_v6 = vpop.xlane.xlu1 %2166  ;;  %v2170_v9 = vpop.xlane.xlu0 %2169 }
 0x789   :  { %17122 = vpow2.f32 %v2190_v3  ;;  %v2183_v12 = vsub.f32 %v2151_v4, %v2167_v6  ;;  %v2184_v15 = vsub.f32 %v2152_v18, %v2170_v9 }
 0x78a   :  { %17124 = vpow2.f32 %v2192_v5 }
 0x78b   :  { %v2194_v21 = vmul.f32 1.442695, %v2183_v12  ;;  %v2196_v26 = vmul.f32 1.442695, %v2184_v15 }
 0x78c   :  { %v2173_v28 = vpop.xlane.xlu1 %2172  ;;  %v2176_v29 = vpop.xlane.xlu0 %2175 }
 0x78d   :  { %17126 = vpow2.f32 %v2194_v21  ;;  %v2185_v51 = vsub.f32 %v2153_v24, %v2173_v28  ;;  %v2186_v31 = vsub.f32 %v2154_v35, %v2176_v29 }
 0x78e   :  { %17128 = vpow2.f32 %v2196_v26 }
 0x78f   :  { %v17121_v33 = vpop.eup %17120  ;;  %v2198_v40 = vmul.f32 1.442695, %v2185_v51  ;;  %v2200_v57 = vmul.f32 1.442695, %v2186_v31 }
 0x790   :  { %v2179_v2 = vpop.xlane.xlu1 %2178  ;;  %v2204_v42 = vsel %vm1539_vm1, %v17121_v33, 0.0  ;;  %v19592_v12 = vpop.permute.xlu0 %2830 }
 0x791   :  { %17130 = vpow2.f32 %v2198_v40  ;;  %v2187_v44 = vsub.f32 %v2155_v38, %v2179_v2  ;;  %2205 = vadd.xlane.f32.xlu0 %v2204_v42 }
 0x792   :  { %17132 = vpow2.f32 %v2200_v57 }
 0x793   :  { %v17123_v4 = vpop.eup %17122  ;;  %v2202_v18 = vmul.f32 1.442695, %v2187_v44 }
 0x794   :  { %v17125_v48 = vpop.eup %17124  ;;  %v2207_v49 = vsel %vm1539_vm1, %v17123_v4, 0.0  ;;  %v19588_v6 = vpop.permute.xlu1 %2908 }
 0x795   :  { %17134 = vpow2.f32 %v2202_v18  ;;  %2208 = vadd.xlane.f32.xlu1 %v2207_v49  ;;  %v2210_v24 = vsel %vm1539_vm1, %v17125_v48, 0.0  ;;  %v19596_v21 = vpop.permute.xlu0 %2986 }
 0x796   :  { %2211 = vadd.xlane.f32.xlu0 %v2210_v24 }
 0x797   :  { %v19548_v35 = vpop.eup %17126 }
 0x798   :  { %v19550_v50 = vpop.eup %17128  ;;  %v2213_v55 = vsel %vm1539_vm1, %v19548_v35, 0.0  ;;  %v19590_v9 = vpop.permute.xlu1 %2828 }
 0x799   :  { %2214 = vadd.xlane.f32.xlu1 %v2213_v55  ;;  %v2216_v38 = vsel %vm1539_vm1, %v19550_v50, 0.0 }
 0x79a   :  { %2217 = vadd.xlane.f32.xlu0 %v2216_v38 }
 0x79b   :  { %v19556_v59 = vpop.eup %17130 }
 0x79c   :  { %v19558_v63 = vpop.eup %17132  ;;  %v2219_v0 = vsel %vm1539_vm1, %v19556_v59, 0.0  ;;  %v19594_v15 = vpop.permute.xlu1 %2906 }
 0x79d   :  { %2220 = vadd.xlane.f32.xlu1 %v2219_v0  ;;  %v2222_v1 = vsel %vm1539_vm1, %v19558_v63, 0.0 }
 0x79e   :  { %2223 = vadd.xlane.f32.xlu0 %v2222_v1 }
 0x79f   :  { %v19564_v3 = vpop.eup %17134 }
 0x7a0   :  { %v2225_v5 = vsel %vm1539_vm1, %v19564_v3, 0.0  ;;  %v19598_v26 = vpop.permute.xlu1 %3064 }
 0x7a1   :  { %2226 = vadd.xlane.f32.xlu1 %v2225_v5 }
 0x7b2   :  { %3062 = vrot.lane.b32.xlu1 %v19440_v14, %s18745_s13 }
 0x7b4   :  { %2984 = vrot.lane.b32.xlu0 %v19449_v17, %s18745_s13 }
 0x7b6   :  { %3220 = vrot.lane.b32.xlu1 %v19438_v13, %s18745_s13 }
 0x7b8   :  { %3142 = vrot.lane.b32.xlu0 %v19445_v16, %s18745_s13 }
 0x7ba   :  { %3218 = vrot.lane.b32.xlu1 %v19464_v20, %s18745_s13 }
 0x7bc   :  { %3140 = vrot.lane.b32.xlu0 %v19473_v23, %s18745_s13 }
 0x7be   :  { %3376 = vrot.lane.b32.xlu1 %v19460_v19, %s18745_s13 }
 0x7c0   :  { %3298 = vrot.lane.b32.xlu0 %v19469_v22, %s18745_s13 }
 0x7c2   :  { %3374 = vrot.lane.b32.xlu1 %v19485_v25, %s18745_s13 }
 0x7c4   :  { %3296 = vrot.lane.b32.xlu0 %v19491_v27, %s18745_s13 }
 0x81e   :  { %v2206_v28 = vpop.xlane.xlu0 %2205 }
 0x81f   :  { %17136 = vrcp.f32 %v2206_v28 }
 0x822   :  { %v2209_v29 = vpop.xlane.xlu1 %2208 }
 0x823   :  { %17138 = vrcp.f32 %v2209_v29  ;;  %v2212_v51 = vpop.xlane.xlu0 %2211 }
 0x824   :  { %17140 = vrcp.f32 %v2212_v51 }
 0x826   :  { %v2215_v31 = vpop.xlane.xlu1 %2214 }
 0x827   :  { %17142 = vrcp.f32 %v2215_v31  ;;  %v2218_v40 = vpop.xlane.xlu0 %2217 }
 0x828   :  { %17144 = vrcp.f32 %v2218_v40 }
 0x829   :  { %v17137_v57 = vpop.eup %17136 }
 0x82a   :  { %v2221_v2 = vpop.xlane.xlu1 %2220  ;;  %v2229_v42 = vmul.f32 %v17137_v57, %v17121_v33 }
 0x82b   :  { %17146 = vrcp.f32 %v2221_v2  ;;  %v2224_v44 = vpop.xlane.xlu0 %2223 }
 0x82c   :  { %17148 = vrcp.f32 %v2224_v44  ;;  %15905 = vmatmul.mubr.msk.f32.vlgmr.msra.gmra.mrb[20].mxu0 %vm1539_vm1, %v2229_v42 }
 0x82d   :  { %v17139_v18 = vpop.eup %17138  ;;  %15913 = vmatpush3.msra.mxu0 %v19515_v36  ;;  %15914 = vmatprep.mubr.msk.f32.mxu0 %vm18744_vm2, %v21891_v37 }
 0x82e   :  { %v17141_v49 = vpop.eup %17140  ;;  %v2227_v24 = vpop.xlane.xlu1 %2226  ;;  %15922 = vmatprep.subr.mxu0 %v21891_v37  ;;  %v2231_v55 = vmul.f32 %v17139_v18, %v17123_v4 }
 0x82f   :  { %17150 = vrcp.f32 %v2227_v24  ;;  %v2233_v38 = vmul.f32 %v17141_v49, %v17125_v48  ;;  %v2985_v5 = vpop.permute.xlu0 %2984 }
 0x830   :  { %15910 = vmatmul.mubr.msk.f32.vlgmr.msra.gmra.mrb[28].mxu1 %vm1539_vm1, %v2231_v55 }
 0x831   :  { %v17143_v33 = vpop.eup %17142  ;;  %15915 = vmatmul.mubr.msk.f32.vlgmr.msra.gmra.mrb[22].mxu0 %vm1539_vm1, %v2233_v38  ;;  %15918 = vmatpush3.msra.mxu1 %v19512_v34 }
 0x832   :  { %v17145_v0 = vpop.eup %17144  ;;  %15923 = vmatpush3.msra.mxu0 %v19519_v41  ;;  %15919 = vmatprep.mubr.msk.f32.mxu1 %vm18744_vm2, %v21891_v37  ;;  %v2235_v1 = vmul.f32 %v17143_v33, %v19548_v35  ;;  %v3063_v29 = vpop.permute.xlu1 %3062 }
 0x833   :  { %15924 = vmatprep.mubr.msk.f32.mxu0 %vm18744_vm2, %v21891_v37  ;;  %15927 = vmatprep.subr.mxu1 %v21891_v37  ;;  %v2237_v4 = vmul.f32 %v17145_v0, %v19550_v50  ;;  %v3143_v31 = vpop.permute.xlu0 %3142 }
 0x834   :  { %15932 = vmatprep.subr.mxu0 %v21891_v37  ;;  %15920 = vmatmul.mubr.msk.f32.vlgmr.msra.gmra.mrb[30].mxu1 %vm1539_vm1, %v2235_v1 }
 0x835   :  { %v17147_v48 = vpop.eup %17146  ;;  %15925 = vmatmul.mubr.msk.f32.vlgmr.msra.gmra.mrb[24].mxu0 %vm1539_vm1, %v2237_v4  ;;  %15928 = vmatpush3.msra.mxu1 %v19517_v39 }
 0x836   :  { %v17149_v28 = vpop.eup %17148  ;;  %15933 = vmatpush3.msra.mxu0 %v19523_v47  ;;  %15929 = vmatprep.mubr.msk.f32.mxu1 %vm18744_vm2, %v21891_v37  ;;  %v2239_v35 = vmul.f32 %v17147_v48, %v19556_v59 }
 0x837   :  { %15934 = vmatprep.mubr.msk.f32.mxu0 %vm18744_vm2, %v21891_v37  ;;  %15937 = vmatprep.subr.mxu1 %v21891_v37  ;;  %v2241_v50 = vmul.f32 %v17149_v28, %v19558_v63  ;;  %v3221_v63 = vpop.permute.xlu1 %3220  ;;  %v3141_v40 = vpop.permute.xlu0 %3140 }
 0x838   :  { %15930 = vmatmul.mubr.msk.f32.vlgmr.msra.gmra.mrb[32].mxu1 %vm1539_vm1, %v2239_v35  ;;  %15942 = vmatprep.subr.mxu0 %v21891_v37 }
 0x839   :  { %v17151_v51 = vpop.eup %17150  ;;  %15935 = vmatmul.mubr.msk.f32.vlgmr.msra.gmra.mrb[26].mxu0 %vm1539_vm1, %v2241_v50  ;;  %15938 = vmatpush3.msra.mxu1 %v19521_v43 }
 0x83a   :  { %15939 = vmatprep.mubr.msk.f32.mxu1 %vm18744_vm2, %v21891_v37  ;;  %v2243_v59 = vmul.f32 %v17151_v51, %v19564_v3  ;;  %15944 = vmatprep.mubr.msk.f32.mxu0 %vm18744_vm2, %v21891_v37 }
 0x83b   :  { %15947 = vmatprep.subr.mxu1 %v21891_v37  ;;  %v3219_v3 = vpop.permute.xlu1 %3218 }
 0x83c   :  { %15940 = vmatmul.mubr.msk.f32.vlgmr.msra.gmra.mrb[34].mxu1 %vm1539_vm1, %v2243_v59 }
 0x83d   :  { %15943 = vmatpush3.xpose.msk.msra.mxu0 %vm1539_vm1, %v19592_v12  ;;  %15949 = vmatprep.mubr.msk.f32.mxu1 %vm18744_vm2, %v21891_v37 }
 0x83e   :  { %15952 = vmatprep.subr.mxu0 %v21891_v37 }
 0x840   :  { %15945 = vmatmul.mubr.msk.f32.vlgmr.msra.gmra.mrb[28].mxu0 %vm1539_vm1, %v19590_v9  ;;  %15948 = vmatpush3.xpose.msk.msra.mxu1 %vm1539_vm1, %v19588_v6  ;;  %v3299_v6 = vpop.permute.xlu0 %3298  ;;  %v3377_v9 = vpop.permute.xlu1 %3376 }
 0x841   :  { %15953 = vmatpush3.xpose.msk.msra.mxu0 %vm1539_vm1, %v19596_v21  ;;  %15954 = vmatprep.mubr.msk.f32.mxu0 %vm18744_vm2, %v21891_v37 }
 0x842   :  { %15957 = vmatprep.subr.mxu1 %v21891_v37  ;;  %15962 = vmatprep.subr.mxu0 %v21891_v37 }
 0x843   :  { %15950 = vmatmul.mubr.msk.f32.vlgmr.msra.gmra.mrb[36].mxu1 %vm1539_vm1, %v19594_v15 }
 0x844   :  { %15955 = vmatmul.mubr.msk.f32.vlgmr.msra.gmra.mrb[30].mxu0 %vm1539_vm1, %v2985_v5  ;;  %15958 = vmatpush3.xpose.msk.msra.mxu1 %vm1539_vm1, %v19598_v26  ;;  %v3297_v12 = vpop.permute.xlu0 %3296  ;;  %v3375_v15 = vpop.permute.xlu1 %3374 }
 0x845   :  { %15963 = vmatpush3.xpose.msk.msra.mxu0 %vm1539_vm1, %v3143_v31  ;;  %15959 = vmatprep.mubr.msk.f32.mxu1 %vm18744_vm2, %v21891_v37 }
 0x846   :  { %15964 = vmatprep.mubr.msk.f32.mxu0 %vm18744_vm2, %v21891_v37  ;;  %15967 = vmatprep.subr.mxu1 %v21891_v37 }
 0x847   :  { %15960 = vmatmul.mubr.msk.f32.vlgmr.msra.gmra.mrb[38].mxu1 %vm1539_vm1, %v3063_v29  ;;  %15972 = vmatprep.subr.mxu0 %v21891_v37 }
 0x848   :  { %15965 = vmatmul.mubr.msk.f32.vlgmr.msra.gmra.mrb[32].mxu0 %vm1539_vm1, %v3141_v40  ;;  %15968 = vmatpush3.xpose.msk.msra.mxu1 %vm1539_vm1, %v3221_v63 }
 0x849   :  { %15973 = vmatpush3.xpose.msk.msra.mxu0 %vm1539_vm1, %v3299_v6  ;;  %15969 = vmatprep.mubr.msk.f32.mxu1 %vm18744_vm2, %v21891_v37 }
 0x84a   :  { %15974 = vmatprep.mubr.msk.f32.mxu0 %vm18744_vm2, %v21891_v37  ;;  %15977 = vmatprep.subr.mxu1 %v21891_v37 }
 0x84b   :  { %15970 = vmatmul.mubr.msk.f32.vlgmr.msra.gmra.mrb[40].mxu1 %vm1539_vm1, %v3219_v3  ;;  %15982 = vmatprep.subr.mxu0 %v21891_v37 }
 0x84c   :  { %15975 = vmatmul.mubr.msk.f32.vlgmr.msra.gmra.mrb[34].mxu0 %vm1539_vm1, %v3297_v12  ;;  %15978 = vmatpush3.xpose.msk.msra.mxu1 %vm1539_vm1, %v3377_v9 }
 0x84d   :  { %15979 = vmatprep.mubr.msk.f32.mxu1 %vm18744_vm2, %v21891_v37  ;;  %15987 = vmatprep.subr.mxu1 %v21891_v37 }
 0x84e   :  { %15984 = vmatprep.mubr.msk.f32.mxu0 %vm18744_vm2, %v21891_v37 }
 0x84f   :  { %15980 = vmatmul.mubr.msk.f32.vlgmr.msra.gmra.mrb[42].mxu1 %vm1539_vm1, %v3375_v15 }
 0x850   :  { %15989 = vmatprep.mubr.msk.f32.mxu1 %vm18744_vm2, %v21891_v37 }
 0x8ff   :  { %v19687_v21 = vpop.f32.mrb[20].mxu0 }
 0x900   :  { %v15906_v26 = vpop.f32.mrb[21].mxu0 }
 0x903   :  { %v19689_v57 = vpop.f32.mrb[28].mxu1 }
 0x904   :  { %v19691_v2 = vpop.f32.mrb[22].mxu0  ;;  %v15911_v42 = vpop.f32.mrb[29].mxu1 }
 0x905   :  { %v15916_v44 = vpop.f32.mrb[23].mxu0 }
 0x907   :  { %v19693_v18 = vpop.f32.mrb[30].mxu1 }
 0x908   :  { %21991 = vst [vmem:[#allocation148_spill] sm:$0xff] %v19693_v18  ;;  %v19695_v49 = vpop.f32.mrb[24].mxu0  ;;  %v15921_v24 = vpop.f32.mrb[31].mxu1 }
 0x909   :  { %21992 = vst [vmem:[#allocation149_spill] sm:$0xff] %v19695_v49  ;;  %v15926_v55 = vpop.f32.mrb[25].mxu0 }
 0x90b   :  { %v19697_v38 = vpop.f32.mrb[32].mxu1 }
 0x90c   :  { %21993 = vst [vmem:[#allocation150_spill] sm:$0xff] %v19697_v38  ;;  %v19699_v33 = vpop.f32.mrb[26].mxu0  ;;  %v15931_v0 = vpop.f32.mrb[33].mxu1 }
 0x90d   :  { %21994 = vst [vmem:[#allocation151_spill] sm:$0xff] %v19699_v33  ;;  %v15936_v1 = vpop.f32.mrb[27].mxu0 }
 0x90f   :  { %v19701_v5 = vpop.f32.mrb[34].mxu1 }
 0x910   :  { %21995 = vst [vmem:[#allocation152_spill] sm:$0xff] %v19701_v5  ;;  %v15941_v4 = vpop.f32.mrb[35].mxu1 }
 0x913   :  { %v2902_v48 = vpop.f32.mrb[28].mxu0 }
 0x914   :  { %v3452_v28 = vmul.f32 0.35355338, %v2902_v48  ;;  %v15946_v29 = vpop.f32.mrb[29].mxu0 }
 0x916   :  { %v2980_v35 = vpop.f32.mrb[36].mxu1  ;;  %v3460_v50 = vsel %vm1539_vm1, %v3452_v28, -inf }
 0x917   :  { %v3453_v51 = vmul.f32 0.35355338, %v2980_v35  ;;  %3461 = vmax.xlane.f32.xlu0 %v3460_v50  ;;  %v3058_v31 = vpop.f32.mrb[30].mxu0  ;;  %v15951_v59 = vpop.f32.mrb[37].mxu1 }
 0x918   :  { %v15956_v63 = vpop.f32.mrb[31].mxu0  ;;  %v3454_v26 = vmul.f32 0.35355338, %v3058_v31 }
 0x919   :  { %v3463_v40 = vsel %vm1539_vm1, %v3453_v51, -inf }
 0x91a   :  { %3464 = vmax.xlane.f32.xlu1 %v3463_v40  ;;  %v3136_v3 = vpop.f32.mrb[38].mxu1  ;;  %v3466_v29 = vsel %vm1539_vm1, %v3454_v26, -inf }
 0x91b   :  { %v3455_v6 = vmul.f32 0.35355338, %v3136_v3  ;;  %v3214_v9 = vpop.f32.mrb[32].mxu0  ;;  %v15961_v12 = vpop.f32.mrb[39].mxu1 }
 0x91c   :  { %v15966_v15 = vpop.f32.mrb[33].mxu0  ;;  %v3456_v4 = vmul.f32 0.35355338, %v3214_v9 }
 0x91d   :  { %v3469_v42 = vsel %vm1539_vm1, %v3455_v6, -inf }
 0x91e   :  { %v3292_v44 = vpop.f32.mrb[40].mxu1  ;;  %3470 = vmax.xlane.f32.xlu0 %v3469_v42  ;;  %v3472_v40 = vsel %vm1539_vm1, %v3456_v4, -inf }
 0x91f   :  { %v3457_v24 = vmul.f32 0.35355338, %v3292_v44  ;;  %v3370_v55 = vpop.f32.mrb[34].mxu0  ;;  %v15971_v0 = vpop.f32.mrb[41].mxu1 }
 0x920   :  { %v15976_v1 = vpop.f32.mrb[35].mxu0  ;;  %v3458_v63 = vmul.f32 0.35355338, %v3370_v55 }
 0x921   :  { %v3475_v48 = vsel %vm1539_vm1, %v3457_v24, -inf }
 0x922   :  { %3476 = vmax.xlane.f32.xlu1 %v3475_v48  ;;  %v3448_v35 = vpop.f32.mrb[42].mxu1  ;;  %3467 = vmax.xlane.f32.xlu0 %v3466_v29  ;;  %v3478_v3 = vsel %vm1539_vm1, %v3458_v63, -inf }
 0x923   :  { %v3459_v50 = vmul.f32 0.35355338, %v3448_v35  ;;  %v15981_v59 = vpop.f32.mrb[43].mxu1 }
 0x925   :  { %v3481_v31 = vsel %vm1539_vm1, %v3459_v50, -inf }
 0x926   :  { %3482 = vmax.xlane.f32.xlu1 %v3481_v31  ;;  %3473 = vmax.xlane.f32.xlu0 %v3472_v40 }
 0x92a   :  { %3479 = vmax.xlane.f32.xlu0 %v3478_v3 }
 0x937   :  { %3626 = vrot.lane.b32.xlu1 %v19503_v30, %s18745_s13 }
 0x93b   :  { %3703 = vrot.lane.b32.xlu1 %v19515_v36, %s18745_s13 }
 0x93f   :  { %3780 = vrot.lane.b32.xlu1 %v19512_v34, %s18745_s13 }
 0x940   :  { %3549 = vrot.lane.b32.xlu0 %v19507_v32, %s18745_s13 }
 0x943   :  { %3934 = vrot.lane.b32.xlu1 %v19517_v39, %s18745_s13 }
 0x944   :  { %3857 = vrot.lane.b32.xlu0 %v19519_v41, %s18745_s13 }
 0x947   :  { %4088 = vrot.lane.b32.xlu1 %v19521_v43, %s18745_s13 }
 0x948   :  { %4011 = vrot.lane.b32.xlu0 %v19523_v47, %s18745_s13 }
 0x94b   :  { %4244 = vrot.lane.b32.xlu1 %v19402_v62, %s18746_s27 }
 0x94c   :  { %4166 = vrot.lane.b32.xlu0 %v19387_v60, %s18746_s27 }
 0x94f   :  { %4242 = vrot.lane.b32.xlu1 %v19424_v8, %s18746_s27 }
 0x950   :  { %4164 = vrot.lane.b32.xlu0 %v19429_v11, %s18746_s27 }
 0x953   :  { %4400 = vrot.lane.b32.xlu1 %v19422_v7, %s18746_s27 }
 0x954   :  { %4322 = vrot.lane.b32.xlu0 %v19427_v10, %s18746_s27 }
 0x9a4   :  { %v3462_v9 = vpop.xlane.xlu0 %3461 }
 0x9a5   :  { %v3484_v12 = vsub.f32 %v3452_v28, %v3462_v9 }
 0x9a7   :  { %v3492_v15 = vmul.f32 1.442695, %v3484_v12  ;;  %v3465_v42 = vpop.xlane.xlu1 %3464 }
 0x9a8   :  { %v3485_v44 = vsub.f32 %v3453_v51, %v3465_v42 }
 0x9a9   :  { %17152 = vpow2.f32 %v3492_v15 }
 0x9aa   :  { %v3494_v55 = vmul.f32 1.442695, %v3485_v44 }
 0x9ab   :  { %v3471_v0 = vpop.xlane.xlu0 %3470 }
 0x9ac   :  { %17154 = vpow2.f32 %v3494_v55  ;;  %v3487_v1 = vsub.f32 %v3455_v6, %v3471_v0 }
 0x9ae   :  { %v3498_v48 = vmul.f32 1.442695, %v3487_v1 }
 0x9af   :  { %v3477_v29 = vpop.xlane.xlu1 %3476  ;;  %v3468_v35 = vpop.xlane.xlu0 %3467 }
 0x9b0   :  { %17156 = vpow2.f32 %v3498_v48  ;;  %v3489_v59 = vsub.f32 %v3457_v24, %v3477_v29  ;;  %v3486_v31 = vsub.f32 %v3454_v26, %v3468_v35 }
 0x9b2   :  { %v3502_v40 = vmul.f32 1.442695, %v3489_v59  ;;  %v3496_v3 = vmul.f32 1.442695, %v3486_v31 }
 0x9b3   :  { %v19739_v37 = vpop.eup %17152  ;;  %v3483_v58 = vpop.xlane.xlu1 %3482 }
 0x9b4   :  { %v3474_v28 = vpop.xlane.xlu0 %3473  ;;  %17158 = vpow2.f32 %v3502_v40  ;;  %v3491_v9 = vsub.f32 %v3459_v50, %v3483_v58  ;;  %v3508_v12 = vsel %vm1539_vm1, %v19739_v37, 0.0  ;;  %v21996_v58 = vmov 0.0  }
 0x9b5   :  { %v3488_v51 = vsub.f32 %v3456_v4, %v3474_v28  ;;  %17160 = vpow2.f32 %v3496_v3  ;;  %3509 = vadd.xlane.f32.xlu0 %v3508_v12 }
 0x9b6   :  { %v19743_v6 = vpop.eup %17154  ;;  %v3506_v15 = vmul.f32 1.442695, %v3491_v9 }
 0x9b7   :  { %v3500_v42 = vmul.f32 1.442695, %v3488_v51  ;;  %v3627_v24 = vpop.permute.xlu1 %3626  ;;  %v3511_v44 = vsel %vm1539_vm1, %v19743_v6, 0.0 }
 0x9b8   :  { %v3480_v26 = vpop.xlane.xlu0 %3479  ;;  %17162 = vpow2.f32 %v3506_v15  ;;  %3512 = vadd.xlane.f32.xlu1 %v3511_v44  ;;  %15988 = vmatpush3.msra.mxu1 %v3627_v24 }
 0x9b9   :  { %v3490_v55 = vsub.f32 %v3458_v63, %v3480_v26  ;;  %17164 = vpow2.f32 %v3500_v42  ;;  %15997 = vmatprep.subr.mxu1 %v21996_v58 }
 0x9ba   :  { %v19748_v4 = vpop.eup %17156 }
 0x9bb   :  { %v3504_v50 = vmul.f32 1.442695, %v3490_v55  ;;  %v3517_v1 = vsel %vm1539_vm1, %v19748_v4, 0.0  ;;  %v3704_v51 = vpop.permute.xlu1 %3703 }
 0x9bc   :  { %v3550_v0 = vpop.permute.xlu0 %3549  ;;  %3518 = vadd.xlane.f32.xlu1 %v3517_v1 }
 0x9bd   :  { %17166 = vpow2.f32 %v3504_v50  ;;  %15983 = vmatpush3.msra.mxu0 %v3550_v0 }
 0x9be   :  { %15992 = vmatprep.subr.mxu0 %v21996_v58  ;;  %v19753_v48 = vpop.eup %17158 }
 0x9bf   :  { %v19755_v63 = vpop.eup %17160  ;;  %v3523_v29 = vsel %vm1539_vm1, %v19753_v48, 0.0  ;;  %v3781_v12 = vpop.permute.xlu1 %3780 }
 0x9c0   :  { %3524 = vadd.xlane.f32.xlu1 %v3523_v29  ;;  %v3514_v35 = vsel %vm1539_vm1, %v19755_v63, 0.0  ;;  %v3858_v15 = vpop.permute.xlu0 %3857 }
 0x9c1   :  { %3515 = vadd.xlane.f32.xlu0 %v3514_v35 }
 0x9c2   :  { %v19761_v59 = vpop.eup %17162 }
 0x9c3   :  { %v19763_v31 = vpop.eup %17164  ;;  %v3529_v40 = vsel %vm1539_vm1, %v19761_v59, 0.0  ;;  %v3935_v42 = vpop.permute.xlu1 %3934 }
 0x9c4   :  { %3530 = vadd.xlane.f32.xlu1 %v3529_v40  ;;  %v3520_v3 = vsel %vm1539_vm1, %v19763_v31, 0.0  ;;  %v19817_v24 = vpop.permute.xlu0 %4011 }
 0x9c5   :  { %3521 = vadd.xlane.f32.xlu0 %v3520_v3 }
 0x9c7   :  { %v19769_v28 = vpop.eup %17166  ;;  %v4089_v26 = vpop.permute.xlu1 %4088 }
 0x9c8   :  { %v3526_v9 = vsel %vm1539_vm1, %v19769_v28, 0.0  ;;  %v19819_v44 = vpop.permute.xlu0 %4166 }
 0x9c9   :  { %3527 = vadd.xlane.f32.xlu0 %v3526_v9 }
 0x9cb   :  { %v19821_v55 = vpop.permute.xlu1 %4244 }
 0x9d5   :  { %4398 = vrot.lane.b32.xlu1 %v19440_v14, %s18746_s27 }
 0x9d9   :  { %4556 = vrot.lane.b32.xlu1 %v19438_v13, %s18746_s27 }
 0x9dd   :  { %4554 = vrot.lane.b32.xlu1 %v19464_v20, %s18746_s27 }
 0x9df   :  { %4320 = vrot.lane.b32.xlu0 %v19449_v17, %s18746_s27 }
 0x9e1   :  { %4712 = vrot.lane.b32.xlu1 %v19460_v19, %s18746_s27 }
 0x9e3   :  { %4478 = vrot.lane.b32.xlu0 %v19445_v16, %s18746_s27 }
 0x9e5   :  { %4710 = vrot.lane.b32.xlu1 %v19485_v25, %s18746_s27 }
 0x9e7   :  { %4476 = vrot.lane.b32.xlu0 %v19473_v23, %s18746_s27 }
 0x9e9   :  { %4960 = vrot.lane.b32.xlu1 %v19503_v30, %s18746_s27 }
 0x9eb   :  { %4634 = vrot.lane.b32.xlu0 %v19469_v22, %s18746_s27 }
 0x9ed   :  { %5036 = vrot.lane.b32.xlu1 %v19515_v36, %s18746_s27 }
 0x9ef   :  { %4632 = vrot.lane.b32.xlu0 %v19491_v27, %s18746_s27 }
 0x9f1   :  { %5112 = vrot.lane.b32.xlu1 %v19512_v34, %s18746_s27 }
 0x9f3   :  { %4884 = vrot.lane.b32.xlu0 %v19507_v32, %s18746_s27 }
 0x9f5   :  { %5264 = vrot.lane.b32.xlu1 %v19517_v39, %s18746_s27 }
 0x9f7   :  { %5188 = vrot.lane.b32.xlu0 %v19519_v41, %s18746_s27 }
 0x9f9   :  { %5416 = vrot.lane.b32.xlu1 %v19521_v43, %s18746_s27 }
 0x9fb   :  { %5340 = vrot.lane.b32.xlu0 %v19523_v47, %s18746_s27 }
 0x9fd   :  { %5572 = vrot.lane.b32.xlu1 %v19402_v62, %s18747_s30  ;;  %v19823_v62 = vpop.permute.xlu0 %4164 }
 0x9ff   :  { %5494 = vrot.lane.b32.xlu0 %v19387_v60, %s18747_s30  ;;  %v19825_v60 = vpop.permute.xlu1 %4242 }
 0xa01   :  { %5570 = vrot.lane.b32.xlu1 %v19424_v8, %s18747_s30  ;;  %v19827_v50 = vpop.permute.xlu0 %4322 }
 0xa03   :  { %5492 = vrot.lane.b32.xlu0 %v19429_v11, %s18747_s30  ;;  %v19829_v8 = vpop.permute.xlu1 %4400 }
 0xa42   :  { %v3510_v11 = vpop.xlane.xlu0 %3509 }
 0xa43   :  { %17168 = vrcp.f32 %v3510_v11 }
 0xa45   :  { %v3513_v0 = vpop.xlane.xlu1 %3512 }
 0xa46   :  { %17170 = vrcp.f32 %v3513_v0 }
 0xa49   :  { %v3519_v1 = vpop.xlane.xlu1 %3518 }
 0xa4a   :  { %17172 = vrcp.f32 %v3519_v1 }
 0xa4d   :  { %v17169_v29 = vpop.eup %17168  ;;  %v3525_v35 = vpop.xlane.xlu1 %3524 }
 0xa4e   :  { %17174 = vrcp.f32 %v3525_v35  ;;  %v3516_v40 = vpop.xlane.xlu0 %3515  ;;  %v3533_v3 = vmul.f32 %v17169_v29, %v19739_v37 }
 0xa4f   :  { %17176 = vrcp.f32 %v3516_v40 }
 0xa50   :  { %v17171_v9 = vpop.eup %17170  ;;  %15985 = vmatmul.mubr.msk.f32.vlgmr.msra.gmra.mrb[36].mxu0 %vm1539_vm1, %v3533_v3 }
 0xa51   :  { %15993 = vmatpush3.msra.mxu0 %v3704_v51  ;;  %v3531_v61 = vpop.xlane.xlu1 %3530  ;;  %v3535_v53 = vmul.f32 %v17171_v9, %v19743_v6  ;;  %15994 = vmatprep.mubr.msk.f32.mxu0 %vm18744_vm2, %v21996_v58 }
 0xa52   :  { %17178 = vrcp.f32 %v3531_v61  ;;  %v3522_v11 = vpop.xlane.xlu0 %3521  ;;  %16002 = vmatprep.subr.mxu0 %v21996_v58 }
 0xa53   :  { %17180 = vrcp.f32 %v3522_v11  ;;  %15990 = vmatmul.mubr.msk.f32.vlgmr.msra.gmra.mrb[44].mxu1 %vm1539_vm1, %v3535_v53 }
 0xa54   :  { %v17173_v0 = vpop.eup %17172  ;;  %15998 = vmatpush3.msra.mxu1 %v3781_v12  ;;  %15999 = vmatprep.mubr.msk.f32.mxu1 %vm18744_vm2, %v21996_v58 }
 0xa55   :  { %v4399_v37 = vpop.permute.xlu1 %4398  ;;  %16007 = vmatprep.subr.mxu1 %v21996_v58  ;;  %v3539_v6 = vmul.f32 %v17173_v0, %v19748_v4 }
 0xa56   :  { %v3528_v51 = vpop.xlane.xlu0 %3527 }
 0xa57   :  { %17182 = vrcp.f32 %v3528_v51  ;;  %16000 = vmatmul.mubr.msk.f32.vlgmr.msra.gmra.mrb[46].mxu1 %vm1539_vm1, %v3539_v6 }
 0xa58   :  { %v17175_v61 = vpop.eup %17174  ;;  %16008 = vmatpush3.msra.mxu1 %v3935_v42  ;;  %16009 = vmatprep.mubr.msk.f32.mxu1 %vm18744_vm2, %v21996_v58 }
 0xa59   :  { %v17177_v53 = vpop.eup %17176  ;;  %16017 = vmatprep.subr.mxu1 %v21996_v58  ;;  %v3543_v12 = vmul.f32 %v17175_v61, %v19753_v48  ;;  %v4557_v1 = vpop.permute.xlu1 %4556 }
 0xa5a   :  { %v4321_v29 = vpop.permute.xlu0 %4320  ;;  %v3537_v35 = vmul.f32 %v17177_v53, %v19755_v63 }
 0xa5b   :  { %16010 = vmatmul.mubr.msk.f32.vlgmr.msra.gmra.mrb[48].mxu1 %vm1539_vm1, %v3543_v12 }
 0xa5c   :  { %v17179_v4 = vpop.eup %17178  ;;  %15995 = vmatmul.mubr.msk.f32.vlgmr.msra.gmra.mrb[38].mxu0 %vm1539_vm1, %v3537_v35  ;;  %16018 = vmatpush3.msra.mxu1 %v4089_v26 }
 0xa5d   :  { %v17181_v40 = vpop.eup %17180  ;;  %16003 = vmatpush3.msra.mxu0 %v3858_v15  ;;  %16004 = vmatprep.mubr.msk.f32.mxu0 %vm18744_vm2, %v21996_v58  ;;  %v3547_v42 = vmul.f32 %v17179_v4, %v19761_v59  ;;  %v4555_v26 = vpop.permute.xlu1 %4554 }
 0xa5e   :  { %16012 = vmatprep.subr.mxu0 %v21996_v58  ;;  %16019 = vmatprep.mubr.msk.f32.mxu1 %vm18744_vm2, %v21996_v58  ;;  %v3541_v48 = vmul.f32 %v17181_v40, %v19763_v31  ;;  %v4479_v63 = vpop.permute.xlu0 %4478 }
 0xa5f   :  { %16020 = vmatmul.mubr.msk.f32.vlgmr.msra.gmra.mrb[50].mxu1 %vm1539_vm1, %v3547_v42  ;;  %16027 = vmatprep.subr.mxu1 %v21996_v58 }
 0xa60   :  { %16005 = vmatmul.mubr.msk.f32.vlgmr.msra.gmra.mrb[40].mxu0 %vm1539_vm1, %v3541_v48  ;;  %16029 = vmatprep.mubr.msk.f32.mxu1 %vm18744_vm2, %v21996_v58 }
 0xa61   :  { %v17183_v15 = vpop.eup %17182  ;;  %16013 = vmatpush3.msra.mxu0 %v19817_v24  ;;  %16014 = vmatprep.mubr.msk.f32.mxu0 %vm18744_vm2, %v21996_v58  ;;  %v4713_v3 = vpop.permute.xlu1 %4712 }
 0xa62   :  { %v3545_v59 = vmul.f32 %v17183_v15, %v19769_v28  ;;  %16022 = vmatprep.subr.mxu0 %v21996_v58  ;;  %v4477_v31 = vpop.permute.xlu0 %4476 }
 0xa63   :  { %16028 = vmatpush3.xpose.msk.msra.mxu1 %vm1539_vm1, %v19821_v55 }
 0xa64   :  { %16015 = vmatmul.mubr.msk.f32.vlgmr.msra.gmra.mrb[42].mxu0 %vm1539_vm1, %v3545_v59  ;;  %16037 = vmatprep.subr.mxu1 %v21996_v58 }
 0xa65   :  { %16024 = vmatprep.mubr.msk.f32.mxu0 %vm18744_vm2, %v21996_v58  ;;  %v4711_v24 = vpop.permute.xlu1 %4710 }
 0xa66   :  { %16030 = vmatmul.mubr.msk.f32.vlgmr.msra.gmra.mrb[52].mxu1 %vm1539_vm1, %v19825_v60  ;;  %v4635_v28 = vpop.permute.xlu0 %4634 }
 0xa67   :  { %16038 = vmatpush3.xpose.msk.msra.mxu1 %vm1539_vm1, %v19829_v8  ;;  %16039 = vmatprep.mubr.msk.f32.mxu1 %vm18744_vm2, %v21996_v58 }
 0xa68   :  { %16023 = vmatpush3.xpose.msk.msra.mxu0 %vm1539_vm1, %v19819_v44  ;;  %16047 = vmatprep.subr.mxu1 %v21996_v58 }
 0xa69   :  { %16032 = vmatprep.subr.mxu0 %v21996_v58  ;;  %v4961_v55 = vpop.permute.xlu1 %4960 }
 0xa6a   :  { %16040 = vmatmul.mubr.msk.f32.vlgmr.msra.gmra.mrb[54].mxu1 %vm1539_vm1, %v4399_v37  ;;  %v4633_v44 = vpop.permute.xlu0 %4632 }
 0xa6b   :  { %16025 = vmatmul.mubr.msk.f32.vlgmr.msra.gmra.mrb[44].mxu0 %vm1539_vm1, %v19823_v62  ;;  %16048 = vmatpush3.xpose.msk.msra.mxu1 %vm1539_vm1, %v4557_v1 }
 0xa6c   :  { %16033 = vmatpush3.xpose.msk.msra.mxu0 %vm1539_vm1, %v19827_v50  ;;  %16034 = vmatprep.mubr.msk.f32.mxu0 %vm18744_vm2, %v21996_v58 }
 0xa6d   :  { %16049 = vmatprep.mubr.msk.f32.mxu1 %vm18744_vm2, %v21996_v58  ;;  %16057 = vmatprep.subr.mxu1 %v21996_v58 }
 0xa6e   :  { %16050 = vmatmul.mubr.msk.f32.vlgmr.msra.gmra.mrb[56].mxu1 %vm1539_vm1, %v4555_v26  ;;  %16042 = vmatprep.subr.mxu0 %v21996_v58  ;;  %v4885_v62 = vpop.permute.xlu0 %4884 }
 0xa6f   :  { %16035 = vmatmul.mubr.msk.f32.vlgmr.msra.gmra.mrb[46].mxu0 %vm1539_vm1, %v4321_v29  ;;  %16058 = vmatpush3.xpose.msk.msra.mxu1 %vm1539_vm1, %v4713_v3 }
 0xa70   :  { %16043 = vmatpush3.xpose.msk.msra.mxu0 %vm1539_vm1, %v4479_v63  ;;  %16044 = vmatprep.mubr.msk.f32.mxu0 %vm18744_vm2, %v21996_v58 }
 0xa71   :  { %16059 = vmatprep.mubr.msk.f32.mxu1 %vm18744_vm2, %v21996_v58  ;;  %16067 = vmatprep.subr.mxu1 %v21996_v58 }
 0xa72   :  { %16060 = vmatmul.mubr.msk.f32.vlgmr.msra.gmra.mrb[58].mxu1 %vm1539_vm1, %v4711_v24  ;;  %16052 = vmatprep.subr.mxu0 %v21996_v58 }
 0xa73   :  { %16045 = vmatmul.mubr.msk.f32.vlgmr.msra.gmra.mrb[48].mxu0 %vm1539_vm1, %v4477_v31  ;;  %16068 = vmatpush3.msra.mxu1 %v4961_v55 }
 0xa74   :  { %16053 = vmatpush3.xpose.msk.msra.mxu0 %vm1539_vm1, %v4635_v28  ;;  %16054 = vmatprep.mubr.msk.f32.mxu0 %vm18744_vm2, %v21996_v58 }
 0xa75   :  { %16062 = vmatprep.subr.mxu0 %v21996_v58  ;;  %16069 = vmatprep.mubr.msk.f32.mxu1 %vm18744_vm2, %v21996_v58 }
 0xa76   :  { %16077 = vmatprep.subr.mxu1 %v21996_v58 }
 0xa77   :  { %16055 = vmatmul.mubr.msk.f32.vlgmr.msra.gmra.mrb[50].mxu0 %vm1539_vm1, %v4633_v44 }
 0xa78   :  { %16063 = vmatpush3.msra.mxu0 %v4885_v62  ;;  %16064 = vmatprep.mubr.msk.f32.mxu0 %vm18744_vm2, %v21996_v58 }
 0xa79   :  { %16072 = vmatprep.subr.mxu0 %v21996_v58 }
 0xb23   :  { %v19918_v60 = vpop.f32.mrb[36].mxu0 }
 0xb24   :  { %v15986_v50 = vpop.f32.mrb[37].mxu0 }
 0xb26   :  { %v19920_v8 = vpop.f32.mrb[44].mxu1 }
 0xb27   :  { %v15991_v9 = vpop.f32.mrb[45].mxu1 }
 0xb2a   :  { %v19922_v11 = vpop.f32.mrb[46].mxu1 }
 0xb2b   :  { %v16001_v0 = vpop.f32.mrb[47].mxu1 }
 0xb2e   :  { %v19924_v37 = vpop.f32.mrb[48].mxu1 }
 0xb2f   :  { %v19926_v6 = vpop.f32.mrb[38].mxu0  ;;  %v16011_v51 = vpop.f32.mrb[49].mxu1 }
 0xb30   :  { %v15996_v61 = vpop.f32.mrb[39].mxu0 }
 0xb32   :  { %v19928_v53 = vpop.f32.mrb[50].mxu1 }
 0xb33   :  { %v19930_v12 = vpop.f32.mrb[40].mxu0  ;;  %v16021_v1 = vpop.f32.mrb[51].mxu1 }
 0xb34   :  { %v16006_v29 = vpop.f32.mrb[41].mxu0 }
 0xb37   :  { %v19932_v35 = vpop.f32.mrb[42].mxu0 }
 0xb38   :  { %v16016_v4 = vpop.f32.mrb[43].mxu0 }
 0xb39   :  { %v4316_v40 = vpop.f32.mrb[52].mxu1 }
 0xb3a   :  { %v4789_v42 = vmul.f32 0.35355338, %v4316_v40  ;;  %v16031_v48 = vpop.f32.mrb[53].mxu1 }
 0xb3c   :  { %v4799_v63 = vsel %vm1539_vm1, %v4789_v42, -inf }
 0xb3d   :  { %4800 = vmax.xlane.f32.xlu1 %v4799_v63  ;;  %v4472_v26 = vpop.f32.mrb[54].mxu1 }
 0xb3e   :  { %v4238_v15 = vpop.f32.mrb[44].mxu0  ;;  %v16041_v59 = vpop.f32.mrb[55].mxu1  ;;  %v4791_v28 = vmul.f32 0.35355338, %v4472_v26 }
 0xb3f   :  { %v4788_v31 = vmul.f32 0.35355338, %v4238_v15  ;;  %v16026_v3 = vpop.f32.mrb[45].mxu0 }
 0xb40   :  { %v4805_v1 = vsel %vm1539_vm1, %v4791_v28, -inf }
 0xb41   :  { %v4628_v24 = vpop.f32.mrb[56].mxu1  ;;  %v4796_v44 = vsel %vm1539_vm1, %v4788_v31, -inf }
 0xb42   :  { %v4793_v55 = vmul.f32 0.35355338, %v4628_v24  ;;  %4797 = vmax.xlane.f32.xlu0 %v4796_v44  ;;  %v4394_v62 = vpop.f32.mrb[46].mxu0  ;;  %v16051_v50 = vpop.f32.mrb[57].mxu1 }
 0xb43   :  { %v16036_v9 = vpop.f32.mrb[47].mxu0  ;;  %v4790_v51 = vmul.f32 0.35355338, %v4394_v62  ;;  %v19952_v50 = vpop.permute.xlu1 %5036 }
 0xb44   :  { %v4811_v0 = vsel %vm1539_vm1, %v4793_v55, -inf }
 0xb45   :  { %4812 = vmax.xlane.f32.xlu1 %v4811_v0  ;;  %v4784_v61 = vpop.f32.mrb[58].mxu1  ;;  %v4802_v15 = vsel %vm1539_vm1, %v4790_v51, -inf }
 0xb46   :  { %v19938_v29 = vmul.f32 0.35355338, %v4784_v61  ;;  %4806 = vmax.xlane.f32.xlu0 %v4805_v1  ;;  %v4550_v4 = vpop.f32.mrb[48].mxu0  ;;  %v16061_v40 = vpop.f32.mrb[59].mxu1 }
 0xb47   :  { %v16046_v48 = vpop.f32.mrb[49].mxu0  ;;  %v4792_v26 = vmul.f32 0.35355338, %v4550_v4  ;;  %v19954_v9 = vpop.permute.xlu1 %5112 }
 0xb48   :  { %v4817_v63 = vsel %vm1539_vm1, %v19938_v29, -inf  ;;  %v19958_v61 = vpop.permute.xlu0 %5188 }
 0xb49   :  { %4818 = vmax.xlane.f32.xlu1 %v4817_v63  ;;  %v4808_v44 = vsel %vm1539_vm1, %v4792_v26, -inf }
 0xb4a   :  { %4803 = vmax.xlane.f32.xlu0 %v4802_v15  ;;  %v4706_v59 = vpop.f32.mrb[50].mxu0 }
 0xb4b   :  { %v16056_v3 = vpop.f32.mrb[51].mxu0  ;;  %v19943_v24 = vmul.f32 0.35355338, %v4706_v59  ;;  %v19956_v0 = vpop.permute.xlu1 %5264 }
 0xb4c   :  { %v19962_v4 = vpop.permute.xlu0 %5340 }
 0xb4d   :  { %v4814_v62 = vsel %vm1539_vm1, %v19943_v24, -inf }
 0xb4e   :  { %4809 = vmax.xlane.f32.xlu0 %v4808_v44 }
 0xb4f   :  { %v19960_v1 = vpop.permute.xlu1 %5416 }
 0xb50   :  { %v19966_v48 = vpop.permute.xlu0 %5494 }
 0xb52   :  { %4815 = vmax.xlane.f32.xlu0 %v4814_v62 }
 0xb53   :  { %v19964_v40 = vpop.permute.xlu1 %5572 }
 0xb5a   :  { %5728 = vrot.lane.b32.xlu1 %v19422_v7, %s18747_s30  ;;  %v19968_v7 = vpop.permute.xlu1 %5570 }
 0xb68   :  { %5650 = vrot.lane.b32.xlu0 %v19427_v10, %s18747_s30  ;;  %v19970_v10 = vpop.permute.xlu0 %5492 }
 0xbca   :  { %v4801_v63 = vpop.xlane.xlu1 %4800 }
 0xbcb   :  { %v4821_v15 = vsub.f32 %v4789_v42, %v4801_v63 }
 0xbcd   :  { %v4830_v59 = vmul.f32 1.442695, %v4821_v15 }
 0xbcf   :  { %17184 = vpow2.f32 %v4830_v59  ;;  %v4798_v3 = vpop.xlane.xlu0 %4797 }
 0xbd0   :  { %v4820_v44 = vsub.f32 %v4788_v31, %v4798_v3 }
 0xbd2   :  { %v4828_v62 = vmul.f32 1.442695, %v4820_v44  ;;  %v4813_v56 = vpop.xlane.xlu1 %4812 }
 0xbd3   :  { %v4825_v52 = vsub.f32 %v4793_v55, %v4813_v56  ;;  %v4807_v54 = vpop.xlane.xlu0 %4806 }
 0xbd4   :  { %17186 = vpow2.f32 %v4828_v62  ;;  %v4823_v45 = vsub.f32 %v4791_v28, %v4807_v54 }
 0xbd5   :  { %v4838_v46 = vmul.f32 1.442695, %v4825_v52 }
 0xbd6   :  { %v4834_v5 = vmul.f32 1.442695, %v4823_v45  ;;  %v4819_v28 = vpop.xlane.xlu1 %4818 }
 0xbd7   :  { %v4804_v33 = vpop.xlane.xlu0 %4803  ;;  %v4827_v55 = vsub.f32 %v19938_v29, %v4819_v28 }
 0xbd8   :  { %17188 = vpow2.f32 %v4834_v5  ;;  %v4822_v38 = vsub.f32 %v4790_v51, %v4804_v33 }
 0xbd9   :  { %v17185_v49 = vpop.eup %17184  ;;  %17190 = vpow2.f32 %v4838_v46 }
 0xbda   :  { %v4832_v18 = vmul.f32 1.442695, %v4822_v38  ;;  %v4847_v42 = vsel %vm1539_vm1, %v17185_v49, 0.0 }
 0xbdb   :  { %v4810_v63 = vpop.xlane.xlu0 %4809  ;;  %4848 = vadd.xlane.f32.xlu1 %v4847_v42 }
 0xbdc   :  { %17192 = vpow2.f32 %v4832_v18  ;;  %v4824_v31 = vsub.f32 %v4792_v26, %v4810_v63  ;;  %v4842_v26 = vmul.f32 1.442695, %v4827_v55 }
 0xbde   :  { %v17187_v15 = vpop.eup %17186  ;;  %v4836_v59 = vmul.f32 1.442695, %v4824_v31 }
 0xbdf   :  { %v4844_v56 = vsel %vm1539_vm1, %v17187_v15, 0.0  ;;  %v4816_v51 = vpop.xlane.xlu0 %4815 }
 0xbe0   :  { %17194 = vpow2.f32 %v4836_v59  ;;  %4845 = vadd.xlane.f32.xlu0 %v4844_v56  ;;  %v4826_v3 = vsub.f32 %v19943_v24, %v4816_v51 }
 0xbe1   :  { %17196 = vpow2.f32 %v4842_v26 }
 0xbe2   :  { %v17189_v52 = vpop.eup %17188  ;;  %v4840_v44 = vmul.f32 1.442695, %v4826_v3 }
 0xbe3   :  { %v4853_v45 = vsel %vm1539_vm1, %v17189_v52, 0.0  ;;  %v19975_v54 = vpop.eup %17190 }
 0xbe4   :  { %4854 = vadd.xlane.f32.xlu1 %v4853_v45  ;;  %v4859_v38 = vsel %vm1539_vm1, %v19975_v54, 0.0  ;;  %17198 = vpow2.f32 %v4840_v44 }
 0xbe6   :  { %v19977_v46 = vpop.eup %17192 }
 0xbe7   :  { %v4850_v18 = vsel %vm1539_vm1, %v19977_v46, 0.0 }
 0xbe8   :  { %4860 = vadd.xlane.f32.xlu1 %v4859_v38  ;;  %4851 = vadd.xlane.f32.xlu0 %v4850_v18 }
 0xbea   :  { %v19983_v33 = vpop.eup %17194 }
 0xbeb   :  { %v4856_v5 = vsel %vm1539_vm1, %v19983_v33, 0.0  ;;  %v19993_v62 = vpop.eup %17196 }
 0xbec   :  { %4857 = vadd.xlane.f32.xlu0 %v4856_v5  ;;  %v4865_v42 = vsel %vm1539_vm1, %v19993_v62, 0.0 }
 0xbee   :  { %v19997_v63 = vpop.eup %17198 }
 0xbf9   :  { %5726 = vrot.lane.b32.xlu1 %v19440_v14, %s18747_s30  ;;  %v4862_v14 = vsel %vm1539_vm1, %v19997_v63, 0.0 }
 0xc02   :  { %5648 = vrot.lane.b32.xlu0 %v19449_v17, %s18747_s30 }
 0xc1d   :  { %4866 = vadd.xlane.f32.xlu1 %v4865_v42 }
 0xc21   :  { %4863 = vadd.xlane.f32.xlu0 %v4862_v14 }
 0xc2e   :  { %5884 = vrot.lane.b32.xlu1 %v19438_v13, %s18747_s30  ;;  %v20017_v13 = vpop.permute.xlu1 %5728 }
 0xc32   :  { %5882 = vrot.lane.b32.xlu1 %v19464_v20, %s18747_s30  ;;  %v20019_v20 = vpop.permute.xlu0 %5650 }
 0xc36   :  { %6040 = vrot.lane.b32.xlu1 %v19460_v19, %s18747_s30 }
 0xc37   :  { %5806 = vrot.lane.b32.xlu0 %v19445_v16, %s18747_s30 }
 0xc3a   :  { %6038 = vrot.lane.b32.xlu1 %v19485_v25, %s18747_s30 }
 0xc3b   :  { %5804 = vrot.lane.b32.xlu0 %v19473_v23, %s18747_s30 }
 0xc3f   :  { %5962 = vrot.lane.b32.xlu0 %v19469_v22, %s18747_s30 }
 0xc43   :  { %5960 = vrot.lane.b32.xlu0 %v19491_v27, %s18747_s30 }
 0xc68   :  { %v4849_v17 = vpop.xlane.xlu1 %4848 }
 0xc69   :  { %17200 = vrcp.f32 %v4849_v17 }
 0xc6d   :  { %v4846_v19 = vpop.xlane.xlu0 %4845 }
 0xc6e   :  { %17202 = vrcp.f32 %v4846_v19 }
 0xc71   :  { %v4855_v16 = vpop.xlane.xlu1 %4854 }
 0xc72   :  { %17204 = vrcp.f32 %v4855_v16 }
 0xc73   :  { %v17201_v25 = vpop.eup %17200 }
 0xc74   :  { %v4871_v29 = vmul.f32 %v17201_v25, %v17185_v49 }
 0xc75   :  { %v4861_v24 = vpop.xlane.xlu1 %4860  ;;  %v4852_v23 = vpop.xlane.xlu0 %4851 }
 0xc76   :  { %17206 = vrcp.f32 %v4861_v24  ;;  %16070 = vmatmul.mubr.msk.f32.vlgmr.msra.gmra.mrb[60].mxu1 %vm1539_vm1, %v4871_v29 }
 0xc77   :  { %17208 = vrcp.f32 %v4852_v23  ;;  %16078 = vmatpush3.msra.mxu1 %v19954_v9  ;;  %16079 = vmatprep.mubr.msk.f32.mxu1 %vm18744_vm2, %v21996_v58 }
 0xc78   :  { %v17203_v22 = vpop.eup %17202  ;;  %16087 = vmatprep.subr.mxu1 %v21996_v58 }
 0xc79   :  { %v4858_v27 = vpop.xlane.xlu0 %4857  ;;  %v4869_v31 = vmul.f32 %v17203_v22, %v17187_v15 }
 0xc7a   :  { %17210 = vrcp.f32 %v4858_v27 }
 0xc7b   :  { %16065 = vmatmul.mubr.msk.f32.vlgmr.msra.gmra.mrb[52].mxu0 %vm1539_vm1, %v4869_v31 }
 0xc7c   :  { %v17205_v49 = vpop.eup %17204  ;;  %16073 = vmatpush3.msra.mxu0 %v19952_v50  ;;  %16074 = vmatprep.mubr.msk.f32.mxu0 %vm18744_vm2, %v21996_v58 }
 0xc7d   :  { %v4875_v59 = vmul.f32 %v17205_v49, %v17189_v52  ;;  %16082 = vmatprep.subr.mxu0 %v21996_v58 }
 0xc7f   :  { %16080 = vmatmul.mubr.msk.f32.vlgmr.msra.gmra.mrb[62].mxu1 %vm1539_vm1, %v4875_v59 }
 0xc80   :  { %v17207_v9 = vpop.eup %17206  ;;  %16088 = vmatpush3.msra.mxu1 %v19956_v0  ;;  %16089 = vmatprep.mubr.msk.f32.mxu1 %vm18744_vm2, %v21996_v58 }
 0xc81   :  { %v17209_v15 = vpop.eup %17208  ;;  %16097 = vmatprep.subr.mxu1 %v21996_v58  ;;  %v4879_v56 = vmul.f32 %v17207_v9, %v19975_v54 }
 0xc82   :  { %v4873_v50 = vmul.f32 %v17209_v15, %v19977_v46 }
 0xc83   :  { %16090 = vmatmul.mubr.msk.f32.vlgmr.msra.gmra.mrb[64].mxu1 %vm1539_vm1, %v4879_v56 }
 0xc84   :  { %v17211_v52 = vpop.eup %17210  ;;  %16075 = vmatmul.mubr.msk.f32.vlgmr.msra.gmra.mrb[54].mxu0 %vm1539_vm1, %v4873_v50  ;;  %16098 = vmatpush3.msra.mxu1 %v19960_v1  ;;  %v5649_v1 = vpop.permute.xlu0 %5648 }
 0xc85   :  { %16083 = vmatpush3.msra.mxu0 %v19958_v61  ;;  %16084 = vmatprep.mubr.msk.f32.mxu0 %vm18744_vm2, %v21996_v58  ;;  %v4877_v0 = vmul.f32 %v17211_v52, %v19983_v33  ;;  %v5727_v61 = vpop.permute.xlu1 %5726 }
 0xc86   :  { %16092 = vmatprep.subr.mxu0 %v21996_v58  ;;  %16099 = vmatprep.mubr.msk.f32.mxu1 %vm18744_vm2, %v21996_v58 }
 0xc87   :  { %16107 = vmatprep.subr.mxu1 %v21996_v58 }
 0xc88   :  { %16085 = vmatmul.mubr.msk.f32.vlgmr.msra.gmra.mrb[56].mxu0 %vm1539_vm1, %v4877_v0 }
 0xc89   :  { %16093 = vmatpush3.msra.mxu0 %v19962_v4  ;;  %16094 = vmatprep.mubr.msk.f32.mxu0 %vm18744_vm2, %v21996_v58 }
 0xc8a   :  { %16102 = vmatprep.subr.mxu0 %v21996_v58 }
 0xcaa   :  { %v4867_v45 = vpop.xlane.xlu1 %4866 }
 0xcab   :  { %17212 = vrcp.f32 %v4867_v45 }
 0xcae   :  { %v4864_v54 = vpop.xlane.xlu0 %4863  ;;  %v5885_v38 = vpop.permute.xlu1 %5884 }
 0xcaf   :  { %17214 = vrcp.f32 %v4864_v54 }
 0xcb2   :  { %v5807_v5 = vpop.permute.xlu0 %5806  ;;  %v5883_v28 = vpop.permute.xlu1 %5882 }
 0xcb5   :  { %v17213_v46 = vpop.eup %17212 }
 0xcb6   :  { %v4883_v18 = vmul.f32 %v17213_v46, %v19993_v62 }
 0xcb8   :  { %16100 = vmatmul.mubr.msk.f32.vlgmr.msra.gmra.mrb[66].mxu1 %vm1539_vm1, %v4883_v18 }
 0xcb9   :  { %v17215_v33 = vpop.eup %17214  ;;  %16108 = vmatpush3.xpose.msk.msra.mxu1 %vm1539_vm1, %v19964_v40  ;;  %16109 = vmatprep.mubr.msk.f32.mxu1 %vm18744_vm2, %v21996_v58  ;;  %v5805_v40 = vpop.permute.xlu0 %5804 }
 0xcba   :  { %16117 = vmatprep.subr.mxu1 %v21996_v58  ;;  %v4881_v4 = vmul.f32 %v17215_v33, %v19997_v63 }
 0xcbc   :  { %16095 = vmatmul.mubr.msk.f32.vlgmr.msra.gmra.mrb[58].mxu0 %vm1539_vm1, %v4881_v4  ;;  %16110 = vmatmul.mubr.msk.f32.vlgmr.msra.gmra.mrb[68].mxu1 %vm1539_vm1, %v19968_v7 }
 0xcbd   :  { %16103 = vmatpush3.xpose.msk.msra.mxu0 %vm1539_vm1, %v19966_v48  ;;  %16118 = vmatpush3.xpose.msk.msra.mxu1 %vm1539_vm1, %v20017_v13  ;;  %v6041_v48 = vpop.permute.xlu1 %6040  ;;  %v5963_v7 = vpop.permute.xlu0 %5962 }
 0xcbe   :  { %16104 = vmatprep.mubr.msk.f32.mxu0 %vm18744_vm2, %v21996_v58  ;;  %16112 = vmatprep.subr.mxu0 %v21996_v58 }
 0xcbf   :  { %16119 = vmatprep.mubr.msk.f32.mxu1 %vm18744_vm2, %v21996_v58  ;;  %16127 = vmatprep.subr.mxu1 %v21996_v58 }
 0xcc0   :  { %16105 = vmatmul.mubr.msk.f32.vlgmr.msra.gmra.mrb[60].mxu0 %vm1539_vm1, %v19970_v10  ;;  %16120 = vmatmul.mubr.msk.f32.vlgmr.msra.gmra.mrb[70].mxu1 %vm1539_vm1, %v5727_v61 }
 0xcc1   :  { %16113 = vmatpush3.xpose.msk.msra.mxu0 %vm1539_vm1, %v20019_v20  ;;  %16128 = vmatpush3.xpose.msk.msra.mxu1 %vm1539_vm1, %v5885_v38  ;;  %v6039_v10 = vpop.permute.xlu1 %6038  ;;  %v5961_v55 = vpop.permute.xlu0 %5960 }
 0xcc2   :  { %16114 = vmatprep.mubr.msk.f32.mxu0 %vm18744_vm2, %v21996_v58  ;;  %16122 = vmatprep.subr.mxu0 %v21996_v58 }
 0xcc3   :  { %16129 = vmatprep.mubr.msk.f32.mxu1 %vm18744_vm2, %v21996_v58  ;;  %16137 = vmatprep.subr.mxu1 %v21996_v58 }
 0xcc4   :  { %16115 = vmatmul.mubr.msk.f32.vlgmr.msra.gmra.mrb[62].mxu0 %vm1539_vm1, %v5649_v1  ;;  %16130 = vmatmul.mubr.msk.f32.vlgmr.msra.gmra.mrb[72].mxu1 %vm1539_vm1, %v5883_v28 }
 0xcc5   :  { %16123 = vmatpush3.xpose.msk.msra.mxu0 %vm1539_vm1, %v5807_v5  ;;  %16138 = vmatpush3.xpose.msk.msra.mxu1 %vm1539_vm1, %v6041_v48 }
 0xcc6   :  { %16124 = vmatprep.mubr.msk.f32.mxu0 %vm18744_vm2, %v21996_v58  ;;  %16132 = vmatprep.subr.mxu0 %v21996_v58 }
 0xcc7   :  { %16139 = vmatprep.mubr.msk.f32.mxu1 %vm18744_vm2, %v21996_v58  ;;  %16147 = vmatprep.subr.mxu1 %v21996_v58 }
 0xcc8   :  { %16125 = vmatmul.mubr.msk.f32.vlgmr.msra.gmra.mrb[64].mxu0 %vm1539_vm1, %v5805_v40  ;;  %16140 = vmatmul.mubr.msk.f32.vlgmr.msra.gmra.mrb[74].mxu1 %vm1539_vm1, %v6039_v10 }
 0xcc9   :  { %16133 = vmatpush3.xpose.msk.msra.mxu0 %vm1539_vm1, %v5963_v7  ;;  %16134 = vmatprep.mubr.msk.f32.mxu0 %vm18744_vm2, %v21996_v58 }
 0xcca   :  { %16142 = vmatprep.subr.mxu0 %v21996_v58  ;;  %16149 = vmatprep.mubr.msk.f32.mxu1 %vm18744_vm2, %v21996_v58 }
 0xccc   :  { %16135 = vmatmul.mubr.msk.f32.vlgmr.msra.gmra.mrb[66].mxu0 %vm1539_vm1, %v5961_v55 }
 0xccd   :  { %16144 = vmatprep.mubr.msk.f32.mxu0 %vm18744_vm2, %v21996_v58 }
 0xd49   :  { %v20108_v51 = vpop.f32.mrb[60].mxu1 }
 0xd4a   :  { %v16071_v26 = vpop.f32.mrb[61].mxu1 }
 0xd4e   :  { %v20110_v3 = vpop.f32.mrb[52].mxu0 }
 0xd4f   :  { %v16066_v44 = vpop.f32.mrb[53].mxu0 }
 0xd52   :  { %v20112_v62 = vpop.f32.mrb[62].mxu1 }
 0xd53   :  { %v16081_v42 = vpop.f32.mrb[63].mxu1 }
 0xd56   :  { %v20114_v63 = vpop.f32.mrb[64].mxu1 }
 0xd57   :  { %v20116_v14 = vpop.f32.mrb[54].mxu0  ;;  %v16091_v13 = vpop.f32.mrb[65].mxu1 }
 0xd58   :  { %v16076_v17 = vpop.f32.mrb[55].mxu0 }
 0xd5b   :  { %v20118_v20 = vpop.f32.mrb[56].mxu0 }
 0xd5c   :  { %v16086_v19 = vpop.f32.mrb[57].mxu0 }
 0xd8b   :  { %v20120_v16 = vpop.f32.mrb[66].mxu1 }
 0xd8c   :  { %v16101_v25 = vpop.f32.mrb[67].mxu1 }
 0xd8f   :  { %v20122_v29 = vpop.f32.mrb[58].mxu0  ;;  %v5644_v24 = vpop.f32.mrb[68].mxu1 }
 0xd90   :  { %v6117_v23 = vmul.f32 0.35355338, %v5644_v24  ;;  %v16096_v22 = vpop.f32.mrb[59].mxu0  ;;  %v16111_v27 = vpop.f32.mrb[69].mxu1 }
 0xd92   :  { %v6127_v31 = vsel %vm1539_vm1, %v6117_v23, -inf }
 0xd93   :  { %6128 = vmax.xlane.f32.xlu1 %v6127_v31  ;;  %v5566_v49 = vpop.f32.mrb[60].mxu0  ;;  %v5800_v59 = vpop.f32.mrb[70].mxu1 }
 0xd94   :  { %v6116_v9 = vmul.f32 0.35355338, %v5566_v49  ;;  %v16106_v15 = vpop.f32.mrb[61].mxu0  ;;  %v16121_v56 = vpop.f32.mrb[71].mxu1  ;;  %v6119_v50 = vmul.f32 0.35355338, %v5800_v59 }
 0xd96   :  { %v6124_v52 = vsel %vm1539_vm1, %v6116_v9, -inf  ;;  %v6133_v18 = vsel %vm1539_vm1, %v6119_v50, -inf }
 0xd97   :  { %v5956_v0 = vpop.f32.mrb[72].mxu1  ;;  %6125 = vmax.xlane.f32.xlu0 %v6124_v52  ;;  %v5722_v61 = vpop.f32.mrb[62].mxu0 }
 0xd98   :  { %v6121_v1 = vmul.f32 0.35355338, %v5956_v0  ;;  %v16116_v45 = vpop.f32.mrb[63].mxu0  ;;  %v16131_v54 = vpop.f32.mrb[73].mxu1  ;;  %v6118_v46 = vmul.f32 0.35355338, %v5722_v61 }
 0xd9a   :  { %v6139_v38 = vsel %vm1539_vm1, %v6121_v1, -inf  ;;  %v6130_v10 = vsel %vm1539_vm1, %v6118_v46, -inf }
 0xd9b   :  { %6140 = vmax.xlane.f32.xlu1 %v6139_v38  ;;  %v6112_v33 = vpop.f32.mrb[74].mxu1  ;;  %6134 = vmax.xlane.f32.xlu0 %v6133_v18  ;;  %v5878_v5 = vpop.f32.mrb[64].mxu0 }
 0xd9c   :  { %v6123_v4 = vmul.f32 0.35355338, %v6112_v33  ;;  %v16126_v28 = vpop.f32.mrb[65].mxu0  ;;  %v16141_v40 = vpop.f32.mrb[75].mxu1  ;;  %v6120_v48 = vmul.f32 0.35355338, %v5878_v5 }
 0xd9e   :  { %v6145_v7 = vsel %vm1539_vm1, %v6123_v4, -inf  ;;  %v6136_v42 = vsel %vm1539_vm1, %v6120_v48, -inf }
 0xd9f   :  { %6146 = vmax.xlane.f32.xlu1 %v6145_v7  ;;  %6131 = vmax.xlane.f32.xlu0 %v6130_v10  ;;  %v6034_v55 = vpop.f32.mrb[66].mxu0 }
 0xda0   :  { %v16136_v26 = vpop.f32.mrb[67].mxu0  ;;  %v6122_v44 = vmul.f32 0.35355338, %v6034_v55 }
 0xda2   :  { %v6142_v13 = vsel %vm1539_vm1, %v6122_v44, -inf }
 0xda3   :  { %6137 = vmax.xlane.f32.xlu0 %v6136_v42 }
 0xda7   :  { %6143 = vmax.xlane.f32.xlu0 %v6142_v13 }
 0xdb0   :  { %6288 = vrot.lane.b32.xlu1 %v19503_v30, %s18747_s30 }
 0xdb4   :  { %6364 = vrot.lane.b32.xlu1 %v19515_v36, %s18747_s30 }
 0xdb8   :  { %6440 = vrot.lane.b32.xlu1 %v19512_v34, %s18747_s30 }
 0xdbc   :  { %6592 = vrot.lane.b32.xlu1 %v19517_v39, %s18747_s30 }
 0xdbd   :  { %6212 = vrot.lane.b32.xlu0 %v19507_v32, %s18747_s30 }
 0xdc1   :  { %6516 = vrot.lane.b32.xlu0 %v19519_v41, %s18747_s30 }
 0xe20   :  { %v6129_v17 = vpop.xlane.xlu1 %6128 }
 0xe21   :  { %v6149_v19 = vsub.f32 %v6117_v23, %v6129_v17 }
 0xe23   :  { %v6158_v25 = vmul.f32 1.442695, %v6149_v19 }
 0xe24   :  { %v6126_v24 = vpop.xlane.xlu0 %6125 }
 0xe25   :  { %17216 = vpow2.f32 %v6158_v25  ;;  %v6148_v30 = vsub.f32 %v6116_v9, %v6126_v24 }
 0xe27   :  { %v6156_v22 = vmul.f32 1.442695, %v6148_v30 }
 0xe28   :  { %v6141_v36 = vpop.xlane.xlu1 %6140  ;;  %v6135_v27 = vpop.xlane.xlu0 %6134 }
 0xe29   :  { %17218 = vpow2.f32 %v6156_v22  ;;  %v6153_v34 = vsub.f32 %v6121_v1, %v6141_v36  ;;  %v6151_v31 = vsub.f32 %v6119_v50, %v6135_v27 }
 0xe2b   :  { %v6162_v49 = vmul.f32 1.442695, %v6151_v31  ;;  %v6166_v39 = vmul.f32 1.442695, %v6153_v34 }
 0xe2c   :  { %v6147_v59 = vpop.xlane.xlu1 %6146  ;;  %v6132_v15 = vpop.xlane.xlu0 %6131 }
 0xe2d   :  { %v6155_v32 = vsub.f32 %v6123_v4, %v6147_v59  ;;  %v6150_v56 = vsub.f32 %v6118_v46, %v6132_v15  ;;  %17220 = vpow2.f32 %v6162_v49  ;;  %v845_v59 = vld [vmem:[#allocation22] sm:$0xff]  ;;  %v846_v15 = vld [vmem:[#allocation22 + $0x8] sm:$0xff] }
 0xe2e   :  { %17222 = vpow2.f32 %v6166_v39 }
 0xe2f   :  { %v20144_v41 = vpop.eup %17216  ;;  %v6160_v23 = vmul.f32 1.442695, %v6150_v56  ;;  %v6170_v52 = vmul.f32 1.442695, %v6155_v32  ;;  %v16810_v32 = vpack.c.bf16 %v846_v15, %v845_v59  ;;  %v847_v56 = vld [vmem:[#allocation22 + $0x10] sm:$0xff] }
 0xe30   :  { %v6289_v0 = vpop.permute.xlu1 %6288  ;;  %v6138_v9 = vpop.xlane.xlu0 %6137  ;;  %v6175_v61 = vsel %vm1539_vm1, %v20144_v41, 0.0 }
 0xe31   :  { %v6152_v45 = vsub.f32 %v6120_v48, %v6138_v9  ;;  %6176 = vadd.xlane.f32.xlu1 %v6175_v61  ;;  %16148 = vmatpush3.msra.mxu1 %v6289_v0  ;;  %17224 = vpow2.f32 %v6160_v23 }
 0xe32   :  { %16157 = vmatprep.subr.mxu1 %v21996_v58  ;;  %17226 = vpow2.f32 %v6170_v52 }
 0xe33   :  { %v20149_v50 = vpop.eup %17218  ;;  %v6164_v1 = vmul.f32 1.442695, %v6152_v45 }
 0xe34   :  { %v6144_v54 = vpop.xlane.xlu0 %6143  ;;  %v6172_v46 = vsel %vm1539_vm1, %v20149_v50, 0.0 }
 0xe35   :  { %17228 = vpow2.f32 %v6164_v1  ;;  %v6154_v38 = vsub.f32 %v6122_v44, %v6144_v54  ;;  %6173 = vadd.xlane.f32.xlu0 %v6172_v46 }
 0xe37   :  { %v6168_v18 = vmul.f32 1.442695, %v6154_v38  ;;  %v20153_v33 = vpop.eup %17220 }
 0xe38   :  { %v6213_v5 = vpop.permute.xlu0 %6212  ;;  %v6181_v4 = vsel %vm1539_vm1, %v20153_v33, 0.0  ;;  %v20157_v28 = vpop.eup %17222 }
 0xe39   :  { %17230 = vpow2.f32 %v6168_v18  ;;  %16143 = vmatpush3.msra.mxu0 %v6213_v5  ;;  %6182 = vadd.xlane.f32.xlu1 %v6181_v4  ;;  %v6187_v48 = vsel %vm1539_vm1, %v20157_v28, 0.0 }
 0xe3a   :  { %16152 = vmatprep.subr.mxu0 %v21996_v58 }
 0xe3b   :  { %v20160_v40 = vpop.eup %17224 }
 0xe3c   :  { %v6178_v7 = vsel %vm1539_vm1, %v20160_v40, 0.0  ;;  %v20166_v10 = vpop.eup %17226 }
 0xe3d   :  { %6188 = vadd.xlane.f32.xlu1 %v6187_v48  ;;  %6179 = vadd.xlane.f32.xlu0 %v6178_v7  ;;  %v6193_v44 = vsel %vm1539_vm1, %v20166_v10, 0.0 }
 0xe3f   :  { %v20168_v55 = vpop.eup %17228 }
 0xe40   :  { %v6184_v26 = vsel %vm1539_vm1, %v20168_v55, 0.0 }
 0xe41   :  { %6194 = vadd.xlane.f32.xlu1 %v6193_v44  ;;  %6185 = vadd.xlane.f32.xlu0 %v6184_v26 }
 0xe43   :  { %v20174_v42 = vpop.eup %17230 }
 0xe44   :  { %v6190_v13 = vsel %vm1539_vm1, %v20174_v42, 0.0 }
 0xe45   :  { %6191 = vadd.xlane.f32.xlu0 %v6190_v13 }
 0xe52   :  { %6744 = vrot.lane.b32.xlu1 %v19521_v43, %s18747_s30  ;;  %v6365_v43 = vpop.permute.xlu1 %6364 }
 0xe56   :  { %6830 = vrot.lane.b32.xlu1 %v19920_v8, %s18692_s28  ;;  %v6517_v8 = vpop.permute.xlu0 %6516 }
 0xe5a   :  { %6862 = vrot.lane.b32.xlu1 %v20108_v51, %s18748_s24 }
 0xe5b   :  { %6668 = vrot.lane.b32.xlu0 %v19523_v47, %s18747_s30  ;;  %v6441_v47 = vpop.permute.xlu1 %6440 }
 0xe5e   :  { %6834 = vrot.lane.b32.xlu1 %v19922_v11, %s18692_s28 }
 0xe5f   :  { %6828 = vrot.lane.b32.xlu0 %v19918_v60, %s18692_s28  ;;  %v6593_v60 = vpop.permute.xlu1 %6592 }
 0xe62   :  { %6866 = vrot.lane.b32.xlu1 %v20112_v62, %s18748_s24 }
 0xe63   :  { %6860 = vrot.lane.b32.xlu0 %v20110_v3, %s18748_s24 }
 0xe66   :  { %6838 = vrot.lane.b32.xlu1 %v19924_v37, %s18692_s28 }
 0xe67   :  { %6832 = vrot.lane.b32.xlu0 %v19926_v6, %s18692_s28 }
 0xe6a   :  { %6870 = vrot.lane.b32.xlu1 %v20114_v63, %s18748_s24 }
 0xe6b   :  { %6864 = vrot.lane.b32.xlu0 %v20116_v14, %s18748_s24 }
 0xe6e   :  { %6842 = vrot.lane.b32.xlu1 %v19928_v53, %s18692_s28 }
 0xe6f   :  { %6836 = vrot.lane.b32.xlu0 %v19930_v12, %s18692_s28 }
 0xe72   :  { %6874 = vrot.lane.b32.xlu1 %v20120_v16, %s18748_s24 }
 0xe73   :  { %6868 = vrot.lane.b32.xlu0 %v20118_v20, %s18748_s24 }
 0xe77   :  { %6840 = vrot.lane.b32.xlu0 %v19932_v35, %s18692_s28 }
 0xe7b   :  { %6872 = vrot.lane.b32.xlu0 %v20122_v29, %s18748_s24 }
 0xebe   :  { %v6177_v11 = vpop.xlane.xlu1 %6176 }
 0xebf   :  { %17232 = vrcp.f32 %v6177_v11 }
 0xec2   :  { %v6174_v37 = vpop.xlane.xlu0 %6173 }
 0xec3   :  { %17234 = vrcp.f32 %v6174_v37 }
 0xec6   :  { %v6183_v6 = vpop.xlane.xlu1 %6182 }
 0xec7   :  { %17236 = vrcp.f32 %v6183_v6 }
 0xec9   :  { %v17233_v53 = vpop.eup %17232 }
 0xeca   :  { %v6199_v12 = vmul.f32 %v17233_v53, %v20144_v41  ;;  %v6189_v51 = vpop.xlane.xlu1 %6188  ;;  %v6180_v3 = vpop.xlane.xlu0 %6179  ;;  %v848_v41 = vld [vmem:[#allocation22 + $0x18] sm:$0xff] }
 0xecb   :  { %17238 = vrcp.f32 %v6189_v51  ;;  %v16814_v23 = vpack.c.bf16 %v848_v41, %v847_v56 }
 0xecc   :  { %16150 = vmatmul.mubr.msk.f32.vlgmr.msra.gmra.mrb[76].mxu1 %vm1539_vm1, %v6199_v12  ;;  %17240 = vrcp.f32 %v6180_v3 }
 0xecd   :  { %v17235_v35 = vpop.eup %17234  ;;  %16158 = vmatpush3.msra.mxu1 %v6441_v47  ;;  %16159 = vmatprep.mubr.msk.f32.mxu1 %vm18744_vm2, %v21996_v58 }
 0xece   :  { %v6197_v62 = vmul.f32 %v17235_v35, %v20149_v50  ;;  %16167 = vmatprep.subr.mxu1 %v21996_v58  ;;  %v6195_v63 = vpop.xlane.xlu1 %6194  ;;  %v6186_v14 = vpop.xlane.xlu0 %6185 }
 0xecf   :  { %17242 = vrcp.f32 %v6195_v63 }
 0xed0   :  { %16145 = vmatmul.mubr.msk.f32.vlgmr.msra.gmra.mrb[68].mxu0 %vm1539_vm1, %v6197_v62  ;;  %17244 = vrcp.f32 %v6186_v14 }
 0xed1   :  { %16153 = vmatpush3.msra.mxu0 %v6365_v43  ;;  %16154 = vmatprep.mubr.msk.f32.mxu0 %vm18744_vm2, %v21996_v58  ;;  %v17237_v20 = vpop.eup %17236 }
 0xed2   :  { %16162 = vmatprep.subr.mxu0 %v21996_v58  ;;  %v6192_v16 = vpop.xlane.xlu0 %6191  ;;  %v6203_v29 = vmul.f32 %v17237_v20, %v20153_v33  ;;  %v6745_v30 = vpop.permute.xlu1 %6744 }
 0xed3   :  { %17246 = vrcp.f32 %v6192_v16 }
 0xed4   :  { %16160 = vmatmul.mubr.msk.f32.vlgmr.msra.gmra.mrb[78].mxu1 %vm1539_vm1, %v6203_v29  ;;  %v21997_v29 = vld [vmem:[#allocation148_spill] sm:$0xff] }
 0xed5   :  { %v17239_v17 = vpop.eup %17238  ;;  %16168 = vmatpush3.msra.mxu1 %v6593_v60  ;;  %16169 = vmatprep.mubr.msk.f32.mxu1 %vm18744_vm2, %v21996_v58 }
 0xed6   :  { %v17241_v19 = vpop.eup %17240  ;;  %16177 = vmatprep.subr.mxu1 %v21996_v58  ;;  %v6207_v25 = vmul.f32 %v17239_v17, %v20157_v28  ;;  %v6669_v49 = vpop.permute.xlu0 %6668 }
 0xed7   :  { %v6201_v24 = vmul.f32 %v17241_v19, %v20160_v40  ;;  %v6831_v48 = vpop.permute.xlu1 %6830 }
 0xed8   :  { %16170 = vmatmul.mubr.msk.f32.vlgmr.msra.gmra.mrb[80].mxu1 %vm1539_vm1, %v6207_v25  ;;  %v6917_v3 = vsel %vm1539_vm1, %v19689_v57, %v6831_v48 }
 0xed9   :  { %v17243_v22 = vpop.eup %17242  ;;  %16155 = vmatmul.mubr.msk.f32.vlgmr.msra.gmra.mrb[70].mxu0 %vm1539_vm1, %v6201_v24  ;;  %16178 = vmatpush3.msra.mxu1 %v6745_v30 }
 0xeda   :  { %v17245_v36 = vpop.eup %17244  ;;  %16163 = vmatpush3.msra.mxu0 %v6517_v8  ;;  %16164 = vmatprep.mubr.msk.f32.mxu0 %vm18744_vm2, %v21996_v58  ;;  %v6211_v27 = vmul.f32 %v17243_v22, %v20166_v10  ;;  %v6829_v7 = vpop.permute.xlu0 %6828 }
 0xedb   :  { %16172 = vmatprep.subr.mxu0 %v21996_v58  ;;  %16179 = vmatprep.mubr.msk.f32.mxu1 %vm18744_vm2, %v21996_v58  ;;  %v6205_v34 = vmul.f32 %v17245_v36, %v20168_v55  ;;  %v6863_v10 = vpop.permute.xlu1 %6862  ;;  %v6916_v12 = vsel %vm1539_vm1, %v19687_v21, %v6829_v7  ;;  %v21998_v36 = vld [vmem:[#allocation149_spill] sm:$0xff] }
 0xedc   :  { %16180 = vmatmul.mubr.msk.f32.vlgmr.msra.gmra.mrb[82].mxu1 %vm1539_vm1, %v6211_v27  ;;  %v6926_v63 = vsel %vm6924_vm3, %v6917_v3, %v6863_v10 }
 0xedd   :  { %v17247_v31 = vpop.eup %17246  ;;  %16165 = vmatmul.mubr.msk.f32.vlgmr.msra.gmra.mrb[72].mxu0 %vm1539_vm1, %v6205_v34 }
 0xede   :  { %16173 = vmatpush3.msra.mxu0 %v6669_v49  ;;  %16174 = vmatprep.mubr.msk.f32.mxu0 %vm18744_vm2, %v21996_v58  ;;  %v6209_v39 = vmul.f32 %v17247_v31, %v20174_v42  ;;  %v6861_v55 = vpop.permute.xlu0 %6860 }
 0xedf   :  { %16811 = vmatprep.subr.bf16.mxu0 %v16810_v32  ;;  %v6835_v26 = vpop.permute.xlu1 %6834  ;;  %v6925_v35 = vsel %vm6924_vm3, %v6916_v12, %v6861_v55 }
 0xee0   :  { %v6919_v57 = vsel %vm1539_vm1, %v21997_v29, %v6835_v26  ;;  %v22009_v29 = vld [vmem:[#allocation146_spill] sm:$0xff] }
 0xee1   :  { %16175 = vmatmul.mubr.msk.f32.vlgmr.msra.gmra.mrb[74].mxu0 %vm1539_vm1, %v6209_v39 }
 0xee2   :  { %16813 = vmatpush3.bf16.msra.mxu0 %v16810_v32  ;;  %v6833_v44 = vpop.permute.xlu0 %6832  ;;  %v22000_v32 = vld [vmem:[#allocation151_spill] sm:$0xff] }
 0xee3   :  { %16815 = vmatprep.subr.bf16.mxu0 %v16814_v23  ;;  %v6867_v42 = vpop.permute.xlu1 %6866  ;;  %v6918_v21 = vsel %vm1539_vm1, %v19691_v2, %v6833_v44  ;;  %v21999_v2 = vld [vmem:[#allocation150_spill] sm:$0xff]  ;;  %v22004_v44 = vld [vmem:[#allocation144_spill] sm:$0xff] }
 0xee4   :  { %v6928_v25 = vsel %vm6924_vm3, %v6919_v57, %v6867_v42 }
 0xee6   :  { %16817 = vmatpush3.bf16.msra.mxu0 %v16814_v23  ;;  %v6865_v13 = vpop.permute.xlu0 %6864  ;;  %v22001_v23 = vld [vmem:[#allocation152_spill] sm:$0xff] }
 0xee7   :  { %v6839_v43 = vpop.permute.xlu1 %6838  ;;  %v6927_v17 = vsel %vm6924_vm3, %v6918_v21, %v6865_v13 }
 0xee8   :  { %v6921_v34 = vsel %vm1539_vm1, %v21999_v2, %v6839_v43  ;;  %v22005_v43 = vld [vmem:[#allocation142_spill] sm:$0xff] }
 0xeea   :  { %v6837_v47 = vpop.permute.xlu0 %6836 }
 0xeeb   :  { %v6871_v60 = vpop.permute.xlu1 %6870  ;;  %v6920_v27 = vsel %vm1539_vm1, %v21998_v36, %v6837_v47 }
 0xeec   :  { %v6930_v39 = vsel %vm6924_vm3, %v6921_v34, %v6871_v60 }
 0xeee   :  { %v6869_v8 = vpop.permute.xlu0 %6868 }
 0xeef   :  { %v6843_v11 = vpop.permute.xlu1 %6842  ;;  %v6929_v31 = vsel %vm6924_vm3, %v6920_v27, %v6869_v8 }
 0xef2   :  { %v6841_v37 = vpop.permute.xlu0 %6840 }
 0xef3   :  { %v6875_v6 = vpop.permute.xlu1 %6874  ;;  %v6922_v56 = vsel %vm1539_vm1, %v22000_v32, %v6841_v37 }
 0xef6   :  { %v6873_v53 = vpop.permute.xlu0 %6872 }
 0xf9f   :  { %v6360_v52 = vpop.f32.mrb[76].mxu1 }
 0xfa0   :  { %v16151_v0 = vpop.f32.mrb[77].mxu1  ;;  %6894 = vrot.lane.b32.xlu1 %v6360_v52, %s18749_s25  ;;  %v6923_v52 = vsel %vm1539_vm1, %v22001_v23, %v6843_v11 }
 0xfa1   :  { %v6931_v0 = vsel %vm6924_vm3, %v6922_v56, %v6873_v53 }
 0xfa3   :  { %v6284_v9 = vpop.f32.mrb[68].mxu0 }
 0xfa4   :  { %6892 = vrot.lane.b32.xlu0 %v6284_v9, %s18749_s25  ;;  %v16146_v61 = vpop.f32.mrb[69].mxu0 }
 0xfa5   :  { %v6932_v61 = vsel %vm6924_vm3, %v6923_v52, %v6875_v6  ;;  %v22006_v6 = vld [vmem:[#allocation145_spill] sm:$0xff] }
 0xfa7   :  { %v6512_v45 = vpop.f32.mrb[78].mxu1 }
 0xfa8   :  { %6898 = vrot.lane.b32.xlu1 %v6512_v45, %s18749_s25  ;;  %v16161_v50 = vpop.f32.mrb[79].mxu1 }
 0xfab   :  { %v6664_v1 = vpop.f32.mrb[80].mxu1 }
 0xfac   :  { %v6436_v54 = vpop.f32.mrb[70].mxu0  ;;  %6902 = vrot.lane.b32.xlu1 %v6664_v1, %s18749_s25  ;;  %v16171_v46 = vpop.f32.mrb[81].mxu1  ;;  %v15120_v1 = vld [vmem:[#allocation23] ss:$0 sm:$0xff] }
 0xfad   :  { %6896 = vrot.lane.b32.xlu0 %v6436_v54, %s18749_s25  ;;  %v16156_v38 = vpop.f32.mrb[71].mxu0 }
 0xfaf   :  { %v6816_v18 = vpop.f32.mrb[82].mxu1 }
 0xfb0   :  { %v6588_v33 = vpop.f32.mrb[72].mxu0  ;;  %6906 = vrot.lane.b32.xlu1 %v6816_v18, %s18749_s25  ;;  %v16181_v5 = vpop.f32.mrb[83].mxu1 }
 0xfb1   :  { %6900 = vrot.lane.b32.xlu0 %v6588_v33, %s18749_s25  ;;  %v16166_v4 = vpop.f32.mrb[73].mxu0  ;;  %v22002_v33 = vld [vmem:[#allocation141_spill] sm:$0xff] }
 0xfb2   :  { %v22003_v4 = vld [vmem:[#allocation140_spill] sm:$0xff] }
 0xfb4   :  { %v6740_v28 = vpop.f32.mrb[74].mxu0 }
 0xfb5   :  { %6904 = vrot.lane.b32.xlu0 %v6740_v28, %s18749_s25  ;;  %v16176_v40 = vpop.f32.mrb[75].mxu0 }
0x1012   :  { %v6895_v51 = vpop.permute.xlu1 %6894 }
0x1013   :  { %v6935_v20 = vsel %vm6933_vm4, %v6926_v63, %v6895_v51  ;;  %v22007_v51 = vld [vmem:[#allocation143_spill] sm:$0xff] }
0x1016   :  { %v6893_v62 = vpop.permute.xlu0 %6892 }
0x1017   :  { %v6934_v14 = vsel %vm6933_vm4, %v6925_v35, %v6893_v62 }
0x1018   :  { %16190 = vmatprep.mubr.msk.f32.mxu0 %vm1028_vm0, %v6934_v14 }
0x1019   :  { %16191 = vmatmul.mubr.msk.f32.vlgmr.msra.gmra.mrb[76].mxu0 %vm1028_vm0, %v6935_v20 }
0x101a   :  { %v6899_v16 = vpop.permute.xlu1 %6898 }
0x101b   :  { %v6937_v22 = vsel %vm6933_vm4, %v6928_v25, %v6899_v16  ;;  %v22008_v16 = vld [vmem:[#allocation147_spill] sm:$0xff] }
0x101e   :  { %v6903_v24 = vpop.permute.xlu1 %6902 }
0x101f   :  { %v6897_v19 = vpop.permute.xlu0 %6896  ;;  %v6939_v15 = vsel %vm6933_vm4, %v6930_v39, %v6903_v24 }
0x1020   :  { %v6936_v30 = vsel %vm6933_vm4, %v6927_v17, %v6897_v19 }
0x1021   :  { %16193 = vmatprep.mubr.msk.f32.mxu0 %vm1028_vm0, %v6936_v30 }
0x1022   :  { %16194 = vmatmul.mubr.msk.f32.gmra.mrb[78].mxu0 %vm1028_vm0, %v6937_v22  ;;  %v6907_v41 = vpop.permute.xlu1 %6906 }
0x1023   :  { %v6901_v49 = vpop.permute.xlu0 %6900  ;;  %v6941_v50 = vsel %vm6933_vm4, %v6932_v61, %v6907_v41 }
0x1024   :  { %v6938_v59 = vsel %vm6933_vm4, %v6929_v31, %v6901_v49 }
0x1025   :  { %16196 = vmatprep.mubr.msk.f32.mxu0 %vm1028_vm0, %v6938_v59 }
0x1026   :  { %16197 = vmatmul.mubr.msk.f32.gmra.mrb[80].mxu0 %vm1028_vm0, %v6939_v15 }
0x1027   :  { %v6905_v9 = vpop.permute.xlu0 %6904 }
0x1028   :  { %v6940_v45 = vsel %vm6933_vm4, %v6931_v0, %v6905_v9 }
0x1029   :  { %16199 = vmatprep.mubr.msk.f32.mxu0 %vm1028_vm0, %v6940_v45 }
0x102a   :  { %16200 = vmatmul.mubr.msk.f32.gmra.mrb[82].mxu0 %vm1028_vm0, %v6941_v50 }
0x10ec   :  { %v16192_v54 = vpop.f32.mrb[76].mxu0 }
0x10ed   :  { %v7044_v46 = vadd.f32 %v16192_v54, %v15120_v1  ;;  %v7038_v38 = vpop.f32.mrb[77].mxu0 }
0x10ee   :  { %v7039_v18 = vadd.f32 %v15120_v1, %v7038_v38 }
0x10ef   :  { %v7078_v5 = vadd.f32 %v7044_v46, %v22002_v33 }
0x10f0   :  { %v7077_v28 = vadd.f32 %v7039_v18, %v22003_v4 }
0x10f1   :  { %v7088_v40 = vsel %vm1028_vm0, %v7078_v5, 0.0 }
0x10f2   :  { %7089 = vadd.xlane.f32.xlu1 %v7088_v40  ;;  %v7085_v48 = vsel %vm1028_vm0, %v7077_v28, 0.0 }
0x10f3   :  { %7086 = vadd.xlane.f32.xlu0 %v7085_v48 }
0x10f5   :  { %v16195_v7 = vpop.f32.mrb[78].mxu0 }
0x10f6   :  { %v7054_v10 = vadd.f32 %v16195_v7, %v15120_v1  ;;  %v7048_v55 = vpop.f32.mrb[79].mxu0 }
0x10f7   :  { %v7049_v26 = vadd.f32 %v15120_v1, %v7048_v55 }
0x10f8   :  { %v7080_v42 = vadd.f32 %v7054_v10, %v22004_v44 }
0x10f9   :  { %v16198_v13 = vpop.f32.mrb[80].mxu0  ;;  %v7079_v47 = vadd.f32 %v7049_v26, %v22005_v43  ;;  %v852_v43 = vld [vmem:[#allocation28] sm:$0xff] }
0x10fa   :  { %v7064_v60 = vadd.f32 %v16198_v13, %v15120_v1  ;;  %v7058_v8 = vpop.f32.mrb[81].mxu0  ;;  %v7094_v11 = vsel %vm1028_vm0, %v7080_v42, 0.0 }
0x10fb   :  { %v7059_v37 = vadd.f32 %v15120_v1, %v7058_v8  ;;  %7095 = vadd.xlane.f32.xlu0 %v7094_v11  ;;  %v7091_v14 = vsel %vm1028_vm0, %v7079_v47, 0.0  ;;  %v854_v8 = vld [vmem:[#allocation28 + $0x10] sm:$0xff]  ;;  %v855_v11 = vld [vmem:[#allocation28 + $0x18] sm:$0xff] }
0x10fc   :  { %v7082_v53 = vadd.f32 %v7064_v60, %v22006_v6  ;;  %v864_v6 = vld [vmem:[#allocation37] sm:$0xff] }
0x10fd   :  { %v16201_v12 = vpop.f32.mrb[82].mxu0  ;;  %v7081_v3 = vadd.f32 %v7059_v37, %v22007_v51  ;;  %v16822_v37 = vpack.c.bf16 %v855_v11, %v854_v8  ;;  %v857_v51 = vld [vmem:[#allocation31] sm:$0xff] }
0x10fe   :  { %v7074_v35 = vadd.f32 %v16201_v12, %v15120_v1  ;;  %v7068_v62 = vpop.f32.mrb[83].mxu0  ;;  %v7100_v63 = vsel %vm1028_vm0, %v7082_v53, 0.0 }
0x10ff   :  { %v7069_v20 = vadd.f32 %v15120_v1, %v7068_v62  ;;  %7101 = vadd.xlane.f32.xlu1 %v7100_v63  ;;  %7092 = vadd.xlane.f32.xlu0 %v7091_v14  ;;  %v7097_v19 = vsel %vm1028_vm0, %v7081_v3, 0.0 }
0x1100   :  { %v7084_v21 = vadd.f32 %v7074_v35, %v22008_v16 }
0x1101   :  { %v7083_v57 = vadd.f32 %v7069_v20, %v22009_v29 }
0x1102   :  { %v7106_v17 = vsel %vm1028_vm0, %v7084_v21, 0.0 }
0x1103   :  { %7107 = vadd.xlane.f32.xlu1 %v7106_v17  ;;  %7098 = vadd.xlane.f32.xlu0 %v7097_v19  ;;  %v7103_v25 = vsel %vm1028_vm0, %v7083_v57, 0.0 }
0x1107   :  { %7104 = vadd.xlane.f32.xlu0 %v7103_v25 }
0x117f   :  { %v7090_v24 = vpop.xlane.xlu1 %7089 }
0x1180   :  { %v7111_v30 = vmul.f32 0.03125, %v7090_v24  ;;  %v7087_v22 = vpop.xlane.xlu0 %7086 }
0x1181   :  { %v7110_v36 = vmul.f32 0.03125, %v7087_v22 }
0x1182   :  { %v20310_v27 = vsub.f32 %v7078_v5, %v7111_v30 }
0x1183   :  { %v20312_v2 = vsub.f32 %v7077_v28, %v7110_v36  ;;  %v15129_v36 = vld [vmem:[#allocation25] ss:$0 sm:$0xff] }
0x1184   :  { %v7127_v34 = vmul.f32 %v20310_v27, %v20310_v27 }
0x1185   :  { %v7126_v31 = vmul.f32 %v20312_v2, %v20312_v2 }
0x1186   :  { %v7137_v49 = vsel %vm1028_vm0, %v7127_v34, 0.0 }
0x1187   :  { %7138 = vadd.xlane.f32.xlu1 %v7137_v49  ;;  %v7134_v39 = vsel %vm1028_vm0, %v7126_v31, 0.0 }
0x1188   :  { %7135 = vadd.xlane.f32.xlu0 %v7134_v39  ;;  %v7096_v59 = vpop.xlane.xlu0 %7095 }
0x1189   :  { %v7113_v15 = vmul.f32 0.03125, %v7096_v59 }
0x118b   :  { %v20320_v32 = vsub.f32 %v7080_v42, %v7113_v15 }
0x118c   :  { %v7102_v56 = vpop.xlane.xlu1 %7101  ;;  %v7093_v41 = vpop.xlane.xlu0 %7092 }
0x118d   :  { %v7115_v23 = vmul.f32 0.03125, %v7102_v56  ;;  %v7112_v52 = vmul.f32 0.03125, %v7093_v41  ;;  %v7129_v0 = vmul.f32 %v20320_v32, %v20320_v32  ;;  %v15130_v41 = vld [vmem:[#allocation26] ss:$0 sm:$0xff] }
0x118f   :  { %v20324_v9 = vsub.f32 %v7082_v53, %v7115_v23  ;;  %v20326_v61 = vsub.f32 %v7079_v47, %v7112_v52  ;;  %v7143_v45 = vsel %vm1028_vm0, %v7129_v0, 0.0  ;;  %v853_v47 = vld [vmem:[#allocation28 + $0x8] sm:$0xff]  ;;  %v865_v53 = vld [vmem:[#allocation37 + $0x8] sm:$0xff] }
0x1190   :  { %v7108_v50 = vpop.xlane.xlu1 %7107  ;;  %7144 = vadd.xlane.f32.xlu1 %v7143_v45  ;;  %v7099_v1 = vpop.xlane.xlu0 %7098  ;;  %v16818_v60 = vpack.c.bf16 %v853_v47, %v852_v43  ;;  %v16834_v12 = vpack.c.bf16 %v865_v53, %v864_v6 }
0x1191   :  { %v7117_v54 = vmul.f32 0.03125, %v7108_v50  ;;  %v7114_v46 = vmul.f32 0.03125, %v7099_v1  ;;  %v7131_v38 = vmul.f32 %v20324_v9, %v20324_v9  ;;  %v7128_v18 = vmul.f32 %v20326_v61, %v20326_v61  ;;  %v866_v50 = vld [vmem:[#allocation37 + $0x10] sm:$0xff]  ;;  %v867_v1 = vld [vmem:[#allocation37 + $0x18] sm:$0xff] }
0x1192   :  { %16819 = vmatprep.subr.bf16.mxu1 %v16818_v60 }
0x1193   :  { %v20333_v33 = vsub.f32 %v7084_v21, %v7117_v54  ;;  %v20335_v5 = vsub.f32 %v7081_v3, %v7114_v46  ;;  %v7149_v4 = vsel %vm1028_vm0, %v7131_v38, 0.0  ;;  %v7140_v28 = vsel %vm1028_vm0, %v7128_v18, 0.0  ;;  %16821 = vmatpush3.bf16.msra.mxu1 %v16818_v60  ;;  %v858_v3 = vld [vmem:[#allocation31 + $0x8] sm:$0xff] }
0x1194   :  { %7150 = vadd.xlane.f32.xlu1 %v7149_v4  ;;  %7141 = vadd.xlane.f32.xlu0 %v7140_v28  ;;  %v7105_v40 = vpop.xlane.xlu0 %7104  ;;  %v16826_v35 = vpack.c.bf16 %v858_v3, %v857_v51  ;;  %v16838_v4 = vpack.c.bf16 %v867_v1, %v866_v50 }
0x1195   :  { %v7116_v48 = vmul.f32 0.03125, %v7105_v40  ;;  %v7133_v7 = vmul.f32 %v20333_v33, %v20333_v33  ;;  %v7130_v10 = vmul.f32 %v20335_v5, %v20335_v5  ;;  %16823 = vmatprep.subr.bf16.mxu1 %v16822_v37 }
0x1196   :  { %16827 = vmatprep.subr.bf16.mxu0 %v16826_v35 }
0x1197   :  { %v20343_v55 = vsub.f32 %v7083_v57, %v7116_v48  ;;  %v7155_v26 = vsel %vm1028_vm0, %v7133_v7, 0.0  ;;  %v7146_v44 = vsel %vm1028_vm0, %v7130_v10, 0.0  ;;  %16825 = vmatpush3.bf16.msra.mxu1 %v16822_v37  ;;  %16829 = vmatpush3.bf16.msra.mxu0 %v16826_v35  ;;  %v17447_v35 = vld [vmem:[#allocation5 + $0x8] sm:$0xff] }
0x1198   :  { %7156 = vadd.xlane.f32.xlu1 %v7155_v26  ;;  %7147 = vadd.xlane.f32.xlu0 %v7146_v44 }
0x1199   :  { %v7132_v42 = vmul.f32 %v20343_v55, %v20343_v55  ;;  %16835 = vmatprep.subr.bf16.mxu1 %v16834_v12 }
0x119b   :  { %v7152_v13 = vsel %vm1028_vm0, %v7132_v42, 0.0 }
0x119c   :  { %7153 = vadd.xlane.f32.xlu0 %v7152_v13 }
0x1214   :  { %v7139_v62 = vpop.xlane.xlu1 %7138 }
0x1215   :  { %v7159_v63 = vmul.f32 0.03125, %v7139_v62  ;;  %v7136_v14 = vpop.xlane.xlu0 %7135  ;;  %v17448_v62 = vld [vmem:[#allocation5 + $0x10] sm:$0xff] }
0x1216   :  { %v7158_v20 = vmul.f32 0.03125, %v7136_v14  ;;  %v17450_v14 = vld [vmem:[#allocation5 + $0x20] sm:$0xff] }
0x1217   :  { %v7167_v16 = vadd.f32 1e-05, %v7159_v63  ;;  %v17449_v63 = vld [vmem:[#allocation5 + $0x18] sm:$0xff] }
0x1218   :  { %v7166_v21 = vadd.f32 1e-05, %v7158_v20  ;;  %v17451_v20 = vld [vmem:[#allocation5 + $0x28] sm:$0xff] }
0x1219   :  { %17248 = vrsqrt.f32 %v7167_v16  ;;  %v17452_v16 = vld [vmem:[#allocation5 + $0x30] sm:$0xff] }
0x121a   :  { %17250 = vrsqrt.f32 %v7166_v21  ;;  %v17453_v21 = vld [vmem:[#allocation5 + $0x38] sm:$0xff] }
0x121d   :  { %v7145_v29 = vpop.xlane.xlu1 %7144 }
0x121e   :  { %v7161_v57 = vmul.f32 0.03125, %v7145_v29  ;;  %v20398_v29 = vld [vmem:[#allocation2] sm:$0xff] }
0x1220   :  { %v7169_v17 = vadd.f32 1e-05, %v7161_v57  ;;  %v859_v57 = vld [vmem:[#allocation31 + $0x10] sm:$0xff] }
0x1221   :  { %v7151_v19 = vpop.xlane.xlu1 %7150  ;;  %v7142_v25 = vpop.xlane.xlu0 %7141 }
0x1222   :  { %17252 = vrsqrt.f32 %v7169_v17  ;;  %v7163_v30 = vmul.f32 0.03125, %v7151_v19  ;;  %v7160_v22 = vmul.f32 0.03125, %v7142_v25  ;;  %v860_v17 = vld [vmem:[#allocation31 + $0x18] sm:$0xff]  ;;  %v874_v25 = vld [vmem:[#allocation43] sm:$0xff] }
0x1223   :  { %v17249_v24 = vpop.eup %17248  ;;  %v16830_v19 = vpack.c.bf16 %v860_v17, %v859_v57 }
0x1224   :  { %v17251_v34 = vpop.eup %17250  ;;  %v7183_v31 = vmul.f32 %v17249_v24, %v20310_v27  ;;  %v7171_v49 = vadd.f32 1e-05, %v7163_v30  ;;  %v7168_v39 = vadd.f32 1e-05, %v7160_v22  ;;  %v875_v24 = vld [vmem:[#allocation43 + $0x8] sm:$0xff]  ;;  %v876_v22 = vld [vmem:[#allocation43 + $0x10] sm:$0xff] }
0x1225   :  { %v7182_v59 = vmul.f32 %v17251_v34, %v20312_v2  ;;  %v7157_v15 = vpop.xlane.xlu1 %7156  ;;  %v7148_v56 = vpop.xlane.xlu0 %7147  ;;  %16831 = vmatprep.subr.bf16.mxu0 %v16830_v19  ;;  %v16850_v30 = vpack.c.bf16 %v875_v24, %v874_v25 }
0x1226   :  { %v7197_v23 = vmul.f32 %v15129_v36, %v7183_v31  ;;  %17254 = vrsqrt.f32 %v7171_v49  ;;  %v7165_v52 = vmul.f32 0.03125, %v7157_v15  ;;  %v7162_v0 = vmul.f32 0.03125, %v7148_v56  ;;  %16833 = vmatpush3.bf16.msra.mxu0 %v16830_v19  ;;  %v20403_v31 = vld [vmem:[#allocation2 + $0x8] sm:$0xff]  ;;  %v20411_v56 = vld [vmem:[#allocation2 + $0x18] sm:$0xff] }
0x1227   :  { %v7196_v45 = vmul.f32 %v15129_v36, %v7182_v59  ;;  %17256 = vrsqrt.f32 %v7168_v39  ;;  %v869_v49 = vld [vmem:[#allocation40] sm:$0xff]  ;;  %v870_v39 = vld [vmem:[#allocation40 + $0x8] sm:$0xff] }
0x1228   :  { %v7173_v54 = vadd.f32 1e-05, %v7165_v52  ;;  %v7170_v46 = vadd.f32 1e-05, %v7162_v0  ;;  %v20354_v18 = vadd.f32 %v15130_v41, %v7197_v23  ;;  %v20407_v59 = vld [vmem:[#allocation2 + $0x10] sm:$0xff]  ;;  %v16842_v15 = vpack.c.bf16 %v870_v39, %v869_v49  ;;  %v20419_v23 = vld [vmem:[#allocation2 + $0x28] sm:$0xff] }
0x1229   :  { %v20352_v38 = vadd.f32 %v15130_v41, %v7196_v45  ;;  %v7154_v27 = vpop.xlane.xlu0 %7153  ;;  %v20423_v52 = vld [vmem:[#allocation2 + $0x30] sm:$0xff]  ;;  %v20427_v0 = vld [vmem:[#allocation2 + $0x38] sm:$0xff]  ;;  %v15169_v39 = vld [vmem:[#allocation44] ss:$0 sm:$0xff] }
0x122a   :  { %22011 = vst [vmem:[#allocation149_spill] sm:$0xff] %v20354_v18  ;;  %17258 = vrsqrt.f32 %v7173_v54  ;;  %v7164_v2 = vmul.f32 0.03125, %v7154_v27  ;;  %16843 = vmatprep.subr.bf16.mxu0 %v16842_v15  ;;  %v15131_v45 = vld [vmem:[#allocation29] ss:$0 sm:$0xff] }
0x122b   :  { %22010 = vst [vmem:[#allocation148_spill] sm:$0xff] %v20352_v38  ;;  %16210 = vmatprep.mubr.msk.f32.mxu1 %vm1028_vm0, %v20352_v38  ;;  %17260 = vrsqrt.f32 %v7170_v46  ;;  %v871_v27 = vld [vmem:[#allocation40 + $0x10] sm:$0xff] }
0x122c   :  { %16211 = vmatmul.mubr.msk.f32.vlgmr.msra.gmra.mrb[84].mxu1 %vm1028_vm0, %v20354_v18  ;;  %v17253_v28 = vpop.eup %17252  ;;  %v7172_v40 = vadd.f32 1e-05, %v7164_v2 }
0x122d   :  { %16837 = vmatpush3.bf16.msra.mxu1 %v16834_v12  ;;  %v7185_v48 = vmul.f32 %v17253_v28, %v20320_v32 }
0x122e   :  { %16839 = vmatprep.subr.bf16.mxu1 %v16838_v4  ;;  %17262 = vrsqrt.f32 %v7172_v40 }
0x122f   :  { %v7199_v44 = vmul.f32 %v15129_v36, %v7185_v48 }
0x1230   :  { %v17255_v7 = vpop.eup %17254 }
0x1231   :  { %16841 = vmatpush3.bf16.msra.mxu1 %v16838_v4  ;;  %v17257_v10 = vpop.eup %17256  ;;  %v7187_v42 = vmul.f32 %v17255_v7, %v20324_v9  ;;  %v20366_v11 = vadd.f32 %v15130_v41, %v7199_v44  ;;  %v872_v4 = vld [vmem:[#allocation40 + $0x18] sm:$0xff] }
0x1232   :  { %v7184_v26 = vmul.f32 %v17257_v10, %v20326_v61  ;;  %16851 = vmatprep.subr.bf16.mxu1 %v16850_v30  ;;  %v16846_v40 = vpack.c.bf16 %v872_v4, %v871_v27  ;;  %v881_v4 = vld [vmem:[#allocation46 + $0x10] sm:$0xff] }
0x1233   :  { %22013 = vst [vmem:[#allocation151_spill] sm:$0xff] %v20366_v11  ;;  %v7201_v37 = vmul.f32 %v15129_v36, %v7187_v42 }
0x1234   :  { %v17259_v13 = vpop.eup %17258  ;;  %v7198_v43 = vmul.f32 %v15129_v36, %v7184_v26 }
0x1235   :  { %v17261_v47 = vpop.eup %17260  ;;  %v7189_v32 = vmul.f32 %v17259_v13, %v20333_v33  ;;  %v20376_v12 = vadd.f32 %v15130_v41, %v7201_v37 }
0x1236   :  { %v20363_v60 = vadd.f32 %v15130_v41, %v7198_v43  ;;  %v7186_v8 = vmul.f32 %v17261_v47, %v20335_v5 }
0x1237   :  { %22015 = vst [vmem:[#allocation141_spill] sm:$0xff] %v20376_v12  ;;  %v7203_v51 = vmul.f32 %v15129_v36, %v7189_v32 }
0x1238   :  { %22012 = vst [vmem:[#allocation150_spill] sm:$0xff] %v20363_v60  ;;  %v17263_v6 = vpop.eup %17262  ;;  %16213 = vmatprep.mubr.msk.f32.mxu1 %vm1028_vm0, %v20363_v60  ;;  %v7200_v61 = vmul.f32 %v15129_v36, %v7186_v8 }
0x1239   :  { %16214 = vmatmul.mubr.msk.f32.gmra.mrb[86].mxu1 %vm1028_vm0, %v20366_v11  ;;  %v7188_v9 = vmul.f32 %v17263_v6, %v20343_v55  ;;  %v20386_v3 = vadd.f32 %v15130_v41, %v7203_v51  ;;  %v17446_v55 = vld [vmem:[#allocation5] sm:$0xff] }
0x123a   :  { %v20374_v53 = vadd.f32 %v15130_v41, %v7200_v61  ;;  %v15151_v51 = vld [vmem:[#allocation38] ss:$0 sm:$0xff] }
0x123b   :  { %v7202_v5 = vmul.f32 %v15129_v36, %v7188_v9  ;;  %22017 = vst [vmem:[#allocation144_spill] sm:$0xff] %v20386_v3  ;;  %v877_v36 = vld [vmem:[#allocation43 + $0x18] sm:$0xff] }
0x123c   :  { %22014 = vst [vmem:[#allocation152_spill] sm:$0xff] %v20374_v53  ;;  %16216 = vmatprep.mubr.msk.f32.mxu1 %vm1028_vm0, %v20374_v53  ;;  %v16854_v34 = vpack.c.bf16 %v877_v36, %v876_v22 }
0x123d   :  { %16217 = vmatmul.mubr.msk.f32.gmra.mrb[88].mxu1 %vm1028_vm0, %v20376_v12  ;;  %v20382_v33 = vadd.f32 %v15130_v41, %v7202_v5  ;;  %v20415_v41 = vld [vmem:[#allocation2 + $0x20] sm:$0xff] }
0x123f   :  { %22016 = vst [vmem:[#allocation140_spill] sm:$0xff] %v20382_v33  ;;  %16219 = vmatprep.mubr.msk.f32.mxu1 %vm1028_vm0, %v20382_v33 }
0x1241   :  { %16220 = vmatmul.mubr.msk.f32.gmra.mrb[90].mxu1 %vm1028_vm0, %v20386_v3 }
0x1242   :  { %16250 = vmatprep.mubr.msk.f32.mxu1 %vm1028_vm0, %v17446_v55 }
0x1245   :  { %16251 = vmatmul.mubr.msk.f32.vlgmr.msra.gmra.mrb[92].mxu1 %vm1028_vm0, %v17447_v35 }
0x1246   :  { %16253 = vmatprep.mubr.msk.f32.mxu1 %vm1028_vm0, %v17448_v62  ;;  %16853 = vmatpush3.bf16.msra.mxu1 %v16850_v30 }
0x1247   :  { %16855 = vmatprep.subr.bf16.mxu1 %v16854_v34 }
0x1249   :  { %16254 = vmatmul.mubr.msk.f32.gmra.mrb[94].mxu1 %vm1028_vm0, %v17449_v63 }
0x124a   :  { %16256 = vmatprep.mubr.msk.f32.mxu1 %vm1028_vm0, %v17450_v14  ;;  %16857 = vmatpush3.bf16.msra.mxu1 %v16854_v34 }
0x124b   :  { %16322 = vmatprep.subr.mxu1 %v21996_v58 }
0x124d   :  { %16257 = vmatmul.mubr.msk.f32.gmra.mrb[96].mxu1 %vm1028_vm0, %v17451_v20 }
0x124e   :  { %16259 = vmatprep.mubr.msk.f32.mxu1 %vm1028_vm0, %v17452_v16 }
0x1251   :  { %16260 = vmatmul.mubr.msk.f32.gmra.mrb[98].mxu1 %vm1028_vm0, %v17453_v21 }
0x1252   :  { %16290 = vmatprep.mubr.msk.f32.mxu1 %vm1028_vm0, %v20398_v29 }
0x1255   :  { %16291 = vmatmul.mubr.msk.f32.vlgmr.msra.gmra.mrb[100].mxu1 %vm1028_vm0, %v20403_v31 }
0x1256   :  { %16293 = vmatprep.mubr.msk.f32.mxu1 %vm1028_vm0, %v20407_v59 }
0x1259   :  { %16294 = vmatmul.mubr.msk.f32.gmra.mrb[102].mxu1 %vm1028_vm0, %v20411_v56 }
0x125a   :  { %16296 = vmatprep.mubr.msk.f32.mxu1 %vm1028_vm0, %v20415_v41 }
0x125d   :  { %16297 = vmatmul.mubr.msk.f32.gmra.mrb[104].mxu1 %vm1028_vm0, %v20419_v23 }
0x125e   :  { %16299 = vmatprep.mubr.msk.f32.mxu1 %vm1028_vm0, %v20423_v52 }
0x1261   :  { %16300 = vmatmul.mubr.msk.f32.gmra.mrb[106].mxu1 %vm1028_vm0, %v20427_v0 }
0x1262   :  { %16324 = vmatprep.mubr.msk.f32.mxu1 %vm18744_vm2, %v21996_v58 }
0x12ff   :  { %v16212_v50 = vpop.f32.mrb[84].mxu1 }
0x1300   :  { %v7320_v1 = vadd.f32 %v16212_v50, %v15131_v45  ;;  %v7314_v54 = vpop.f32.mrb[85].mxu1 }
0x1301   :  { %v7315_v46 = vadd.f32 %v15131_v45, %v7314_v54  ;;  %v879_v54 = vld [vmem:[#allocation46] sm:$0xff] }
0x1302   :  { %v7354_v28 = vmax.f32 %v7320_v1, 0.0 }
0x1303   :  { %v7353_v2 = vmax.f32 %v7315_v46, 0.0  ;;  %v880_v46 = vld [vmem:[#allocation46 + $0x8] sm:$0xff] }
0x1304   :  { %v16858_v27 = vpack.c.bf16 %v880_v46, %v879_v54 }
0x1305   :  { %16230 = vmatprep.mubr.msk.f32.mxu0 %vm1028_vm0, %v7353_v2  ;;  %v882_v2 = vld [vmem:[#allocation46 + $0x18] sm:$0xff] }
0x1306   :  { %16231 = vmatmul.mubr.msk.f32.vlgmr.msra.gmra.mrb[84].mxu0 %vm1028_vm0, %v7354_v28 }
0x1307   :  { %16845 = vmatpush3.bf16.msra.mxu0 %v16842_v15 }
0x1308   :  { %16847 = vmatprep.subr.bf16.mxu0 %v16846_v40 }
0x130b   :  { %16849 = vmatpush3.bf16.msra.mxu0 %v16846_v40 }
0x130c   :  { %v16215_v48 = vpop.f32.mrb[86].mxu1  ;;  %16859 = vmatprep.subr.bf16.mxu0 %v16858_v27 }
0x130d   :  { %v7330_v7 = vadd.f32 %v16215_v48, %v15131_v45  ;;  %v7324_v10 = vpop.f32.mrb[87].mxu1 }
0x130e   :  { %v7325_v26 = vadd.f32 %v15131_v45, %v7324_v10 }
0x130f   :  { %v7356_v13 = vmax.f32 %v7330_v7, 0.0 }
0x1310   :  { %v7355_v44 = vmax.f32 %v7325_v26, 0.0  ;;  %v16218_v42 = vpop.f32.mrb[88].mxu1 }
0x1311   :  { %v7340_v43 = vadd.f32 %v16218_v42, %v15131_v45  ;;  %v7334_v47 = vpop.f32.mrb[89].mxu1 }
0x1312   :  { %v7335_v8 = vadd.f32 %v15131_v45, %v7334_v47  ;;  %16233 = vmatprep.mubr.msk.f32.mxu0 %vm1028_vm0, %v7355_v44 }
0x1313   :  { %16234 = vmatmul.mubr.msk.f32.gmra.mrb[86].mxu0 %vm1028_vm0, %v7356_v13  ;;  %v7358_v6 = vmax.f32 %v7340_v43, 0.0 }
0x1314   :  { %v7357_v37 = vmax.f32 %v7335_v8, 0.0  ;;  %v16221_v32 = vpop.f32.mrb[90].mxu1 }
0x1315   :  { %v7350_v61 = vadd.f32 %v16221_v32, %v15131_v45  ;;  %v7344_v9 = vpop.f32.mrb[91].mxu1  ;;  %v15160_v32 = vld [vmem:[#allocation41] ss:$0 sm:$0xff] }
0x1316   :  { %v7345_v5 = vadd.f32 %v15131_v45, %v7344_v9  ;;  %16236 = vmatprep.mubr.msk.f32.mxu0 %vm1028_vm0, %v7357_v37 }
0x1317   :  { %16237 = vmatmul.mubr.msk.f32.gmra.mrb[88].mxu0 %vm1028_vm0, %v7358_v6  ;;  %v7360_v62 = vmax.f32 %v7350_v61, 0.0 }
0x1318   :  { %v7359_v55 = vmax.f32 %v7345_v5, 0.0  ;;  %v16252_v35 = vpop.f32.mrb[92].mxu1 }
0x1319   :  { %v7708_v63 = vpop.f32.mrb[93].mxu1  ;;  %v20445_v16 = vadd.f32 %v16252_v35, %v15151_v51 }
0x131a   :  { %16239 = vmatprep.mubr.msk.f32.mxu0 %vm1028_vm0, %v7359_v55  ;;  %v20440_v14 = vadd.f32 %v15151_v51, %v7708_v63 }
0x131b   :  { %16240 = vmatmul.mubr.msk.f32.gmra.mrb[90].mxu0 %vm1028_vm0, %v7360_v62  ;;  %22019 = vst [vmem:[#allocation145_spill] sm:$0xff] %v20445_v16 }
0x131c   :  { %22018 = vst [vmem:[#allocation142_spill] sm:$0xff] %v20440_v14  ;;  %16270 = vmatprep.mubr.msk.f32.mxu0 %vm1028_vm0, %v20440_v14  ;;  %v16255_v20 = vpop.f32.mrb[94].mxu1 }
0x131d   :  { %v7718_v21 = vpop.f32.mrb[95].mxu1  ;;  %v20449_v17 = vadd.f32 %v16255_v20, %v15151_v51 }
0x131e   :  { %v20447_v57 = vadd.f32 %v15151_v51, %v7718_v21 }
0x131f   :  { %22021 = vst [vmem:[#allocation147_spill] sm:$0xff] %v20449_v17  ;;  %16271 = vmatmul.mubr.msk.f32.vlgmr.msra.gmra.mrb[92].mxu0 %vm1028_vm0, %v20445_v16 }
0x1320   :  { %22020 = vst [vmem:[#allocation143_spill] sm:$0xff] %v20447_v57  ;;  %16273 = vmatprep.mubr.msk.f32.mxu0 %vm1028_vm0, %v20447_v57  ;;  %v16258_v19 = vpop.f32.mrb[96].mxu1  ;;  %16861 = vmatpush3.bf16.msra.mxu0 %v16858_v27 }
0x1321   :  { %v7728_v25 = vpop.f32.mrb[97].mxu1  ;;  %v20459_v30 = vadd.f32 %v16258_v19, %v15151_v51 }
0x1322   :  { %v20455_v24 = vadd.f32 %v15151_v51, %v7728_v25 }
0x1323   :  { %16274 = vmatmul.mubr.msk.f32.gmra.mrb[94].mxu0 %vm1028_vm0, %v20449_v17  ;;  %22023 = vst [vmem:[#allocation153_spill] sm:$0xff] %v20459_v30 }
0x1324   :  { %22022 = vst [vmem:[#allocation146_spill] sm:$0xff] %v20455_v24  ;;  %v16261_v22 = vpop.f32.mrb[98].mxu1  ;;  %16276 = vmatprep.mubr.msk.f32.mxu0 %vm1028_vm0, %v20455_v24 }
0x1325   :  { %v7738_v36 = vpop.f32.mrb[99].mxu1  ;;  %v20465_v49 = vadd.f32 %v16261_v22, %v15151_v51 }
0x1326   :  { %v20463_v34 = vadd.f32 %v15151_v51, %v7738_v36 }
0x1327   :  { %22025 = vst [vmem:[#allocation155_spill] sm:$0xff] %v20465_v49  ;;  %16277 = vmatmul.mubr.msk.f32.gmra.mrb[96].mxu0 %vm1028_vm0, %v20459_v30 }
0x1328   :  { %22024 = vst [vmem:[#allocation154_spill] sm:$0xff] %v20463_v34  ;;  %16279 = vmatprep.mubr.msk.f32.mxu0 %vm1028_vm0, %v20463_v34  ;;  %v16292_v15 = vpop.f32.mrb[100].mxu1 }
0x1329   :  { %v20475_v45 = vadd.f32 %v16292_v15, %v15169_v39  ;;  %v7954_v50 = vpop.f32.mrb[101].mxu1 }
0x132a   :  { %v20477_v1 = vadd.f32 %v15169_v39, %v7954_v50  ;;  %v15178_v50 = vld [vmem:[#allocation47] ss:$0 sm:$0xff] }
0x132b   :  { %16280 = vmatmul.mubr.msk.f32.gmra.mrb[98].mxu0 %vm1028_vm0, %v20465_v49 }
0x132c   :  { %16310 = vmatprep.mubr.msk.f32.mxu0 %vm1028_vm0, %v20398_v29  ;;  %16323 = vmatpush3.xpose.msk.msra.mxu1 %vm1539_vm1, %v20477_v1  ;;  %v16862_v29 = vpack.c.bf16 %v882_v2, %v881_v4  ;;  %v16295_v28 = vpop.f32.mrb[102].mxu1 }
0x132d   :  { %16327 = vmatprep.subr.mxu1 %v21996_v58  ;;  %v20487_v40 = vadd.f32 %v16295_v28, %v15169_v39  ;;  %v7964_v48 = vpop.f32.mrb[103].mxu1 }
0x132e   :  { %16863 = vmatprep.subr.bf16.mxu0 %v16862_v29  ;;  %v20493_v7 = vadd.f32 %v15169_v39, %v7964_v48 }
0x132f   :  { %16865 = vmatpush3.bf16.msra.mxu0 %v16862_v29 }
0x1330   :  { %16342 = vmatprep.subr.mxu0 %v21996_v58  ;;  %v16298_v10 = vpop.f32.mrb[104].mxu1 }
0x1332   :  { %16311 = vmatmul.mubr.msk.f32.vlgmr.msra.gmra.mrb[100].mxu0 %vm1028_vm0, %v20403_v31  ;;  %v20499_v31 = vadd.f32 %v16298_v10, %v15169_v39 }
0x1333   :  { %16313 = vmatprep.mubr.msk.f32.mxu0 %vm1028_vm0, %v20407_v59  ;;  %v7974_v59 = vpop.f32.mrb[105].mxu1 }
0x1334   :  { %v20501_v26 = vadd.f32 %v15169_v39, %v7974_v59 }
0x1336   :  { %16314 = vmatmul.mubr.msk.f32.gmra.mrb[102].mxu0 %vm1028_vm0, %v20411_v56  ;;  %v16301_v56 = vpop.f32.mrb[106].mxu1 }
0x1337   :  { %16316 = vmatprep.mubr.msk.f32.mxu0 %vm1028_vm0, %v20415_v41  ;;  %v20509_v41 = vadd.f32 %v16301_v56, %v15169_v39 }
0x1338   :  { %16343 = vmatpush3.xpose.msk.msra.mxu0 %vm1539_vm1, %v20501_v26 }
0x1339   :  { %16352 = vmatprep.subr.mxu0 %v21996_v58 }
0x133a   :  { %16317 = vmatmul.mubr.msk.f32.gmra.mrb[104].mxu0 %vm1028_vm0, %v20419_v23  ;;  %v7984_v23 = vpop.f32.mrb[107].mxu1 }
0x133b   :  { %16319 = vmatprep.mubr.msk.f32.mxu0 %vm1028_vm0, %v20423_v52  ;;  %v20512_v52 = vadd.f32 %v15169_v39, %v7984_v23 }
0x133e   :  { %16320 = vmatmul.mubr.msk.f32.gmra.mrb[106].mxu0 %vm1028_vm0, %v20427_v0 }
0x133f   :  { %16344 = vmatprep.mubr.msk.f32.mxu0 %vm18744_vm2, %v21996_v58 }
0x13d9   :  { %v20514_v44 = vpop.f32.mrb[84].mxu0 }
0x13da   :  { %22026 = vst [vmem:[#allocation156_spill] sm:$0xff] %v20514_v44  ;;  %v20516_v42 = vpop.f32.mrb[85].mxu0 }
0x13db   :  { %22027 = vst [vmem:[#allocation157_spill] sm:$0xff] %v20516_v42 }
0x13e6   :  { %v20518_v13 = vpop.f32.mrb[86].mxu0 }
0x13e7   :  { %22028 = vst [vmem:[#allocation158_spill] sm:$0xff] %v20518_v13  ;;  %v20520_v0 = vpop.f32.mrb[87].mxu0 }
0x13e8   :  { %22029 = vst [vmem:[#allocation159_spill] sm:$0xff] %v20520_v0 }
0x13ea   :  { %v20522_v43 = vpop.f32.mrb[88].mxu0 }
0x13eb   :  { %22030 = vst [vmem:[#allocation160_spill] sm:$0xff] %v20522_v43  ;;  %v20524_v47 = vpop.f32.mrb[89].mxu0 }
0x13ec   :  { %22031 = vst [vmem:[#allocation161_spill] sm:$0xff] %v20524_v47 }
0x13ee   :  { %v20526_v8 = vpop.f32.mrb[90].mxu0 }
0x13ef   :  { %22032 = vst [vmem:[#allocation162_spill] sm:$0xff] %v20526_v8  ;;  %v20528_v37 = vpop.f32.mrb[91].mxu0 }
0x13f0   :  { %22033 = vst [vmem:[#allocation163_spill] sm:$0xff] %v20528_v37 }
0x13f2   :  { %v16272_v6 = vpop.f32.mrb[92].mxu0 }
0x13f3   :  { %v7843_v61 = vpop.f32.mrb[93].mxu0  ;;  %v20538_v55 = vadd.f32 %v16272_v6, %v15160_v32 }
0x13f4   :  { %v20530_v9 = vadd.f32 %v15160_v32, %v7843_v61 }
0x13f6   :  { %16325 = vmatmul.mubr.msk.f32.vlgmr.msra.gmra.mrb[108].mxu1 %vm1539_vm1, %v20530_v9  ;;  %v16275_v5 = vpop.f32.mrb[94].mxu0 }
0x13f7   :  { %16328 = vmatpush3.xpose.msk.msra.mxu1 %vm1539_vm1, %v20475_v45  ;;  %v7853_v51 = vpop.f32.mrb[95].mxu0  ;;  %16329 = vmatprep.mubr.msk.f32.mxu1 %vm18744_vm2, %v21996_v58  ;;  %v20560_v25 = vadd.f32 %v16275_v5, %v15160_v32 }
0x13f8   :  { %16332 = vmatprep.subr.mxu1 %v21996_v58  ;;  %v20547_v63 = vadd.f32 %v15160_v32, %v7853_v51 }
0x13fa   :  { %16330 = vmatmul.mubr.msk.f32.vlgmr.msra.gmra.mrb[110].mxu1 %vm1539_vm1, %v20538_v55  ;;  %v16278_v35 = vpop.f32.mrb[96].mxu0 }
0x13fb   :  { %16333 = vmatpush3.xpose.msk.msra.mxu1 %vm1539_vm1, %v20493_v7  ;;  %16334 = vmatprep.mubr.msk.f32.mxu1 %vm18744_vm2, %v21996_v58  ;;  %v7863_v62 = vpop.f32.mrb[97].mxu0  ;;  %v20570_v36 = vadd.f32 %v16278_v35, %v15160_v32 }
0x13fc   :  { %16337 = vmatprep.subr.mxu1 %v21996_v58  ;;  %v20550_v20 = vadd.f32 %v15160_v32, %v7863_v62 }
0x13fe   :  { %16335 = vmatmul.mubr.msk.f32.vlgmr.msra.gmra.mrb[112].mxu1 %vm1539_vm1, %v20547_v63  ;;  %v16281_v21 = vpop.f32.mrb[98].mxu0  ;;  %16345 = vmatmul.mubr.msk.f32.vlgmr.msra.gmra.mrb[108].mxu0 %vm1539_vm1, %v20550_v20 }
0x13ff   :  { %16338 = vmatpush3.xpose.msk.msra.mxu1 %vm1539_vm1, %v20487_v40  ;;  %16339 = vmatprep.mubr.msk.f32.mxu1 %vm18744_vm2, %v21996_v58  ;;  %v7873_v19 = vpop.f32.mrb[99].mxu0  ;;  %v20583_v39 = vadd.f32 %v16281_v21, %v15160_v32 }
0x1400   :  { %v20562_v22 = vadd.f32 %v15160_v32, %v7873_v19  ;;  %16353 = vmatpush3.xpose.msk.msra.mxu0 %vm1539_vm1, %v20512_v52  ;;  %16354 = vmatprep.mubr.msk.f32.mxu0 %vm18744_vm2, %v21996_v58 }
0x1401   :  { %16347 = vmatprep.subr.mxu1 %v21996_v58  ;;  %16362 = vmatprep.subr.mxu0 %v21996_v58 }
0x1402   :  { %16340 = vmatmul.mubr.msk.f32.vlgmr.msra.gmra.mrb[114].mxu1 %vm1539_vm1, %v20560_v25 }
0x1403   :  { %16355 = vmatmul.mubr.msk.f32.vlgmr.msra.gmra.mrb[110].mxu0 %vm1539_vm1, %v20562_v22  ;;  %16348 = vmatpush3.xpose.msk.msra.mxu1 %vm1539_vm1, %v20499_v31 }
0x1404   :  { %16349 = vmatprep.mubr.msk.f32.mxu1 %vm18744_vm2, %v21996_v58  ;;  %16357 = vmatprep.subr.mxu1 %v21996_v58 }
0x1405   :  { %16364 = vmatprep.mubr.msk.f32.mxu0 %vm18744_vm2, %v21996_v58  ;;  %v16312_v15 = vpop.f32.mrb[100].mxu0 }
0x1406   :  { %16350 = vmatmul.mubr.msk.f32.vlgmr.msra.gmra.mrb[116].mxu1 %vm1539_vm1, %v20570_v36  ;;  %v20596_v54 = vadd.f32 %v16312_v15, %v15178_v50  ;;  %v8065_v46 = vpop.f32.mrb[101].mxu0 }
0x1407   :  { %16358 = vmatpush3.xpose.msk.msra.mxu1 %vm1539_vm1, %v20509_v41  ;;  %16359 = vmatprep.mubr.msk.f32.mxu1 %vm18744_vm2, %v21996_v58  ;;  %v20600_v27 = vadd.f32 %v15178_v50, %v8065_v46 }
0x1408   :  { %16367 = vmatprep.subr.mxu1 %v21996_v58 }
0x1409   :  { %v16315_v4 = vpop.f32.mrb[102].mxu0  ;;  %16363 = vmatpush3.msra.mxu0 %v20600_v27 }
0x140a   :  { %16360 = vmatmul.mubr.msk.f32.vlgmr.msra.gmra.mrb[118].mxu1 %vm1539_vm1, %v20583_v39  ;;  %v20602_v2 = vadd.f32 %v16315_v4, %v15178_v50  ;;  %v8075_v29 = vpop.f32.mrb[103].mxu0  ;;  %16372 = vmatprep.subr.mxu0 %v21996_v58 }
0x140b   :  { %16369 = vmatprep.mubr.msk.f32.mxu1 %vm18744_vm2, %v21996_v58  ;;  %16368 = vmatpush3.msra.mxu1 %v20596_v54  ;;  %v20604_v28 = vadd.f32 %v15178_v50, %v8075_v29 }
0x140c   :  { %16377 = vmatprep.subr.mxu1 %v21996_v58 }
0x140d   :  { %v16318_v48 = vpop.f32.mrb[104].mxu0 }
0x140e   :  { %v20607_v10 = vadd.f32 %v16318_v48, %v15178_v50  ;;  %v8085_v59 = vpop.f32.mrb[105].mxu0 }
0x140f   :  { %v20610_v56 = vadd.f32 %v15178_v50, %v8085_v59 }
0x1411   :  { %v16321_v23 = vpop.f32.mrb[106].mxu0 }
0x1412   :  { %v20612_v32 = vadd.f32 %v16321_v23, %v15178_v50  ;;  %v8095_v6 = vpop.f32.mrb[107].mxu0 }
0x1413   :  { %v20614_v61 = vadd.f32 %v15178_v50, %v8095_v6 }
0x14c9   :  { %v8176_v5 = vpop.f32.mrb[108].mxu1 }
0x14ca   :  { %v8712_v51 = vmul.f32 0.35355338, %v8176_v5  ;;  %v16326_v35 = vpop.f32.mrb[109].mxu1 }
0x14cc   :  { %v8720_v62 = vsel %vm1539_vm1, %v8712_v51, -inf }
0x14cd   :  { %8721 = vmax.xlane.f32.xlu0 %v8720_v62  ;;  %v8252_v21 = vpop.f32.mrb[110].mxu1 }
0x14ce   :  { %v8713_v19 = vmul.f32 0.35355338, %v8252_v21  ;;  %v16331_v15 = vpop.f32.mrb[111].mxu1 }
0x14d0   :  { %v8723_v46 = vsel %vm1539_vm1, %v8713_v19, -inf }
0x14d1   :  { %8724 = vmax.xlane.f32.xlu1 %v8723_v46  ;;  %v8328_v4 = vpop.f32.mrb[112].mxu1  ;;  %v8480_v29 = vpop.f32.mrb[108].mxu0 }
0x14d2   :  { %v8714_v48 = vmul.f32 0.35355338, %v8328_v4  ;;  %v16336_v59 = vpop.f32.mrb[113].mxu1  ;;  %v8716_v23 = vmul.f32 0.35355338, %v8480_v29  ;;  %v16346_v33 = vpop.f32.mrb[109].mxu0 }
0x14d4   :  { %v8726_v50 = vsel %vm1539_vm1, %v8714_v48, -inf  ;;  %v8732_v62 = vsel %vm1539_vm1, %v8716_v23, -inf }
0x14d5   :  { %8727 = vmax.xlane.f32.xlu0 %v8726_v50  ;;  %v8404_v6 = vpop.f32.mrb[114].mxu1 }
0x14d6   :  { %v8715_v5 = vmul.f32 0.35355338, %v8404_v6  ;;  %v16341_v35 = vpop.f32.mrb[115].mxu1  ;;  %v8632_v3 = vpop.f32.mrb[110].mxu0 }
0x14d7   :  { %v8718_v21 = vmul.f32 0.35355338, %v8632_v3  ;;  %v16356_v15 = vpop.f32.mrb[111].mxu0 }
0x14d8   :  { %v8729_v37 = vsel %vm1539_vm1, %v8715_v5, -inf }
0x14d9   :  { %8733 = vmax.xlane.f32.xlu0 %v8732_v62  ;;  %8730 = vmax.xlane.f32.xlu1 %v8729_v37  ;;  %v8556_v46 = vpop.f32.mrb[116].mxu1  ;;  %v8738_v4 = vsel %vm1539_vm1, %v8718_v21, -inf }
0x14da   :  { %v16351_v29 = vpop.f32.mrb[117].mxu1  ;;  %v8717_v3 = vmul.f32 0.35355338, %v8556_v46 }
0x14dc   :  { %v8735_v50 = vsel %vm1539_vm1, %v8717_v3, -inf }
0x14dd   :  { %8739 = vmax.xlane.f32.xlu0 %v8738_v4  ;;  %v8708_v33 = vpop.f32.mrb[118].mxu1 }
0x14de   :  { %v16361_v59 = vpop.f32.mrb[119].mxu1  ;;  %v20632_v37 = vmul.f32 0.35355338, %v8708_v33 }
0x14e0   :  { %v8741_v6 = vsel %vm1539_vm1, %v20632_v37, -inf }
0x14ea   :  { %9472 = vrot.lane.b32.xlu1 %v20475_v45, %s18745_s13 }
0x14ee   :  { %9392 = vrot.lane.b32.xlu1 %v20530_v9, %s18745_s13 }
0x14f2   :  { %9470 = vrot.lane.b32.xlu1 %v20538_v55, %s18745_s13 }
0x14f3   :  { %9394 = vrot.lane.b32.xlu0 %v20477_v1, %s18745_s13 }
0x14f7   :  { %9550 = vrot.lane.b32.xlu0 %v20493_v7, %s18745_s13 }
0x1516   :  { %8736 = vmax.xlane.f32.xlu1 %v8735_v50 }
0x151a   :  { %8742 = vmax.xlane.f32.xlu1 %v8741_v6 }
0x152b   :  { %9628 = vrot.lane.b32.xlu1 %v20487_v40, %s18745_s13 }
0x155a   :  { %v8722_v35 = vpop.xlane.xlu0 %8721 }
0x155b   :  { %v8744_v62 = vsub.f32 %v8712_v51, %v8722_v35 }
0x155d   :  { %v8752_v15 = vmul.f32 1.442695, %v8744_v62 }
0x155e   :  { %v8725_v4 = vpop.xlane.xlu1 %8724 }
0x155f   :  { %17264 = vpow2.f32 %v8752_v15  ;;  %v8745_v29 = vsub.f32 %v8713_v19, %v8725_v4 }
0x1561   :  { %v8754_v59 = vmul.f32 1.442695, %v8745_v29 }
0x1562   :  { %v8728_v46 = vpop.xlane.xlu0 %8727 }
0x1563   :  { %17266 = vpow2.f32 %v8754_v59  ;;  %v8746_v33 = vsub.f32 %v8714_v48, %v8728_v46 }
0x1565   :  { %v8756_v53 = vmul.f32 1.442695, %v8746_v33 }
0x1566   :  { %v8734_v8 = vpop.xlane.xlu0 %8733  ;;  %v8731_v50 = vpop.xlane.xlu1 %8730 }
0x1567   :  { %17268 = vpow2.f32 %v8756_v53  ;;  %v8748_v12 = vsub.f32 %v8716_v23, %v8734_v8  ;;  %v8747_v47 = vsub.f32 %v8715_v5, %v8731_v50 }
0x1569   :  { %v20639_v6 = vpop.eup %17264  ;;  %v8760_v60 = vmul.f32 1.442695, %v8748_v12  ;;  %v8758_v43 = vmul.f32 1.442695, %v8747_v47 }
0x156a   :  { %v8740_v11 = vpop.xlane.xlu0 %8739  ;;  %v8768_v51 = vsel %vm1539_vm1, %v20639_v6, 0.0 }
0x156b   :  { %17270 = vpow2.f32 %v8760_v60  ;;  %v8750_v19 = vsub.f32 %v8718_v21, %v8740_v11  ;;  %8769 = vadd.xlane.f32.xlu0 %v8768_v51  ;;  %v20667_v21 = vpop.permute.xlu1 %9472 }
0x156c   :  { %17272 = vpow2.f32 %v8758_v43 }
0x156d   :  { %v20643_v35 = vpop.eup %17266  ;;  %v8764_v48 = vmul.f32 1.442695, %v8750_v19 }
0x156e   :  { %v8771_v53 = vsel %vm1539_vm1, %v20643_v35, 0.0 }
0x156f   :  { %17274 = vpow2.f32 %v8764_v48  ;;  %8772 = vadd.xlane.f32.xlu1 %v8771_v53  ;;  %v20671_v62 = vpop.permute.xlu1 %9392 }
0x1571   :  { %v20647_v8 = vpop.eup %17268 }
0x1572   :  { %v8774_v12 = vsel %vm1539_vm1, %v20647_v8, 0.0 }
0x1573   :  { %8775 = vadd.xlane.f32.xlu0 %v8774_v12  ;;  %v20677_v15 = vpop.permute.xlu1 %9470 }
0x1575   :  { %v20651_v47 = vpop.eup %17270 }
0x1576   :  { %v20653_v60 = vpop.eup %17272  ;;  %v8780_v11 = vsel %vm1539_vm1, %v20651_v47, 0.0 }
0x1577   :  { %8781 = vadd.xlane.f32.xlu0 %v8780_v11  ;;  %v8777_v43 = vsel %vm1539_vm1, %v20653_v60, 0.0 }
0x1578   :  { %8778 = vadd.xlane.f32.xlu1 %v8777_v43 }
0x1579   :  { %v20659_v23 = vpop.eup %17274 }
0x157a   :  { %v8786_v5 = vsel %vm1539_vm1, %v20659_v23, 0.0 }
0x157b   :  { %8787 = vadd.xlane.f32.xlu0 %v8786_v5 }
0x1589   :  { %9626 = vrot.lane.b32.xlu1 %v20560_v25, %s18745_s13 }
0x1591   :  { %9548 = vrot.lane.b32.xlu0 %v20547_v63, %s18745_s13 }
0x1595   :  { %9706 = vrot.lane.b32.xlu0 %v20501_v26, %s18745_s13 }
0x1599   :  { %9704 = vrot.lane.b32.xlu0 %v20550_v20, %s18745_s13 }
0x159d   :  { %9862 = vrot.lane.b32.xlu0 %v20512_v52, %s18745_s13 }
0x15a1   :  { %9860 = vrot.lane.b32.xlu0 %v20562_v22, %s18745_s13 }
0x15a3   :  { %v8737_v4 = vpop.xlane.xlu1 %8736 }
0x15a4   :  { %v8749_v29 = vsub.f32 %v8717_v3, %v8737_v4  ;;  %v9395_v3 = vpop.permute.xlu0 %9394 }
0x15a6   :  { %v8762_v59 = vmul.f32 1.442695, %v8749_v29 }
0x15a7   :  { %v8743_v46 = vpop.xlane.xlu1 %8742 }
0x15a8   :  { %17276 = vpow2.f32 %v8762_v59  ;;  %v8751_v33 = vsub.f32 %v20632_v37, %v8743_v46  ;;  %v9551_v37 = vpop.permute.xlu0 %9550 }
0x15aa   :  { %v8766_v50 = vmul.f32 1.442695, %v8751_v33 }
0x15ab   :  { %v20698_v12 = vpop.permute.xlu1 %9628 }
0x15ac   :  { %17278 = vpow2.f32 %v8766_v50 }
0x15b2   :  { %v20682_v51 = vpop.eup %17276 }
0x15b3   :  { %v8783_v19 = vsel %vm1539_vm1, %v20682_v51, 0.0 }
0x15b4   :  { %8784 = vadd.xlane.f32.xlu1 %v8783_v19 }
0x15b6   :  { %v20686_v48 = vpop.eup %17278 }
0x15b7   :  { %v8789_v53 = vsel %vm1539_vm1, %v20686_v48, 0.0 }
0x15b8   :  { %8790 = vadd.xlane.f32.xlu1 %v8789_v53 }
0x15c9   :  { %9784 = vrot.lane.b32.xlu1 %v20499_v31, %s18745_s13 }
0x15cd   :  { %9782 = vrot.lane.b32.xlu1 %v20570_v36, %s18745_s13 }
0x15d1   :  { %9940 = vrot.lane.b32.xlu1 %v20509_v41, %s18745_s13 }
0x15d5   :  { %9938 = vrot.lane.b32.xlu1 %v20583_v39, %s18745_s13 }
0x15f8   :  { %v8770_v11 = vpop.xlane.xlu0 %8769 }
0x15f9   :  { %17280 = vrcp.f32 %v8770_v11 }
0x15fc   :  { %v8773_v43 = vpop.xlane.xlu1 %8772 }
0x15fd   :  { %17282 = vrcp.f32 %v8773_v43 }
0x1600   :  { %v8776_v5 = vpop.xlane.xlu0 %8775 }
0x1601   :  { %17284 = vrcp.f32 %v8776_v5 }
0x1603   :  { %v17281_v4 = vpop.eup %17280 }
0x1604   :  { %v8782_v29 = vpop.xlane.xlu0 %8781  ;;  %v8793_v59 = vmul.f32 %v17281_v4, %v20639_v6 }
0x1605   :  { %17286 = vrcp.f32 %v8782_v29  ;;  %v8779_v46 = vpop.xlane.xlu1 %8778 }
0x1606   :  { %17288 = vrcp.f32 %v8779_v46  ;;  %16365 = vmatmul.mubr.msk.f32.vlgmr.msra.gmra.mrb[112].mxu0 %vm1539_vm1, %v8793_v59 }
0x1607   :  { %v17283_v33 = vpop.eup %17282  ;;  %16373 = vmatpush3.msra.mxu0 %v20604_v28  ;;  %16374 = vmatprep.mubr.msk.f32.mxu0 %vm18744_vm2, %v21996_v58 }
0x1608   :  { %v8788_v50 = vpop.xlane.xlu0 %8787  ;;  %v8795_v19 = vmul.f32 %v17283_v33, %v20643_v35  ;;  %16382 = vmatprep.subr.mxu0 %v21996_v58 }
0x1609   :  { %17290 = vrcp.f32 %v8788_v50 }
0x160a   :  { %16370 = vmatmul.mubr.msk.f32.vlgmr.msra.gmra.mrb[120].mxu1 %vm1539_vm1, %v8795_v19 }
0x160b   :  { %v17285_v6 = vpop.eup %17284  ;;  %16378 = vmatpush3.msra.mxu1 %v20602_v2  ;;  %16379 = vmatprep.mubr.msk.f32.mxu1 %vm18744_vm2, %v21996_v58 }
0x160c   :  { %v8797_v53 = vmul.f32 %v17285_v6, %v20647_v8  ;;  %16387 = vmatprep.subr.mxu1 %v21996_v58  ;;  %v9549_v43 = vpop.permute.xlu0 %9548 }
0x160e   :  { %16375 = vmatmul.mubr.msk.f32.vlgmr.msra.gmra.mrb[114].mxu0 %vm1539_vm1, %v8797_v53 }
0x160f   :  { %v17287_v11 = vpop.eup %17286  ;;  %16383 = vmatpush3.msra.mxu0 %v20610_v56  ;;  %16384 = vmatprep.mubr.msk.f32.mxu0 %vm18744_vm2, %v21996_v58 }
0x1610   :  { %v17289_v35 = vpop.eup %17288  ;;  %16392 = vmatprep.subr.mxu0 %v21996_v58  ;;  %v8801_v5 = vmul.f32 %v17287_v11, %v20651_v47  ;;  %v9707_v47 = vpop.permute.xlu0 %9706 }
0x1611   :  { %v8799_v4 = vmul.f32 %v17289_v35, %v20653_v60 }
0x1612   :  { %16385 = vmatmul.mubr.msk.f32.vlgmr.msra.gmra.mrb[116].mxu0 %vm1539_vm1, %v8801_v5 }
0x1613   :  { %v17291_v8 = vpop.eup %17290  ;;  %16380 = vmatmul.mubr.msk.f32.vlgmr.msra.gmra.mrb[122].mxu1 %vm1539_vm1, %v8799_v4  ;;  %16393 = vmatpush3.msra.mxu0 %v20614_v61 }
0x1614   :  { %16388 = vmatpush3.msra.mxu1 %v20607_v10  ;;  %16394 = vmatprep.mubr.msk.f32.mxu0 %vm18744_vm2, %v21996_v58  ;;  %v8805_v29 = vmul.f32 %v17291_v8, %v20659_v23  ;;  %v9705_v60 = vpop.permute.xlu0 %9704 }
0x1615   :  { %16402 = vmatprep.subr.mxu0 %v21996_v58  ;;  %16389 = vmatprep.mubr.msk.f32.mxu1 %vm18744_vm2, %v21996_v58 }
0x1616   :  { %16395 = vmatmul.mubr.msk.f32.vlgmr.msra.gmra.mrb[118].mxu0 %vm1539_vm1, %v8805_v29  ;;  %16397 = vmatprep.subr.mxu1 %v21996_v58 }
0x1617   :  { %16404 = vmatprep.mubr.msk.f32.mxu0 %vm18744_vm2, %v21996_v58 }
0x1618   :  { %v9863_v23 = vpop.permute.xlu0 %9862 }
0x161a   :  { %16403 = vmatpush3.xpose.msk.msra.mxu0 %vm1539_vm1, %v9395_v3  ;;  %v9627_v3 = vpop.permute.xlu1 %9626 }
0x161b   :  { %16412 = vmatprep.subr.mxu0 %v21996_v58 }
0x161d   :  { %16405 = vmatmul.mubr.msk.f32.vlgmr.msra.gmra.mrb[120].mxu0 %vm1539_vm1, %v20671_v62  ;;  %v9861_v62 = vpop.permute.xlu0 %9860 }
0x161e   :  { %16413 = vmatpush3.xpose.msk.msra.mxu0 %vm1539_vm1, %v9551_v37  ;;  %16414 = vmatprep.mubr.msk.f32.mxu0 %vm18744_vm2, %v21996_v58 }
0x161f   :  { %16422 = vmatprep.subr.mxu0 %v21996_v58 }
0x1621   :  { %16415 = vmatmul.mubr.msk.f32.vlgmr.msra.gmra.mrb[122].mxu0 %vm1539_vm1, %v9549_v43 }
0x1622   :  { %16423 = vmatpush3.xpose.msk.msra.mxu0 %vm1539_vm1, %v9707_v47  ;;  %16424 = vmatprep.mubr.msk.f32.mxu0 %vm18744_vm2, %v21996_v58 }
0x1623   :  { %16432 = vmatprep.subr.mxu0 %v21996_v58 }
0x1625   :  { %16425 = vmatmul.mubr.msk.f32.vlgmr.msra.gmra.mrb[124].mxu0 %vm1539_vm1, %v9705_v60 }
0x1626   :  { %16433 = vmatpush3.xpose.msk.msra.mxu0 %vm1539_vm1, %v9863_v23  ;;  %16434 = vmatprep.mubr.msk.f32.mxu0 %vm18744_vm2, %v21996_v58 }
0x1627   :  { %16442 = vmatprep.subr.mxu0 %v21996_v58 }
0x1629   :  { %16435 = vmatmul.mubr.msk.f32.vlgmr.msra.gmra.mrb[126].mxu0 %vm1539_vm1, %v9861_v62 }
0x162a   :  { %16444 = vmatprep.mubr.msk.f32.mxu0 %vm18744_vm2, %v21996_v58 }
0x1641   :  { %v8785_v37 = vpop.xlane.xlu1 %8784 }
0x1642   :  { %17292 = vrcp.f32 %v8785_v37 }
0x1645   :  { %v8791_v59 = vpop.xlane.xlu1 %8790 }
0x1646   :  { %17294 = vrcp.f32 %v8791_v59 }
0x1649   :  { %v9785_v6 = vpop.permute.xlu1 %9784 }
0x164c   :  { %v17293_v46 = vpop.eup %17292 }
0x164d   :  { %v8803_v33 = vmul.f32 %v17293_v46, %v20682_v51  ;;  %v9783_v51 = vpop.permute.xlu1 %9782 }
0x164f   :  { %16390 = vmatmul.mubr.msk.f32.vlgmr.msra.gmra.mrb[124].mxu1 %vm1539_vm1, %v8803_v33 }
0x1650   :  { %v17295_v50 = vpop.eup %17294  ;;  %16398 = vmatpush3.msra.mxu1 %v20612_v32  ;;  %16399 = vmatprep.mubr.msk.f32.mxu1 %vm18744_vm2, %v21996_v58 }
0x1651   :  { %v8807_v19 = vmul.f32 %v17295_v50, %v20686_v48  ;;  %16407 = vmatprep.subr.mxu1 %v21996_v58  ;;  %v9941_v48 = vpop.permute.xlu1 %9940 }
0x1653   :  { %16400 = vmatmul.mubr.msk.f32.vlgmr.msra.gmra.mrb[126].mxu1 %vm1539_vm1, %v8807_v19 }
0x1654   :  { %16409 = vmatprep.mubr.msk.f32.mxu1 %vm18744_vm2, %v21996_v58 }
0x1657   :  { %16408 = vmatpush3.xpose.msk.msra.mxu1 %vm1539_vm1, %v20667_v21  ;;  %v9939_v21 = vpop.permute.xlu1 %9938 }
0x1658   :  { %16417 = vmatprep.subr.mxu1 %v21996_v58 }
0x165a   :  { %16410 = vmatmul.mubr.msk.f32.vlgmr.msra.gmra.mrb[128].mxu1 %vm1539_vm1, %v20677_v15 }
0x165b   :  { %16418 = vmatpush3.xpose.msk.msra.mxu1 %vm1539_vm1, %v20698_v12  ;;  %16419 = vmatprep.mubr.msk.f32.mxu1 %vm18744_vm2, %v21996_v58 }
0x165c   :  { %16427 = vmatprep.subr.mxu1 %v21996_v58 }
0x165e   :  { %16420 = vmatmul.mubr.msk.f32.vlgmr.msra.gmra.mrb[130].mxu1 %vm1539_vm1, %v9627_v3 }
0x165f   :  { %16428 = vmatpush3.xpose.msk.msra.mxu1 %vm1539_vm1, %v9785_v6  ;;  %16429 = vmatprep.mubr.msk.f32.mxu1 %vm18744_vm2, %v21996_v58 }
0x1660   :  { %16437 = vmatprep.subr.mxu1 %v21996_v58 }
0x1662   :  { %16430 = vmatmul.mubr.msk.f32.vlgmr.msra.gmra.mrb[132].mxu1 %vm1539_vm1, %v9783_v51 }
0x1663   :  { %16438 = vmatpush3.xpose.msk.msra.mxu1 %vm1539_vm1, %v9941_v48  ;;  %16439 = vmatprep.mubr.msk.f32.mxu1 %vm18744_vm2, %v21996_v58 }
0x1664   :  { %16447 = vmatprep.subr.mxu1 %v21996_v58 }
0x1666   :  { %16440 = vmatmul.mubr.msk.f32.vlgmr.msra.gmra.mrb[134].mxu1 %vm1539_vm1, %v9939_v21 }
0x1667   :  { %16449 = vmatprep.mubr.msk.f32.mxu1 %vm18744_vm2, %v21996_v58 }
0x16d9   :  { %v20788_v15 = vpop.f32.mrb[112].mxu0 }
0x16da   :  { %v16366_v12 = vpop.f32.mrb[113].mxu0 }
0x16dd   :  { %v20790_v53 = vpop.f32.mrb[120].mxu1 }
0x16de   :  { %v16371_v11 = vpop.f32.mrb[121].mxu1 }
0x16e1   :  { %v20792_v35 = vpop.f32.mrb[114].mxu0 }
0x16e2   :  { %v16376_v43 = vpop.f32.mrb[115].mxu0 }
0x16e5   :  { %v20794_v5 = vpop.f32.mrb[116].mxu0 }
0x16e6   :  { %v20796_v4 = vpop.f32.mrb[122].mxu1  ;;  %v16386_v8 = vpop.f32.mrb[117].mxu0 }
0x16e7   :  { %v16381_v29 = vpop.f32.mrb[123].mxu1 }
0x16e9   :  { %v20798_v47 = vpop.f32.mrb[118].mxu0 }
0x16ea   :  { %v16396_v60 = vpop.f32.mrb[119].mxu0 }
0x16f0   :  { %v9466_v23 = vpop.f32.mrb[120].mxu0 }
0x16f1   :  { %v10016_v62 = vmul.f32 0.35355338, %v9466_v23  ;;  %v16406_v3 = vpop.f32.mrb[121].mxu0 }
0x16f3   :  { %v10024_v37 = vsel %vm1539_vm1, %v10016_v62, -inf }
0x16f4   :  { %10025 = vmax.xlane.f32.xlu0 %v10024_v37  ;;  %v9622_v59 = vpop.f32.mrb[122].mxu0 }
0x16f5   :  { %v10018_v46 = vmul.f32 0.35355338, %v9622_v59  ;;  %v16416_v33 = vpop.f32.mrb[123].mxu0 }
0x16f7   :  { %v10030_v50 = vsel %vm1539_vm1, %v10018_v46, -inf }
0x16f8   :  { %10031 = vmax.xlane.f32.xlu0 %v10030_v50  ;;  %v9778_v19 = vpop.f32.mrb[124].mxu0 }
0x16f9   :  { %v16426_v6 = vpop.f32.mrb[125].mxu0  ;;  %v10020_v33 = vmul.f32 0.35355338, %v9778_v19 }
0x16fb   :  { %v10036_v38 = vsel %vm1539_vm1, %v10020_v33, -inf }
0x16fc   :  { %v9934_v51 = vpop.f32.mrb[126].mxu0 }
0x16fd   :  { %v16436_v48 = vpop.f32.mrb[127].mxu0 }
0x1722   :  { %v20802_v21 = vpop.f32.mrb[124].mxu1 }
0x1723   :  { %v16391_v12 = vpop.f32.mrb[125].mxu1 }
0x1724   :  { %v10022_v12 = vmul.f32 0.35355338, %v9934_v51 }
0x1726   :  { %v20804_v11 = vpop.f32.mrb[126].mxu1 }
0x1727   :  { %22034 = vst [vmem:[#allocation164_spill] sm:$0xff] %v20804_v11  ;;  %v16401_v43 = vpop.f32.mrb[127].mxu1 }
0x172d   :  { %v9544_v8 = vpop.f32.mrb[128].mxu1 }
0x172e   :  { %v10017_v29 = vmul.f32 0.35355338, %v9544_v8  ;;  %v16411_v60 = vpop.f32.mrb[129].mxu1 }
0x1730   :  { %v10027_v23 = vsel %vm1539_vm1, %v10017_v29, -inf }
0x1731   :  { %10028 = vmax.xlane.f32.xlu1 %v10027_v23  ;;  %v9700_v3 = vpop.f32.mrb[130].mxu1  ;;  %v10042_v23 = vsel %vm1539_vm1, %v10022_v12, -inf }
0x1732   :  { %v10019_v37 = vmul.f32 0.35355338, %v9700_v3  ;;  %v16421_v59 = vpop.f32.mrb[131].mxu1 }
0x1734   :  { %v10033_v50 = vsel %vm1539_vm1, %v10019_v37, -inf }
0x1735   :  { %10034 = vmax.xlane.f32.xlu0 %v10033_v50  ;;  %v9856_v6 = vpop.f32.mrb[132].mxu1 }
0x1736   :  { %v10021_v48 = vmul.f32 0.35355338, %v9856_v6  ;;  %v16431_v0 = vpop.f32.mrb[133].mxu1 }
0x1738   :  { %v10039_v43 = vsel %vm1539_vm1, %v10021_v48, -inf }
0x1739   :  { %10037 = vmax.xlane.f32.xlu0 %v10036_v38  ;;  %10040 = vmax.xlane.f32.xlu1 %v10039_v43  ;;  %v10012_v8 = vpop.f32.mrb[134].mxu1 }
0x173a   :  { %v16441_v60 = vpop.f32.mrb[135].mxu1  ;;  %v20837_v38 = vmul.f32 0.35355338, %v10012_v8 }
0x173c   :  { %v10045_v59 = vsel %vm1539_vm1, %v20837_v38, -inf }
0x173d   :  { %10043 = vmax.xlane.f32.xlu0 %v10042_v23 }
0x174a   :  { %10190 = vrot.lane.b32.xlu1 %v20596_v54, %s18745_s13 }
0x174e   :  { %10267 = vrot.lane.b32.xlu1 %v20604_v28, %s18745_s13 }
0x1752   :  { %10344 = vrot.lane.b32.xlu1 %v20602_v2, %s18745_s13 }
0x1753   :  { %10113 = vrot.lane.b32.xlu0 %v20600_v27, %s18745_s13 }
0x1756   :  { %10498 = vrot.lane.b32.xlu1 %v20607_v10, %s18745_s13 }
0x1757   :  { %10421 = vrot.lane.b32.xlu0 %v20610_v56, %s18745_s13 }
0x175a   :  { %10652 = vrot.lane.b32.xlu1 %v20612_v32, %s18745_s13 }
0x175b   :  { %10575 = vrot.lane.b32.xlu0 %v20614_v61, %s18745_s13 }
0x175e   :  { %10808 = vrot.lane.b32.xlu1 %v20475_v45, %s18746_s27 }
0x175f   :  { %10730 = vrot.lane.b32.xlu0 %v20477_v1, %s18746_s27 }
0x1762   :  { %10806 = vrot.lane.b32.xlu1 %v20538_v55, %s18746_s27 }
0x1763   :  { %10728 = vrot.lane.b32.xlu0 %v20530_v9, %s18746_s27 }
0x1767   :  { %10886 = vrot.lane.b32.xlu0 %v20493_v7, %s18746_s27 }
0x1781   :  { %v10026_v0 = vpop.xlane.xlu0 %10025 }
0x1782   :  { %v10048_v19 = vsub.f32 %v10016_v62, %v10026_v0 }
0x1784   :  { %v10056_v51 = vmul.f32 1.442695, %v10048_v19 }
0x1785   :  { %v10032_v3 = vpop.xlane.xlu0 %10031 }
0x1786   :  { %17296 = vpow2.f32 %v10056_v51  ;;  %v10050_v50 = vsub.f32 %v10018_v46, %v10032_v3  ;;  %10046 = vmax.xlane.f32.xlu1 %v10045_v59 }
0x1788   :  { %v10060_v6 = vmul.f32 1.442695, %v10050_v50 }
0x178a   :  { %17298 = vpow2.f32 %v10060_v6 }
0x1790   :  { %v20841_v43 = vpop.eup %17296 }
0x1791   :  { %v10072_v60 = vsel %vm1539_vm1, %v20841_v43, 0.0 }
0x1792   :  { %10073 = vadd.xlane.f32.xlu0 %v10072_v60 }
0x1794   :  { %v20845_v8 = vpop.eup %17298 }
0x1795   :  { %v10078_v62 = vsel %vm1539_vm1, %v20845_v8, 0.0 }
0x1796   :  { %10079 = vadd.xlane.f32.xlu0 %v10078_v62 }
0x1797   :  { %10964 = vrot.lane.b32.xlu1 %v20487_v40, %s18746_s27 }
0x17be   :  { %v10029_v23 = vpop.xlane.xlu1 %10028 }
0x17bf   :  { %v10049_v46 = vsub.f32 %v10017_v29, %v10029_v23 }
0x17c1   :  { %v10058_v0 = vmul.f32 1.442695, %v10049_v46 }
0x17c2   :  { %v10035_v19 = vpop.xlane.xlu0 %10034 }
0x17c3   :  { %17300 = vpow2.f32 %v10058_v0  ;;  %v10051_v51 = vsub.f32 %v10019_v37, %v10035_v19 }
0x17c5   :  { %v10062_v3 = vmul.f32 1.442695, %v10051_v51 }
0x17c6   :  { %v10038_v59 = vpop.xlane.xlu0 %10037  ;;  %v10041_v50 = vpop.xlane.xlu1 %10040 }
0x17c7   :  { %17302 = vpow2.f32 %v10062_v3  ;;  %v10052_v6 = vsub.f32 %v10020_v33, %v10038_v59  ;;  %v10053_v60 = vsub.f32 %v10021_v48, %v10041_v50 }
0x17c9   :  { %v10064_v13 = vmul.f32 1.442695, %v10052_v6  ;;  %v10066_v18 = vmul.f32 1.442695, %v10053_v60 }
0x17ca   :  { %v10044_v42 = vpop.xlane.xlu0 %10043  ;;  %v10191_v44 = vpop.permute.xlu1 %10190 }
0x17cb   :  { %17304 = vpow2.f32 %v10064_v13  ;;  %v10054_v62 = vsub.f32 %v10022_v12, %v10044_v42  ;;  %16448 = vmatpush3.msra.mxu1 %v10191_v44 }
0x17cc   :  { %17306 = vpow2.f32 %v10066_v18  ;;  %16457 = vmatprep.subr.mxu1 %v21996_v58 }
0x17cd   :  { %v20852_v29 = vpop.eup %17300  ;;  %v10068_v23 = vmul.f32 1.442695, %v10054_v62 }
0x17ce   :  { %v10114_v37 = vpop.permute.xlu0 %10113  ;;  %v10075_v46 = vsel %vm1539_vm1, %v20852_v29, 0.0  ;;  %v10268_v19 = vpop.permute.xlu1 %10267 }
0x17cf   :  { %17308 = vpow2.f32 %v10068_v23  ;;  %16443 = vmatpush3.msra.mxu0 %v10114_v37  ;;  %10076 = vadd.xlane.f32.xlu1 %v10075_v46 }
0x17d0   :  { %16452 = vmatprep.subr.mxu0 %v21996_v58 }
0x17d1   :  { %v20857_v33 = vpop.eup %17302 }
0x17d2   :  { %v10081_v44 = vsel %vm1539_vm1, %v20857_v33, 0.0  ;;  %v20879_v51 = vpop.permute.xlu1 %10344  ;;  %v10422_v59 = vpop.permute.xlu0 %10421 }
0x17d3   :  { %10082 = vadd.xlane.f32.xlu1 %v10081_v44 }
0x17d5   :  { %v20861_v18 = vpop.eup %17304 }
0x17d6   :  { %v20863_v42 = vpop.eup %17306  ;;  %v10084_v13 = vsel %vm1539_vm1, %v20861_v18, 0.0  ;;  %v20883_v3 = vpop.permute.xlu1 %10498 }
0x17d7   :  { %10085 = vadd.xlane.f32.xlu0 %v10084_v13  ;;  %v10087_v48 = vsel %vm1539_vm1, %v20863_v42, 0.0  ;;  %v20893_v6 = vpop.permute.xlu0 %10575 }
0x17d8   :  { %10088 = vadd.xlane.f32.xlu1 %v10087_v48 }
0x17d9   :  { %v20869_v12 = vpop.eup %17308 }
0x17da   :  { %v10090_v0 = vsel %vm1539_vm1, %v20869_v12, 0.0  ;;  %v20889_v50 = vpop.permute.xlu1 %10652 }
0x17db   :  { %10091 = vadd.xlane.f32.xlu0 %v10090_v0  ;;  %v20901_v62 = vpop.permute.xlu0 %10730 }
0x17de   :  { %v20895_v60 = vpop.permute.xlu1 %10808 }
0x17df   :  { %v20908_v44 = vpop.permute.xlu0 %10728 }
0x17e2   :  { %v20903_v23 = vpop.permute.xlu1 %10806 }
0x17e3   :  { %v20912_v48 = vpop.permute.xlu0 %10886 }
0x17e9   :  { %10962 = vrot.lane.b32.xlu1 %v20560_v25, %s18746_s27 }
0x17f1   :  { %10884 = vrot.lane.b32.xlu0 %v20547_v63, %s18746_s27 }
0x17f5   :  { %11042 = vrot.lane.b32.xlu0 %v20501_v26, %s18746_s27 }
0x17f9   :  { %11040 = vrot.lane.b32.xlu0 %v20550_v20, %s18746_s27 }
0x17fd   :  { %11198 = vrot.lane.b32.xlu0 %v20512_v52, %s18746_s27 }
0x1801   :  { %11196 = vrot.lane.b32.xlu0 %v20562_v22, %s18746_s27 }
0x1805   :  { %11448 = vrot.lane.b32.xlu0 %v20600_v27, %s18746_s27 }
0x1809   :  { %11752 = vrot.lane.b32.xlu0 %v20610_v56, %s18746_s27 }
0x180d   :  { %11904 = vrot.lane.b32.xlu0 %v20614_v61, %s18746_s27 }
0x1811   :  { %12058 = vrot.lane.b32.xlu0 %v20477_v1, %s18747_s30 }
0x1813   :  { %v10047_v37 = vpop.xlane.xlu1 %10046 }
0x1814   :  { %v10055_v46 = vsub.f32 %v20837_v38, %v10047_v37 }
0x1815   :  { %12056 = vrot.lane.b32.xlu0 %v20530_v9, %s18747_s30 }
0x1816   :  { %v10070_v13 = vmul.f32 1.442695, %v10055_v46 }
0x1818   :  { %17310 = vpow2.f32 %v10070_v13 }
0x181f   :  { %v10074_v0 = vpop.xlane.xlu0 %10073 }
0x1820   :  { %17312 = vrcp.f32 %v10074_v0 }
0x1822   :  { %v20914_v34 = vpop.eup %17310 }
0x1823   :  { %v10080_v49 = vpop.xlane.xlu0 %10079  ;;  %v10093_v1 = vsel %vm1539_vm1, %v20914_v34, 0.0 }
0x1824   :  { %17314 = vrcp.f32 %v10080_v49  ;;  %10094 = vadd.xlane.f32.xlu1 %v10093_v1  ;;  %v20946_v49 = vpop.permute.xlu1 %10964 }
0x182a   :  { %v17313_v38 = vpop.eup %17312 }
0x182b   :  { %v10097_v37 = vmul.f32 %v17313_v38, %v20841_v43 }
0x182d   :  { %16445 = vmatmul.mubr.msk.f32.vlgmr.msra.gmra.mrb[128].mxu0 %vm1539_vm1, %v10097_v37 }
0x182e   :  { %v17315_v9 = vpop.eup %17314  ;;  %16453 = vmatpush3.msra.mxu0 %v10268_v19  ;;  %16454 = vmatprep.mubr.msk.f32.mxu0 %vm18744_vm2, %v21996_v58 }
0x182f   :  { %16462 = vmatprep.subr.mxu0 %v21996_v58  ;;  %v10101_v46 = vmul.f32 %v17315_v9, %v20845_v8 }
0x1831   :  { %16455 = vmatmul.mubr.msk.f32.vlgmr.msra.gmra.mrb[130].mxu0 %vm1539_vm1, %v10101_v46 }
0x1832   :  { %16463 = vmatpush3.msra.mxu0 %v10422_v59  ;;  %16464 = vmatprep.mubr.msk.f32.mxu0 %vm18744_vm2, %v21996_v58 }
0x1833   :  { %16472 = vmatprep.subr.mxu0 %v21996_v58 }
0x1835   :  { %11120 = vrot.lane.b32.xlu1 %v20499_v31, %s18746_s27 }
0x1839   :  { %11118 = vrot.lane.b32.xlu1 %v20570_v36, %s18746_s27 }
0x183d   :  { %11276 = vrot.lane.b32.xlu1 %v20509_v41, %s18746_s27 }
0x1841   :  { %11274 = vrot.lane.b32.xlu1 %v20583_v39, %s18746_s27 }
0x1845   :  { %11524 = vrot.lane.b32.xlu1 %v20596_v54, %s18746_s27 }
0x1849   :  { %11600 = vrot.lane.b32.xlu1 %v20604_v28, %s18746_s27 }
0x184d   :  { %11676 = vrot.lane.b32.xlu1 %v20602_v2, %s18746_s27 }
0x1851   :  { %11828 = vrot.lane.b32.xlu1 %v20607_v10, %s18746_s27 }
0x1855   :  { %11980 = vrot.lane.b32.xlu1 %v20612_v32, %s18746_s27 }
0x1859   :  { %12136 = vrot.lane.b32.xlu1 %v20475_v45, %s18747_s30 }
0x185c   :  { %v10077_v43 = vpop.xlane.xlu1 %10076 }
0x185d   :  { %17316 = vrcp.f32 %v10077_v43  ;;  %12134 = vrot.lane.b32.xlu1 %v20538_v55, %s18747_s30 }
0x1860   :  { %v10083_v8 = vpop.xlane.xlu1 %10082 }
0x1861   :  { %17318 = vrcp.f32 %v10083_v8 }
0x1864   :  { %v10086_v19 = vpop.xlane.xlu0 %10085 }
0x1865   :  { %17320 = vrcp.f32 %v10086_v19  ;;  %v10089_v59 = vpop.xlane.xlu1 %10088 }
0x1866   :  { %17322 = vrcp.f32 %v10089_v59 }
0x1867   :  { %v17317_v13 = vpop.eup %17316 }
0x1868   :  { %v10092_v0 = vpop.xlane.xlu0 %10091  ;;  %v10099_v1 = vmul.f32 %v17317_v13, %v20852_v29 }
0x1869   :  { %17324 = vrcp.f32 %v10092_v0 }
0x186a   :  { %16450 = vmatmul.mubr.msk.f32.vlgmr.msra.gmra.mrb[136].mxu1 %vm1539_vm1, %v10099_v1 }
0x186b   :  { %v17319_v38 = vpop.eup %17318  ;;  %16458 = vmatpush3.msra.mxu1 %v20879_v51  ;;  %16459 = vmatprep.mubr.msk.f32.mxu1 %vm18744_vm2, %v21996_v58 }
0x186c   :  { %v10885_v45 = vpop.permute.xlu0 %10884  ;;  %16467 = vmatprep.subr.mxu1 %v21996_v58  ;;  %v10103_v55 = vmul.f32 %v17319_v38, %v20857_v33 }
0x186e   :  { %16460 = vmatmul.mubr.msk.f32.vlgmr.msra.gmra.mrb[138].mxu1 %vm1539_vm1, %v10103_v55 }
0x186f   :  { %v17321_v37 = vpop.eup %17320  ;;  %16468 = vmatpush3.msra.mxu1 %v20883_v3  ;;  %16469 = vmatprep.mubr.msk.f32.mxu1 %vm18744_vm2, %v21996_v58 }
0x1870   :  { %v17323_v29 = vpop.eup %17322  ;;  %16477 = vmatprep.subr.mxu1 %v21996_v58  ;;  %v10105_v51 = vmul.f32 %v17321_v37, %v20861_v18  ;;  %v11043_v9 = vpop.permute.xlu0 %11042 }
0x1871   :  { %v10107_v46 = vmul.f32 %v17323_v29, %v20863_v42 }
0x1872   :  { %16465 = vmatmul.mubr.msk.f32.vlgmr.msra.gmra.mrb[132].mxu0 %vm1539_vm1, %v10105_v51 }
0x1873   :  { %v17325_v43 = vpop.eup %17324  ;;  %16470 = vmatmul.mubr.msk.f32.vlgmr.msra.gmra.mrb[140].mxu1 %vm1539_vm1, %v10107_v46  ;;  %16473 = vmatpush3.msra.mxu0 %v20893_v6 }
0x1874   :  { %16478 = vmatpush3.msra.mxu1 %v20889_v50  ;;  %16474 = vmatprep.mubr.msk.f32.mxu0 %vm18744_vm2, %v21996_v58  ;;  %v10109_v33 = vmul.f32 %v17325_v43, %v20869_v12  ;;  %v11041_v18 = vpop.permute.xlu0 %11040  ;;  %v10963_v50 = vpop.permute.xlu1 %10962 }
0x1875   :  { %16482 = vmatprep.subr.mxu0 %v21996_v58  ;;  %16479 = vmatprep.mubr.msk.f32.mxu1 %vm18744_vm2, %v21996_v58 }
0x1876   :  { %16475 = vmatmul.mubr.msk.f32.vlgmr.msra.gmra.mrb[134].mxu0 %vm1539_vm1, %v10109_v33  ;;  %16487 = vmatprep.subr.mxu1 %v21996_v58 }
0x1877   :  { %16484 = vmatprep.mubr.msk.f32.mxu0 %vm18744_vm2, %v21996_v58 }
0x1878   :  { %v11199_v42 = vpop.permute.xlu0 %11198 }
0x187a   :  { %16483 = vmatpush3.xpose.msk.msra.mxu0 %vm1539_vm1, %v20901_v62 }
0x187b   :  { %16492 = vmatprep.subr.mxu0 %v21996_v58 }
0x187c   :  { %v11197_v12 = vpop.permute.xlu0 %11196 }
0x187d   :  { %16485 = vmatmul.mubr.msk.f32.vlgmr.msra.gmra.mrb[136].mxu0 %vm1539_vm1, %v20908_v44 }
0x187e   :  { %16493 = vmatpush3.xpose.msk.msra.mxu0 %vm1539_vm1, %v20912_v48  ;;  %16494 = vmatprep.mubr.msk.f32.mxu0 %vm18744_vm2, %v21996_v58 }
0x187f   :  { %16502 = vmatprep.subr.mxu0 %v21996_v58 }
0x1880   :  { %v11449_v3 = vpop.permute.xlu0 %11448 }
0x1881   :  { %16495 = vmatmul.mubr.msk.f32.vlgmr.msra.gmra.mrb[138].mxu0 %vm1539_vm1, %v10885_v45 }
0x1882   :  { %16503 = vmatpush3.xpose.msk.msra.mxu0 %vm1539_vm1, %v11043_v9  ;;  %16504 = vmatprep.mubr.msk.f32.mxu0 %vm18744_vm2, %v21996_v58 }
0x1883   :  { %16512 = vmatprep.subr.mxu0 %v21996_v58 }
0x1885   :  { %16505 = vmatmul.mubr.msk.f32.vlgmr.msra.gmra.mrb[140].mxu0 %vm1539_vm1, %v11041_v18 }
0x1886   :  { %16513 = vmatpush3.xpose.msk.msra.mxu0 %vm1539_vm1, %v11199_v42  ;;  %16514 = vmatprep.mubr.msk.f32.mxu0 %vm18744_vm2, %v21996_v58 }
0x1887   :  { %16522 = vmatprep.subr.mxu0 %v21996_v58 }
0x1889   :  { %16515 = vmatmul.mubr.msk.f32.vlgmr.msra.gmra.mrb[142].mxu0 %vm1539_vm1, %v11197_v12 }
0x188a   :  { %16523 = vmatpush3.msra.mxu0 %v11449_v3  ;;  %16524 = vmatprep.mubr.msk.f32.mxu0 %vm18744_vm2, %v21996_v58 }
0x188b   :  { %16532 = vmatprep.subr.mxu0 %v21996_v58 }
0x18b1   :  { %v10095_v6 = vpop.xlane.xlu1 %10094 }
0x18b2   :  { %17326 = vrcp.f32 %v10095_v6 }
0x18b5   :  { %v11121_v62 = vpop.permute.xlu1 %11120 }
0x18b9   :  { %v11119_v48 = vpop.permute.xlu1 %11118 }
0x18bc   :  { %v17327_v44 = vpop.eup %17326 }
0x18bd   :  { %v10111_v8 = vmul.f32 %v17327_v44, %v20914_v34  ;;  %v11277_v19 = vpop.permute.xlu1 %11276 }
0x18bf   :  { %16480 = vmatmul.mubr.msk.f32.vlgmr.msra.gmra.mrb[142].mxu1 %vm1539_vm1, %v10111_v8 }
0x18c0   :  { %16488 = vmatpush3.xpose.msk.msra.mxu1 %vm1539_vm1, %v20895_v60  ;;  %16489 = vmatprep.mubr.msk.f32.mxu1 %vm18744_vm2, %v21996_v58 }
0x18c1   :  { %16497 = vmatprep.subr.mxu1 %v21996_v58  ;;  %v11275_v34 = vpop.permute.xlu1 %11274 }
0x18c3   :  { %16490 = vmatmul.mubr.msk.f32.vlgmr.msra.gmra.mrb[144].mxu1 %vm1539_vm1, %v20903_v23 }
0x18c4   :  { %16498 = vmatpush3.xpose.msk.msra.mxu1 %vm1539_vm1, %v20946_v49  ;;  %16499 = vmatprep.mubr.msk.f32.mxu1 %vm18744_vm2, %v21996_v58 }
0x18c5   :  { %16507 = vmatprep.subr.mxu1 %v21996_v58  ;;  %v11525_v60 = vpop.permute.xlu1 %11524 }
0x18c7   :  { %16500 = vmatmul.mubr.msk.f32.vlgmr.msra.gmra.mrb[146].mxu1 %vm1539_vm1, %v10963_v50 }
0x18c8   :  { %16508 = vmatpush3.xpose.msk.msra.mxu1 %vm1539_vm1, %v11121_v62  ;;  %16509 = vmatprep.mubr.msk.f32.mxu1 %vm18744_vm2, %v21996_v58 }
0x18c9   :  { %16517 = vmatprep.subr.mxu1 %v21996_v58 }
0x18cb   :  { %16510 = vmatmul.mubr.msk.f32.vlgmr.msra.gmra.mrb[148].mxu1 %vm1539_vm1, %v11119_v48 }
0x18cc   :  { %16518 = vmatpush3.xpose.msk.msra.mxu1 %vm1539_vm1, %v11277_v19  ;;  %16519 = vmatprep.mubr.msk.f32.mxu1 %vm18744_vm2, %v21996_v58 }
0x18cd   :  { %16527 = vmatprep.subr.mxu1 %v21996_v58 }
0x18cf   :  { %16520 = vmatmul.mubr.msk.f32.vlgmr.msra.gmra.mrb[150].mxu1 %vm1539_vm1, %v11275_v34 }
0x18d0   :  { %16528 = vmatpush3.msra.mxu1 %v11525_v60  ;;  %16529 = vmatprep.mubr.msk.f32.mxu1 %vm18744_vm2, %v21996_v58 }
0x18d1   :  { %16537 = vmatprep.subr.mxu1 %v21996_v58 }
0x1900   :  { %v21032_v23 = vpop.f32.mrb[128].mxu0 }
0x1901   :  { %v16446_v49 = vpop.f32.mrb[129].mxu0 }
0x1904   :  { %v21034_v59 = vpop.f32.mrb[130].mxu0 }
0x1905   :  { %v16456_v13 = vpop.f32.mrb[131].mxu0 }
0x193d   :  { %v21036_v0 = vpop.f32.mrb[136].mxu1 }
0x193e   :  { %v16451_v1 = vpop.f32.mrb[137].mxu1 }
0x1941   :  { %v21038_v38 = vpop.f32.mrb[138].mxu1 }
0x1942   :  { %v16461_v45 = vpop.f32.mrb[139].mxu1 }
0x1945   :  { %v21040_v55 = vpop.f32.mrb[132].mxu0 }
0x1946   :  { %v21042_v37 = vpop.f32.mrb[140].mxu1  ;;  %v16466_v29 = vpop.f32.mrb[133].mxu0 }
0x1947   :  { %v16471_v51 = vpop.f32.mrb[141].mxu1 }
0x1949   :  { %v21044_v9 = vpop.f32.mrb[134].mxu0 }
0x194a   :  { %v16476_v46 = vpop.f32.mrb[135].mxu0 }
0x1950   :  { %v10802_v43 = vpop.f32.mrb[136].mxu0 }
0x1951   :  { %v11352_v33 = vmul.f32 0.35355338, %v10802_v43  ;;  %v16486_v18 = vpop.f32.mrb[137].mxu0 }
0x1953   :  { %v11360_v42 = vsel %vm1539_vm1, %v11352_v33, -inf }
0x1954   :  { %11361 = vmax.xlane.f32.xlu0 %v11360_v42  ;;  %v10958_v12 = vpop.f32.mrb[138].mxu0 }
0x1955   :  { %v11354_v3 = vmul.f32 0.35355338, %v10958_v12  ;;  %v16496_v50 = vpop.f32.mrb[139].mxu0 }
0x1957   :  { %v11366_v6 = vsel %vm1539_vm1, %v11354_v3, -inf }
0x1958   :  { %11367 = vmax.xlane.f32.xlu0 %v11366_v6  ;;  %v11114_v62 = vpop.f32.mrb[140].mxu0 }
0x1959   :  { %v16506_v44 = vpop.f32.mrb[141].mxu0  ;;  %v11356_v46 = vmul.f32 0.35355338, %v11114_v62 }
0x195b   :  { %v11372_v6 = vsel %vm1539_vm1, %v11356_v46, -inf }
0x195c   :  { %v11270_v48 = vpop.f32.mrb[142].mxu0 }
0x195d   :  { %v16516_v8 = vpop.f32.mrb[143].mxu0  ;;  %v21054_v50 = vmul.f32 0.35355338, %v11270_v48  ;;  %v21065_v48 = vpop.permute.xlu0 %11752 }
0x195f   :  { %v11378_v62 = vsel %vm1539_vm1, %v21054_v50, -inf }
0x1992   :  { %v21048_v19 = vpop.f32.mrb[142].mxu1 }
0x1993   :  { %v16481_v34 = vpop.f32.mrb[143].mxu1 }
0x1996   :  { %v10880_v60 = vpop.f32.mrb[144].mxu1 }
0x1997   :  { %v11353_v49 = vmul.f32 0.35355338, %v10880_v60  ;;  %v16491_v13 = vpop.f32.mrb[145].mxu1  ;;  %v21067_v60 = vpop.permute.xlu0 %11904 }
0x1999   :  { %v11363_v1 = vsel %vm1539_vm1, %v11353_v49, -inf }
0x199a   :  { %11364 = vmax.xlane.f32.xlu1 %v11363_v1  ;;  %v11036_v45 = vpop.f32.mrb[146].mxu1 }
0x199b   :  { %v11355_v29 = vmul.f32 0.35355338, %v11036_v45  ;;  %v16501_v51 = vpop.f32.mrb[147].mxu1  ;;  %v21073_v45 = vpop.permute.xlu0 %12058 }
0x199d   :  { %v11369_v43 = vsel %vm1539_vm1, %v11355_v29, -inf }
0x199e   :  { %11370 = vmax.xlane.f32.xlu0 %v11369_v43  ;;  %v11192_v18 = vpop.f32.mrb[148].mxu1 }
0x199f   :  { %v21052_v42 = vmul.f32 0.35355338, %v11192_v18  ;;  %v16511_v12 = vpop.f32.mrb[149].mxu1  ;;  %v21075_v51 = vpop.permute.xlu0 %12056 }
0x19a1   :  { %v11375_v44 = vsel %vm1539_vm1, %v21052_v42, -inf }
0x19a2   :  { %11373 = vmax.xlane.f32.xlu0 %v11372_v6  ;;  %11376 = vmax.xlane.f32.xlu1 %v11375_v44  ;;  %v11348_v8 = vpop.f32.mrb[150].mxu1 }
0x19a3   :  { %v16521_v34 = vpop.f32.mrb[151].mxu1  ;;  %v21069_v13 = vmul.f32 0.35355338, %v11348_v8 }
0x19a5   :  { %v11381_v1 = vsel %vm1539_vm1, %v21069_v13, -inf }
0x19a6   :  { %11379 = vmax.xlane.f32.xlu0 %v11378_v62 }
0x19b3   :  { %12292 = vrot.lane.b32.xlu1 %v20487_v40, %s18747_s30 }
0x19bc   :  { %12214 = vrot.lane.b32.xlu0 %v20493_v7, %s18747_s30 }
0x19d7   :  { %11382 = vmax.xlane.f32.xlu1 %v11381_v1  ;;  %v11601_v1 = vpop.permute.xlu1 %11600 }
0x19db   :  { %v21082_v24 = vpop.permute.xlu1 %11676 }
0x19e1   :  { %v11362_v43 = vpop.xlane.xlu0 %11361 }
0x19e2   :  { %v11384_v18 = vsub.f32 %v11352_v33, %v11362_v43  ;;  %v21084_v33 = vpop.permute.xlu1 %11828 }
0x19e4   :  { %v11392_v40 = vmul.f32 1.442695, %v11384_v18 }
0x19e5   :  { %v11368_v12 = vpop.xlane.xlu0 %11367 }
0x19e6   :  { %17328 = vpow2.f32 %v11392_v40  ;;  %v11386_v7 = vsub.f32 %v11354_v3, %v11368_v12  ;;  %v21086_v43 = vpop.permute.xlu1 %11980 }
0x19e8   :  { %v11396_v6 = vmul.f32 1.442695, %v11386_v7 }
0x19ea   :  { %17330 = vpow2.f32 %v11396_v6  ;;  %v21088_v3 = vpop.permute.xlu1 %12136 }
0x19ee   :  { %v21090_v18 = vpop.permute.xlu1 %12134 }
0x19f0   :  { %v17329_v44 = vpop.eup %17328 }
0x19f1   :  { %v11408_v8 = vsel %vm1539_vm1, %v17329_v44, 0.0 }
0x19f2   :  { %11409 = vadd.xlane.f32.xlu0 %v11408_v8 }
0x19f4   :  { %v21078_v34 = vpop.eup %17330 }
0x19f5   :  { %v11414_v62 = vsel %vm1539_vm1, %v21078_v34, 0.0 }
0x19f6   :  { %11415 = vadd.xlane.f32.xlu0 %v11414_v62 }
0x1a27   :  { %v11365_v40 = vpop.xlane.xlu1 %11364 }
0x1a28   :  { %v11385_v12 = vsub.f32 %v11353_v49, %v11365_v40 }
0x1a2a   :  { %v11394_v7 = vmul.f32 1.442695, %v11385_v12 }
0x1a2b   :  { %v11371_v6 = vpop.xlane.xlu0 %11370 }
0x1a2c   :  { %17332 = vpow2.f32 %v11394_v7  ;;  %v11387_v8 = vsub.f32 %v11355_v29, %v11371_v6 }
0x1a2e   :  { %v11398_v30 = vmul.f32 1.442695, %v11387_v8 }
0x1a2f   :  { %v11374_v57 = vpop.xlane.xlu0 %11373 }
0x1a30   :  { %17334 = vpow2.f32 %v11398_v30  ;;  %v11388_v62 = vsub.f32 %v11356_v46, %v11374_v57  ;;  %v11377_v57 = vpop.xlane.xlu1 %11376 }
0x1a32   :  { %v11400_v17 = vmul.f32 1.442695, %v11388_v62 }
0x1a34   :  { %17336 = vpow2.f32 %v11400_v17  ;;  %v11380_v17 = vpop.xlane.xlu0 %11379  ;;  %v21122_v62 = vpop.permute.xlu1 %12292 }
0x1a35   :  { %v11390_v46 = vsub.f32 %v21054_v50, %v11380_v17 }
0x1a36   :  { %v21092_v14 = vpop.eup %17332 }
0x1a37   :  { %v11411_v16 = vsel %vm1539_vm1, %v21092_v14, 0.0  ;;  %v11404_v12 = vmul.f32 1.442695, %v11390_v46 }
0x1a38   :  { %11412 = vadd.xlane.f32.xlu1 %v11411_v16  ;;  %v11389_v16 = vsub.f32 %v21052_v42, %v11377_v57 }
0x1a3a   :  { %v21096_v11 = vpop.eup %17334  ;;  %v11402_v29 = vmul.f32 1.442695, %v11389_v16 }
0x1a3b   :  { %v11417_v49 = vsel %vm1539_vm1, %v21096_v11, 0.0 }
0x1a3c   :  { %11418 = vadd.xlane.f32.xlu1 %v11417_v49  ;;  %17338 = vpow2.f32 %v11402_v29 }
0x1a3d   :  { %17340 = vpow2.f32 %v11404_v12 }
0x1a3e   :  { %v21100_v40 = vpop.eup %17336 }
0x1a3f   :  { %v11420_v30 = vsel %vm1539_vm1, %v21100_v40, 0.0 }
0x1a40   :  { %11421 = vadd.xlane.f32.xlu0 %v11420_v30 }
0x1a46   :  { %v21110_v7 = vpop.eup %17338 }
0x1a47   :  { %v11423_v6 = vsel %vm1539_vm1, %v21110_v7, 0.0  ;;  %v21114_v8 = vpop.eup %17340 }
0x1a4d   :  { %12290 = vrot.lane.b32.xlu1 %v20560_v25, %s18747_s30  ;;  %v21118_v25 = vpop.permute.xlu0 %12214 }
0x1a56   :  { %12212 = vrot.lane.b32.xlu0 %v20547_v63, %s18747_s30  ;;  %v11426_v63 = vsel %vm1539_vm1, %v21114_v8, 0.0 }
0x1a64   :  { %v11383_v57 = vpop.xlane.xlu1 %11382 }
0x1a65   :  { %v11391_v17 = vsub.f32 %v21069_v13, %v11383_v57 }
0x1a71   :  { %11424 = vadd.xlane.f32.xlu1 %v11423_v6 }
0x1a75   :  { %11427 = vadd.xlane.f32.xlu0 %v11426_v63 }
0x1a7f   :  { %v11410_v42 = vpop.xlane.xlu0 %11409 }
0x1a80   :  { %17342 = vrcp.f32 %v11410_v42 }
0x1a82   :  { %12448 = vrot.lane.b32.xlu1 %v20499_v31, %s18747_s30 }
0x1a83   :  { %v11416_v50 = vpop.xlane.xlu0 %11415 }
0x1a84   :  { %17344 = vrcp.f32 %v11416_v50 }
0x1a8a   :  { %v17343_v49 = vpop.eup %17342 }
0x1a8b   :  { %12370 = vrot.lane.b32.xlu0 %v20501_v26, %s18747_s30  ;;  %v11433_v30 = vmul.f32 %v17343_v49, %v17329_v44  ;;  %v11406_v26 = vmul.f32 1.442695, %v11391_v17 }
0x1a8d   :  { %16525 = vmatmul.mubr.msk.f32.vlgmr.msra.gmra.mrb[144].mxu0 %vm1539_vm1, %v11433_v30  ;;  %17346 = vpow2.f32 %v11406_v26 }
0x1a8e   :  { %v17345_v16 = vpop.eup %17344  ;;  %16533 = vmatpush3.msra.mxu0 %v11601_v1  ;;  %16534 = vmatprep.mubr.msk.f32.mxu0 %vm18744_vm2, %v21996_v58 }
0x1a8f   :  { %12368 = vrot.lane.b32.xlu0 %v20550_v20, %s18747_s30  ;;  %16542 = vmatprep.subr.mxu0 %v21996_v58  ;;  %v11437_v31 = vmul.f32 %v17345_v16, %v21078_v34 }
0x1a91   :  { %16535 = vmatmul.mubr.msk.f32.vlgmr.msra.gmra.mrb[146].mxu0 %vm1539_vm1, %v11437_v31 }
0x1a92   :  { %16543 = vmatpush3.msra.mxu0 %v21065_v48  ;;  %16544 = vmatprep.mubr.msk.f32.mxu0 %vm18744_vm2, %v21996_v58 }
0x1a93   :  { %12526 = vrot.lane.b32.xlu0 %v20512_v52, %s18747_s30  ;;  %16552 = vmatprep.subr.mxu0 %v21996_v58 }
0x1a97   :  { %12524 = vrot.lane.b32.xlu0 %v20562_v22, %s18747_s30  ;;  %v21143_v20 = vpop.eup %17346 }
0x1a98   :  { %v11429_v13 = vsel %vm1539_vm1, %v21143_v20, 0.0 }
0x1aa6   :  { %11430 = vadd.xlane.f32.xlu1 %v11429_v13 }
0x1ab7   :  { %12446 = vrot.lane.b32.xlu1 %v20570_v36, %s18747_s30 }
0x1abb   :  { %12604 = vrot.lane.b32.xlu1 %v20509_v41, %s18747_s30 }
0x1abf   :  { %12602 = vrot.lane.b32.xlu1 %v20583_v39, %s18747_s30 }
0x1ac5   :  { %v11413_v52 = vpop.xlane.xlu1 %11412 }
0x1ac6   :  { %17348 = vrcp.f32 %v11413_v52 }
0x1ac9   :  { %v11419_v48 = vpop.xlane.xlu1 %11418 }
0x1aca   :  { %17350 = vrcp.f32 %v11419_v48 }
0x1acd   :  { %v11422_v22 = vpop.xlane.xlu0 %11421 }
0x1ace   :  { %17352 = vrcp.f32 %v11422_v22 }
0x1ad0   :  { %v17349_v44 = vpop.eup %17348 }
0x1ad1   :  { %v11435_v34 = vmul.f32 %v17349_v44, %v21092_v14  ;;  %v12213_v39 = vpop.permute.xlu0 %12212 }
0x1ad3   :  { %16530 = vmatmul.mubr.msk.f32.vlgmr.msra.gmra.mrb[152].mxu1 %vm1539_vm1, %v11435_v34 }
0x1ad4   :  { %v17351_v1 = vpop.eup %17350  ;;  %16538 = vmatpush3.msra.mxu1 %v21082_v24  ;;  %16539 = vmatprep.mubr.msk.f32.mxu1 %vm18744_vm2, %v21996_v58  ;;  %v12291_v24 = vpop.permute.xlu1 %12290 }
0x1ad5   :  { %16547 = vmatprep.subr.mxu1 %v21996_v58  ;;  %v11439_v41 = vmul.f32 %v17351_v1, %v21096_v11 }
0x1ad7   :  { %16540 = vmatmul.mubr.msk.f32.vlgmr.msra.gmra.mrb[154].mxu1 %vm1539_vm1, %v11439_v41 }
0x1ad8   :  { %v17353_v36 = vpop.eup %17352  ;;  %16548 = vmatpush3.msra.mxu1 %v21084_v33  ;;  %16549 = vmatprep.mubr.msk.f32.mxu1 %vm18744_vm2, %v21996_v58 }
0x1ad9   :  { %v11441_v14 = vmul.f32 %v17353_v36, %v21100_v40  ;;  %16557 = vmatprep.subr.mxu1 %v21996_v58 }
0x1adb   :  { %16545 = vmatmul.mubr.msk.f32.vlgmr.msra.gmra.mrb[148].mxu0 %vm1539_vm1, %v11441_v14 }
0x1adc   :  { %16553 = vmatpush3.msra.mxu0 %v21067_v60  ;;  %16554 = vmatprep.mubr.msk.f32.mxu0 %vm18744_vm2, %v21996_v58 }
0x1add   :  { %16562 = vmatprep.subr.mxu0 %v21996_v58 }
0x1afe   :  { %v11425_v11 = vpop.xlane.xlu1 %11424 }
0x1aff   :  { %17354 = vrcp.f32 %v11425_v11 }
0x1b02   :  { %v11428_v33 = vpop.xlane.xlu0 %11427 }
0x1b03   :  { %17356 = vrcp.f32 %v11428_v33 }
0x1b06   :  { %v12371_v12 = vpop.permute.xlu0 %12370 }
0x1b09   :  { %v17355_v29 = vpop.eup %17354 }
0x1b0a   :  { %v11443_v40 = vmul.f32 %v17355_v29, %v21110_v7  ;;  %v12369_v7 = vpop.permute.xlu0 %12368 }
0x1b0c   :  { %16550 = vmatmul.mubr.msk.f32.vlgmr.msra.gmra.mrb[156].mxu1 %vm1539_vm1, %v11443_v40 }
0x1b0d   :  { %v17357_v46 = vpop.eup %17356  ;;  %16558 = vmatpush3.msra.mxu1 %v21086_v43  ;;  %16559 = vmatprep.mubr.msk.f32.mxu1 %vm18744_vm2, %v21996_v58  ;;  %v12449_v43 = vpop.permute.xlu1 %12448 }
0x1b0e   :  { %v11445_v60 = vmul.f32 %v17357_v46, %v21114_v8  ;;  %16567 = vmatprep.subr.mxu1 %v21996_v58 }
0x1b10   :  { %16555 = vmatmul.mubr.msk.f32.vlgmr.msra.gmra.mrb[150].mxu0 %vm1539_vm1, %v11445_v60 }
0x1b11   :  { %16563 = vmatpush3.xpose.msk.msra.mxu0 %vm1539_vm1, %v21073_v45  ;;  %16564 = vmatprep.mubr.msk.f32.mxu0 %vm18744_vm2, %v21996_v58  ;;  %v12527_v45 = vpop.permute.xlu0 %12526 }
0x1b12   :  { %16572 = vmatprep.subr.mxu0 %v21996_v58 }
0x1b14   :  { %16565 = vmatmul.mubr.msk.f32.vlgmr.msra.gmra.mrb[152].mxu0 %vm1539_vm1, %v21075_v51 }
0x1b15   :  { %16573 = vmatpush3.xpose.msk.msra.mxu0 %vm1539_vm1, %v21118_v25  ;;  %16574 = vmatprep.mubr.msk.f32.mxu0 %vm18744_vm2, %v21996_v58  ;;  %v12525_v51 = vpop.permute.xlu0 %12524 }
0x1b16   :  { %16582 = vmatprep.subr.mxu0 %v21996_v58 }
0x1b18   :  { %16575 = vmatmul.mubr.msk.f32.vlgmr.msra.gmra.mrb[154].mxu0 %vm1539_vm1, %v12213_v39 }
0x1b19   :  { %16583 = vmatpush3.xpose.msk.msra.mxu0 %vm1539_vm1, %v12371_v12  ;;  %16584 = vmatprep.mubr.msk.f32.mxu0 %vm18744_vm2, %v21996_v58 }
0x1b1a   :  { %16592 = vmatprep.subr.mxu0 %v21996_v58 }
0x1b1c   :  { %16585 = vmatmul.mubr.msk.f32.vlgmr.msra.gmra.mrb[156].mxu0 %vm1539_vm1, %v12369_v7 }
0x1b1d   :  { %16593 = vmatpush3.xpose.msk.msra.mxu0 %vm1539_vm1, %v12527_v45  ;;  %16594 = vmatprep.mubr.msk.f32.mxu0 %vm18744_vm2, %v21996_v58 }
0x1b1e   :  { %16602 = vmatprep.subr.mxu0 %v21996_v58 }
0x1b20   :  { %16595 = vmatmul.mubr.msk.f32.vlgmr.msra.gmra.mrb[158].mxu0 %vm1539_vm1, %v12525_v51 }
0x1b21   :  { %16604 = vmatprep.mubr.msk.f32.mxu0 %vm18744_vm2, %v21996_v58 }
0x1b33   :  { %v11431_v6 = vpop.xlane.xlu1 %11430 }
0x1b34   :  { %17358 = vrcp.f32 %v11431_v6 }
0x1b37   :  { %v12447_v25 = vpop.permute.xlu1 %12446 }
0x1b3e   :  { %v17359_v8 = vpop.eup %17358 }
0x1b3f   :  { %v11447_v63 = vmul.f32 %v17359_v8, %v21143_v20 }
0x1b41   :  { %16560 = vmatmul.mubr.msk.f32.vlgmr.msra.gmra.mrb[158].mxu1 %vm1539_vm1, %v11447_v63 }
0x1b42   :  { %16568 = vmatpush3.xpose.msk.msra.mxu1 %vm1539_vm1, %v21088_v3  ;;  %16569 = vmatprep.mubr.msk.f32.mxu1 %vm18744_vm2, %v21996_v58  ;;  %v12605_v3 = vpop.permute.xlu1 %12604 }
0x1b43   :  { %16577 = vmatprep.subr.mxu1 %v21996_v58 }
0x1b45   :  { %16570 = vmatmul.mubr.msk.f32.vlgmr.msra.gmra.mrb[160].mxu1 %vm1539_vm1, %v21090_v18 }
0x1b46   :  { %16578 = vmatpush3.xpose.msk.msra.mxu1 %vm1539_vm1, %v21122_v62  ;;  %16579 = vmatprep.mubr.msk.f32.mxu1 %vm18744_vm2, %v21996_v58  ;;  %v12603_v18 = vpop.permute.xlu1 %12602 }
0x1b47   :  { %16587 = vmatprep.subr.mxu1 %v21996_v58 }
0x1b49   :  { %16580 = vmatmul.mubr.msk.f32.vlgmr.msra.gmra.mrb[162].mxu1 %vm1539_vm1, %v12291_v24 }
0x1b4a   :  { %16588 = vmatpush3.xpose.msk.msra.mxu1 %vm1539_vm1, %v12449_v43  ;;  %16589 = vmatprep.mubr.msk.f32.mxu1 %vm18744_vm2, %v21996_v58 }
0x1b4b   :  { %16597 = vmatprep.subr.mxu1 %v21996_v58 }
0x1b4d   :  { %16590 = vmatmul.mubr.msk.f32.vlgmr.msra.gmra.mrb[164].mxu1 %vm1539_vm1, %v12447_v25 }
0x1b4e   :  { %16598 = vmatpush3.xpose.msk.msra.mxu1 %vm1539_vm1, %v12605_v3  ;;  %16599 = vmatprep.mubr.msk.f32.mxu1 %vm18744_vm2, %v21996_v58 }
0x1b4f   :  { %16607 = vmatprep.subr.mxu1 %v21996_v58 }
0x1b51   :  { %16600 = vmatmul.mubr.msk.f32.vlgmr.msra.gmra.mrb[166].mxu1 %vm1539_vm1, %v12603_v18 }
0x1b52   :  { %16609 = vmatprep.mubr.msk.f32.mxu1 %vm18744_vm2, %v21996_v58 }
0x1b60   :  { %v21231_v42 = vpop.f32.mrb[144].mxu0 }
0x1b61   :  { %v16526_v50 = vpop.f32.mrb[145].mxu0 }
0x1b64   :  { %v21233_v62 = vpop.f32.mrb[146].mxu0 }
0x1b65   :  { %v16536_v49 = vpop.f32.mrb[147].mxu0 }
0x1ba6   :  { %v21235_v30 = vpop.f32.mrb[152].mxu1 }
0x1ba7   :  { %v16531_v57 = vpop.f32.mrb[153].mxu1 }
0x1baa   :  { %v21237_v16 = vpop.f32.mrb[154].mxu1 }
0x1bab   :  { %v16541_v31 = vpop.f32.mrb[155].mxu1 }
0x1bae   :  { %v21239_v17 = vpop.f32.mrb[148].mxu0 }
0x1baf   :  { %v16546_v26 = vpop.f32.mrb[149].mxu0 }
0x1bdf   :  { %v21241_v20 = vpop.f32.mrb[156].mxu1 }
0x1be0   :  { %v16551_v13 = vpop.f32.mrb[157].mxu1 }
0x1be3   :  { %v21243_v52 = vpop.f32.mrb[150].mxu0 }
0x1be4   :  { %v16556_v48 = vpop.f32.mrb[151].mxu0 }
0x1be7   :  { %v12130_v22 = vpop.f32.mrb[152].mxu0 }
0x1be8   :  { %v12680_v44 = vmul.f32 0.35355338, %v12130_v22  ;;  %v16566_v34 = vpop.f32.mrb[153].mxu0 }
0x1bea   :  { %v12688_v1 = vsel %vm1539_vm1, %v12680_v44, -inf }
0x1beb   :  { %12689 = vmax.xlane.f32.xlu0 %v12688_v1  ;;  %v12286_v41 = vpop.f32.mrb[154].mxu0 }
0x1bec   :  { %v12682_v36 = vmul.f32 0.35355338, %v12286_v41  ;;  %v16576_v14 = vpop.f32.mrb[155].mxu0 }
0x1bee   :  { %v12694_v24 = vsel %vm1539_vm1, %v12682_v36, -inf }
0x1bef   :  { %12695 = vmax.xlane.f32.xlu0 %v12694_v24  ;;  %v12442_v39 = vpop.f32.mrb[156].mxu0 }
0x1bf0   :  { %v16586_v11 = vpop.f32.mrb[157].mxu0  ;;  %v12684_v8 = vmul.f32 0.35355338, %v12442_v39 }
0x1bf2   :  { %v12700_v49 = vsel %vm1539_vm1, %v12684_v8, -inf }
0x1bf3   :  { %v12598_v33 = vpop.f32.mrb[158].mxu0 }
0x1bf4   :  { %v16596_v29 = vpop.f32.mrb[159].mxu0  ;;  %v12686_v50 = vmul.f32 0.35355338, %v12598_v33 }
0x1bf6   :  { %v12706_v48 = vsel %vm1539_vm1, %v12686_v50, -inf }
0x1c14   :  { %v21247_v40 = vpop.f32.mrb[158].mxu1 }
0x1c15   :  { %v16561_v46 = vpop.f32.mrb[159].mxu1 }
0x1c18   :  { %v12208_v12 = vpop.f32.mrb[160].mxu1 }
0x1c19   :  { %v12681_v60 = vmul.f32 0.35355338, %v12208_v12  ;;  %v16571_v7 = vpop.f32.mrb[161].mxu1 }
0x1c1b   :  { %v12691_v45 = vsel %vm1539_vm1, %v12681_v60, -inf }
0x1c1c   :  { %12692 = vmax.xlane.f32.xlu1 %v12691_v45  ;;  %v12364_v51 = vpop.f32.mrb[162].mxu1 }
0x1c1d   :  { %v12683_v43 = vmul.f32 0.35355338, %v12364_v51  ;;  %v16581_v6 = vpop.f32.mrb[163].mxu1 }
0x1c1f   :  { %v12697_v63 = vsel %vm1539_vm1, %v12683_v43, -inf }
0x1c20   :  { %12698 = vmax.xlane.f32.xlu0 %v12697_v63  ;;  %v12520_v25 = vpop.f32.mrb[164].mxu1 }
0x1c21   :  { %v12685_v3 = vmul.f32 0.35355338, %v12520_v25  ;;  %v16591_v18 = vpop.f32.mrb[165].mxu1 }
0x1c23   :  { %v12703_v57 = vsel %vm1539_vm1, %v12685_v3, -inf }
0x1c24   :  { %12701 = vmax.xlane.f32.xlu0 %v12700_v49  ;;  %12704 = vmax.xlane.f32.xlu1 %v12703_v57  ;;  %v12676_v31 = vpop.f32.mrb[166].mxu1 }
0x1c25   :  { %v12687_v26 = vmul.f32 0.35355338, %v12676_v31  ;;  %v16601_v13 = vpop.f32.mrb[167].mxu1 }
0x1c27   :  { %v12709_v22 = vsel %vm1539_vm1, %v12687_v26, -inf }
0x1c28   :  { %12707 = vmax.xlane.f32.xlu0 %v12706_v48  ;;  %12710 = vmax.xlane.f32.xlu1 %v12709_v22 }
0x1c39   :  { %12852 = vrot.lane.b32.xlu1 %v20596_v54, %s18747_s30 }
0x1c3d   :  { %12928 = vrot.lane.b32.xlu1 %v20604_v28, %s18747_s30 }
0x1c3e   :  { %12776 = vrot.lane.b32.xlu0 %v20600_v27, %s18747_s30 }
0x1c41   :  { %13004 = vrot.lane.b32.xlu1 %v20602_v2, %s18747_s30 }
0x1c42   :  { %13080 = vrot.lane.b32.xlu0 %v20610_v56, %s18747_s30 }
0x1c45   :  { %13156 = vrot.lane.b32.xlu1 %v20607_v10, %s18747_s30 }
0x1c78   :  { %v12690_v34 = vpop.xlane.xlu0 %12689 }
0x1c79   :  { %v12712_v1 = vsub.f32 %v12680_v44, %v12690_v34 }
0x1c7b   :  { %v12720_v41 = vmul.f32 1.442695, %v12712_v1 }
0x1c7c   :  { %v12696_v14 = vpop.xlane.xlu0 %12695 }
0x1c7d   :  { %17360 = vpow2.f32 %v12720_v41  ;;  %v12714_v54 = vsub.f32 %v12682_v36, %v12696_v14 }
0x1c7f   :  { %v12724_v24 = vmul.f32 1.442695, %v12714_v54 }
0x1c81   :  { %17362 = vpow2.f32 %v12724_v24 }
0x1c87   :  { %v21267_v28 = vpop.eup %17360 }
0x1c88   :  { %v12736_v27 = vsel %vm1539_vm1, %v21267_v28, 0.0 }
0x1c89   :  { %12737 = vadd.xlane.f32.xlu0 %v12736_v27 }
0x1c8b   :  { %v21271_v2 = vpop.eup %17362 }
0x1c8c   :  { %v12742_v56 = vsel %vm1539_vm1, %v21271_v2, 0.0 }
0x1c8d   :  { %12743 = vadd.xlane.f32.xlu0 %v12742_v56 }
0x1ca9   :  { %v12693_v10 = vpop.xlane.xlu1 %12692 }
0x1caa   :  { %v12713_v44 = vsub.f32 %v12681_v60, %v12693_v10 }
0x1cac   :  { %v12722_v39 = vmul.f32 1.442695, %v12713_v44 }
0x1cad   :  { %v12699_v11 = vpop.xlane.xlu0 %12698 }
0x1cae   :  { %17364 = vpow2.f32 %v12722_v39  ;;  %v12715_v36 = vsub.f32 %v12683_v43, %v12699_v11 }
0x1cb0   :  { %v12726_v33 = vmul.f32 1.442695, %v12715_v36 }
0x1cb1   :  { %v12702_v29 = vpop.xlane.xlu0 %12701  ;;  %v12705_v46 = vpop.xlane.xlu1 %12704 }
0x1cb2   :  { %17366 = vpow2.f32 %v12726_v33  ;;  %v12716_v12 = vsub.f32 %v12684_v8, %v12702_v29  ;;  %v12717_v7 = vsub.f32 %v12685_v3, %v12705_v46 }
0x1cb4   :  { %v12728_v45 = vmul.f32 1.442695, %v12716_v12  ;;  %v12730_v51 = vmul.f32 1.442695, %v12717_v7 }
0x1cb5   :  { %v12708_v6 = vpop.xlane.xlu0 %12707  ;;  %v12711_v63 = vpop.xlane.xlu1 %12710 }
0x1cb6   :  { %17368 = vpow2.f32 %v12728_v45  ;;  %v12718_v25 = vsub.f32 %v12686_v50, %v12708_v6  ;;  %v12719_v18 = vsub.f32 %v12687_v26, %v12711_v63 }
0x1cb7   :  { %17370 = vpow2.f32 %v12730_v51 }
0x1cb8   :  { %v21275_v49 = vpop.eup %17364  ;;  %v12732_v60 = vmul.f32 1.442695, %v12718_v25  ;;  %v12734_v57 = vmul.f32 1.442695, %v12719_v18 }
0x1cb9   :  { %v12777_v31 = vpop.permute.xlu0 %12776  ;;  %v12853_v43 = vpop.permute.xlu1 %12852  ;;  %v12739_v13 = vsel %vm1539_vm1, %v21275_v49, 0.0 }
0x1cba   :  { %17372 = vpow2.f32 %v12732_v60  ;;  %16603 = vmatpush3.msra.mxu0 %v12777_v31  ;;  %12740 = vadd.xlane.f32.xlu1 %v12739_v13  ;;  %v886_v13 = vld [vmem:[#allocation49 + $0x10] sm:$0xff] }
0x1cbb   :  { %17374 = vpow2.f32 %v12734_v57  ;;  %16608 = vmatpush3.msra.mxu1 %v12853_v43  ;;  %16612 = vmatprep.subr.mxu0 %v21996_v58  ;;  %v885_v43 = vld [vmem:[#allocation49 + $0x8] sm:$0xff] }
0x1cbc   :  { %v21280_v8 = vpop.eup %17366  ;;  %16617 = vmatprep.subr.mxu1 %v21996_v58 }
0x1cbd   :  { %v12745_v3 = vsel %vm1539_vm1, %v21280_v8, 0.0 }
0x1cbe   :  { %12746 = vadd.xlane.f32.xlu1 %v12745_v3  ;;  %v887_v3 = vld [vmem:[#allocation49 + $0x18] sm:$0xff] }
0x1cc0   :  { %v21285_v50 = vpop.eup %17368 }
0x1cc1   :  { %v21287_v26 = vpop.eup %17370  ;;  %v12748_v48 = vsel %vm1539_vm1, %v21285_v50, 0.0 }
0x1cc2   :  { %12749 = vadd.xlane.f32.xlu0 %v12748_v48  ;;  %v12751_v22 = vsel %vm1539_vm1, %v21287_v26, 0.0 }
0x1cc3   :  { %12752 = vadd.xlane.f32.xlu1 %v12751_v22 }
0x1cc4   :  { %v21293_v34 = vpop.eup %17372 }
0x1cc5   :  { %v21295_v1 = vpop.eup %17374  ;;  %v12754_v41 = vsel %vm1539_vm1, %v21293_v34, 0.0 }
0x1cc6   :  { %12755 = vadd.xlane.f32.xlu0 %v12754_v41  ;;  %v12757_v14 = vsel %vm1539_vm1, %v21295_v1, 0.0 }
0x1cc7   :  { %12758 = vadd.xlane.f32.xlu1 %v12757_v14 }
0x1cd8   :  { %13308 = vrot.lane.b32.xlu1 %v20612_v32, %s18747_s30  ;;  %v13081_v32 = vpop.permute.xlu0 %13080 }
0x1cdc   :  { %13394 = vrot.lane.b32.xlu1 %v21036_v0, %s18692_s28  ;;  %13232 = vrot.lane.b32.xlu0 %v20614_v61, %s18747_s30 }
0x1ce0   :  { %13426 = vrot.lane.b32.xlu1 %v21235_v30, %s18748_s24  ;;  %13392 = vrot.lane.b32.xlu0 %v21032_v23, %s18692_s28 }
0x1ce4   :  { %13398 = vrot.lane.b32.xlu1 %v21038_v38, %s18692_s28  ;;  %13424 = vrot.lane.b32.xlu0 %v21231_v42, %s18748_s24  ;;  %v12929_v38 = vpop.permute.xlu1 %12928 }
0x1ce8   :  { %13430 = vrot.lane.b32.xlu1 %v21237_v16, %s18748_s24  ;;  %13396 = vrot.lane.b32.xlu0 %v21034_v59, %s18692_s28 }
0x1cec   :  { %13402 = vrot.lane.b32.xlu1 %v21042_v37, %s18692_s28  ;;  %13428 = vrot.lane.b32.xlu0 %v21233_v62, %s18748_s24 }
0x1cf0   :  { %13434 = vrot.lane.b32.xlu1 %v21241_v20, %s18748_s24  ;;  %13400 = vrot.lane.b32.xlu0 %v21040_v55, %s18692_s28 }
0x1cf4   :  { %13406 = vrot.lane.b32.xlu1 %v21048_v19, %s18692_s28  ;;  %13432 = vrot.lane.b32.xlu0 %v21239_v17, %s18748_s24 }
0x1cf8   :  { %13438 = vrot.lane.b32.xlu1 %v21247_v40, %s18748_s24  ;;  %13404 = vrot.lane.b32.xlu0 %v21044_v9, %s18692_s28  ;;  %v13005_v9 = vpop.permute.xlu1 %13004  ;;  %s18751_s28 = smov 64  }
0x1cfc   :  { %13436 = vrot.lane.b32.xlu0 %v21243_v52, %s18748_s24  ;;  %v13157_v19 = vpop.permute.xlu1 %13156 }
0x1d16   :  { %v12738_v61 = vpop.xlane.xlu0 %12737 }
0x1d17   :  { %17376 = vrcp.f32 %v12738_v61 }
0x1d1a   :  { %v12744_v23 = vpop.xlane.xlu0 %12743 }
0x1d1b   :  { %17378 = vrcp.f32 %v12744_v23 }
0x1d21   :  { %v17377_v59 = vpop.eup %17376 }
0x1d22   :  { %v12761_v0 = vmul.f32 %v17377_v59, %v21267_v28 }
0x1d24   :  { %16605 = vmatmul.mubr.msk.f32.vlgmr.msra.gmra.mrb[160].mxu0 %vm1539_vm1, %v12761_v0 }
0x1d25   :  { %v17379_v55 = vpop.eup %17378  ;;  %16613 = vmatpush3.msra.mxu0 %v12929_v38  ;;  %16614 = vmatprep.mubr.msk.f32.mxu0 %vm18744_vm2, %v21996_v58 }
0x1d26   :  { %v12765_v37 = vmul.f32 %v17379_v55, %v21271_v2  ;;  %16622 = vmatprep.subr.mxu0 %v21996_v58 }
0x1d28   :  { %16615 = vmatmul.mubr.msk.f32.vlgmr.msra.gmra.mrb[162].mxu0 %vm1539_vm1, %v12765_v37 }
0x1d29   :  { %16623 = vmatpush3.msra.mxu0 %v13081_v32  ;;  %16624 = vmatprep.mubr.msk.f32.mxu0 %vm18744_vm2, %v21996_v58 }
0x1d2a   :  { %16632 = vmatprep.subr.mxu0 %v21996_v58 }
0x1d47   :  { %v12741_v42 = vpop.xlane.xlu1 %12740 }
0x1d48   :  { %17380 = vrcp.f32 %v12741_v42 }
0x1d4b   :  { %v12747_v62 = vpop.xlane.xlu1 %12746 }
0x1d4c   :  { %17382 = vrcp.f32 %v12747_v62 }
0x1d4f   :  { %v12750_v30 = vpop.xlane.xlu0 %12749 }
0x1d50   :  { %17384 = vrcp.f32 %v12750_v30  ;;  %v12753_v16 = vpop.xlane.xlu1 %12752 }
0x1d51   :  { %17386 = vrcp.f32 %v12753_v16 }
0x1d52   :  { %v17381_v17 = vpop.eup %17380 }
0x1d53   :  { %v12763_v20 = vmul.f32 %v17381_v17, %v21275_v49  ;;  %v12756_v52 = vpop.xlane.xlu0 %12755 }
0x1d54   :  { %17388 = vrcp.f32 %v12756_v52  ;;  %v12759_v40 = vpop.xlane.xlu1 %12758 }
0x1d55   :  { %17390 = vrcp.f32 %v12759_v40  ;;  %16610 = vmatmul.mubr.msk.f32.vlgmr.msra.gmra.mrb[168].mxu1 %vm1539_vm1, %v12763_v20 }
0x1d56   :  { %v17383_v54 = vpop.eup %17382  ;;  %16618 = vmatpush3.msra.mxu1 %v13005_v9  ;;  %16619 = vmatprep.mubr.msk.f32.mxu1 %vm18744_vm2, %v21996_v58 }
0x1d57   :  { %v12767_v24 = vmul.f32 %v17383_v54, %v21280_v8  ;;  %v13233_v28 = vpop.permute.xlu0 %13232  ;;  %16627 = vmatprep.subr.mxu1 %v21996_v58 }
0x1d58   :  { %v13309_v11 = vpop.permute.xlu1 %13308 }
0x1d59   :  { %16620 = vmatmul.mubr.msk.f32.vlgmr.msra.gmra.mrb[170].mxu1 %vm1539_vm1, %v12767_v24 }
0x1d5a   :  { %v17385_v27 = vpop.eup %17384  ;;  %16628 = vmatpush3.msra.mxu1 %v13157_v19  ;;  %16629 = vmatprep.mubr.msk.f32.mxu1 %vm18744_vm2, %v21996_v58 }
0x1d5b   :  { %v17387_v2 = vpop.eup %17386  ;;  %v12769_v56 = vmul.f32 %v17385_v27, %v21285_v50  ;;  %v21357_v10 = vpop.permute.xlu0 %13392  ;;  %16637 = vmatprep.subr.mxu1 %v21996_v58  ;;  %v16870_v50 = vpack.c.bf16 %v887_v3, %v886_v13  ;;  %v22037_v13 = vld [vmem:[#allocation142_spill] sm:$0xff] }
0x1d5c   :  { %v12771_v44 = vmul.f32 %v17387_v2, %v21287_v26  ;;  %v13480_v37 = vsel %vm1539_vm1, %v20788_v15, %v21357_v10  ;;  %v13395_v62 = vpop.permute.xlu1 %13394 }
0x1d5d   :  { %16625 = vmatmul.mubr.msk.f32.vlgmr.msra.gmra.mrb[164].mxu0 %vm1539_vm1, %v12769_v56  ;;  %v13481_v24 = vsel %vm1539_vm1, %v20790_v53, %v13395_v62 }
0x1d5e   :  { %v17389_v39 = vpop.eup %17388  ;;  %16630 = vmatmul.mubr.msk.f32.vlgmr.msra.gmra.mrb[172].mxu1 %vm1539_vm1, %v12771_v44  ;;  %16633 = vmatpush3.msra.mxu0 %v13233_v28 }
0x1d5f   :  { %v17391_v36 = vpop.eup %17390  ;;  %v12773_v33 = vmul.f32 %v17389_v39, %v21293_v34  ;;  %16638 = vmatpush3.msra.mxu1 %v13309_v11  ;;  %v13425_v29 = vpop.permute.xlu0 %13424  ;;  %16634 = vmatprep.mubr.msk.f32.mxu0 %vm18744_vm2, %v21996_v58 }
0x1d60   :  { %v12775_v46 = vmul.f32 %v17391_v36, %v21295_v1  ;;  %16639 = vmatprep.mubr.msk.f32.mxu1 %vm18744_vm2, %v21996_v58  ;;  %v13488_v9 = vsel %vm6924_vm3, %v13480_v37, %v13425_v29  ;;  %v13427_v30 = vpop.permute.xlu1 %13426 }
0x1d61   :  { %16635 = vmatmul.mubr.msk.f32.vlgmr.msra.gmra.mrb[166].mxu0 %vm1539_vm1, %v12773_v33  ;;  %v13489_v15 = vsel %vm6924_vm3, %v13481_v24, %v13427_v30 }
0x1d62   :  { %16640 = vmatmul.mubr.msk.f32.vlgmr.msra.gmra.mrb[174].mxu1 %vm1539_vm1, %v12775_v46 }
0x1d63   :  { %v13397_v12 = vpop.permute.xlu0 %13396 }
0x1d64   :  { %v13482_v7 = vsel %vm1539_vm1, %v20792_v35, %v13397_v12  ;;  %v884_v35 = vld [vmem:[#allocation49] sm:$0xff]  ;;  %v13399_v16 = vpop.permute.xlu1 %13398 }
0x1d65   :  { %v16866_v8 = vpack.c.bf16 %v885_v43, %v884_v35  ;;  %v13483_v10 = vsel %vm1539_vm1, %v20796_v4, %v13399_v16  ;;  %v22035_v12 = vld [vmem:[#allocation164_spill] sm:$0xff]  ;;  %v22036_v35 = vld [vmem:[#allocation145_spill] sm:$0xff]  ;;  %v22042_v16 = vld [vmem:[#allocation155_spill] sm:$0xff] }
0x1d67   :  { %v13429_v45 = vpop.permute.xlu0 %13428  ;;  %16867 = vmatprep.subr.bf16.mxu0 %v16866_v8 }
0x1d68   :  { %v13490_v51 = vsel %vm6924_vm3, %v13482_v7, %v13429_v45  ;;  %16869 = vmatpush3.bf16.msra.mxu0 %v16866_v8  ;;  %v13431_v17 = vpop.permute.xlu1 %13430 }
0x1d69   :  { %16871 = vmatprep.subr.bf16.mxu0 %v16870_v50  ;;  %v13491_v44 = vsel %vm6924_vm3, %v13483_v10, %v13431_v17 }
0x1d6b   :  { %v13401_v6 = vpop.permute.xlu0 %13400 }
0x1d6c   :  { %v13484_v63 = vsel %vm1539_vm1, %v20794_v5, %v13401_v6  ;;  %16873 = vmatpush3.bf16.msra.mxu0 %v16870_v50  ;;  %v13403_v20 = vpop.permute.xlu1 %13402 }
0x1d6d   :  { %v13485_v11 = vsel %vm1539_vm1, %v20802_v21, %v13403_v20  ;;  %v22043_v20 = vld [vmem:[#allocation154_spill] sm:$0xff] }
0x1d6f   :  { %v13433_v25 = vpop.permute.xlu0 %13432 }
0x1d70   :  { %v21377_v18 = vsel %vm6924_vm3, %v13484_v63, %v13433_v25  ;;  %v13435_v52 = vpop.permute.xlu1 %13434  ;;  %v15283_v25 = vld [vmem:[#allocation50] ss:$0 sm:$0xff] }
0x1d71   :  { %v13493_v33 = vsel %vm6924_vm3, %v13485_v11, %v13435_v52 }
0x1d73   :  { %v13405_v49 = vpop.permute.xlu0 %13404 }
0x1d74   :  { %v13486_v60 = vsel %vm1539_vm1, %v20798_v47, %v13405_v49  ;;  %v13407_v40 = vpop.permute.xlu1 %13406 }
0x1d75   :  { %v13487_v7 = vsel %vm1539_vm1, %v22035_v12, %v13407_v40 }
0x1d77   :  { %v13437_v57 = vpop.permute.xlu0 %13436 }
0x1d78   :  { %v21382_v31 = vsel %vm6924_vm3, %v13486_v60, %v13437_v57  ;;  %v13439_v54 = vpop.permute.xlu1 %13438 }
0x1df7   :  { %v12848_v5 = vpop.f32.mrb[160].mxu0 }
0x1df8   :  { %13456 = vrot.lane.b32.xlu0 %v12848_v5, %s18749_s25  ;;  %v16606_v26 = vpop.f32.mrb[161].mxu0 }
0x1dfb   :  { %v13000_v48 = vpop.f32.mrb[162].mxu0 }
0x1dfc   :  { %13460 = vrot.lane.b32.xlu0 %v13000_v48, %s18749_s25  ;;  %v16616_v47 = vpop.f32.mrb[163].mxu0 }
0x1dfd   :  { %v22038_v47 = vld [vmem:[#allocation147_spill] sm:$0xff] }
0x1e28   :  { %v12924_v22 = vpop.f32.mrb[168].mxu1 }
0x1e29   :  { %13458 = vrot.lane.b32.xlu1 %v12924_v22, %s18749_s25  ;;  %v16611_v34 = vpop.f32.mrb[169].mxu1 }
0x1e2c   :  { %v13076_v1 = vpop.f32.mrb[170].mxu1 }
0x1e2d   :  { %13462 = vrot.lane.b32.xlu1 %v13076_v1, %s18749_s25  ;;  %v16621_v41 = vpop.f32.mrb[171].mxu1 }
0x1e2e   :  { %v22039_v41 = vld [vmem:[#allocation143_spill] sm:$0xff] }
0x1e30   :  { %v13152_v14 = vpop.f32.mrb[164].mxu0 }
0x1e31   :  { %v13228_v32 = vpop.f32.mrb[172].mxu1  ;;  %13464 = vrot.lane.b32.xlu0 %v13152_v14, %s18749_s25  ;;  %v16626_v61 = vpop.f32.mrb[165].mxu0 }
0x1e32   :  { %13466 = vrot.lane.b32.xlu1 %v13228_v32, %s18749_s25  ;;  %v16631_v23 = vpop.f32.mrb[173].mxu1 }
0x1e34   :  { %v13304_v59 = vpop.f32.mrb[166].mxu0 }
0x1e35   :  { %v13380_v0 = vpop.f32.mrb[174].mxu1  ;;  %13468 = vrot.lane.b32.xlu0 %v13304_v59, %s18749_s25  ;;  %v16636_v38 = vpop.f32.mrb[167].mxu0  ;;  %v22040_v59 = vld [vmem:[#allocation153_spill] sm:$0xff] }
0x1e36   :  { %13470 = vrot.lane.b32.xlu1 %v13380_v0, %s18749_s25  ;;  %v16641_v55 = vpop.f32.mrb[175].mxu1 }
0x1e37   :  { %v22041_v55 = vld [vmem:[#allocation146_spill] sm:$0xff] }
0x1e6a   :  { %v13457_v19 = vpop.permute.xlu0 %13456 }
0x1e6b   :  { %v13496_v42 = vsel %vm6933_vm4, %v13488_v9, %v13457_v19 }
0x1e6c   :  { %16650 = vmatprep.mubr.msk.f32.mxu0 %vm1028_vm0, %v13496_v42 }
0x1e6e   :  { %v13461_v28 = vpop.permute.xlu0 %13460 }
0x1e6f   :  { %v13498_v56 = vsel %vm6933_vm4, %v13490_v51, %v13461_v28  ;;  %v13495_v51 = vsel %vm6924_vm3, %v13487_v7, %v13439_v54 }
0x1e9b   :  { %v13459_v27 = vpop.permute.xlu1 %13458 }
0x1e9c   :  { %v13497_v2 = vsel %vm6933_vm4, %v13489_v15, %v13459_v27 }
0x1e9d   :  { %16651 = vmatmul.mubr.msk.f32.vlgmr.msra.gmra.mrb[168].mxu0 %vm1028_vm0, %v13497_v2 }
0x1e9e   :  { %16653 = vmatprep.mubr.msk.f32.mxu0 %vm1028_vm0, %v13498_v56 }
0x1e9f   :  { %v13463_v39 = vpop.permute.xlu1 %13462 }
0x1ea0   :  { %v13499_v53 = vsel %vm6933_vm4, %v13491_v44, %v13463_v39 }
0x1ea1   :  { %16654 = vmatmul.mubr.msk.f32.gmra.mrb[170].mxu0 %vm1028_vm0, %v13499_v53 }
0x1ea3   :  { %v13465_v36 = vpop.permute.xlu0 %13464 }
0x1ea4   :  { %v13500_v29 = vsel %vm6933_vm4, %v21377_v18, %v13465_v36  ;;  %v13467_v46 = vpop.permute.xlu1 %13466 }
0x1ea5   :  { %v13501_v4 = vsel %vm6933_vm4, %v13493_v33, %v13467_v46  ;;  %16656 = vmatprep.mubr.msk.f32.mxu0 %vm1028_vm0, %v13500_v29 }
0x1ea6   :  { %16657 = vmatmul.mubr.msk.f32.gmra.mrb[172].mxu0 %vm1028_vm0, %v13501_v4 }
0x1ea7   :  { %v13469_v45 = vpop.permute.xlu0 %13468 }
0x1ea8   :  { %v13502_v21 = vsel %vm6933_vm4, %v21382_v31, %v13469_v45  ;;  %v13471_v6 = vpop.permute.xlu1 %13470 }
0x1ea9   :  { %v13503_v63 = vsel %vm6933_vm4, %v13495_v51, %v13471_v6  ;;  %16659 = vmatprep.mubr.msk.f32.mxu0 %vm1028_vm0, %v13502_v21 }
0x1eaa   :  { %16660 = vmatmul.mubr.msk.f32.gmra.mrb[174].mxu0 %vm1028_vm0, %v13503_v63 }
0x1f70   :  { %v16652_v18 = vpop.f32.mrb[168].mxu0 }
0x1f71   :  { %v13606_v49 = vadd.f32 %v16652_v18, %v15283_v25  ;;  %v13600_v60 = vpop.f32.mrb[169].mxu0 }
0x1f72   :  { %v13601_v57 = vadd.f32 %v15283_v25, %v13600_v60 }
0x1f73   :  { %v13640_v43 = vadd.f32 %v13606_v49, %v22036_v35 }
0x1f74   :  { %v13639_v8 = vadd.f32 %v13601_v57, %v22037_v13  ;;  %v16655_v3 = vpop.f32.mrb[170].mxu0 }
0x1f75   :  { %v13616_v50 = vadd.f32 %v16655_v3, %v15283_v25  ;;  %v13610_v5 = vpop.f32.mrb[171].mxu0  ;;  %v13650_v31 = vsel %vm1028_vm0, %v13640_v43, 0.0 }
0x1f76   :  { %v13611_v26 = vadd.f32 %v15283_v25, %v13610_v5  ;;  %13651 = vadd.xlane.f32.xlu1 %v13650_v31  ;;  %v13647_v48 = vsel %vm1028_vm0, %v13639_v8, 0.0 }
0x1f77   :  { %v13642_v22 = vadd.f32 %v13616_v50, %v22038_v47  ;;  %13648 = vadd.xlane.f32.xlu0 %v13647_v48 }
0x1f78   :  { %v13641_v14 = vadd.f32 %v13611_v26, %v22039_v41  ;;  %v892_v41 = vld [vmem:[#allocation55 + $0x8] sm:$0xff] }
0x1f79   :  { %v16658_v34 = vpop.f32.mrb[172].mxu0  ;;  %v13656_v1 = vsel %vm1028_vm0, %v13642_v22, 0.0 }
0x1f7a   :  { %v13626_v32 = vadd.f32 %v16658_v34, %v15283_v25  ;;  %v13620_v61 = vpop.f32.mrb[173].mxu0  ;;  %v13653_v42 = vsel %vm1028_vm0, %v13641_v14, 0.0 }
0x1f7b   :  { %v13621_v23 = vadd.f32 %v15283_v25, %v13620_v61  ;;  %13657 = vadd.xlane.f32.xlu0 %v13656_v1  ;;  %v891_v1 = vld [vmem:[#allocation55] sm:$0xff]  ;;  %v894_v61 = vld [vmem:[#allocation55 + $0x18] sm:$0xff] }
0x1f7c   :  { %v13644_v0 = vadd.f32 %v13626_v32, %v22040_v59  ;;  %v893_v32 = vld [vmem:[#allocation55 + $0x10] sm:$0xff]  ;;  %v896_v59 = vld [vmem:[#allocation58] sm:$0xff] }
0x1f7d   :  { %v16661_v38 = vpop.f32.mrb[174].mxu0  ;;  %v13643_v37 = vadd.f32 %v13621_v23, %v22041_v55  ;;  %v16878_v23 = vpack.c.bf16 %v894_v61, %v893_v32 }
0x1f7e   :  { %v13636_v9 = vadd.f32 %v16661_v38, %v15283_v25  ;;  %v13630_v19 = vpop.f32.mrb[175].mxu0  ;;  %v13662_v62 = vsel %vm1028_vm0, %v13644_v0, 0.0 }
0x1f7f   :  { %v13631_v30 = vadd.f32 %v15283_v25, %v13630_v19  ;;  %13654 = vadd.xlane.f32.xlu0 %v13653_v42  ;;  %13663 = vadd.xlane.f32.xlu1 %v13662_v62  ;;  %v13659_v40 = vsel %vm1028_vm0, %v13643_v37, 0.0 }
0x1f80   :  { %v13646_v17 = vadd.f32 %v13636_v9, %v22042_v16 }
0x1f81   :  { %v13645_v52 = vadd.f32 %v13631_v30, %v22043_v20 }
0x1f82   :  { %v13668_v54 = vsel %vm1028_vm0, %v13646_v17, 0.0 }
0x1f83   :  { %13660 = vadd.xlane.f32.xlu0 %v13659_v40  ;;  %13669 = vadd.xlane.f32.xlu1 %v13668_v54  ;;  %v13665_v24 = vsel %vm1028_vm0, %v13645_v52, 0.0 }
0x1f87   :  { %13666 = vadd.xlane.f32.xlu0 %v13665_v24 }
0x2003   :  { %v13652_v28 = vpop.xlane.xlu1 %13651 }
0x2004   :  { %v13672_v15 = vmul.f32 0.03125, %v13652_v28  ;;  %v13649_v27 = vpop.xlane.xlu0 %13648 }
0x2005   :  { %v13671_v2 = vmul.f32 0.03125, %v13649_v27 }
0x2006   :  { %v21442_v56 = vsub.f32 %v13640_v43, %v13672_v15 }
0x2007   :  { %v21444_v10 = vsub.f32 %v13639_v8, %v13671_v2 }
0x2008   :  { %v13658_v44 = vpop.xlane.xlu0 %13657  ;;  %v13688_v39 = vmul.f32 %v21442_v56, %v21442_v56 }
0x2009   :  { %v13674_v53 = vmul.f32 0.03125, %v13658_v44  ;;  %v13687_v11 = vmul.f32 %v21444_v10, %v21444_v10 }
0x200a   :  { %v13698_v36 = vsel %vm1028_vm0, %v13688_v39, 0.0 }
0x200b   :  { %v21451_v33 = vsub.f32 %v13642_v22, %v13674_v53  ;;  %13699 = vadd.xlane.f32.xlu1 %v13698_v36  ;;  %v13695_v29 = vsel %vm1028_vm0, %v13687_v11, 0.0  ;;  %v15292_v53 = vld [vmem:[#allocation52] ss:$0 sm:$0xff] }
0x200c   :  { %v13655_v46 = vpop.xlane.xlu0 %13654  ;;  %13696 = vadd.xlane.f32.xlu0 %v13695_v29  ;;  %v13664_v4 = vpop.xlane.xlu1 %13663 }
0x200d   :  { %v13673_v12 = vmul.f32 0.03125, %v13655_v46  ;;  %v13676_v7 = vmul.f32 0.03125, %v13664_v4  ;;  %v13690_v45 = vmul.f32 %v21451_v33, %v21451_v33 }
0x200f   :  { %v21456_v51 = vsub.f32 %v13641_v14, %v13673_v12  ;;  %v21458_v21 = vsub.f32 %v13644_v0, %v13676_v7  ;;  %v13704_v6 = vsel %vm1028_vm0, %v13690_v45, 0.0  ;;  %v16874_v14 = vpack.c.bf16 %v892_v41, %v891_v1  ;;  %v897_v0 = vld [vmem:[#allocation58 + $0x8] sm:$0xff]  ;;  %v15293_v45 = vld [vmem:[#allocation53] ss:$0 sm:$0xff] }
0x2010   :  { %v13661_v63 = vpop.xlane.xlu0 %13660  ;;  %13705 = vadd.xlane.f32.xlu1 %v13704_v6  ;;  %v13670_v25 = vpop.xlane.xlu1 %13669  ;;  %v16882_v38 = vpack.c.bf16 %v897_v0, %v896_v59  ;;  %v15294_v0 = vld [vmem:[#allocation56] ss:$0 sm:$0xff] }
0x2011   :  { %v13675_v18 = vmul.f32 0.03125, %v13661_v63  ;;  %v13678_v49 = vmul.f32 0.03125, %v13670_v25  ;;  %v13689_v60 = vmul.f32 %v21456_v51, %v21456_v51  ;;  %v13692_v57 = vmul.f32 %v21458_v21, %v21458_v21  ;;  %16875 = vmatprep.subr.bf16.mxu1 %v16874_v14 }
0x2012   :  { %16877 = vmatpush3.bf16.msra.mxu1 %v16874_v14  ;;  %16883 = vmatprep.subr.bf16.mxu0 %v16882_v38 }
0x2013   :  { %v21465_v35 = vsub.f32 %v13643_v37, %v13675_v18  ;;  %v21467_v43 = vsub.f32 %v13646_v17, %v13678_v49  ;;  %v13701_v13 = vsel %vm1028_vm0, %v13689_v60, 0.0  ;;  %v13710_v8 = vsel %vm1028_vm0, %v13692_v57, 0.0  ;;  %16879 = vmatprep.subr.bf16.mxu1 %v16878_v23  ;;  %16885 = vmatpush3.bf16.msra.mxu0 %v16882_v38 }
0x2014   :  { %13702 = vadd.xlane.f32.xlu0 %v13701_v13  ;;  %v13667_v3 = vpop.xlane.xlu0 %13666  ;;  %13711 = vadd.xlane.f32.xlu1 %v13710_v8 }
0x2015   :  { %v13677_v50 = vmul.f32 0.03125, %v13667_v3  ;;  %v13691_v5 = vmul.f32 %v21465_v35, %v21465_v35  ;;  %v13694_v31 = vmul.f32 %v21467_v43, %v21467_v43 }
0x2016   :  { %16881 = vmatpush3.bf16.msra.mxu1 %v16878_v23  ;;  %v899_v23 = vld [vmem:[#allocation58 + $0x18] sm:$0xff] }
0x2017   :  { %v21475_v26 = vsub.f32 %v13645_v52, %v13677_v50  ;;  %v13707_v48 = vsel %vm1028_vm0, %v13691_v5, 0.0  ;;  %v13716_v47 = vsel %vm1028_vm0, %v13694_v31, 0.0 }
0x2018   :  { %13708 = vadd.xlane.f32.xlu0 %v13707_v48  ;;  %13717 = vadd.xlane.f32.xlu1 %v13716_v47 }
0x2019   :  { %v13693_v22 = vmul.f32 %v21475_v26, %v21475_v26 }
0x201b   :  { %v13713_v34 = vsel %vm1028_vm0, %v13693_v22, 0.0 }
0x201c   :  { %13714 = vadd.xlane.f32.xlu0 %v13713_v34 }
0x2098   :  { %v13700_v55 = vpop.xlane.xlu1 %13699 }
0x2099   :  { %v13720_v37 = vmul.f32 0.03125, %v13700_v55  ;;  %v13697_v9 = vpop.xlane.xlu0 %13696 }
0x209a   :  { %v13719_v19 = vmul.f32 0.03125, %v13697_v9 }
0x209b   :  { %v13728_v42 = vadd.f32 1e-05, %v13720_v37 }
0x209c   :  { %v13727_v62 = vadd.f32 1e-05, %v13719_v19 }
0x209d   :  { %17392 = vrsqrt.f32 %v13728_v42  ;;  %v13706_v30 = vpop.xlane.xlu1 %13705 }
0x209e   :  { %17394 = vrsqrt.f32 %v13727_v62  ;;  %v13722_v16 = vmul.f32 0.03125, %v13706_v30 }
0x20a0   :  { %v13730_v17 = vadd.f32 1e-05, %v13722_v16 }
0x20a1   :  { %v13703_v20 = vpop.xlane.xlu0 %13702  ;;  %v13712_v52 = vpop.xlane.xlu1 %13711 }
0x20a2   :  { %17396 = vrsqrt.f32 %v13730_v17  ;;  %v13721_v40 = vmul.f32 0.03125, %v13703_v20  ;;  %v13724_v54 = vmul.f32 0.03125, %v13712_v52 }
0x20a4   :  { %v13729_v24 = vadd.f32 1e-05, %v13721_v40  ;;  %v13732_v28 = vadd.f32 1e-05, %v13724_v54 }
0x20a5   :  { %v13709_v15 = vpop.xlane.xlu0 %13708  ;;  %v13718_v27 = vpop.xlane.xlu1 %13717 }
0x20a6   :  { %17398 = vrsqrt.f32 %v13729_v24  ;;  %v13723_v2 = vmul.f32 0.03125, %v13709_v15  ;;  %v13726_v44 = vmul.f32 0.03125, %v13718_v27 }
0x20a7   :  { %v17393_v39 = vpop.eup %17392  ;;  %17400 = vrsqrt.f32 %v13732_v28 }
0x20a8   :  { %v17395_v11 = vpop.eup %17394  ;;  %v13744_v36 = vmul.f32 %v17393_v39, %v21442_v56  ;;  %v13731_v29 = vadd.f32 1e-05, %v13723_v2  ;;  %v13734_v46 = vadd.f32 1e-05, %v13726_v44 }
0x20a9   :  { %v13715_v4 = vpop.xlane.xlu0 %13714  ;;  %v13743_v12 = vmul.f32 %v17395_v11, %v21444_v10 }
0x20aa   :  { %17402 = vrsqrt.f32 %v13731_v29  ;;  %v13725_v7 = vmul.f32 0.03125, %v13715_v4  ;;  %v13758_v6 = vmul.f32 %v15292_v53, %v13744_v36  ;;  %v15303_v29 = vld [vmem:[#allocation59] ss:$0 sm:$0xff] }
0x20ab   :  { %17404 = vrsqrt.f32 %v13734_v46  ;;  %v13757_v63 = vmul.f32 %v15292_v53, %v13743_v12 }
0x20ac   :  { %v17397_v25 = vpop.eup %17396  ;;  %v13733_v18 = vadd.f32 1e-05, %v13725_v7  ;;  %v21486_v60 = vadd.f32 %v15293_v45, %v13758_v6 }
0x20ad   :  { %v21484_v49 = vadd.f32 %v15293_v45, %v13757_v63  ;;  %v13746_v56 = vmul.f32 %v17397_v25, %v21451_v33 }
0x20ae   :  { %17406 = vrsqrt.f32 %v13733_v18 }
0x20af   :  { %16670 = vmatprep.mubr.msk.f32.mxu1 %vm1028_vm0, %v21484_v49  ;;  %v13760_v8 = vmul.f32 %v15292_v53, %v13746_v56 }
0x20b0   :  { %v17399_v57 = vpop.eup %17398  ;;  %16671 = vmatmul.mubr.msk.f32.vlgmr.msra.gmra.mrb[176].mxu1 %vm1028_vm0, %v21486_v60 }
0x20b1   :  { %v17401_v10 = vpop.eup %17400  ;;  %v13745_v13 = vmul.f32 %v17399_v57, %v21456_v51  ;;  %v21498_v47 = vadd.f32 %v15293_v45, %v13760_v8 }
0x20b2   :  { %v13748_v3 = vmul.f32 %v17401_v10, %v21458_v21 }
0x20b3   :  { %v13759_v50 = vmul.f32 %v15292_v53, %v13745_v13 }
0x20b4   :  { %v17403_v5 = vpop.eup %17402  ;;  %v13762_v22 = vmul.f32 %v15292_v53, %v13748_v3 }
0x20b5   :  { %v17405_v31 = vpop.eup %17404  ;;  %v21495_v48 = vadd.f32 %v15293_v45, %v13759_v50  ;;  %v13747_v33 = vmul.f32 %v17403_v5, %v21465_v35  ;;  %v15140_v5 = vld [vmem:[#allocation32] ss:$0 sm:$0xff] }
0x20b6   :  { %v13750_v34 = vmul.f32 %v17405_v31, %v21467_v43  ;;  %v21508_v14 = vadd.f32 %v15293_v45, %v13762_v22 }
0x20b7   :  { %16673 = vmatprep.mubr.msk.f32.mxu1 %vm1028_vm0, %v21495_v48  ;;  %v13761_v1 = vmul.f32 %v15292_v53, %v13747_v33 }
0x20b8   :  { %v17407_v51 = vpop.eup %17406  ;;  %16674 = vmatmul.mubr.msk.f32.gmra.mrb[178].mxu1 %vm1028_vm0, %v21498_v47  ;;  %v13764_v35 = vmul.f32 %v15292_v53, %v13750_v34  ;;  %v22044_v34 = vld [vmem:[#allocation156_spill] sm:$0xff] }
0x20b9   :  { %v21505_v21 = vadd.f32 %v15293_v45, %v13761_v1  ;;  %v13749_v41 = vmul.f32 %v17407_v51, %v21475_v26  ;;  %v898_v26 = vld [vmem:[#allocation58 + $0x10] sm:$0xff]  ;;  %v7463_v1 = vadd.f32 %v22044_v34, %v15140_v5 }
0x20ba   :  { %v21516_v61 = vadd.f32 %v15293_v45, %v13764_v35  ;;  %v16886_v59 = vpack.c.bf16 %v899_v23, %v898_v26 }
0x20bb   :  { %16676 = vmatprep.mubr.msk.f32.mxu1 %vm1028_vm0, %v21505_v21  ;;  %v13763_v32 = vmul.f32 %v15292_v53, %v13749_v41 }
0x20bc   :  { %16677 = vmatmul.mubr.msk.f32.gmra.mrb[180].mxu1 %vm1028_vm0, %v21508_v14  ;;  %16887 = vmatprep.subr.bf16.mxu0 %v16886_v59 }
0x20bd   :  { %v21514_v43 = vadd.f32 %v15293_v45, %v13763_v32  ;;  %16889 = vmatpush3.bf16.msra.mxu0 %v16886_v59  ;;  %v22045_v32 = vld [vmem:[#allocation157_spill] sm:$0xff] }
0x20be   :  { %v7458_v26 = vadd.f32 %v15140_v5, %v22045_v32 }
0x20bf   :  { %16679 = vmatprep.mubr.msk.f32.mxu1 %vm1028_vm0, %v21514_v43 }
0x20c0   :  { %16680 = vmatmul.mubr.msk.f32.gmra.mrb[182].mxu1 %vm1028_vm0, %v21516_v61 }
0x20c1   :  { %16718 = vmatprep.mubr.msk.f32.mxu1 %vm18744_vm2, %v21996_v58 }
0x2183   :  { %v16672_v38 = vpop.f32.mrb[176].mxu1 }
0x2184   :  { %v13881_v55 = vadd.f32 %v16672_v38, %v15294_v0  ;;  %v13875_v37 = vpop.f32.mrb[177].mxu1 }
0x2185   :  { %v13876_v9 = vadd.f32 %v15294_v0, %v13875_v37 }
0x2186   :  { %v13915_v42 = vmax.f32 %v13881_v55, 0.0  ;;  %v22047_v55 = vld [vmem:[#allocation158_spill] sm:$0xff] }
0x2187   :  { %v13914_v19 = vmax.f32 %v13876_v9, 0.0  ;;  %v7473_v37 = vadd.f32 %v22047_v55, %v15140_v5 }
0x2189   :  { %16690 = vmatprep.mubr.msk.f32.mxu0 %vm1028_vm0, %v13914_v19  ;;  %v22048_v19 = vld [vmem:[#allocation148_spill] sm:$0xff] }
0x218a   :  { %16691 = vmatmul.mubr.msk.f32.vlgmr.msra.gmra.mrb[176].mxu0 %vm1028_vm0, %v13915_v42  ;;  %v21579_v42 = vadd.f32 %v7458_v26, %v22048_v19 }
0x218b   :  { %v16675_v62 = vpop.f32.mrb[178].mxu1 }
0x218c   :  { %v13891_v30 = vadd.f32 %v16675_v62, %v15294_v0  ;;  %v13885_v16 = vpop.f32.mrb[179].mxu1  ;;  %v22049_v62 = vld [vmem:[#allocation159_spill] sm:$0xff] }
0x218d   :  { %v13886_v17 = vadd.f32 %v15294_v0, %v13885_v16 }
0x218e   :  { %v13917_v40 = vmax.f32 %v13891_v30, 0.0  ;;  %v7468_v30 = vadd.f32 %v15140_v5, %v22049_v62 }
0x218f   :  { %v13916_v20 = vmax.f32 %v13886_v17, 0.0  ;;  %v16678_v52 = vpop.f32.mrb[180].mxu1  ;;  %v22051_v17 = vld [vmem:[#allocation160_spill] sm:$0xff] }
0x2190   :  { %v13901_v54 = vadd.f32 %v16678_v52, %v15294_v0  ;;  %v13895_v24 = vpop.f32.mrb[181].mxu1 }
0x2191   :  { %v13896_v28 = vadd.f32 %v15294_v0, %v13895_v24  ;;  %16693 = vmatprep.mubr.msk.f32.mxu0 %vm1028_vm0, %v13916_v20  ;;  %v7483_v20 = vadd.f32 %v22051_v17, %v15140_v5  ;;  %v22053_v24 = vld [vmem:[#allocation161_spill] sm:$0xff] }
0x2192   :  { %16694 = vmatmul.mubr.msk.f32.gmra.mrb[178].mxu0 %vm1028_vm0, %v13917_v40  ;;  %v13919_v2 = vmax.f32 %v13901_v54, 0.0  ;;  %v22052_v40 = vld [vmem:[#allocation150_spill] sm:$0xff] }
0x2193   :  { %v13918_v15 = vmax.f32 %v13896_v28, 0.0  ;;  %v16681_v27 = vpop.f32.mrb[182].mxu1  ;;  %v21591_v54 = vadd.f32 %v7468_v30, %v22052_v40  ;;  %v7478_v28 = vadd.f32 %v15140_v5, %v22053_v24 }
0x2194   :  { %v13911_v44 = vadd.f32 %v16681_v27, %v15294_v0  ;;  %v13905_v39 = vpop.f32.mrb[183].mxu1  ;;  %v22054_v27 = vld [vmem:[#allocation141_spill] sm:$0xff] }
0x2195   :  { %v13906_v53 = vadd.f32 %v15294_v0, %v13905_v39  ;;  %16696 = vmatprep.mubr.msk.f32.mxu0 %vm1028_vm0, %v13918_v15  ;;  %v22046_v0 = vld [vmem:[#allocation149_spill] sm:$0xff]  ;;  %v7504_v15 = vsel %vm1028_vm0, %v21579_v42, 0.0 }
0x2196   :  { %16697 = vmatmul.mubr.msk.f32.gmra.mrb[180].mxu0 %vm1028_vm0, %v13919_v2  ;;  %v13921_v36 = vmax.f32 %v13911_v44, 0.0  ;;  %v21573_v38 = vadd.f32 %v7463_v1, %v22046_v0  ;;  %v21597_v2 = vadd.f32 %v7483_v20, %v22054_v27  ;;  %v22055_v44 = vld [vmem:[#allocation162_spill] sm:$0xff] }
0x2197   :  { %v13920_v11 = vmax.f32 %v13906_v53, 0.0  ;;  %v7493_v39 = vadd.f32 %v22055_v44, %v15140_v5 }
0x2198   :  { %v7507_v52 = vsel %vm1028_vm0, %v21573_v38, 0.0 }
0x2199   :  { %16699 = vmatprep.mubr.msk.f32.mxu0 %vm1028_vm0, %v13920_v11  ;;  %v22056_v11 = vld [vmem:[#allocation152_spill] sm:$0xff] }
0x219a   :  { %16700 = vmatmul.mubr.msk.f32.gmra.mrb[182].mxu0 %vm1028_vm0, %v13921_v36  ;;  %v21603_v36 = vadd.f32 %v7478_v28, %v22056_v11 }
0x219b   :  { %16737 = vmatprep.mubr.msk.f32.mxu0 %vm18744_vm2, %v21996_v58 }
0x225d   :  { %v16692_v46 = vpop.f32.mrb[176].mxu0 }
0x225e   :  { %v14024_v4 = vadd.f32 %v16692_v46, %v15303_v29  ;;  %v14018_v12 = vpop.f32.mrb[177].mxu0 }
0x225f   :  { %v14019_v7 = vadd.f32 %v15303_v29, %v14018_v12  ;;  %v22058_v12 = vld [vmem:[#allocation144_spill] sm:$0xff] }
0x2260   :  { %v21535_v45 = vadd.f32 %v14024_v4, %v21486_v60  ;;  %v7510_v4 = vsel %vm1028_vm0, %v21591_v54, 0.0 }
0x2261   :  { %v21538_v6 = vadd.f32 %v14019_v7, %v21484_v49  ;;  %v21609_v7 = vadd.f32 %v7493_v39, %v22058_v12 }
0x2262   :  { %v14068_v63 = vsel %vm1028_vm0, %v21535_v45, 0.0 }
0x2263   :  { %14069 = vadd.xlane.f32.xlu1 %v14068_v63  ;;  %v14065_v25 = vsel %vm1028_vm0, %v21538_v6, 0.0  ;;  %v7519_v63 = vsel %vm1028_vm0, %v21597_v2, 0.0 }
0x2264   :  { %14066 = vadd.xlane.f32.xlu0 %v14065_v25  ;;  %v22059_v25 = vld [vmem:[#allocation140_spill] sm:$0xff] }
0x2265   :  { %v16695_v18 = vpop.f32.mrb[178].mxu0 }
0x2266   :  { %v14034_v56 = vadd.f32 %v16695_v18, %v15303_v29  ;;  %v14028_v57 = vpop.f32.mrb[179].mxu0 }
0x2267   :  { %v14029_v10 = vadd.f32 %v15303_v29, %v14028_v57  ;;  %v7525_v57 = vsel %vm1028_vm0, %v21609_v7, 0.0 }
0x2268   :  { %v21545_v13 = vadd.f32 %v14034_v56, %v21498_v47  ;;  %v7516_v56 = vsel %vm1028_vm0, %v21603_v36, 0.0 }
0x2269   :  { %v21548_v60 = vadd.f32 %v14029_v10, %v21495_v48  ;;  %v16698_v49 = vpop.f32.mrb[180].mxu0 }
0x226a   :  { %v14044_v8 = vadd.f32 %v16698_v49, %v15303_v29  ;;  %v14038_v3 = vpop.f32.mrb[181].mxu0  ;;  %v14074_v50 = vsel %vm1028_vm0, %v21545_v13, 0.0 }
0x226b   :  { %v14039_v31 = vadd.f32 %v15303_v29, %v14038_v3  ;;  %14075 = vadd.xlane.f32.xlu1 %v14074_v50  ;;  %v14071_v33 = vsel %vm1028_vm0, %v21548_v60, 0.0 }
0x226c   :  { %v21555_v22 = vadd.f32 %v14044_v8, %v21508_v14  ;;  %14072 = vadd.xlane.f32.xlu0 %v14071_v33 }
0x226d   :  { %v21558_v47 = vadd.f32 %v14039_v31, %v21505_v21  ;;  %v16701_v48 = vpop.f32.mrb[182].mxu0 }
0x226e   :  { %v14054_v51 = vadd.f32 %v16701_v48, %v15303_v29  ;;  %v14048_v41 = vpop.f32.mrb[183].mxu0  ;;  %v14080_v35 = vsel %vm1028_vm0, %v21555_v22, 0.0 }
0x226f   :  { %v14049_v23 = vadd.f32 %v15303_v29, %v14048_v41  ;;  %14081 = vadd.xlane.f32.xlu1 %v14080_v35  ;;  %v14077_v14 = vsel %vm1028_vm0, %v21558_v47, 0.0  ;;  %v22057_v29 = vld [vmem:[#allocation163_spill] sm:$0xff] }
0x2270   :  { %v21567_v59 = vadd.f32 %v14054_v51, %v21516_v61  ;;  %14078 = vadd.xlane.f32.xlu0 %v14077_v14  ;;  %v7488_v46 = vadd.f32 %v15140_v5, %v22057_v29 }
0x2271   :  { %v21570_v21 = vadd.f32 %v14049_v23, %v21514_v43  ;;  %v22050_v43 = vld [vmem:[#allocation151_spill] sm:$0xff] }
0x2272   :  { %v14086_v9 = vsel %vm1028_vm0, %v21567_v59, 0.0  ;;  %v21585_v16 = vadd.f32 %v7473_v37, %v22050_v43  ;;  %v21614_v18 = vadd.f32 %v7488_v46, %v22059_v25 }
0x2273   :  { %14087 = vadd.xlane.f32.xlu1 %v14086_v9  ;;  %v14083_v61 = vsel %vm1028_vm0, %v21570_v21, 0.0 }
0x2274   :  { %14084 = vadd.xlane.f32.xlu0 %v14083_v61  ;;  %v7513_v53 = vsel %vm1028_vm0, %v21585_v16, 0.0  ;;  %v7522_v10 = vsel %vm1028_vm0, %v21614_v18, 0.0 }
0x2277   :  { %7508 = vadd.xlane.f32.xlu1 %v7507_v52 }
0x2278   :  { %7505 = vadd.xlane.f32.xlu0 %v7504_v15 }
0x227b   :  { %7514 = vadd.xlane.f32.xlu1 %v7513_v53 }
0x227c   :  { %7511 = vadd.xlane.f32.xlu0 %v7510_v4 }
0x227f   :  { %7520 = vadd.xlane.f32.xlu1 %v7519_v63 }
0x2280   :  { %7517 = vadd.xlane.f32.xlu0 %v7516_v56 }
0x2283   :  { %7526 = vadd.xlane.f32.xlu1 %v7525_v57 }
0x2284   :  { %7523 = vadd.xlane.f32.xlu0 %v7522_v10 }
0x22f0   :  { %v14070_v49 = vpop.xlane.xlu1 %14069 }
0x22f1   :  { %v14090_v8 = vmul.f32 0.03125, %v14070_v49  ;;  %v14067_v3 = vpop.xlane.xlu0 %14066 }
0x22f2   :  { %v14089_v50 = vmul.f32 0.03125, %v14067_v3 }
0x22f3   :  { %v21623_v5 = vsub.f32 %v21535_v45, %v14090_v8 }
0x22f4   :  { %v21626_v31 = vsub.f32 %v21538_v6, %v14089_v50 }
0x22f5   :  { %v14106_v33 = vmul.f32 %v21623_v5, %v21623_v5 }
0x22f6   :  { %v14105_v48 = vmul.f32 %v21626_v31, %v21626_v31 }
0x22f7   :  { %v14116_v34 = vsel %vm1028_vm0, %v14106_v33, 0.0 }
0x22f8   :  { %v14076_v1 = vpop.xlane.xlu1 %14075  ;;  %14117 = vadd.xlane.f32.xlu1 %v14116_v34  ;;  %v14113_v51 = vsel %vm1028_vm0, %v14105_v48, 0.0 }
0x22f9   :  { %v14092_v41 = vmul.f32 0.03125, %v14076_v1  ;;  %v14073_v35 = vpop.xlane.xlu0 %14072  ;;  %14114 = vadd.xlane.f32.xlu0 %v14113_v51 }
0x22fa   :  { %v14091_v45 = vmul.f32 0.03125, %v14073_v35 }
0x22fb   :  { %v21635_v32 = vsub.f32 %v21545_v13, %v14092_v41 }
0x22fc   :  { %v21638_v6 = vsub.f32 %v21548_v60, %v14091_v45  ;;  %v14082_v26 = vpop.xlane.xlu1 %14081 }
0x22fd   :  { %v14094_v23 = vmul.f32 0.03125, %v14082_v26  ;;  %v14079_v14 = vpop.xlane.xlu0 %14078  ;;  %v14108_v0 = vmul.f32 %v21635_v32, %v21635_v32 }
0x22fe   :  { %v14093_v55 = vmul.f32 0.03125, %v14079_v14  ;;  %v14107_v37 = vmul.f32 %v21638_v6, %v21638_v6 }
0x22ff   :  { %v21645_v9 = vsub.f32 %v21555_v22, %v14094_v23  ;;  %v14122_v19 = vsel %vm1028_vm0, %v14108_v0, 0.0 }
0x2300   :  { %v21649_v13 = vsub.f32 %v21558_v47, %v14093_v55  ;;  %14123 = vadd.xlane.f32.xlu1 %v14122_v19  ;;  %v14088_v60 = vpop.xlane.xlu1 %14087  ;;  %v14119_v62 = vsel %vm1028_vm0, %v14107_v37, 0.0  ;;  %v1021_v19 = vld [vmem:[#allocation8] sm:$0xff] }
0x2301   :  { %v14096_v30 = vmul.f32 0.03125, %v14088_v60  ;;  %v14085_v61 = vpop.xlane.xlu0 %14084  ;;  %14120 = vadd.xlane.f32.xlu0 %v14119_v62  ;;  %v14110_v43 = vmul.f32 %v21645_v9, %v21645_v9  ;;  %v903_v60 = vld [vmem:[#allocation64] sm:$0xff]  ;;  %v18750_v62 = vmov 0.0|0.0  }
0x2302   :  { %v14095_v17 = vmul.f32 0.03125, %v14085_v61  ;;  %v14109_v22 = vmul.f32 %v21649_v13, %v21649_v13  ;;  %16890 = vmatprep.subr.bf16.mxu1 %v18750_v62  ;;  %v905_v61 = vld [vmem:[#allocation64 + $0x10] sm:$0xff]  ;;  %16902 = vmatprep.subr.bf16.mxu0 %v18750_v62 }
0x2303   :  { %v21657_v20 = vsub.f32 %v21567_v59, %v14096_v30  ;;  %v14128_v47 = vsel %vm1028_vm0, %v14110_v43, 0.0  ;;  %v906_v43 = vld [vmem:[#allocation64 + $0x18] sm:$0xff] }
0x2304   :  { %v21661_v52 = vsub.f32 %v21570_v21, %v14095_v17  ;;  %14129 = vadd.xlane.f32.xlu1 %v14128_v47  ;;  %v7509_v40 = vpop.xlane.xlu1 %7508  ;;  %v14125_v24 = vsel %vm1028_vm0, %v14109_v22, 0.0  ;;  %v16894_v17 = vpack.c.bf16 %v906_v43, %v905_v61  ;;  %v907_v22 = vld [vmem:[#allocation64 + $0x20] sm:$0xff]  ;;  %v908_v47 = vld [vmem:[#allocation64 + $0x28] sm:$0xff] }
0x2305   :  { %v7529_v28 = vmul.f32 0.03125, %v7509_v40  ;;  %v7506_v15 = vpop.xlane.xlu0 %7505  ;;  %14126 = vadd.xlane.f32.xlu0 %v14125_v24  ;;  %v14112_v27 = vmul.f32 %v21657_v20, %v21657_v20  ;;  %v16897_v40 = vpack.c.bf16 %v908_v47, %v907_v22  ;;  %v909_v24 = vld [vmem:[#allocation64 + $0x30] sm:$0xff] }
0x2306   :  { %v7528_v44 = vmul.f32 0.03125, %v7506_v15  ;;  %v14111_v59 = vmul.f32 %v21661_v52, %v21661_v52 }
0x2307   :  { %v21669_v39 = vsub.f32 %v21573_v38, %v7529_v28  ;;  %v14134_v21 = vsel %vm1028_vm0, %v14112_v27, 0.0  ;;  %v910_v28 = vld [vmem:[#allocation64 + $0x38] sm:$0xff] }
0x2308   :  { %v21673_v53 = vsub.f32 %v21579_v42, %v7528_v44  ;;  %14135 = vadd.xlane.f32.xlu1 %v14134_v21  ;;  %v7515_v11 = vpop.xlane.xlu1 %7514  ;;  %v14131_v29 = vsel %vm1028_vm0, %v14111_v59, 0.0  ;;  %v16900_v15 = vpack.c.bf16 %v910_v28, %v909_v24 }
0x2309   :  { %v7531_v46 = vmul.f32 0.03125, %v7515_v11  ;;  %v7512_v4 = vpop.xlane.xlu0 %7511  ;;  %14132 = vadd.xlane.f32.xlu0 %v14131_v29  ;;  %v7545_v12 = vmul.f32 %v21669_v39, %v21669_v39 }
0x230a   :  { %v7530_v63 = vmul.f32 0.03125, %v7512_v4  ;;  %v7544_v38 = vmul.f32 %v21673_v53, %v21673_v53 }
0x230b   :  { %v21681_v25 = vsub.f32 %v21585_v16, %v7531_v46  ;;  %v7555_v42 = vsel %vm1028_vm0, %v7545_v12, 0.0 }
0x230c   :  { %v21685_v56 = vsub.f32 %v21591_v54, %v7530_v63  ;;  %7556 = vadd.xlane.f32.xlu1 %v7555_v42  ;;  %v7521_v57 = vpop.xlane.xlu1 %7520  ;;  %v7552_v10 = vsel %vm1028_vm0, %v7544_v38, 0.0 }
0x230d   :  { %v7533_v49 = vmul.f32 0.03125, %v7521_v57  ;;  %v7518_v8 = vpop.xlane.xlu0 %7517  ;;  %7553 = vadd.xlane.f32.xlu0 %v7552_v10  ;;  %v7547_v3 = vmul.f32 %v21681_v25, %v21681_v25 }
0x230e   :  { %v7532_v50 = vmul.f32 0.03125, %v7518_v8  ;;  %v7546_v16 = vmul.f32 %v21685_v56, %v21685_v56 }
0x230f   :  { %v21693_v33 = vsub.f32 %v21597_v2, %v7533_v49  ;;  %v7561_v54 = vsel %vm1028_vm0, %v7547_v3, 0.0 }
0x2310   :  { %v21697_v48 = vsub.f32 %v21603_v36, %v7532_v50  ;;  %7562 = vadd.xlane.f32.xlu1 %v7561_v54  ;;  %v7527_v34 = vpop.xlane.xlu1 %7526  ;;  %v7558_v1 = vsel %vm1028_vm0, %v7546_v16, 0.0  ;;  %v21725_v50 = vld [vmem:[#allocation61] ss:$0 sm:$0xff] }
0x2311   :  { %v7535_v51 = vmul.f32 0.03125, %v7527_v34  ;;  %7559 = vadd.xlane.f32.xlu0 %v7558_v1  ;;  %v7524_v41 = vpop.xlane.xlu0 %7523  ;;  %v7549_v35 = vmul.f32 %v21693_v33, %v21693_v33 }
0x2312   :  { %v7534_v45 = vmul.f32 0.03125, %v7524_v41  ;;  %v7548_v2 = vmul.f32 %v21697_v48, %v21697_v48  ;;  %v21728_v41 = vld [vmem:[#allocation62] ss:$0 sm:$0xff] }
0x2313   :  { %v21705_v26 = vsub.f32 %v21609_v7, %v7535_v51  ;;  %v7567_v36 = vsel %vm1028_vm0, %v7549_v35, 0.0 }
0x2314   :  { %v21709_v23 = vsub.f32 %v21614_v18, %v7534_v45  ;;  %7568 = vadd.xlane.f32.xlu1 %v7567_v36  ;;  %v7564_v14 = vsel %vm1028_vm0, %v7548_v2, 0.0  ;;  %v904_v18 = vld [vmem:[#allocation64 + $0x8] sm:$0xff] }
0x2315   :  { %7565 = vadd.xlane.f32.xlu0 %v7564_v14  ;;  %v7551_v0 = vmul.f32 %v21705_v26, %v21705_v26  ;;  %v16891_v30 = vpack.c.bf16 %v904_v18, %v903_v60 }
0x2316   :  { %v7550_v55 = vmul.f32 %v21709_v23, %v21709_v23 }
0x2317   :  { %v7573_v37 = vsel %vm1028_vm0, %v7551_v0, 0.0  ;;  %16892 = vmatpush3.bf16.msra.mxu1 %v16891_v30 }
0x2318   :  { %7574 = vadd.xlane.f32.xlu1 %v7573_v37  ;;  %v7570_v7 = vsel %vm1028_vm0, %v7550_v55, 0.0  ;;  %16893 = vmatprep.subr.bf16.mxu1 %v18750_v62 }
0x2319   :  { %7571 = vadd.xlane.f32.xlu0 %v7570_v7 }
0x231b   :  { %16895 = vmatpush3.bf16.msra.mxu1 %v16894_v17 }
0x231c   :  { %16896 = vmatprep.subr.bf16.mxu1 %v18750_v62 }
0x231f   :  { %16898 = vmatpush3.bf16.msra.mxu1 %v16897_v40 }
0x2320   :  { %16899 = vmatprep.subr.bf16.mxu1 %v18750_v62 }
0x2323   :  { %16901 = vmatpush3.bf16.msra.mxu1 %v16900_v15 }
0x2324   :  { %16914 = vmatprep.subr.bf16.mxu1 %v18750_v62 }
0x2329   :  { %14529 = vrot.lane.b32.xlu1 %v1021_v19, %s18741_s26 }
0x2385   :  { %v14118_v27 = vpop.xlane.xlu1 %14117 }
0x2386   :  { %v14138_v44 = vmul.f32 0.03125, %v14118_v27  ;;  %v14115_v59 = vpop.xlane.xlu0 %14114 }
0x2387   :  { %v14137_v21 = vmul.f32 0.03125, %v14115_v59 }
0x2388   :  { %v14146_v11 = vadd.f32 1e-05, %v14138_v44 }
0x2389   :  { %v14145_v29 = vadd.f32 1e-05, %v14137_v21 }
0x238a   :  { %17408 = vrsqrt.f32 %v14146_v11 }
0x238b   :  { %17410 = vrsqrt.f32 %v14145_v29 }
0x238d   :  { %v14124_v46 = vpop.xlane.xlu1 %14123 }
0x238e   :  { %v14140_v4 = vmul.f32 0.03125, %v14124_v46  ;;  %v14121_v12 = vpop.xlane.xlu0 %14120 }
0x238f   :  { %v14139_v63 = vmul.f32 0.03125, %v14121_v12 }
0x2390   :  { %v14148_v38 = vadd.f32 1e-05, %v14140_v4 }
0x2391   :  { %v14147_v42 = vadd.f32 1e-05, %v14139_v63  ;;  %v14130_v57 = vpop.xlane.xlu1 %14129 }
0x2392   :  { %17412 = vrsqrt.f32 %v14148_v38  ;;  %v14142_v10 = vmul.f32 0.03125, %v14130_v57  ;;  %v14127_v49 = vpop.xlane.xlu0 %14126 }
0x2393   :  { %17414 = vrsqrt.f32 %v14147_v42  ;;  %v14141_v8 = vmul.f32 0.03125, %v14127_v49 }
0x2394   :  { %v17409_v3 = vpop.eup %17408  ;;  %v14150_v16 = vadd.f32 1e-05, %v14142_v10 }
0x2395   :  { %v17411_v54 = vpop.eup %17410  ;;  %v14162_v34 = vmul.f32 %v17409_v3, %v21623_v5  ;;  %v14149_v1 = vadd.f32 1e-05, %v14141_v8  ;;  %v14136_v51 = vpop.xlane.xlu1 %14135 }
0x2396   :  { %v14161_v35 = vmul.f32 %v17411_v54, %v21626_v31  ;;  %17416 = vrsqrt.f32 %v14150_v16  ;;  %v14144_v45 = vmul.f32 0.03125, %v14136_v51  ;;  %v14133_v2 = vpop.xlane.xlu0 %14132 }
0x2397   :  { %v14176_v36 = vmul.f32 %v21725_v50, %v14162_v34  ;;  %17418 = vrsqrt.f32 %v14149_v1  ;;  %v14143_v14 = vmul.f32 0.03125, %v14133_v2 }
0x2398   :  { %v14175_v0 = vmul.f32 %v21725_v50, %v14161_v35  ;;  %v14152_v55 = vadd.f32 1e-05, %v14144_v45 }
0x2399   :  { %v14190_v37 = vadd.f32 %v21728_v41, %v14176_v36  ;;  %v14151_v7 = vadd.f32 1e-05, %v14143_v14  ;;  %v7557_v5 = vpop.xlane.xlu1 %7556 }
0x239a   :  { %v14189_v19 = vadd.f32 %v21728_v41, %v14175_v0  ;;  %17420 = vrsqrt.f32 %v14152_v55  ;;  %v7577_v60 = vmul.f32 0.03125, %v7557_v5  ;;  %v7554_v18 = vpop.xlane.xlu0 %7553 }
0x239b   :  { %v14269_v31 = vsel %vm1028_vm0, %v14190_v37, 0.0  ;;  %17422 = vrsqrt.f32 %v14151_v7  ;;  %v7576_v30 = vmul.f32 0.03125, %v7554_v18 }
0x239c   :  { %v17413_v61 = vpop.eup %17412  ;;  %v14270_v43 = vrot.slane %v14269_v31, 4  ;;  %v14262_v17 = vsel %vm1028_vm0, %v14189_v19, 0.0  ;;  %v7585_v22 = vadd.f32 1e-05, %v7577_v60 }
0x239d   :  { %v17415_v47 = vpop.eup %17414  ;;  %v14263_v40 = vrot.slane %v14262_v17, 4  ;;  %v14164_v24 = vmul.f32 %v17413_v61, %v21635_v32  ;;  %v7584_v28 = vadd.f32 1e-05, %v7576_v30  ;;  %v7563_v15 = vpop.xlane.xlu1 %7562 }
0x239e   :  { %v14271_v27 = vadd.f32 %v14270_v43, %v14269_v31  ;;  %v14163_v44 = vmul.f32 %v17415_v47, %v21638_v6  ;;  %17424 = vrsqrt.f32 %v7585_v22  ;;  %v7579_v59 = vmul.f32 0.03125, %v7563_v15  ;;  %v7560_v21 = vpop.xlane.xlu0 %7559 }
0x239f   :  { %v14264_v11 = vadd.f32 %v14263_v40, %v14262_v17  ;;  %v14178_v29 = vmul.f32 %v21725_v50, %v14164_v24  ;;  %17426 = vrsqrt.f32 %v7584_v28  ;;  %v7578_v46 = vmul.f32 0.03125, %v7560_v21  ;;  %v21755_v40 = vld [vmem:[#allocation34] ss:$0 sm:$0xff] }
0x23a0   :  { %v17417_v4 = vpop.eup %17416  ;;  %v14272_v12 = vrot.slane %v14271_v27, 2  ;;  %v14177_v63 = vmul.f32 %v21725_v50, %v14163_v44  ;;  %v7587_v38 = vadd.f32 1e-05, %v7579_v59  ;;  %v21758_v44 = vld [vmem:[#allocation35] ss:$0 sm:$0xff] }
0x23a1   :  { %v17419_v42 = vpop.eup %17418  ;;  %v14265_v32 = vrot.slane %v14264_v11, 2  ;;  %v14192_v57 = vadd.f32 %v21728_v41, %v14178_v29  ;;  %v14166_v10 = vmul.f32 %v17417_v4, %v21645_v9  ;;  %v7586_v6 = vadd.f32 1e-05, %v7578_v46  ;;  %v7569_v49 = vpop.xlane.xlu1 %7568 }
0x23a2   :  { %v14273_v8 = vadd.f32 %v14272_v12, %v14271_v27  ;;  %v14191_v3 = vadd.f32 %v21728_v41, %v14177_v63  ;;  %v14165_v16 = vmul.f32 %v17419_v42, %v21649_v13  ;;  %17428 = vrsqrt.f32 %v7587_v38  ;;  %v7566_v54 = vpop.xlane.xlu0 %7565 }
0x23a3   :  { %v14266_v34 = vadd.f32 %v14265_v32, %v14264_v11  ;;  %v14283_v1 = vsel %vm1028_vm0, %v14192_v57, 0.0  ;;  %v14180_v51 = vmul.f32 %v21725_v50, %v14166_v10  ;;  %17430 = vrsqrt.f32 %v7586_v6 }
0x23a4   :  { %v17421_v35 = vpop.eup %17420  ;;  %v14284_v45 = vrot.slane %v14283_v1, 4  ;;  %v14276_v2 = vsel %vm1028_vm0, %v14191_v3, 0.0  ;;  %v14179_v9 = vmul.f32 %v21725_v50, %v14165_v16  ;;  %v7581_v36 = vmul.f32 0.03125, %v7569_v49 }
0x23a5   :  { %v17423_v14 = vpop.eup %17422  ;;  %v14277_v0 = vrot.slane %v14276_v2, 4  ;;  %v14194_v55 = vadd.f32 %v21728_v41, %v14180_v51  ;;  %v14168_v13 = vmul.f32 %v17421_v35, %v21657_v20  ;;  %v7580_v37 = vmul.f32 0.03125, %v7566_v54  ;;  %v7575_v7 = vpop.xlane.xlu1 %7574 }
0x23a6   :  { %v14285_v5 = vadd.f32 %v14284_v45, %v14283_v1  ;;  %v14193_v19 = vadd.f32 %v21728_v41, %v14179_v9  ;;  %v14167_v60 = vmul.f32 %v17423_v14, %v21661_v52  ;;  %v7589_v18 = vadd.f32 1e-05, %v7581_v36  ;;  %v7572_v31 = vpop.xlane.xlu0 %7571 }
0x23a7   :  { %v14278_v30 = vadd.f32 %v14277_v0, %v14276_v2  ;;  %v14182_v61 = vmul.f32 %v21725_v50, %v14168_v13  ;;  %v7588_v43 = vadd.f32 1e-05, %v7580_v37  ;;  %v7583_v17 = vmul.f32 0.03125, %v7575_v7 }
0x23a8   :  { %v17425_v22 = vpop.eup %17424  ;;  %v14181_v47 = vmul.f32 %v21725_v50, %v14167_v60  ;;  %17432 = vrsqrt.f32 %v7589_v18  ;;  %v7582_v20 = vmul.f32 0.03125, %v7572_v31  ;;  %v14267_v24 = vrot.slane %v14266_v34, 1 }
0x23a9   :  { %v17427_v28 = vpop.eup %17426  ;;  %v14279_v15 = vrot.slane %v14278_v30, 2  ;;  %v7601_v27 = vmul.f32 %v17425_v22, %v21669_v39  ;;  %17434 = vrsqrt.f32 %v7588_v43  ;;  %v7591_v52 = vadd.f32 1e-05, %v7583_v17 }
0x23aa   :  { %v7600_v59 = vmul.f32 %v17427_v28, %v21673_v53  ;;  %v7590_v21 = vadd.f32 1e-05, %v7582_v20  ;;  %v14195_v11 = vadd.f32 %v21728_v41, %v14181_v47  ;;  %v21763_v50 = vadd.f32 %v21728_v41, %v14182_v61 }
0x23ab   :  { %v7615_v29 = vmul.f32 %v21755_v40, %v7601_v27  ;;  %17436 = vrsqrt.f32 %v7591_v52  ;;  %v21766_v46 = vadd.f32 %v14267_v24, %v14266_v34  ;;  %v14274_v4 = vrot.slane %v14273_v8, 1 }
0x23ac   :  { %v17429_v12 = vpop.eup %17428  ;;  %v7614_v39 = vmul.f32 %v21755_v40, %v7600_v59  ;;  %17438 = vrsqrt.f32 %v7590_v21  ;;  %v14280_v63 = vadd.f32 %v14279_v15, %v14278_v30  ;;  %v14286_v38 = vrot.slane %v14285_v5, 2 }
0x23ad   :  { %v17431_v42 = vpop.eup %17430  ;;  %v7629_v53 = vadd.f32 %v21758_v44, %v7615_v29  ;;  %v7603_v32 = vmul.f32 %v17429_v12, %v21681_v25  ;;  %v21771_v57 = vadd.f32 %v14274_v4, %v14273_v8  ;;  %v14290_v41 = vsel %vm1028_vm0, %v14193_v19, 0.0 }
0x23ae   :  { %v7628_v10 = vadd.f32 %v21758_v44, %v7614_v39  ;;  %v7602_v6 = vmul.f32 %v17431_v42, %v21685_v56  ;;  %v14281_v49 = vrot.slane %v14280_v63, 1  ;;  %v14287_v3 = vadd.f32 %v14286_v38, %v14285_v5 }
0x23af   :  { %v14204_v16 = vsel %vm1028_vm0, %v7629_v53, 0.0  ;;  %v7617_v54 = vmul.f32 %v21755_v40, %v7603_v32  ;;  %v14291_v34 = vrot.slane %v14290_v41, 4  ;;  %v14297_v1 = vsel %vm1028_vm0, %v14194_v55, 0.0 }
0x23b0   :  { %v14205_v51 = vrot.slane %v14204_v16, 4  ;;  %v14197_v25 = vsel %vm1028_vm0, %v7628_v10, 0.0  ;;  %v7616_v8 = vmul.f32 %v21755_v40, %v7602_v6  ;;  %v14282_v35 = vadd.f32 %v14281_v49, %v14280_v63 }
0x23b1   :  { %v14198_v45 = vrot.slane %v14197_v25, 4  ;;  %v7631_v2 = vadd.f32 %v21758_v44, %v7617_v54  ;;  %v14288_v9 = vrot.slane %v14287_v3, 1  ;;  %v14292_v56 = vadd.f32 %v14291_v34, %v14290_v41 }
0x23b2   :  { %v17433_v36 = vpop.eup %17432  ;;  %v14206_v14 = vadd.f32 %v14205_v51, %v14204_v16  ;;  %v7630_v0 = vadd.f32 %v21758_v44, %v7616_v8  ;;  %v14298_v13 = vrot.slane %v14297_v1, 4  ;;  %v14304_v37 = vsel %vm1028_vm0, %v14195_v11, 0.0 }
0x23b3   :  { %v17435_v7 = vpop.eup %17434  ;;  %v14199_v55 = vadd.f32 %v14198_v45, %v14197_v25  ;;  %v14218_v5 = vsel %vm1028_vm0, %v7631_v2, 0.0  ;;  %v7605_v19 = vmul.f32 %v17433_v36, %v21693_v33  ;;  %v14289_v60 = vadd.f32 %v14288_v9, %v14287_v3 }
0x23b4   :  { %v14207_v18 = vrot.slane %v14206_v14, 2  ;;  %v14219_v31 = vrot.slane %v14218_v5, 4  ;;  %v14211_v30 = vsel %vm1028_vm0, %v7630_v0, 0.0  ;;  %v7604_v61 = vmul.f32 %v17435_v7, %v21697_v48 }
0x23b5   :  { %v17437_v43 = vpop.eup %17436  ;;  %v14200_v17 = vrot.slane %v14199_v55, 2  ;;  %v14212_v22 = vrot.slane %v14211_v30, 4  ;;  %v7619_v47 = vmul.f32 %v21755_v40, %v7605_v19  ;;  %v14293_v20 = vrot.slane %v14292_v56, 2 }
0x23b6   :  { %v17439_v24 = vpop.eup %17438  ;;  %v14208_v28 = vadd.f32 %v14207_v18, %v14206_v14  ;;  %v14220_v15 = vadd.f32 %v14219_v31, %v14218_v5  ;;  %v7618_v33 = vmul.f32 %v21755_v40, %v7604_v61  ;;  %v7607_v27 = vmul.f32 %v17437_v43, %v21705_v26 }
0x23b7   :  { %v14201_v52 = vadd.f32 %v14200_v17, %v14199_v55  ;;  %v14213_v59 = vadd.f32 %v14212_v22, %v14211_v30  ;;  %v7633_v48 = vadd.f32 %v21758_v44, %v7619_v47  ;;  %v7606_v21 = vmul.f32 %v17439_v24, %v21709_v23 }
0x23b8   :  { %v14209_v11 = vrot.slane %v14208_v28, 1  ;;  %v14221_v29 = vrot.slane %v14220_v15, 2  ;;  %v7632_v4 = vadd.f32 %v21758_v44, %v7618_v33  ;;  %v7621_v12 = vmul.f32 %v21755_v40, %v7607_v27 }
0x23b9   :  { %v14202_v39 = vrot.slane %v14201_v52, 1  ;;  %v14214_v63 = vrot.slane %v14213_v59, 2  ;;  %v7620_v38 = vmul.f32 %v21755_v40, %v7606_v21  ;;  %v14294_v42 = vadd.f32 %v14293_v20, %v14292_v56 }
0x23ba   :  { %v14225_v26 = vsel %vm1028_vm0, %v7632_v4, 0.0  ;;  %v14299_v53 = vadd.f32 %v14298_v13, %v14297_v1  ;;  %v14305_v32 = vrot.slane %v14304_v37, 4  ;;  %v14311_v41 = vsel %vm1028_vm0, %v21763_v50, 0.0 }
0x23bb   :  { %v14215_v23 = vadd.f32 %v14214_v63, %v14213_v59  ;;  %v14226_v10 = vrot.slane %v14225_v26, 4  ;;  %v7634_v6 = vadd.f32 %v21758_v44, %v7620_v38  ;;  %v14295_v49 = vrot.slane %v14294_v42, 1 }
0x23bc   :  { %v14300_v3 = vrot.slane %v14299_v53, 2  ;;  %v14306_v16 = vadd.f32 %v14305_v32, %v14304_v37  ;;  %v14312_v54 = vrot.slane %v14311_v41, 4  ;;  %v14318_v34 = vmul.f32 0.125, %v21766_v46 }
0x23bd   :  { %v14227_v40 = vadd.f32 %v14226_v10, %v14225_v26  ;;  %v14296_v51 = vadd.f32 %v14295_v49, %v14294_v42  ;;  %v14319_v25 = vmul.f32 0.125, %v21771_v57  ;;  %v14320_v1 = vmul.f32 0.125, %v14282_v35 }
0x23be   :  { %v14301_v8 = vadd.f32 %v14300_v3, %v14299_v53  ;;  %v14307_v45 = vrot.slane %v14306_v16, 2  ;;  %v14313_v50 = vadd.f32 %v14312_v54, %v14311_v41  ;;  %v14321_v2 = vmul.f32 0.125, %v14289_v60 }
0x23bf   :  { %v14322_v9 = vmul.f32 0.125, %v14296_v51  ;;  %v14357_v56 = vsel %vm14334_vm5, %v14319_v25, %v14318_v34  ;;  %v7635_v36 = vadd.f32 %v21758_v44, %v7621_v12  ;;  %v14203_v14 = vadd.f32 %v14202_v39, %v14201_v52 }
0x23c0   :  { %v14302_v0 = vrot.slane %v14301_v8, 1  ;;  %v14308_v13 = vadd.f32 %v14307_v45, %v14306_v16  ;;  %v14314_v46 = vrot.slane %v14313_v50, 2  ;;  %v14358_v37 = vsel %vm14336_vm6, %v14320_v1, %v14357_v56 }
0x23c1   :  { %v14359_v57 = vsel %vm14338_vm7, %v14321_v2, %v14358_v37  ;;  %v14210_v35 = vadd.f32 %v14209_v11, %v14208_v28  ;;  %v14216_v7 = vrot.slane %v14215_v23, 1  ;;  %v14222_v55 = vadd.f32 %v14221_v29, %v14220_v15  ;;  %v913_v2 = vld [vmem:[#allocation67 + $0x8] sm:$0xff] }
0x23c2   :  { %v14303_v5 = vadd.f32 %v14302_v0, %v14301_v8  ;;  %v14309_v19 = vrot.slane %v14308_v13, 1  ;;  %v14315_v60 = vadd.f32 %v14314_v46, %v14313_v50  ;;  %v14360_v18 = vsel %vm14340_vm8, %v14322_v9, %v14359_v57  ;;  %v912_v50 = vld [vmem:[#allocation67] sm:$0xff]  ;;  %v914_v9 = vld [vmem:[#allocation67 + $0x10] sm:$0xff] }
0x23c3   :  { %v14217_v31 = vadd.f32 %v14216_v7, %v14215_v23  ;;  %v14223_v30 = vrot.slane %v14222_v55, 1  ;;  %v14228_v61 = vrot.slane %v14227_v40, 2  ;;  %v14232_v44 = vsel %vm1028_vm0, %v7633_v48, 0.0  ;;  %v917_v7 = vld [vmem:[#allocation67 + $0x28] sm:$0xff] }
0x23c4   :  { %v14310_v43 = vadd.f32 %v14309_v19, %v14308_v13  ;;  %v14316_v17 = vrot.slane %v14315_v60, 1  ;;  %v14323_v22 = vmul.f32 0.125, %v14303_v5  ;;  %v14233_v47 = vrot.slane %v14232_v44, 4 }
0x23c5   :  { %v14224_v20 = vadd.f32 %v14223_v30, %v14222_v55  ;;  %v14229_v24 = vadd.f32 %v14228_v61, %v14227_v40  ;;  %v14239_v28 = vsel %vm1028_vm0, %v7634_v6, 0.0  ;;  %v14246_v15 = vsel %vm1028_vm0, %v7635_v36, 0.0 }
0x23c6   :  { %v14317_v33 = vadd.f32 %v14316_v17, %v14315_v60  ;;  %v14324_v27 = vmul.f32 0.125, %v14310_v43  ;;  %v14361_v52 = vsel %vm14342_vm9, %v14323_v22, %v14360_v18  ;;  %v14234_v59 = vadd.f32 %v14233_v47, %v14232_v44  ;;  %v921_v18 = vld [vmem:[#allocation70] sm:$0xff]  ;;  %v923_v44 = vld [vmem:[#allocation70 + $0x10] sm:$0xff]  ;;  %v924_v43 = vld [vmem:[#allocation70 + $0x18] sm:$0xff] }
0x23c7   :  { %v14230_v21 = vrot.slane %v14229_v24, 1  ;;  %v14240_v11 = vrot.slane %v14239_v28, 4  ;;  %v14247_v29 = vrot.slane %v14246_v15, 4  ;;  %v14254_v4 = vmul.f32 0.125, %v14203_v14  ;;  %v915_v14 = vld [vmem:[#allocation67 + $0x18] sm:$0xff]  ;;  %v925_v47 = vld [vmem:[#allocation70 + $0x20] sm:$0xff] }
0x23c8   :  { %v14325_v48 = vmul.f32 0.125, %v14317_v33  ;;  %v14362_v12 = vsel %vm14344_vm10, %v14324_v27, %v14361_v52  ;;  %v14235_v39 = vrot.slane %v14234_v59, 2  ;;  %v14255_v63 = vmul.f32 0.125, %v14210_v35  ;;  %v916_v35 = vld [vmem:[#allocation67 + $0x20] sm:$0xff]  ;;  %v14530_v52 = vpop.permute.xlu1 %14529 }
0x23c9   :  { %v14231_v38 = vadd.f32 %v14230_v21, %v14229_v24  ;;  %v14241_v42 = vadd.f32 %v14240_v11, %v14239_v28  ;;  %v14248_v26 = vadd.f32 %v14247_v29, %v14246_v15  ;;  %v14256_v53 = vmul.f32 0.125, %v14217_v31  ;;  %v922_v31 = vld [vmem:[#allocation70 + $0x8] sm:$0xff]  ;;  %v927_v28 = vld [vmem:[#allocation70 + $0x30] sm:$0xff]  ;;  %v928_v15 = vld [vmem:[#allocation70 + $0x38] sm:$0xff] }
0x23ca   :  { %v14363_v32 = vsel %vm14346_vm11, %v14325_v48, %v14362_v12  ;;  %v14236_v41 = vadd.f32 %v14235_v39, %v14234_v59  ;;  %v14257_v23 = vmul.f32 0.125, %v14224_v20  ;;  %v14335_v10 = vsel %vm14334_vm5, %v14255_v63, %v14254_v4  ;;  %v926_v20 = vld [vmem:[#allocation70 + $0x28] sm:$0xff]  ;;  %v21831_v27 = vld [vmem:[#allocation7] sm:$0xff]  ;;  %v919_v11 = vld [vmem:[#allocation67 + $0x38] sm:$0xff] }
0x23cb   :  { %14364 = vrot.lane.b32.xlu0 %v14363_v32, %s18741_s26  ;;  %v14242_v6 = vrot.slane %v14241_v42, 2  ;;  %v14249_v49 = vrot.slane %v14248_v26, 2  ;;  %v14258_v3 = vmul.f32 0.125, %v14231_v38  ;;  %v14337_v16 = vsel %vm14336_vm6, %v14256_v53, %v14335_v10  ;;  %v918_v21 = vld [vmem:[#allocation67 + $0x30] sm:$0xff]  ;;  %v15314_v4 = vld [vmem:[#allocation65] ss:$0 sm:$0xff] }
0x23cc   :  { %v14237_v54 = vrot.slane %v14236_v41, 1  ;;  %v14339_v34 = vsel %vm14338_vm7, %v14257_v23, %v14337_v16  ;;  %v16903_v36 = vpack.c.bf16 %v913_v2, %v912_v50  ;;  %v16906_v37 = vpack.c.bf16 %v915_v14, %v914_v9  ;;  %v930_v48 = vld [vmem:[#allocation73] sm:$0xff]  ;;  %v931_v12 = vld [vmem:[#allocation73 + $0x8] sm:$0xff]  ;;  %v932_v53 = vld [vmem:[#allocation73 + $0x10] sm:$0xff] }
0x23cd   :  { %v14243_v40 = vadd.f32 %v14242_v6, %v14241_v42  ;;  %v14250_v51 = vadd.f32 %v14249_v49, %v14248_v26  ;;  %v14341_v25 = vsel %vm14340_vm8, %v14258_v3, %v14339_v34  ;;  %v16909_v60 = vpack.c.bf16 %v917_v7, %v916_v35  ;;  %v933_v32 = vld [vmem:[#allocation73 + $0x18] sm:$0xff]  ;;  %v934_v23 = vld [vmem:[#allocation73 + $0x20] sm:$0xff]  ;;  %v935_v10 = vld [vmem:[#allocation73 + $0x28] sm:$0xff] }
0x23ce   :  { %v14238_v1 = vadd.f32 %v14237_v54, %v14236_v41  ;;  %16904 = vmatpush3.bf16.msra.mxu0 %v16903_v36  ;;  %v16915_v30 = vpack.c.bf16 %v922_v31, %v921_v18  ;;  %v16918_v22 = vpack.c.bf16 %v924_v43, %v923_v44  ;;  %v16921_v24 = vpack.c.bf16 %v926_v20, %v925_v47  ;;  %v936_v49 = vld [vmem:[#allocation73 + $0x30] sm:$0xff]  ;;  %v937_v3 = vld [vmem:[#allocation73 + $0x38] sm:$0xff]  ;;  %v939_v9 = vld [vmem:[#allocation76] sm:$0xff] }
0x23cf   :  { %v14244_v8 = vrot.slane %v14243_v40, 1  ;;  %v14251_v45 = vrot.slane %v14250_v51, 1  ;;  %16905 = vmatprep.subr.bf16.mxu0 %v18750_v62  ;;  %v16924_v33 = vpack.c.bf16 %v928_v15, %v927_v28  ;;  %v14532_v59 = vsel %vm1028_vm0, %v21831_v27, %v14530_v52  ;;  %v15318_v16 = vld [vmem:[#allocation71] ss:$0 sm:$0xff]  ;;  %v953_v18 = vld [vmem:[#allocation76 + $0x70] sm:$0xff]  ;;  %v956_v31 = vld [vmem:[#allocation76 + $0x88] sm:$0xff] }
0x23d0   :  { %v14259_v56 = vmul.f32 0.125, %v14238_v1  ;;  %v16912_v29 = vpack.c.bf16 %v919_v11, %v918_v21  ;;  %v16927_v42 = vpack.c.bf16 %v931_v12, %v930_v48  ;;  %v16930_v41 = vpack.c.bf16 %v933_v32, %v932_v53  ;;  %v940_v1 = vld [vmem:[#allocation76 + $0x8] sm:$0xff]  ;;  %v946_v2 = vld [vmem:[#allocation76 + $0x38] sm:$0xff]  ;;  %v959_v20 = vld [vmem:[#allocation76 + $0xa0] sm:$0xff] }
0x23d1   :  { %v14245_v0 = vadd.f32 %v14244_v8, %v14243_v40  ;;  %v14252_v13 = vadd.f32 %v14251_v45, %v14250_v51  ;;  %v16933_v6 = vpack.c.bf16 %v935_v10, %v934_v23  ;;  %v16936_v54 = vpack.c.bf16 %v937_v3, %v936_v49  ;;  %v944_v8 = vld [vmem:[#allocation76 + $0x28] sm:$0xff]  ;;  %v942_v45 = vld [vmem:[#allocation76 + $0x18] sm:$0xff]  ;;  %v961_v28 = vld [vmem:[#allocation76 + $0xb0] sm:$0xff] }
0x23d2   :  { %v14343_v46 = vsel %vm14342_vm9, %v14259_v56, %v14341_v25  ;;  %16907 = vmatpush3.bf16.msra.mxu0 %v16906_v37  ;;  %v16938_v50 = vpack.c.bf16 %v944_v8, %v940_v1  ;;  %v943_v56 = vld [vmem:[#allocation76 + $0x20] sm:$0xff]  ;;  %v16970_v36 = vpack.c.bf16 %v946_v2, %v942_v45  ;;  %v952_v37 = vld [vmem:[#allocation76 + $0x68] sm:$0xff]  ;;  %v954_v35 = vld [vmem:[#allocation76 + $0x78] sm:$0xff] }
0x23d3   :  { %v14260_v57 = vmul.f32 0.125, %v14245_v0  ;;  %v14261_v55 = vmul.f32 0.125, %v14252_v13  ;;  %16908 = vmatprep.subr.bf16.mxu0 %v18750_v62  ;;  %v16940_v14 = vpack.c.bf16 %v943_v56, %v939_v9  ;;  %v941_v0 = vld [vmem:[#allocation76 + $0x10] sm:$0xff]  ;;  %v948_v13 = vld [vmem:[#allocation76 + $0x48] sm:$0xff]  ;;  %v958_v43 = vld [vmem:[#allocation76 + $0x98] sm:$0xff] }
0x23d4   :  { %v968_v52 = vld [vmem:[#allocation76 + $0xe8] sm:$0xff]  ;;  %v967_v48 = vld [vmem:[#allocation76 + $0xe0] sm:$0xff]  ;;  %v978_v53 = vld [vmem:[#allocation76 + $0x138] sm:$0xff] }
0x23d5   :  { %v14345_v5 = vsel %vm14344_vm10, %v14260_v57, %v14343_v46  ;;  %v950_v57 = vld [vmem:[#allocation76 + $0x58] sm:$0xff]  ;;  %v971_v10 = vld [vmem:[#allocation76 + $0x100] sm:$0xff]  ;;  %v973_v49 = vld [vmem:[#allocation76 + $0x110] sm:$0xff] }
0x23d6   :  { %v14347_v19 = vsel %vm14346_vm11, %v14261_v55, %v14345_v5  ;;  %16910 = vmatpush3.bf16.msra.mxu0 %v16909_v60  ;;  %v16974_v7 = vpack.c.bf16 %v954_v35, %v950_v57  ;;  %v947_v55 = vld [vmem:[#allocation76 + $0x40] sm:$0xff]  ;;  %v981_v2 = vld [vmem:[#allocation76 + $0x150] sm:$0xff] }
0x23d7   :  { %16911 = vmatprep.subr.bf16.mxu0 %v18750_v62  ;;  %v951_v5 = vld [vmem:[#allocation76 + $0x60] sm:$0xff]  ;;  %v985_v56 = vld [vmem:[#allocation76 + $0x170] sm:$0xff] }
0x23d8   :  { %v16944_v60 = vpack.c.bf16 %v951_v5, %v947_v55  ;;  %v979_v45 = vld [vmem:[#allocation76 + $0x140] sm:$0xff]  ;;  %v993_v55 = vld [vmem:[#allocation76 + $0x1b0] sm:$0xff]  ;;  %v996_v5 = vld [vmem:[#allocation76 + $0x1c8] sm:$0xff] }
0x23d9   :  { %v987_v57 = vld [vmem:[#allocation76 + $0x180] sm:$0xff] }
0x23da   :  { %16913 = vmatpush3.bf16.msra.mxu0 %v16912_v29  ;;  %v970_v29 = vld [vmem:[#allocation76 + $0xf8] sm:$0xff]  ;;  %v991_v35 = vld [vmem:[#allocation76 + $0x1a0] sm:$0xff] }
0x23db   :  { %16926 = vmatprep.subr.bf16.mxu0 %v18750_v62 }
0x243d   :  { %v14365_v61 = vpop.permute.xlu0 %14364 }
0x243e   :  { %v14367_v17 = vsel %vm1028_vm0, %v14347_v19, %v14365_v61  ;;  %v949_v19 = vld [vmem:[#allocation76 + $0x50] sm:$0xff] }
0x243f   :  { %16719 = vmatmul.mubr.msk.f32.vlgmr.msra.gmra.mrb[184].mxu1 %vm14374_vm12, %v14367_v17  ;;  %v16976_v61 = vpack.c.bf16 %v953_v18, %v949_v19  ;;  %v962_v17 = vld [vmem:[#allocation76 + $0xb8] sm:$0xff]  ;;  %v1000_v19 = vld [vmem:[#allocation76 + $0x1e8] sm:$0xff] }
0x2440   :  { %16916 = vmatpush3.bf16.msra.mxu1 %v16915_v30  ;;  %16756 = vmatprep.mubr.msk.f32.mxu1 %vm18744_vm2, %v21996_v58  ;;  %v960_v30 = vld [vmem:[#allocation76 + $0xa8] sm:$0xff]  ;;  %v16978_v47 = vpack.c.bf16 %v962_v17, %v958_v43  ;;  %v1002_v18 = vld [vmem:[#allocation76 + $0x1f8] sm:$0xff]  ;;  %v999_v43 = vld [vmem:[#allocation76 + $0x1e0] sm:$0xff] }
0x2441   :  { %16917 = vmatprep.subr.bf16.mxu1 %v18750_v62  ;;  %v16946_v44 = vpack.c.bf16 %v960_v30, %v956_v31  ;;  %v16964_v31 = vpack.c.bf16 %v991_v35, %v987_v57 }
0x2444   :  { %16919 = vmatpush3.bf16.msra.mxu1 %v16918_v22  ;;  %v955_v22 = vld [vmem:[#allocation76 + $0x80] sm:$0xff] }
0x2445   :  { %16920 = vmatprep.subr.bf16.mxu1 %v18750_v62  ;;  %v16948_v15 = vpack.c.bf16 %v959_v20, %v955_v22  ;;  %v997_v22 = vld [vmem:[#allocation76 + $0x1d0] sm:$0xff] }
0x2448   :  { %16922 = vmatpush3.bf16.msra.mxu1 %v16921_v24  ;;  %v957_v24 = vld [vmem:[#allocation76 + $0x90] sm:$0xff] }
0x2449   :  { %16923 = vmatprep.subr.bf16.mxu1 %v18750_v62  ;;  %v16980_v21 = vpack.c.bf16 %v961_v28, %v957_v24 }
0x244c   :  { %16925 = vmatpush3.bf16.msra.mxu1 %v16924_v33  ;;  %v964_v33 = vld [vmem:[#allocation76 + $0xc8] sm:$0xff] }
0x244d   :  { %16939 = vmatprep.subr.bf16.mxu1 %v16938_v50  ;;  %v16950_v11 = vpack.c.bf16 %v968_v52, %v964_v33  ;;  %v983_v50 = vld [vmem:[#allocation76 + $0x160] sm:$0xff] }
0x244e   :  { %v17462_v33 = vld [vmem:[#allocation8] sm:$0xff] }
0x244f   :  { %16757 = vmatmul.mubr.msk.f32.vlgmr.msra.gmra.mrb[186].mxu1 %vm14374_vm12, %v14532_v59  ;;  %v966_v59 = vld [vmem:[#allocation76 + $0xd8] sm:$0xff]  ;;  %v14875_v52 = vmul.f32 %v17462_v33, %v17462_v33 }
0x2450   :  { %14782 = vmatprep.mubr.f32.mxu1 %v21996_v58  ;;  %16941 = vmatpush1.bf16.msra.mxu1 %v16940_v14  ;;  %v16982_v12 = vpack.c.bf16 %v970_v29, %v966_v59  ;;  %v992_v14 = vld [vmem:[#allocation76 + $0x1a8] sm:$0xff]  ;;  %v14860_v59 = vmul.f32 %v17462_v33, %v21831_v27  ;;  %v15320_v29 = vld [vmem:[#allocation74] ss:$0 sm:$0xff] }
0x2512   :  { %v14444_v39 = vpop.f32.mrb[184].mxu1 }
0x2513   :  { %v14445_v63 = vadd.f32 %v15314_v4, %v14444_v39  ;;  %v16720_v38 = vpop.f32.mrb[185].mxu1  ;;  %v963_v4 = vld [vmem:[#allocation76 + $0xc0] sm:$0xff]  ;;  %v965_v39 = vld [vmem:[#allocation76 + $0xd0] sm:$0xff] }
0x2514   :  { %v972_v38 = vld [vmem:[#allocation76 + $0x108] sm:$0xff]  ;;  %v16952_v32 = vpack.c.bf16 %v967_v48, %v963_v4 }
0x2515   :  { %v14448_v26 = vmax.f32 %v14445_v63, 0.0  ;;  %v969_v63 = vld [vmem:[#allocation76 + $0xf0] sm:$0xff] }
0x2517   :  { %16738 = vmatmul.mubr.msk.f32.vlgmr.msra.gmra.mrb[184].mxu0 %vm14374_vm12, %v14448_v26  ;;  %v974_v26 = vld [vmem:[#allocation76 + $0x118] sm:$0xff] }
0x2518   :  { %16928 = vmatpush3.bf16.msra.mxu0 %v16927_v42  ;;  %16775 = vmatprep.mubr.msk.f32.mxu0 %vm18744_vm2, %v21996_v58  ;;  %v976_v42 = vld [vmem:[#allocation76 + $0x128] sm:$0xff]  ;;  %v16986_v3 = vpack.c.bf16 %v978_v53, %v974_v26 }
0x2519   :  { %16929 = vmatprep.subr.bf16.mxu0 %v18750_v62  ;;  %v16954_v23 = vpack.c.bf16 %v976_v42, %v972_v38  ;;  %v15316_v38 = vld [vmem:[#allocation68] ss:$0 sm:$0xff] }
0x251c   :  { %16931 = vmatpush3.bf16.msra.mxu0 %v16930_v41  ;;  %v16984_v41 = vpack.c.bf16 %v969_v63, %v965_v39  ;;  %v14864_v39 = vmul.f32 %v21831_v27, %v21831_v27 }
0x251d   :  { %16932 = vmatprep.subr.bf16.mxu0 %v18750_v62 }
0x251e   :  { %v14865_v63 = vsel %vm1028_vm0, %v14864_v39, 0.0 }
0x2520   :  { %16934 = vmatpush3.bf16.msra.mxu0 %v16933_v6  ;;  %v975_v6 = vld [vmem:[#allocation76 + $0x120] sm:$0xff] }
0x2521   :  { %16935 = vmatprep.subr.bf16.mxu0 %v18750_v62  ;;  %v945_v62 = vld [vmem:[#allocation76 + $0x30] sm:$0xff] }
0x2522   :  { %v14608_v34 = vpop.f32.mrb[186].mxu1  ;;  %v16972_v46 = vpack.c.bf16 %v945_v62, %v941_v0  ;;  %v990_v0 = vld [vmem:[#allocation76 + $0x198] sm:$0xff] }
0x2523   :  { %v14609_v40 = vadd.f32 %v15318_v16, %v14608_v34  ;;  %v16758_v51 = vpop.f32.mrb[187].mxu1  ;;  %v977_v16 = vld [vmem:[#allocation76 + $0x130] sm:$0xff]  ;;  %v984_v34 = vld [vmem:[#allocation76 + $0x168] sm:$0xff]  ;;  %v994_v62 = vld [vmem:[#allocation76 + $0x1b8] sm:$0xff] }
0x2524   :  { %16937 = vmatpush3.bf16.msra.mxu0 %v16936_v54  ;;  %v980_v54 = vld [vmem:[#allocation76 + $0x148] sm:$0xff]  ;;  %v986_v51 = vld [vmem:[#allocation76 + $0x178] sm:$0xff]  ;;  %v16988_v1 = vpack.c.bf16 %v977_v16, %v973_v49 }
0x2525   :  { %v14612_v25 = vmax.f32 %v14609_v40, 0.0  ;;  %16971 = vmatprep.subr.bf16.mxu0 %v16970_v36  ;;  %v982_v40 = vld [vmem:[#allocation76 + $0x158] sm:$0xff]  ;;  %v16958_v8 = vpack.c.bf16 %v984_v34, %v980_v54  ;;  %v988_v36 = vld [vmem:[#allocation76 + $0x188] sm:$0xff] }
0x2526   :  { %v16990_v9 = vpack.c.bf16 %v986_v51, %v982_v40 }
0x2527   :  { %16776 = vmatmul.mubr.msk.f32.vlgmr.msra.gmra.mrb[186].mxu0 %vm14374_vm12, %v14612_v25  ;;  %v16956_v25 = vpack.c.bf16 %v975_v6, %v971_v10 }
0x2528   :  { %14853 = vmatprep.mubr.f32.mxu0 %v21996_v58  ;;  %v16942_v58 = vpack.c.bf16 %v952_v37, %v948_v13  ;;  %16973 = vmatpush1.bf16.msra.mxu0 %v16972_v46  ;;  %v16960_v13 = vpack.c.bf16 %v983_v50, %v979_v45  ;;  %v16992_v46 = vpack.c.bf16 %v985_v56, %v981_v2  ;;  %v1003_v2 = vld [vmem:[#allocation77] sm:$0xf] }
0x2529   :  { %16975 = vmatprep.subr.bf16.mxu0 %v16974_v7  ;;  %v16962_v37 = vpack.c.bf16 %v992_v14, %v988_v36  ;;  %v16994_v7 = vpack.c.bf16 %v994_v62, %v990_v0 }
0x252a   :  { %16943 = vmatprep.subr.bf16.mxu1 %v16942_v58  ;;  %v989_v58 = vld [vmem:[#allocation76 + $0x190] sm:$0xff] }
0x252b   :  { %16945 = vmatpush1.bf16.msra.mxu1 %v16944_v60  ;;  %v998_v60 = vld [vmem:[#allocation76 + $0x1d8] sm:$0xff]  ;;  %v16996_v30 = vpack.c.bf16 %v993_v55, %v989_v58 }
0x252c   :  { %16977 = vmatpush1.bf16.msra.mxu0 %v16976_v61  ;;  %16947 = vmatprep.subr.bf16.mxu1 %v16946_v44  ;;  %v16966_v61 = vpack.c.bf16 %v1000_v19, %v996_v5  ;;  %v995_v44 = vld [vmem:[#allocation76 + $0x1c0] sm:$0xff]  ;;  %v16998_v17 = vpack.c.bf16 %v1002_v18, %v998_v60 }
0x252d   :  { %16979 = vmatprep.subr.bf16.mxu0 %v16978_v47  ;;  %v1001_v47 = vld [vmem:[#allocation76 + $0x1f0] sm:$0xff]  ;;  %v16968_v20 = vpack.c.bf16 %v999_v43, %v995_v44 }
0x252e   :  { %v17000_v24 = vpack.c.bf16 %v1001_v47, %v997_v22 }
0x252f   :  { %16949 = vmatpush1.bf16.msra.mxu1 %v16948_v15 }
0x2530   :  { %16981 = vmatpush1.bf16.msra.mxu0 %v16980_v21  ;;  %16951 = vmatprep.subr.bf16.mxu1 %v16950_v11  ;;  %v14876_v21 = vsel %vm1028_vm0, %v14875_v52, 0.0  ;;  %v14861_v11 = vsel %vm1028_vm0, %v14860_v59, 0.0 }
0x2531   :  { %16983 = vmatprep.subr.bf16.mxu0 %v16982_v12  ;;  %14877 = vadd.xlane.f32.xlu0 %v14876_v21 }
0x2533   :  { %16953 = vmatpush1.bf16.msra.mxu1 %v16952_v32 }
0x2534   :  { %16985 = vmatpush1.bf16.msra.mxu0 %v16984_v41  ;;  %16955 = vmatprep.subr.bf16.mxu1 %v16954_v23 }
0x2535   :  { %16987 = vmatprep.subr.bf16.mxu0 %v16986_v3  ;;  %14862 = vadd.xlane.f32.xlu0 %v14861_v11 }
0x2537   :  { %16957 = vmatpush1.bf16.msra.mxu1 %v16956_v25 }
0x2538   :  { %16989 = vmatpush1.bf16.msra.mxu0 %v16988_v1  ;;  %16959 = vmatprep.subr.bf16.mxu1 %v16958_v8  ;;  %v14698_v1 = vlaneseq }
0x2539   :  { %16991 = vmatprep.subr.bf16.mxu0 %v16990_v9 }
0x253a   :  { %v14699_v8 = vshrl.u32 %v14698_v1, 7 }
0x253b   :  { %16961 = vmatpush1.bf16.msra.mxu1 %v16960_v13 }
0x253c   :  { %16993 = vmatpush1.bf16.msra.mxu0 %v16992_v46  ;;  %16963 = vmatprep.subr.bf16.mxu1 %v16962_v37  ;;  %v14700_v45 = vsub.s32 0, %v14699_v8  ;;  %v14708_v50 = vsub.s32 2, %v14699_v8  ;;  %v14704_v9 = vsub.s32 1, %v14699_v8  ;;  %v14712_v56 = vsub.s32 3, %v14699_v8 }
0x253d   :  { %16995 = vmatprep.subr.bf16.mxu0 %v16994_v7 }
0x253e   :  { %v14701_v36 = vrot.slane %v1003_v2, %v14700_v45  ;;  %v14709_v14 = vrot.slane %v1003_v2, %v14708_v50  ;;  %v14705_v13 = vrot.slane %v1003_v2, %v14704_v9  ;;  %v14713_v46 = vrot.slane %v1003_v2, %v14712_v56 }
0x253f   :  { %16965 = vmatpush1.bf16.msra.mxu1 %v16964_v31 }
0x2540   :  { %16997 = vmatpush1.bf16.msra.mxu0 %v16996_v30  ;;  %16967 = vmatprep.subr.bf16.mxu1 %v16966_v61 }
0x2541   :  { %16999 = vmatprep.subr.bf16.mxu0 %v16998_v17 }
0x2543   :  { %16969 = vmatpush1.bf16.msra.mxu1 %v16968_v20 }
0x2544   :  { %17001 = vmatpush1.bf16.msra.mxu0 %v17000_v24 }
0x25be   :  { %v14878_v32 = vpop.xlane.xlu0 %14877 }
0x25bf   :  { %17440 = vrsqrt.f32 %v14878_v32  ;;  %vm14881_vm14 = vcmp.eq.f32.partialorder %v14878_v32, inf  ;;  %v14884_v3 = vand.u32 2147483648, %v14878_v32  ;;  %vm14883_vm0 = vcmp.eq.f32.partialorder %v14878_v32, 0.0 }
0x25c2   :  { %v14863_v62 = vpop.xlane.xlu0 %14862 }
0x25c9   :  { %v17441_v23 = vpop.eup %17440 }
0x25ca   :  { %v14880_v49 = vmul.f32 %v17441_v23, %v14878_v32 }
0x25cc   :  { %v14882_v54 = vsel %vm14881_vm14, %v14878_v32, %v14880_v49 }
0x25cd   :  { %v14885_v40 = vsel %vm14883_vm0, %v14884_v3, %v14882_v54 }
0x25ea   :  { %v14524_v28 = vpop.f32.mrb[184].mxu0 }
0x25eb   :  { %v16739_v15 = vpop.f32.mrb[185].mxu0  ;;  %v14525_v42 = vadd.f32 %v15316_v38, %v14524_v28 }
0x25fa   :  { %v14688_v4 = vpop.f32.mrb[186].mxu0 }
0x25fb   :  { %v14689_v48 = vadd.f32 %v15320_v29, %v14688_v4  ;;  %v16777_v12 = vpop.f32.mrb[187].mxu0 }
0x25fd   :  { %14693 = vrot.lane.b32.xlu1 %v14689_v48, %s18751_s28 }
0x2621   :  { %14866 = vadd.xlane.f32.xlu1 %v14865_v63 }
0x266f   :  { %v14694_v26 = vpop.permute.xlu1 %14693 }
0x2670   :  { %v14696_v53 = vsel %vm14374_vm12, %v14525_v42, %v14694_v26 }
0x2671   :  { %14783 = vmatmul.mubr.f32.vlgmr.msra.gmra.mrb[188].mxu1 %v14696_v53  ;;  %14854 = vmatmul.mubr.f32.vlgmr.msra.gmra.mrb[188].mxu0 %v14696_v53 }
0x26ae   :  { %v14867_v41 = vpop.xlane.xlu1 %14866 }
0x26af   :  { %17442 = vrsqrt.f32 %v14867_v41  ;;  %vm14870_vm13 = vcmp.eq.f32.partialorder %v14867_v41, inf  ;;  %v14873_v27 = vand.u32 2147483648, %v14867_v41  ;;  %vm14872_vm15 = vcmp.eq.f32.partialorder %v14867_v41, 0.0 }
0x26b9   :  { %v17443_v10 = vpop.eup %17442 }
0x26ba   :  { %v14869_v6 = vmul.f32 %v17443_v10, %v14867_v41 }
0x26bc   :  { %v14871_v16 = vsel %vm14870_vm13, %v14867_v41, %v14869_v6 }
0x26bd   :  { %v14874_v34 = vsel %vm14872_vm15, %v14873_v27, %v14871_v16 }
0x26be   :  { %v14886_v51 = vmul.f32 %v14885_v40, %v14874_v34 }
0x26c0   :  { %v14887_v25 = vmax.f32 %v14886_v51, 1e-06 }
0x26c2   :  { %17444 = vrcp.f32 %v14887_v25 }
0x26cc   :  { %v17445_v0 = vpop.eup %17444 }
0x26cd   :  { %v14889_v35 = vmul.f32 %v17445_v0, %v14863_v62 }
0x2744   :  { %v14784_v37 = vpop.f32.mrb[188].mxu1  ;;  %v14855_v57 = vpop.f32.mrb[188].mxu0 }
0x2745   :  { %v14785_v58 = vadd.f32 %v14784_v37, %v14701_v36  ;;  %v14856_v7 = vadd.f32 %v14855_v57, %v14709_v14  ;;  %v14786_v55 = vpop.f32.mrb[189].mxu1  ;;  %v14857_v5 = vpop.f32.mrb[189].mxu0 }
0x2746   :  { %v14787_v19 = vadd.f32 %v14786_v55, %v14705_v13  ;;  %v14858_v60 = vadd.f32 %v14857_v5, %v14713_v46 }
0x2747   :  { %v14890_v18 = vmul.f32 %v14889_v35, %v14785_v58  ;;  %v14892_v31 = vmul.f32 %v14889_v35, %v14856_v7 }
0x2748   :  { %v14891_v30 = vmul.f32 %v14889_v35, %v14787_v19  ;;  %v14893_v61 = vmul.f32 %v14889_v35, %v14858_v60 }
0x2749   :  { %14894 = vst [vmem:[#allocation79] sm:$0xff] %v14890_v18  ;;  %14896 = vst [vmem:[#allocation79 + $0x10] sm:$0xff] %v14892_v31 }
0x274a   :  { %14895 = vst [vmem:[#allocation79 + $0x8] sm:$0xff] %v14891_v30  ;;  %14897 = vst [vmem:[#allocation79 + $0x18] sm:$0xff] %v14893_v61 }
0x274b   :  { %18574 = shalt.err (!%p18571_p12)
}
0x274c   :  { %s18575_s2 = scalar_lea.hbm %s19011_s12, 512 }
0x274d   :  { %p18576_p13 = scmp.ne.s32.totalorder %s19011_s12, %s18575_s2  ;;  %p18579_p0 = scmp.lt.u32.totalorder %s18575_s2, %s19011_s12 }
0x274f   :  { %p18581_p1 = pnand %p18579_p0, %p18576_p13 }
0x2751   :  { %18584 = shalt.err (!%p18581_p1)
}
0x2752   :  { %14907 = dma.vmem_to_hbm [thread:$0]  %s14905_s5, 512, %s19011_s12, [#allocation4]  }
0x2753   :  { %18637 = dma.done.wait [#allocation4], 512  }
0x2754   :  { %18638 = vsyncadd [#allocation4], 4294966784 }
0x2755   :  { %14911 = vsyncpa [#allocation3], 1 }
0x2756   :  { %14912 = vsyncpa [#allocation6], 1 }
0x2757   :  { %14913 = vsyncpa [#allocation9], 1 }
0x2758   :  { %14914 = vsyncpa [#allocation12], 1 }
0x2759   :  { %14915 = vsyncpa [#allocation15], 1 }
0x275a   :  { %14916 = vsyncpa [#allocation18], 1 }
0x275b   :  { %14917 = vsyncpa [#allocation21], 1 }
0x275c   :  { %14918 = vsyncpa [#allocation24], 1 }
0x275d   :  { %14919 = vsyncpa [#allocation27], 1 }
0x275e   :  { %14920 = vsyncpa [#allocation30], 1 }
0x275f   :  { %14921 = vsyncpa [#allocation33], 1 }
0x2760   :  { %14922 = vsyncpa [#allocation36], 1 }
0x2761   :  { %14923 = vsyncpa [#allocation39], 1 }
0x2762   :  { %14924 = vsyncpa [#allocation42], 1 }
0x2763   :  { %14925 = vsyncpa [#allocation45], 1 }
0x2764   :  { %14926 = vsyncpa [#allocation48], 1 }
0x2765   :  { %14927 = vsyncpa [#allocation51], 1 }
0x2766   :  { %14928 = vsyncpa [#allocation54], 1 }
0x2767   :  { %14929 = vsyncpa [#allocation57], 1 }
0x2768   :  { %14930 = vsyncpa [#allocation60], 1 }
0x2769   :  { %14931 = vsyncpa [#allocation63], 1 }
0x276a   :  { %14932 = vsyncpa [#allocation66], 1 }
0x276b   :  { %14933 = vsyncpa [#allocation69], 1 }
0x276c   :  { %14934 = vsyncpa [#allocation72], 1 }
0x276d   :  { %14935 = vsyncpa [#allocation75], 1 }
0x276e   :  { %14936 = vsyncpa [#allocation78], 1 }
0x276f   :  { %14937 = vsyncpa [#allocation4], 1 }

</bundles_post_ra>
